<compile_context>
chip_gen: v5e
topology: v5e:2x2
jax: 0.10.0
libtpu: 0.0.40
codegen_flags: <defaults>
</compile_context>

<pallas_src>
import numpy as np
import jax
import jax.numpy as jnp
from jax.experimental import pallas as pl
from jax.experimental.pallas import tpu as pltpu

LEAKY_SLOPE = 0.2
BN_EPS = 1e-5
KSIZE = 4
PAD = 1


# ---------------------------------------------------------------------------
# In-kernel building blocks
# ---------------------------------------------------------------------------
def _conv4_taps(slab_fn, b_ref, shift_ref, *, slope):
    """4 H-tap matmuls -> f32 acc -> folded bias/BN add -> LeakyReLU (f32)."""
    acc = None
    for i in range(KSIZE):
        part = jnp.dot(slab_fn(i), b_ref[i], preferred_element_type=jnp.float32)
        acc = part if acc is None else acc + part
    z = acc + shift_ref[...]
    if slope is not None:
        z = jnp.where(z >= 0, z, slope * z)
    return z


def _layer_s2_parity(src, b_ref, shift_ref, perm_ref, dst, *, n, h_out, slope):
    """Stride-2 conv(4x4, pad 1) layer, parity-grouped input and output.

    src[p, j*n + b, :] holds H-padded input row t = 2*j + p of image b, so H tap i
    reads one contiguous (h_out*n, K_in) slab and B_i is staged on the MXU once.
    The output is re-packed into the next layer's parity grouping (zero H-pad rows
    included) with one small 0/1 matmul per parity group -> both dst groups are
    written in full, contiguously.
    """
    rows = h_out * n

    def slab(i):
        return src[i % 2, pl.ds((i // 2) * n, rows), :]

    z = _conv4_taps(slab, b_ref, shift_ref, slope=slope).astype(dst.dtype)
    for p in range(2):
        dst[p, :, :] = jnp.dot(perm_ref[p], z,
                               preferred_element_type=jnp.float32
                               ).astype(dst.dtype)


def _layer_s2_natural(src, b_ref, shift_ref, dst, *, n, h_out, slope):
    """Stride-2 conv whose output feeds a stride-1 layer: natural padded row order."""
    rows = h_out * n

    def slab(i):
        return src[i % 2, pl.ds((i // 2) * n, rows), :]

    z = _conv4_taps(slab, b_ref, shift_ref, slope=slope).astype(dst.dtype)
    dst[pl.ds(n, rows), :] = z
    zero = jnp.zeros((n, dst.shape[-1]), dst.dtype)
    dst[pl.ds(0, n), :] = zero
    dst[pl.ds((h_out + 1) * n, n), :] = zero


def _layer_s1_final(src, b_ref, shift_ref, out_ref, *, n, h_out):
    """Final stride-1 conv(4x4, pad 1): no norm, no activation, f32 output."""
    rows = h_out * n
    acc = None
    for i in range(KSIZE):
        slab = src[pl.ds(i * n, rows), :]
        part = jnp.dot(slab, b_ref[i], preferred_element_type=jnp.float32)
        acc = part if acc is None else acc + part
    out_ref[...] = acc + shift_ref[...]


def _make_kernel(n, h_outs):
    ho1, ho2, ho3, ho4, ho5 = h_outs

    def kernel(a0, b1, s1, p1, b2h, s2, p2, b3h, s3, p3, b4h, s4, b5h, s5,
               out_ref,
               t1, t2, t3, t4, wb2, wb3, wb4, wb5, sems):
        # Kick off the layer-2..5 banded-weight DMAs; they overlap layer-1..4 compute.
        cp2 = pltpu.make_async_copy(b2h, wb2, sems.at[0])
        cp3 = pltpu.make_async_copy(b3h, wb3, sems.at[1])
        cp4 = pltpu.make_async_copy(b4h, wb4, sems.at[2])
        cp5 = pltpu.make_async_copy(b5h, wb5, sems.at[3])
        cp2.start()
        cp3.start()
        cp4.start()
        cp5.start()

        _layer_s2_parity(a0, b1, s1, p1, t1, n=n, h_out=ho1, slope=LEAKY_SLOPE)
        cp2.wait()
        _layer_s2_parity(t1, wb2, s2, p2, t2, n=n, h_out=ho2, slope=LEAKY_SLOPE)
        cp3.wait()
        _layer_s2_parity(t2, wb3, s3, p3, t3, n=n, h_out=ho3, slope=LEAKY_SLOPE)
        cp4.wait()
        _layer_s2_natural(t3, wb4, s4, t4, n=n, h_out=ho4, slope=LEAKY_SLOPE)
        cp5.wait()
        _layer_s1_final(t4, wb5, s5, out_ref, n=n, h_out=ho5)

    return kernel


# ---------------------------------------------------------------------------
# Host-side parameter folding (bias + eval-mode BN + W handling -> banded mats)
# ---------------------------------------------------------------------------
def _banded_weight(w_eff, stride, w_in, w_out, ci_pad=None):
    """w_eff: (Cout, Cin, 4, 4) f32.  Returns (4, w_in*ci_pad, w_out*Cout): for each
    H tap, the W / Cin / Cout / W-padding / W-stride handling folded into a dense
    banded matrix.  Row index = w*ci_pad + ci, col index = wo*Cout + co."""
    co, ci, kh, kw = w_eff.shape
    ci_pad = ci if ci_pad is None else ci_pad
    b = np.zeros((kh, w_in * ci_pad, w_out * co), np.float32)
    for i in range(kh):
        for wo in range(w_out):
            for j in range(kw):
                w = stride * wo + j - PAD
                if 0 <= w < w_in:
                    b[i, w * ci_pad:w * ci_pad + ci,
                      wo * co:(wo + 1) * co] = w_eff[:, :, i, j].T
    return b


def _parity_pack_matrices(h_out, n):
    """(2, (h_out//2+1)*n, h_out*n) 0/1 matrices mapping a layer's output rows
    (m-major, batch-minor) into the next layer's H-padded parity-grouped order;
    the zero H-pad rows (t = 0 and t = h_out + 1) are all-zero rows."""
    assert h_out % 2 == 0, h_out
    g = h_out // 2 + 1
    p = np.zeros((2, g * n, h_out * n), np.float32)
    for m in range(h_out):
        t = m + PAD
        grp, j = t % 2, t // 2
        for b in range(n):
            p[grp, j * n + b, m * n + b] = 1.0
    return p


def init_raw_params(key, in_channels=3):
    """Deterministic synthetic parameters matching the PyTorch module's shapes."""
    cfgs = [
        dict(cin=in_channels, cout=8,  stride=2, norm=False, act=True),
        dict(cin=8,  cout=16, stride=2, norm=True,  act=True),
        dict(cin=16, cout=32, stride=2, norm=True,  act=True),
        dict(cin=32, cout=64, stride=2, norm=True,  act=True),
        dict(cin=64, cout=1,  stride=1, norm=False, act=False),
    ]
    layers = []
    for cfg in cfgs:
        key, kw_, kb_, kg_, kbt_, km_, kv_ = jax.random.split(key, 7)
        fan_in = cfg["cin"] * KSIZE * KSIZE
        bound = 1.0 / (fan_in ** 0.5)
        w = jax.random.uniform(kw_, (cfg["cout"], cfg["cin"], KSIZE, KSIZE),
                               jnp.float32, -bound, bound)
        b = jax.random.uniform(kb_, (cfg["cout"],), jnp.float32, -bound, bound)
        if cfg["norm"]:
            # TODO(synk): eval-mode (running-stat) BN fold; train-mode batch stats differ.
            gamma = 1.0 + 0.1 * jax.random.normal(kg_, (cfg["cout"],), jnp.float32)
            beta = 0.1 * jax.random.normal(kbt_, (cfg["cout"],), jnp.float32)
            mean = 0.1 * jax.random.normal(km_, (cfg["cout"],), jnp.float32)
            var = jax.random.uniform(kv_, (cfg["cout"],), jnp.float32, 0.5, 1.5)
            scale = gamma / jnp.sqrt(var + BN_EPS)
            shift = beta - mean * scale
        else:
            scale = jnp.ones((cfg["cout"],), jnp.float32)
            shift = jnp.zeros((cfg["cout"],), jnp.float32)
        layers.append(dict(w=w, b=b, scale=scale, shift=shift,
                           stride=cfg["stride"],
                           slope=LEAKY_SLOPE if cfg["act"] else None))
    return layers


def pack_params(raw_layers, n, h_in, w_in):
    """Fold BN/bias into banded per-tap weights, per-layer shift vectors and
    parity-packing matrices."""
    b_mats, shifts, perms, cfg = [], [], [], []
    cur_h, cur_w = h_in, w_in
    n_layers = len(raw_layers)
    for idx, lyr in enumerate(raw_layers):
        wt = np.asarray(lyr["w"], np.float32)
        scale = np.asarray(lyr["scale"], np.float32)
        shift = np.asarray(lyr["shift"], np.float32)
        bias = np.asarray(lyr["b"], np.float32)
        co, ci = wt.shape[0], wt.shape[1]
        s = lyr["stride"]
        ho = (cur_h + 2 * PAD - KSIZE) // s + 1
        wo = (cur_w + 2 * PAD - KSIZE) // s + 1
        # v5e/v6e MXU: pad layer-1 Cin up to a multiple of 4 so K_in is lane/tile clean.
        ci_pad = (ci if ci % 4 == 0 else ci + (4 - ci % 4)) if idx == 0 else ci

        w_eff = wt * scale[:, None, None, None]      # BN scale -> weights
        shift_eff = shift + bias * scale             # bias + BN shift -> one add
        bm = _banded_weight(w_eff, s, cur_w, wo, ci_pad=ci_pad)
        sh = np.tile(shift_eff, wo)[None, :]
        if idx == n_layers - 1:
            # pad the final layer's output columns to a full lane group
            pad_cols = (-bm.shape[-1]) % 128
            bm = np.pad(bm, ((0, 0), (0, 0), (0, pad_cols)))
            sh = np.pad(sh, ((0, 0), (0, pad_cols)))
        b_mats.append(jnp.asarray(bm, jnp.bfloat16))
        shifts.append(jnp.asarray(sh, jnp.float32))

        if s == 2 and idx + 1 < n_layers and raw_layers[idx + 1]["stride"] == 2:
            perms.append(jnp.asarray(_parity_pack_matrices(ho, n), jnp.bfloat16))
        else:
            perms.append(None)

        cfg.append(dict(stride=s, h_in=cur_h, w_in=cur_w, h_out=ho, w_out=wo,
                        c_in=ci, c_in_pad=ci_pad, c_out=co, slope=lyr["slope"]))
        cur_h, cur_w = ho, wo
    return b_mats, shifts, perms, cfg


# ---------------------------------------------------------------------------
# Fused forward
# ---------------------------------------------------------------------------
def make_forward(raw_layers, n, h, w):
    assert h % 16 == 0 and w % 16 == 0 and h >= 32 and w >= 32, (h, w)
    b_mats, shifts, perms, cfg = pack_params(raw_layers, n, h, w)
    assert [c["stride"] for c in cfg] == [2, 2, 2, 2, 1]
    h_outs = [c["h_out"] for c in cfg]
    assert all(ho % 2 == 0 for ho in h_outs[:3]) and h_outs[3] >= 1, h_outs

    c_in = cfg[0]["c_in"]
    c_in_pad = cfg[0]["c_in_pad"]
    k0 = w * c_in_pad
    a0_shape = (2, (h // 2 + 1) * n, k0)

    def group_rows(h_act):                       # rows per parity group (H-padded)
        return (h_act // 2 + 1) * n

    t_shapes = [
        (2, group_rows(h_outs[0]), cfg[0]["w_out"] * cfg[0]["c_out"]),
        (2, group_rows(h_outs[1]), cfg[1]["w_out"] * cfg[1]["c_out"]),
        (2, group_rows(h_outs[2]), cfg[2]["w_out"] * cfg[2]["c_out"]),
        ((h_outs[3] + 2) * n, cfg[3]["w_out"] * cfg[3]["c_out"]),
    ]

    ho5, wo5, co5 = h_outs[4], cfg[4]["w_out"], cfg[4]["c_out"]
    out_lanes = b_mats[4].shape[-1]
    out_struct = jax.ShapeDtypeStruct((ho5 * n, out_lanes), jnp.float32)

    def vmem_spec(shape):
        nd = len(shape)
        return pl.BlockSpec(shape, lambda i, _nd=nd: (0,) * _nd)

    any_spec = pl.BlockSpec(memory_space=pl.ANY)

    in_specs = [
        vmem_spec(a0_shape),                     # a0 (needed immediately)
        vmem_spec(b_mats[0].shape),              # b1 (needed immediately)
        vmem_spec(shifts[0].shape),              # s1
        vmem_spec(perms[0].shape),               # p1
        any_spec,                                # b2 -> manual DMA, overlapped
        vmem_spec(shifts[1].shape),              # s2
        vmem_spec(perms[1].shape),               # p2
        any_spec,                                # b3
        vmem_spec(shifts[2].shape),              # s3
        vmem_spec(perms[2].shape),               # p3
        any_spec,                                # b4
        vmem_spec(shifts[3].shape),              # s4
        any_spec,                                # b5
        vmem_spec(shifts[4].shape),              # s5
    ]

    scratch_shapes = (
        [pltpu.VMEM(s, jnp.bfloat16) for s in t_shapes]              # t1..t4
        + [pltpu.VMEM(b_mats[l].shape, jnp.bfloat16) for l in (1, 2, 3, 4)]
        + [pltpu.SemaphoreType.DMA((4,))]
    )

    # Advisory cost estimate for the XLA scheduler.
    flops = 0
    for l, c in enumerate(cfg):
        k_in, k_out = b_mats[l].shape[1], b_mats[l].shape[2]
        flops += 2 * KSIZE * (c["h_out"] * n) * k_in * k_out
        if perms[l] is not None:
            pshape = perms[l].shape
            flops += 2 * pshape[0] * pshape[1] * pshape[2] * k_out
    bytes_accessed = int(np.prod(a0_shape)) * 2 + int(np.prod(out_struct.shape)) * 4
    for arr in list(b_mats) + list(shifts) + [p for p in perms if p is not None]:
        bytes_accessed += int(arr.size) * arr.dtype.itemsize
    cost = pl.CostEstimate(flops=int(flops), transcendentals=0,
                           bytes_accessed=int(bytes_accessed))

    call = pl.pallas_call(
        _make_kernel(n, h_outs),
        out_shape=out_struct,
        grid=(1,),
        in_specs=in_specs,
        out_specs=vmem_spec(out_struct.shape),
        scratch_shapes=scratch_shapes,
        compiler_params=pltpu.CompilerParams(
            dimension_semantics=("arbitrary",),
            vmem_limit_bytes=16 * 1024 * 1024,
        ),
        cost_estimate=cost,
    )

    @jax.jit
    def forward(x_nchw):
        # Input marshalling (one small XLA fusion): NCHW -> H-padded, parity-grouped
        # rows with W*C_pad lanes.
        xh = jnp.transpose(x_nchw, (0, 2, 3, 1)).astype(jnp.float32)     # (n,H,W,C)
        xh = jnp.pad(xh, ((0, 0), (PAD, PAD), (0, 0), (0, c_in_pad - c_in)))
        xh = xh.reshape(n, (h + 2 * PAD) // 2, 2, k0)                    # (n,j,p,K)
        a0 = jnp.transpose(xh, (2, 1, 0, 3)).reshape(a0_shape).astype(jnp.bfloat16)

        out = call(a0,
                   b_mats[0], shifts[0], perms[0],
                   b_mats[1], shifts[1], perms[1],
                   b_mats[2], shifts[2], perms[2],
                   b_mats[3], shifts[3],
                   b_mats[4], shifts[4])                                 # (ho5*n, lanes)
        y = out[:, :wo5 * co5].reshape(ho5, n, wo5, co5)                 # m-major rows
        return jnp.transpose(y, (1, 3, 0, 2))                            # NCHW

    return forward


# ---------------------------------------------------------------------------
# Pure-JAX references
# ---------------------------------------------------------------------------
def reference_forward(x_nchw, raw_layers):
    """Pure f32 lax.conv reference."""
    x = jnp.transpose(x_nchw, (0, 2, 3, 1)).astype(jnp.float32)
    for lyr in raw_layers:
        w_hwio = jnp.transpose(lyr["w"], (2, 3, 1, 0))
        y = jax.lax.conv_general_dilated(
            x, w_hwio, (lyr["stride"], lyr["stride"]),
            [(PAD, PAD), (PAD, PAD)],
            dimension_numbers=("NHWC", "HWIO", "NHWC"))
        y = (y + lyr["b"]) * lyr["scale"] + lyr["shift"]
        if lyr["slope"] is not None:
            y = jnp.where(y >= 0, y, lyr["slope"] * y)
        x = y
    return jnp.transpose(x, (0, 3, 1, 2))


def reference_forward_matched(x_nchw, raw_layers):
    """Same math as the kernel: bf16-rounded folded weights / activations,
    f32 accumulation and epilogue."""
    def q(v):
        return v.astype(jnp.bfloat16).astype(jnp.float32)

    x = q(jnp.transpose(x_nchw, (0, 2, 3, 1)).astype(jnp.float32))
    last = len(raw_layers) - 1
    for idx, lyr in enumerate(raw_layers):
        w_eff = lyr["w"] * lyr["scale"][:, None, None, None]
        shift_eff = lyr["shift"] + lyr["b"] * lyr["scale"]
        w_hwio = q(jnp.transpose(w_eff, (2, 3, 1, 0)))
        y = jax.lax.conv_general_dilated(
            x, w_hwio, (lyr["stride"], lyr["stride"]),
            [(PAD, PAD), (PAD, PAD)],
            dimension_numbers=("NHWC", "HWIO", "NHWC"))
        y = y + shift_eff
        if lyr["slope"] is not None:
            y = jnp.where(y >= 0, y, lyr["slope"] * y)
        x = q(y) if idx < last else y
    return jnp.transpose(x, (0, 3, 1, 2))


if __name__ == "__main__":
    key = jax.random.PRNGKey(0)
    kx, kp = jax.random.split(key)
    N, C, H, W = 2, 3, 64, 64          # 4 stride-2 convs + final k4/p1 conv -> 3x3 patches
    x = jax.random.normal(kx, (N, C, H, W), jnp.float32)
    raw = init_raw_params(kp, in_channels=C)

    forward = make_forward(raw, N, H, W)
    out = jax.block_until_ready(forward(x))

    ref_matched = jax.block_until_ready(reference_forward_matched(x, raw))
    ref_f32 = jax.block_until_ready(reference_forward(x, raw))

    assert out.shape == (N, 1, 3, 3), out.shape
    err_matched = float(jnp.max(jnp.abs(out - ref_matched)))
    err_f32 = float(jnp.max(jnp.abs(out - ref_f32)))
    # Tight check vs. a reference with identical bf16 quantization points.
    assert err_matched < 2e-3, err_matched
    # Loose sanity check vs. the pure-f32 reference (bf16 weight/act rounding).
    assert err_f32 < 1e-1, err_f32
    print("KERNEL_OK")
</pallas_src>

<mosaic_0001>
module attributes {stable_mosaic.version = 11 : i64} {
  func.func @kernel(%arg0: i32, %arg1: memref<2x66x256xbf16, #tpu.memory_space<vmem>>, %arg2: memref<4x256x256xbf16, #tpu.memory_space<vmem>>, %arg3: memref<1x256xf32, #tpu.memory_space<vmem>>, %arg4: memref<2x34x64xbf16, #tpu.memory_space<vmem>>, %arg5: memref<4x256x256xbf16, #tpu.memory_space<any>>, %arg6: memref<1x256xf32, #tpu.memory_space<vmem>>, %arg7: memref<2x18x32xbf16, #tpu.memory_space<vmem>>, %arg8: memref<4x256x256xbf16, #tpu.memory_space<any>>, %arg9: memref<1x256xf32, #tpu.memory_space<vmem>>, %arg10: memref<2x10x16xbf16, #tpu.memory_space<vmem>>, %arg11: memref<4x256x256xbf16, #tpu.memory_space<any>>, %arg12: memref<1x256xf32, #tpu.memory_space<vmem>>, %arg13: memref<4x256x128xbf16, #tpu.memory_space<any>>, %arg14: memref<1x128xf32, #tpu.memory_space<vmem>>, %arg15: memref<6x128xf32, #tpu.memory_space<vmem>>, %arg16: memref<2x34x256xbf16, #tpu.memory_space<vmem>>, %arg17: memref<2x18x256xbf16, #tpu.memory_space<vmem>>, %arg18: memref<2x10x256xbf16, #tpu.memory_space<vmem>>, %arg19: memref<12x256xbf16, #tpu.memory_space<vmem>>, %arg20: memref<4x256x256xbf16, #tpu.memory_space<vmem>>, %arg21: memref<4x256x256xbf16, #tpu.memory_space<vmem>>, %arg22: memref<4x256x256xbf16, #tpu.memory_space<vmem>>, %arg23: memref<4x256x128xbf16, #tpu.memory_space<vmem>>, %arg24: memref<4x!tpu.dma_semaphore, #tpu.memory_space<semaphore_mem>>) attributes {dimension_semantics = [#tpu.dimension_semantics<arbitrary>], iteration_bounds = array<i64: 1>, scalar_prefetch = 0 : i64, scratch_operands = 9 : i64, tpu.core_type = #tpu.core_type<tc>, window_params = [{pipeline_mode = #tpu.pipeline_mode<synchronous>, transform_indices = @transform_0, window_bounds = array<i64: 2, 66, 256>}, {pipeline_mode = #tpu.pipeline_mode<synchronous>, transform_indices = @transform_1, window_bounds = array<i64: 4, 256, 256>}, {pipeline_mode = #tpu.pipeline_mode<synchronous>, transform_indices = @transform_2, window_bounds = array<i64: 1, 256>}, {pipeline_mode = #tpu.pipeline_mode<synchronous>, transform_indices = @transform_3, window_bounds = array<i64: 2, 34, 64>}, {}, {pipeline_mode = #tpu.pipeline_mode<synchronous>, transform_indices = @transform_5, window_bounds = array<i64: 1, 256>}, {pipeline_mode = #tpu.pipeline_mode<synchronous>, transform_indices = @transform_6, window_bounds = array<i64: 2, 18, 32>}, {}, {pipeline_mode = #tpu.pipeline_mode<synchronous>, transform_indices = @transform_8, window_bounds = array<i64: 1, 256>}, {pipeline_mode = #tpu.pipeline_mode<synchronous>, transform_indices = @transform_9, window_bounds = array<i64: 2, 10, 16>}, {}, {pipeline_mode = #tpu.pipeline_mode<synchronous>, transform_indices = @transform_11, window_bounds = array<i64: 1, 256>}, {}, {pipeline_mode = #tpu.pipeline_mode<synchronous>, transform_indices = @transform_13, window_bounds = array<i64: 1, 128>}, {pipeline_mode = #tpu.pipeline_mode<synchronous>, transform_indices = @transform_14, window_bounds = array<i64: 6, 128>}]} {
    %c0_i32 = arith.constant 0 : i32
    %0 = tpu.memref_slice %arg24[%c0_i32] : memref<4x!tpu.dma_semaphore, #tpu.memory_space<semaphore_mem>> -> memref<1x!tpu.dma_semaphore, #tpu.memory_space<semaphore_mem>>
    %1 = tpu.memref_squeeze %0 : memref<1x!tpu.dma_semaphore, #tpu.memory_space<semaphore_mem>> -> memref<!tpu.dma_semaphore, #tpu.memory_space<semaphore_mem>>
    tpu.enqueue_dma source(%arg5 : memref<4x256x256xbf16, #tpu.memory_space<any>>) target(%arg20 : memref<4x256x256xbf16, #tpu.memory_space<vmem>>) target_semaphore(%1 : memref<!tpu.dma_semaphore, #tpu.memory_space<semaphore_mem>>)
    %c1_i32 = arith.constant 1 : i32
    %2 = tpu.memref_slice %arg24[%c1_i32] : memref<4x!tpu.dma_semaphore, #tpu.memory_space<semaphore_mem>> -> memref<1x!tpu.dma_semaphore, #tpu.memory_space<semaphore_mem>>
    %3 = tpu.memref_squeeze %2 : memref<1x!tpu.dma_semaphore, #tpu.memory_space<semaphore_mem>> -> memref<!tpu.dma_semaphore, #tpu.memory_space<semaphore_mem>>
    tpu.enqueue_dma source(%arg8 : memref<4x256x256xbf16, #tpu.memory_space<any>>) target(%arg21 : memref<4x256x256xbf16, #tpu.memory_space<vmem>>) target_semaphore(%3 : memref<!tpu.dma_semaphore, #tpu.memory_space<semaphore_mem>>)
    %c2_i32 = arith.constant 2 : i32
    %4 = tpu.memref_slice %arg24[%c2_i32] : memref<4x!tpu.dma_semaphore, #tpu.memory_space<semaphore_mem>> -> memref<1x!tpu.dma_semaphore, #tpu.memory_space<semaphore_mem>>
    %5 = tpu.memref_squeeze %4 : memref<1x!tpu.dma_semaphore, #tpu.memory_space<semaphore_mem>> -> memref<!tpu.dma_semaphore, #tpu.memory_space<semaphore_mem>>
    tpu.enqueue_dma source(%arg11 : memref<4x256x256xbf16, #tpu.memory_space<any>>) target(%arg22 : memref<4x256x256xbf16, #tpu.memory_space<vmem>>) target_semaphore(%5 : memref<!tpu.dma_semaphore, #tpu.memory_space<semaphore_mem>>)
    %c3_i32 = arith.constant 3 : i32
    %6 = tpu.memref_slice %arg24[%c3_i32] : memref<4x!tpu.dma_semaphore, #tpu.memory_space<semaphore_mem>> -> memref<1x!tpu.dma_semaphore, #tpu.memory_space<semaphore_mem>>
    %7 = tpu.memref_squeeze %6 : memref<1x!tpu.dma_semaphore, #tpu.memory_space<semaphore_mem>> -> memref<!tpu.dma_semaphore, #tpu.memory_space<semaphore_mem>>
    tpu.enqueue_dma source(%arg13 : memref<4x256x128xbf16, #tpu.memory_space<any>>) target(%arg23 : memref<4x256x128xbf16, #tpu.memory_space<vmem>>) target_semaphore(%7 : memref<!tpu.dma_semaphore, #tpu.memory_space<semaphore_mem>>)
    %c0 = arith.constant 0 : index
    %c0_0 = arith.constant 0 : index
    %c0_1 = arith.constant 0 : index
    %8 = vector.load %arg1[%c0, %c0_0, %c0_1] : memref<2x66x256xbf16, #tpu.memory_space<vmem>>, vector<1x64x256xbf16>
    %9 = vector.shape_cast %8 : vector<1x64x256xbf16> to vector<64x256xbf16>
    %c0_2 = arith.constant 0 : index
    %c0_3 = arith.constant 0 : index
    %c0_4 = arith.constant 0 : index
    %10 = vector.load %arg2[%c0_2, %c0_3, %c0_4] : memref<4x256x256xbf16, #tpu.memory_space<vmem>>, vector<1x256x256xbf16>
    %11 = vector.shape_cast %10 : vector<1x256x256xbf16> to vector<256x256xbf16>
    %cst = arith.constant dense<0.000000e+00> : vector<64x256xf32>
    %12 = tpu.matmul %9, %11, %cst {dimension_numbers = #tpu.dot_dimension_numbers<[1], [0], [0], [1], [0, 0, 1, 1], [], []>} : vector<64x256xbf16>, vector<256x256xbf16>, vector<64x256xf32> -> vector<64x256xf32>
    %c1 = arith.constant 1 : index
    %c0_5 = arith.constant 0 : index
    %c0_6 = arith.constant 0 : index
    %13 = vector.load %arg1[%c1, %c0_5, %c0_6] : memref<2x66x256xbf16, #tpu.memory_space<vmem>>, vector<1x64x256xbf16>
    %14 = vector.shape_cast %13 : vector<1x64x256xbf16> to vector<64x256xbf16>
    %c1_7 = arith.constant 1 : index
    %c0_8 = arith.constant 0 : index
    %c0_9 = arith.constant 0 : index
    %15 = vector.load %arg2[%c1_7, %c0_8, %c0_9] : memref<4x256x256xbf16, #tpu.memory_space<vmem>>, vector<1x256x256xbf16>
    %16 = vector.shape_cast %15 : vector<1x256x256xbf16> to vector<256x256xbf16>
    %cst_10 = arith.constant dense<0.000000e+00> : vector<64x256xf32>
    %17 = tpu.matmul %14, %16, %cst_10 {dimension_numbers = #tpu.dot_dimension_numbers<[1], [0], [0], [1], [0, 0, 1, 1], [], []>} : vector<64x256xbf16>, vector<256x256xbf16>, vector<64x256xf32> -> vector<64x256xf32>
    %18 = arith.addf %12, %17 : vector<64x256xf32>
    %c0_11 = arith.constant 0 : index
    %c2 = arith.constant 2 : index
    %c0_12 = arith.constant 0 : index
    %19 = vector.load %arg1[%c0_11, %c2, %c0_12] : memref<2x66x256xbf16, #tpu.memory_space<vmem>>, vector<1x64x256xbf16>
    %20 = vector.shape_cast %19 : vector<1x64x256xbf16> to vector<64x256xbf16>
    %c2_13 = arith.constant 2 : index
    %c0_14 = arith.constant 0 : index
    %c0_15 = arith.constant 0 : index
    %21 = vector.load %arg2[%c2_13, %c0_14, %c0_15] : memref<4x256x256xbf16, #tpu.memory_space<vmem>>, vector<1x256x256xbf16>
    %22 = vector.shape_cast %21 : vector<1x256x256xbf16> to vector<256x256xbf16>
    %cst_16 = arith.constant dense<0.000000e+00> : vector<64x256xf32>
    %23 = tpu.matmul %20, %22, %cst_16 {dimension_numbers = #tpu.dot_dimension_numbers<[1], [0], [0], [1], [0, 0, 1, 1], [], []>} : vector<64x256xbf16>, vector<256x256xbf16>, vector<64x256xf32> -> vector<64x256xf32>
    %24 = arith.addf %18, %23 : vector<64x256xf32>
    %c1_17 = arith.constant 1 : index
    %c2_18 = arith.constant 2 : index
    %c0_19 = arith.constant 0 : index
    %25 = vector.load %arg1[%c1_17, %c2_18, %c0_19] : memref<2x66x256xbf16, #tpu.memory_space<vmem>>, vector<1x64x256xbf16>
    %26 = vector.shape_cast %25 : vector<1x64x256xbf16> to vector<64x256xbf16>
    %c3 = arith.constant 3 : index
    %c0_20 = arith.constant 0 : index
    %c0_21 = arith.constant 0 : index
    %27 = vector.load %arg2[%c3, %c0_20, %c0_21] : memref<4x256x256xbf16, #tpu.memory_space<vmem>>, vector<1x256x256xbf16>
    %28 = vector.shape_cast %27 : vector<1x256x256xbf16> to vector<256x256xbf16>
    %cst_22 = arith.constant dense<0.000000e+00> : vector<64x256xf32>
    %29 = tpu.matmul %26, %28, %cst_22 {dimension_numbers = #tpu.dot_dimension_numbers<[1], [0], [0], [1], [0, 0, 1, 1], [], []>} : vector<64x256xbf16>, vector<256x256xbf16>, vector<64x256xf32> -> vector<64x256xf32>
    %30 = arith.addf %24, %29 : vector<64x256xf32>
    %c0_23 = arith.constant 0 : index
    %c0_24 = arith.constant 0 : index
    %31 = vector.load %arg3[%c0_23, %c0_24] : memref<1x256xf32, #tpu.memory_space<vmem>>, vector<1x256xf32>
    %32 = vector.broadcast %31 : vector<1x256xf32> to vector<64x256xf32>
    %33 = arith.addf %30, %32 : vector<64x256xf32>
    %cst_25 = arith.constant 0.000000e+00 : f32
    %34 = vector.broadcast %cst_25 : f32 to vector<64x256xf32>
    %35 = arith.cmpf oge, %33, %34 : vector<64x256xf32>
    %cst_26 = arith.constant 2.000000e-01 : f32
    %36 = vector.broadcast %cst_26 : f32 to vector<64x256xf32>
    %37 = arith.mulf %36, %33 : vector<64x256xf32>
    %38 = arith.select %35, %33, %37 : vector<64x256xi1>, vector<64x256xf32>
    %39 = arith.truncf %38 : vector<64x256xf32> to vector<64x256xbf16>
    %c0_27 = arith.constant 0 : index
    %c0_28 = arith.constant 0 : index
    %c0_29 = arith.constant 0 : index
    %40 = vector.load %arg4[%c0_27, %c0_28, %c0_29] : memref<2x34x64xbf16, #tpu.memory_space<vmem>>, vector<1x34x64xbf16>
    %41 = vector.shape_cast %40 : vector<1x34x64xbf16> to vector<34x64xbf16>
    %cst_30 = arith.constant dense<0.000000e+00> : vector<34x256xf32>
    %42 = tpu.matmul %41, %39, %cst_30 {dimension_numbers = #tpu.dot_dimension_numbers<[1], [0], [0], [1], [0, 0, 1, 1], [], []>} : vector<34x64xbf16>, vector<64x256xbf16>, vector<34x256xf32> -> vector<34x256xf32>
    %43 = arith.truncf %42 : vector<34x256xf32> to vector<34x256xbf16>
    %c0_31 = arith.constant 0 : index
    %c0_32 = arith.constant 0 : index
    %c0_33 = arith.constant 0 : index
    %44 = vector.load %arg16[%c0_31, %c0_32, %c0_33] : memref<2x34x256xbf16, #tpu.memory_space<vmem>>, vector<1x34x256xbf16>
    %45 = vector.shape_cast %44 : vector<1x34x256xbf16> to vector<34x256xbf16>
    %46 = vector.shape_cast %43 : vector<34x256xbf16> to vector<1x34x256xbf16>
    tpu.vector_store %arg16[%c0_31, %c0_32, %c0_33], %46 {strides = array<i32>} : memref<2x34x256xbf16, #tpu.memory_space<vmem>>, vector<1x34x256xbf16>,
    %c1_34 = arith.constant 1 : index
    %c0_35 = arith.constant 0 : index
    %c0_36 = arith.constant 0 : index
    %47 = vector.load %arg4[%c1_34, %c0_35, %c0_36] : memref<2x34x64xbf16, #tpu.memory_space<vmem>>, vector<1x34x64xbf16>
    %48 = vector.shape_cast %47 : vector<1x34x64xbf16> to vector<34x64xbf16>
    %cst_37 = arith.constant dense<0.000000e+00> : vector<34x256xf32>
    %49 = tpu.matmul %48, %39, %cst_37 {dimension_numbers = #tpu.dot_dimension_numbers<[1], [0], [0], [1], [0, 0, 1, 1], [], []>} : vector<34x64xbf16>, vector<64x256xbf16>, vector<34x256xf32> -> vector<34x256xf32>
    %50 = arith.truncf %49 : vector<34x256xf32> to vector<34x256xbf16>
    %c1_38 = arith.constant 1 : index
    %c0_39 = arith.constant 0 : index
    %c0_40 = arith.constant 0 : index
    %51 = vector.load %arg16[%c1_38, %c0_39, %c0_40] : memref<2x34x256xbf16, #tpu.memory_space<vmem>>, vector<1x34x256xbf16>
    %52 = vector.shape_cast %51 : vector<1x34x256xbf16> to vector<34x256xbf16>
    %53 = vector.shape_cast %50 : vector<34x256xbf16> to vector<1x34x256xbf16>
    tpu.vector_store %arg16[%c1_38, %c0_39, %c0_40], %53 {strides = array<i32>} : memref<2x34x256xbf16, #tpu.memory_space<vmem>>, vector<1x34x256xbf16>,
    %c0_i32_41 = arith.constant 0 : i32
    %54 = tpu.memref_slice %arg24[%c0_i32_41] : memref<4x!tpu.dma_semaphore, #tpu.memory_space<semaphore_mem>> -> memref<1x!tpu.dma_semaphore, #tpu.memory_space<semaphore_mem>>
    %55 = tpu.memref_squeeze %54 : memref<1x!tpu.dma_semaphore, #tpu.memory_space<semaphore_mem>> -> memref<!tpu.dma_semaphore, #tpu.memory_space<semaphore_mem>>
    tpu.wait_dma2 semaphore(%55 : memref<!tpu.dma_semaphore, #tpu.memory_space<semaphore_mem>>) src(%arg5 : memref<4x256x256xbf16, #tpu.memory_space<any>>) dst(%arg20 : memref<4x256x256xbf16, #tpu.memory_space<vmem>>)
    %c0_42 = arith.constant 0 : index
    %c0_43 = arith.constant 0 : index
    %c0_44 = arith.constant 0 : index
    %56 = vector.load %arg16[%c0_42, %c0_43, %c0_44] : memref<2x34x256xbf16, #tpu.memory_space<vmem>>, vector<1x32x256xbf16>
    %57 = vector.shape_cast %56 : vector<1x32x256xbf16> to vector<32x256xbf16>
    %c0_45 = arith.constant 0 : index
    %c0_46 = arith.constant 0 : index
    %c0_47 = arith.constant 0 : index
    %58 = vector.load %arg20[%c0_45, %c0_46, %c0_47] : memref<4x256x256xbf16, #tpu.memory_space<vmem>>, vector<1x256x256xbf16>
    %59 = vector.shape_cast %58 : vector<1x256x256xbf16> to vector<256x256xbf16>
    %cst_48 = arith.constant dense<0.000000e+00> : vector<32x256xf32>
    %60 = tpu.matmul %57, %59, %cst_48 {dimension_numbers = #tpu.dot_dimension_numbers<[1], [0], [0], [1], [0, 0, 1, 1], [], []>} : vector<32x256xbf16>, vector<256x256xbf16>, vector<32x256xf32> -> vector<32x256xf32>
    %c1_49 = arith.constant 1 : index
    %c0_50 = arith.constant 0 : index
    %c0_51 = arith.constant 0 : index
    %61 = vector.load %arg16[%c1_49, %c0_50, %c0_51] : memref<2x34x256xbf16, #tpu.memory_space<vmem>>, vector<1x32x256xbf16>
    %62 = vector.shape_cast %61 : vector<1x32x256xbf16> to vector<32x256xbf16>
    %c1_52 = arith.constant 1 : index
    %c0_53 = arith.constant 0 : index
    %c0_54 = arith.constant 0 : index
    %63 = vector.load %arg20[%c1_52, %c0_53, %c0_54] : memref<4x256x256xbf16, #tpu.memory_space<vmem>>, vector<1x256x256xbf16>
    %64 = vector.shape_cast %63 : vector<1x256x256xbf16> to vector<256x256xbf16>
    %cst_55 = arith.constant dense<0.000000e+00> : vector<32x256xf32>
    %65 = tpu.matmul %62, %64, %cst_55 {dimension_numbers = #tpu.dot_dimension_numbers<[1], [0], [0], [1], [0, 0, 1, 1], [], []>} : vector<32x256xbf16>, vector<256x256xbf16>, vector<32x256xf32> -> vector<32x256xf32>
    %66 = arith.addf %60, %65 : vector<32x256xf32>
    %c0_56 = arith.constant 0 : index
    %c2_57 = arith.constant 2 : index
    %c0_58 = arith.constant 0 : index
    %67 = vector.load %arg16[%c0_56, %c2_57, %c0_58] : memref<2x34x256xbf16, #tpu.memory_space<vmem>>, vector<1x32x256xbf16>
    %68 = vector.shape_cast %67 : vector<1x32x256xbf16> to vector<32x256xbf16>
    %c2_59 = arith.constant 2 : index
    %c0_60 = arith.constant 0 : index
    %c0_61 = arith.constant 0 : index
    %69 = vector.load %arg20[%c2_59, %c0_60, %c0_61] : memref<4x256x256xbf16, #tpu.memory_space<vmem>>, vector<1x256x256xbf16>
    %70 = vector.shape_cast %69 : vector<1x256x256xbf16> to vector<256x256xbf16>
    %cst_62 = arith.constant dense<0.000000e+00> : vector<32x256xf32>
    %71 = tpu.matmul %68, %70, %cst_62 {dimension_numbers = #tpu.dot_dimension_numbers<[1], [0], [0], [1], [0, 0, 1, 1], [], []>} : vector<32x256xbf16>, vector<256x256xbf16>, vector<32x256xf32> -> vector<32x256xf32>
    %72 = arith.addf %66, %71 : vector<32x256xf32>
    %c1_63 = arith.constant 1 : index
    %c2_64 = arith.constant 2 : index
    %c0_65 = arith.constant 0 : index
    %73 = vector.load %arg16[%c1_63, %c2_64, %c0_65] : memref<2x34x256xbf16, #tpu.memory_space<vmem>>, vector<1x32x256xbf16>
    %74 = vector.shape_cast %73 : vector<1x32x256xbf16> to vector<32x256xbf16>
    %c3_66 = arith.constant 3 : index
    %c0_67 = arith.constant 0 : index
    %c0_68 = arith.constant 0 : index
    %75 = vector.load %arg20[%c3_66, %c0_67, %c0_68] : memref<4x256x256xbf16, #tpu.memory_space<vmem>>, vector<1x256x256xbf16>
    %76 = vector.shape_cast %75 : vector<1x256x256xbf16> to vector<256x256xbf16>
    %cst_69 = arith.constant dense<0.000000e+00> : vector<32x256xf32>
    %77 = tpu.matmul %74, %76, %cst_69 {dimension_numbers = #tpu.dot_dimension_numbers<[1], [0], [0], [1], [0, 0, 1, 1], [], []>} : vector<32x256xbf16>, vector<256x256xbf16>, vector<32x256xf32> -> vector<32x256xf32>
    %78 = arith.addf %72, %77 : vector<32x256xf32>
    %c0_70 = arith.constant 0 : index
    %c0_71 = arith.constant 0 : index
    %79 = vector.load %arg6[%c0_70, %c0_71] : memref<1x256xf32, #tpu.memory_space<vmem>>, vector<1x256xf32>
    %80 = vector.broadcast %79 : vector<1x256xf32> to vector<32x256xf32>
    %81 = arith.addf %78, %80 : vector<32x256xf32>
    %cst_72 = arith.constant 0.000000e+00 : f32
    %82 = vector.broadcast %cst_72 : f32 to vector<32x256xf32>
    %83 = arith.cmpf oge, %81, %82 : vector<32x256xf32>
    %cst_73 = arith.constant 2.000000e-01 : f32
    %84 = vector.broadcast %cst_73 : f32 to vector<32x256xf32>
    %85 = arith.mulf %84, %81 : vector<32x256xf32>
    %86 = arith.select %83, %81, %85 : vector<32x256xi1>, vector<32x256xf32>
    %87 = arith.truncf %86 : vector<32x256xf32> to vector<32x256xbf16>
    %c0_74 = arith.constant 0 : index
    %c0_75 = arith.constant 0 : index
    %c0_76 = arith.constant 0 : index
    %88 = vector.load %arg7[%c0_74, %c0_75, %c0_76] : memref<2x18x32xbf16, #tpu.memory_space<vmem>>, vector<1x18x32xbf16>
    %89 = vector.shape_cast %88 : vector<1x18x32xbf16> to vector<18x32xbf16>
    %cst_77 = arith.constant dense<0.000000e+00> : vector<18x256xf32>
    %90 = tpu.matmul %89, %87, %cst_77 {dimension_numbers = #tpu.dot_dimension_numbers<[1], [0], [0], [1], [0, 0, 1, 1], [], []>} : vector<18x32xbf16>, vector<32x256xbf16>, vector<18x256xf32> -> vector<18x256xf32>
    %91 = arith.truncf %90 : vector<18x256xf32> to vector<18x256xbf16>
    %c0_78 = arith.constant 0 : index
    %c0_79 = arith.constant 0 : index
    %c0_80 = arith.constant 0 : index
    %92 = vector.load %arg17[%c0_78, %c0_79, %c0_80] : memref<2x18x256xbf16, #tpu.memory_space<vmem>>, vector<1x18x256xbf16>
    %93 = vector.shape_cast %92 : vector<1x18x256xbf16> to vector<18x256xbf16>
    %94 = vector.shape_cast %91 : vector<18x256xbf16> to vector<1x18x256xbf16>
    tpu.vector_store %arg17[%c0_78, %c0_79, %c0_80], %94 {strides = array<i32>} : memref<2x18x256xbf16, #tpu.memory_space<vmem>>, vector<1x18x256xbf16>,
    %c1_81 = arith.constant 1 : index
    %c0_82 = arith.constant 0 : index
    %c0_83 = arith.constant 0 : index
    %95 = vector.load %arg7[%c1_81, %c0_82, %c0_83] : memref<2x18x32xbf16, #tpu.memory_space<vmem>>, vector<1x18x32xbf16>
    %96 = vector.shape_cast %95 : vector<1x18x32xbf16> to vector<18x32xbf16>
    %cst_84 = arith.constant dense<0.000000e+00> : vector<18x256xf32>
    %97 = tpu.matmul %96, %87, %cst_84 {dimension_numbers = #tpu.dot_dimension_numbers<[1], [0], [0], [1], [0, 0, 1, 1], [], []>} : vector<18x32xbf16>, vector<32x256xbf16>, vector<18x256xf32> -> vector<18x256xf32>
    %98 = arith.truncf %97 : vector<18x256xf32> to vector<18x256xbf16>
    %c1_85 = arith.constant 1 : index
    %c0_86 = arith.constant 0 : index
    %c0_87 = arith.constant 0 : index
    %99 = vector.load %arg17[%c1_85, %c0_86, %c0_87] : memref<2x18x256xbf16, #tpu.memory_space<vmem>>, vector<1x18x256xbf16>
    %100 = vector.shape_cast %99 : vector<1x18x256xbf16> to vector<18x256xbf16>
    %101 = vector.shape_cast %98 : vector<18x256xbf16> to vector<1x18x256xbf16>
    tpu.vector_store %arg17[%c1_85, %c0_86, %c0_87], %101 {strides = array<i32>} : memref<2x18x256xbf16, #tpu.memory_space<vmem>>, vector<1x18x256xbf16>,
    %c1_i32_88 = arith.constant 1 : i32
    %102 = tpu.memref_slice %arg24[%c1_i32_88] : memref<4x!tpu.dma_semaphore, #tpu.memory_space<semaphore_mem>> -> memref<1x!tpu.dma_semaphore, #tpu.memory_space<semaphore_mem>>
    %103 = tpu.memref_squeeze %102 : memref<1x!tpu.dma_semaphore, #tpu.memory_space<semaphore_mem>> -> memref<!tpu.dma_semaphore, #tpu.memory_space<semaphore_mem>>
    tpu.wait_dma2 semaphore(%103 : memref<!tpu.dma_semaphore, #tpu.memory_space<semaphore_mem>>) src(%arg8 : memref<4x256x256xbf16, #tpu.memory_space<any>>) dst(%arg21 : memref<4x256x256xbf16, #tpu.memory_space<vmem>>)
    %c0_89 = arith.constant 0 : index
    %c0_90 = arith.constant 0 : index
    %c0_91 = arith.constant 0 : index
    %104 = vector.load %arg17[%c0_89, %c0_90, %c0_91] : memref<2x18x256xbf16, #tpu.memory_space<vmem>>, vector<1x16x256xbf16>
    %105 = vector.shape_cast %104 : vector<1x16x256xbf16> to vector<16x256xbf16>
    %c0_92 = arith.constant 0 : index
    %c0_93 = arith.constant 0 : index
    %c0_94 = arith.constant 0 : index
    %106 = vector.load %arg21[%c0_92, %c0_93, %c0_94] : memref<4x256x256xbf16, #tpu.memory_space<vmem>>, vector<1x256x256xbf16>
    %107 = vector.shape_cast %106 : vector<1x256x256xbf16> to vector<256x256xbf16>
    %cst_95 = arith.constant dense<0.000000e+00> : vector<16x256xf32>
    %108 = tpu.matmul %105, %107, %cst_95 {dimension_numbers = #tpu.dot_dimension_numbers<[1], [0], [0], [1], [0, 0, 1, 1], [], []>} : vector<16x256xbf16>, vector<256x256xbf16>, vector<16x256xf32> -> vector<16x256xf32>
    %c1_96 = arith.constant 1 : index
    %c0_97 = arith.constant 0 : index
    %c0_98 = arith.constant 0 : index
    %109 = vector.load %arg17[%c1_96, %c0_97, %c0_98] : memref<2x18x256xbf16, #tpu.memory_space<vmem>>, vector<1x16x256xbf16>
    %110 = vector.shape_cast %109 : vector<1x16x256xbf16> to vector<16x256xbf16>
    %c1_99 = arith.constant 1 : index
    %c0_100 = arith.constant 0 : index
    %c0_101 = arith.constant 0 : index
    %111 = vector.load %arg21[%c1_99, %c0_100, %c0_101] : memref<4x256x256xbf16, #tpu.memory_space<vmem>>, vector<1x256x256xbf16>
    %112 = vector.shape_cast %111 : vector<1x256x256xbf16> to vector<256x256xbf16>
    %cst_102 = arith.constant dense<0.000000e+00> : vector<16x256xf32>
    %113 = tpu.matmul %110, %112, %cst_102 {dimension_numbers = #tpu.dot_dimension_numbers<[1], [0], [0], [1], [0, 0, 1, 1], [], []>} : vector<16x256xbf16>, vector<256x256xbf16>, vector<16x256xf32> -> vector<16x256xf32>
    %114 = arith.addf %108, %113 : vector<16x256xf32>
    %c0_103 = arith.constant 0 : index
    %c2_104 = arith.constant 2 : index
    %c0_105 = arith.constant 0 : index
    %115 = vector.load %arg17[%c0_103, %c2_104, %c0_105] : memref<2x18x256xbf16, #tpu.memory_space<vmem>>, vector<1x16x256xbf16>
    %116 = vector.shape_cast %115 : vector<1x16x256xbf16> to vector<16x256xbf16>
    %c2_106 = arith.constant 2 : index
    %c0_107 = arith.constant 0 : index
    %c0_108 = arith.constant 0 : index
    %117 = vector.load %arg21[%c2_106, %c0_107, %c0_108] : memref<4x256x256xbf16, #tpu.memory_space<vmem>>, vector<1x256x256xbf16>
    %118 = vector.shape_cast %117 : vector<1x256x256xbf16> to vector<256x256xbf16>
    %cst_109 = arith.constant dense<0.000000e+00> : vector<16x256xf32>
    %119 = tpu.matmul %116, %118, %cst_109 {dimension_numbers = #tpu.dot_dimension_numbers<[1], [0], [0], [1], [0, 0, 1, 1], [], []>} : vector<16x256xbf16>, vector<256x256xbf16>, vector<16x256xf32> -> vector<16x256xf32>
    %120 = arith.addf %114, %119 : vector<16x256xf32>
    %c1_110 = arith.constant 1 : index
    %c2_111 = arith.constant 2 : index
    %c0_112 = arith.constant 0 : index
    %121 = vector.load %arg17[%c1_110, %c2_111, %c0_112] : memref<2x18x256xbf16, #tpu.memory_space<vmem>>, vector<1x16x256xbf16>
    %122 = vector.shape_cast %121 : vector<1x16x256xbf16> to vector<16x256xbf16>
    %c3_113 = arith.constant 3 : index
    %c0_114 = arith.constant 0 : index
    %c0_115 = arith.constant 0 : index
    %123 = vector.load %arg21[%c3_113, %c0_114, %c0_115] : memref<4x256x256xbf16, #tpu.memory_space<vmem>>, vector<1x256x256xbf16>
    %124 = vector.shape_cast %123 : vector<1x256x256xbf16> to vector<256x256xbf16>
    %cst_116 = arith.constant dense<0.000000e+00> : vector<16x256xf32>
    %125 = tpu.matmul %122, %124, %cst_116 {dimension_numbers = #tpu.dot_dimension_numbers<[1], [0], [0], [1], [0, 0, 1, 1], [], []>} : vector<16x256xbf16>, vector<256x256xbf16>, vector<16x256xf32> -> vector<16x256xf32>
    %126 = arith.addf %120, %125 : vector<16x256xf32>
    %c0_117 = arith.constant 0 : index
    %c0_118 = arith.constant 0 : index
    %127 = vector.load %arg9[%c0_117, %c0_118] : memref<1x256xf32, #tpu.memory_space<vmem>>, vector<1x256xf32>
    %128 = vector.broadcast %127 : vector<1x256xf32> to vector<16x256xf32>
    %129 = arith.addf %126, %128 : vector<16x256xf32>
    %cst_119 = arith.constant 0.000000e+00 : f32
    %130 = vector.broadcast %cst_119 : f32 to vector<16x256xf32>
    %131 = arith.cmpf oge, %129, %130 : vector<16x256xf32>
    %cst_120 = arith.constant 2.000000e-01 : f32
    %132 = vector.broadcast %cst_120 : f32 to vector<16x256xf32>
    %133 = arith.mulf %132, %129 : vector<16x256xf32>
    %134 = arith.select %131, %129, %133 : vector<16x256xi1>, vector<16x256xf32>
    %135 = arith.truncf %134 : vector<16x256xf32> to vector<16x256xbf16>
    %c0_121 = arith.constant 0 : index
    %c0_122 = arith.constant 0 : index
    %c0_123 = arith.constant 0 : index
    %136 = vector.load %arg10[%c0_121, %c0_122, %c0_123] : memref<2x10x16xbf16, #tpu.memory_space<vmem>>, vector<1x10x16xbf16>
    %137 = vector.shape_cast %136 : vector<1x10x16xbf16> to vector<10x16xbf16>
    %cst_124 = arith.constant dense<0.000000e+00> : vector<10x256xf32>
    %138 = tpu.matmul %137, %135, %cst_124 {dimension_numbers = #tpu.dot_dimension_numbers<[1], [0], [0], [1], [0, 0, 1, 1], [], []>} : vector<10x16xbf16>, vector<16x256xbf16>, vector<10x256xf32> -> vector<10x256xf32>
    %139 = arith.truncf %138 : vector<10x256xf32> to vector<10x256xbf16>
    %c0_125 = arith.constant 0 : index
    %c0_126 = arith.constant 0 : index
    %c0_127 = arith.constant 0 : index
    %140 = vector.load %arg18[%c0_125, %c0_126, %c0_127] : memref<2x10x256xbf16, #tpu.memory_space<vmem>>, vector<1x10x256xbf16>
    %141 = vector.shape_cast %140 : vector<1x10x256xbf16> to vector<10x256xbf16>
    %142 = vector.shape_cast %139 : vector<10x256xbf16> to vector<1x10x256xbf16>
    tpu.vector_store %arg18[%c0_125, %c0_126, %c0_127], %142 {strides = array<i32>} : memref<2x10x256xbf16, #tpu.memory_space<vmem>>, vector<1x10x256xbf16>,
    %c1_128 = arith.constant 1 : index
    %c0_129 = arith.constant 0 : index
    %c0_130 = arith.constant 0 : index
    %143 = vector.load %arg10[%c1_128, %c0_129, %c0_130] : memref<2x10x16xbf16, #tpu.memory_space<vmem>>, vector<1x10x16xbf16>
    %144 = vector.shape_cast %143 : vector<1x10x16xbf16> to vector<10x16xbf16>
    %cst_131 = arith.constant dense<0.000000e+00> : vector<10x256xf32>
    %145 = tpu.matmul %144, %135, %cst_131 {dimension_numbers = #tpu.dot_dimension_numbers<[1], [0], [0], [1], [0, 0, 1, 1], [], []>} : vector<10x16xbf16>, vector<16x256xbf16>, vector<10x256xf32> -> vector<10x256xf32>
    %146 = arith.truncf %145 : vector<10x256xf32> to vector<10x256xbf16>
    %c1_132 = arith.constant 1 : index
    %c0_133 = arith.constant 0 : index
    %c0_134 = arith.constant 0 : index
    %147 = vector.load %arg18[%c1_132, %c0_133, %c0_134] : memref<2x10x256xbf16, #tpu.memory_space<vmem>>, vector<1x10x256xbf16>
    %148 = vector.shape_cast %147 : vector<1x10x256xbf16> to vector<10x256xbf16>
    %149 = vector.shape_cast %146 : vector<10x256xbf16> to vector<1x10x256xbf16>
    tpu.vector_store %arg18[%c1_132, %c0_133, %c0_134], %149 {strides = array<i32>} : memref<2x10x256xbf16, #tpu.memory_space<vmem>>, vector<1x10x256xbf16>,
    %c2_i32_135 = arith.constant 2 : i32
    %150 = tpu.memref_slice %arg24[%c2_i32_135] : memref<4x!tpu.dma_semaphore, #tpu.memory_space<semaphore_mem>> -> memref<1x!tpu.dma_semaphore, #tpu.memory_space<semaphore_mem>>
    %151 = tpu.memref_squeeze %150 : memref<1x!tpu.dma_semaphore, #tpu.memory_space<semaphore_mem>> -> memref<!tpu.dma_semaphore, #tpu.memory_space<semaphore_mem>>
    tpu.wait_dma2 semaphore(%151 : memref<!tpu.dma_semaphore, #tpu.memory_space<semaphore_mem>>) src(%arg11 : memref<4x256x256xbf16, #tpu.memory_space<any>>) dst(%arg22 : memref<4x256x256xbf16, #tpu.memory_space<vmem>>)
    %c0_136 = arith.constant 0 : index
    %c0_137 = arith.constant 0 : index
    %c0_138 = arith.constant 0 : index
    %152 = vector.load %arg18[%c0_136, %c0_137, %c0_138] : memref<2x10x256xbf16, #tpu.memory_space<vmem>>, vector<1x8x256xbf16>
    %153 = vector.shape_cast %152 : vector<1x8x256xbf16> to vector<8x256xbf16>
    %c0_139 = arith.constant 0 : index
    %c0_140 = arith.constant 0 : index
    %c0_141 = arith.constant 0 : index
    %154 = vector.load %arg22[%c0_139, %c0_140, %c0_141] : memref<4x256x256xbf16, #tpu.memory_space<vmem>>, vector<1x256x256xbf16>
    %155 = vector.shape_cast %154 : vector<1x256x256xbf16> to vector<256x256xbf16>
    %cst_142 = arith.constant dense<0.000000e+00> : vector<8x256xf32>
    %156 = tpu.matmul %153, %155, %cst_142 {dimension_numbers = #tpu.dot_dimension_numbers<[1], [0], [0], [1], [0, 0, 1, 1], [], []>} : vector<8x256xbf16>, vector<256x256xbf16>, vector<8x256xf32> -> vector<8x256xf32>
    %c1_143 = arith.constant 1 : index
    %c0_144 = arith.constant 0 : index
    %c0_145 = arith.constant 0 : index
    %157 = vector.load %arg18[%c1_143, %c0_144, %c0_145] : memref<2x10x256xbf16, #tpu.memory_space<vmem>>, vector<1x8x256xbf16>
    %158 = vector.shape_cast %157 : vector<1x8x256xbf16> to vector<8x256xbf16>
    %c1_146 = arith.constant 1 : index
    %c0_147 = arith.constant 0 : index
    %c0_148 = arith.constant 0 : index
    %159 = vector.load %arg22[%c1_146, %c0_147, %c0_148] : memref<4x256x256xbf16, #tpu.memory_space<vmem>>, vector<1x256x256xbf16>
    %160 = vector.shape_cast %159 : vector<1x256x256xbf16> to vector<256x256xbf16>
    %cst_149 = arith.constant dense<0.000000e+00> : vector<8x256xf32>
    %161 = tpu.matmul %158, %160, %cst_149 {dimension_numbers = #tpu.dot_dimension_numbers<[1], [0], [0], [1], [0, 0, 1, 1], [], []>} : vector<8x256xbf16>, vector<256x256xbf16>, vector<8x256xf32> -> vector<8x256xf32>
    %162 = arith.addf %156, %161 : vector<8x256xf32>
    %c0_150 = arith.constant 0 : index
    %c2_151 = arith.constant 2 : index
    %c0_152 = arith.constant 0 : index
    %163 = vector.load %arg18[%c0_150, %c2_151, %c0_152] : memref<2x10x256xbf16, #tpu.memory_space<vmem>>, vector<1x8x256xbf16>
    %164 = vector.shape_cast %163 : vector<1x8x256xbf16> to vector<8x256xbf16>
    %c2_153 = arith.constant 2 : index
    %c0_154 = arith.constant 0 : index
    %c0_155 = arith.constant 0 : index
    %165 = vector.load %arg22[%c2_153, %c0_154, %c0_155] : memref<4x256x256xbf16, #tpu.memory_space<vmem>>, vector<1x256x256xbf16>
    %166 = vector.shape_cast %165 : vector<1x256x256xbf16> to vector<256x256xbf16>
    %cst_156 = arith.constant dense<0.000000e+00> : vector<8x256xf32>
    %167 = tpu.matmul %164, %166, %cst_156 {dimension_numbers = #tpu.dot_dimension_numbers<[1], [0], [0], [1], [0, 0, 1, 1], [], []>} : vector<8x256xbf16>, vector<256x256xbf16>, vector<8x256xf32> -> vector<8x256xf32>
    %168 = arith.addf %162, %167 : vector<8x256xf32>
    %c1_157 = arith.constant 1 : index
    %c2_158 = arith.constant 2 : index
    %c0_159 = arith.constant 0 : index
    %169 = vector.load %arg18[%c1_157, %c2_158, %c0_159] : memref<2x10x256xbf16, #tpu.memory_space<vmem>>, vector<1x8x256xbf16>
    %170 = vector.shape_cast %169 : vector<1x8x256xbf16> to vector<8x256xbf16>
    %c3_160 = arith.constant 3 : index
    %c0_161 = arith.constant 0 : index
    %c0_162 = arith.constant 0 : index
    %171 = vector.load %arg22[%c3_160, %c0_161, %c0_162] : memref<4x256x256xbf16, #tpu.memory_space<vmem>>, vector<1x256x256xbf16>
    %172 = vector.shape_cast %171 : vector<1x256x256xbf16> to vector<256x256xbf16>
    %cst_163 = arith.constant dense<0.000000e+00> : vector<8x256xf32>
    %173 = tpu.matmul %170, %172, %cst_163 {dimension_numbers = #tpu.dot_dimension_numbers<[1], [0], [0], [1], [0, 0, 1, 1], [], []>} : vector<8x256xbf16>, vector<256x256xbf16>, vector<8x256xf32> -> vector<8x256xf32>
    %174 = arith.addf %168, %173 : vector<8x256xf32>
    %c0_164 = arith.constant 0 : index
    %c0_165 = arith.constant 0 : index
    %175 = vector.load %arg12[%c0_164, %c0_165] : memref<1x256xf32, #tpu.memory_space<vmem>>, vector<1x256xf32>
    %176 = vector.broadcast %175 : vector<1x256xf32> to vector<8x256xf32>
    %177 = arith.addf %174, %176 : vector<8x256xf32>
    %cst_166 = arith.constant 0.000000e+00 : f32
    %178 = vector.broadcast %cst_166 : f32 to vector<8x256xf32>
    %179 = arith.cmpf oge, %177, %178 : vector<8x256xf32>
    %cst_167 = arith.constant 2.000000e-01 : f32
    %180 = vector.broadcast %cst_167 : f32 to vector<8x256xf32>
    %181 = arith.mulf %180, %177 : vector<8x256xf32>
    %182 = arith.select %179, %177, %181 : vector<8x256xi1>, vector<8x256xf32>
    %183 = arith.truncf %182 : vector<8x256xf32> to vector<8x256xbf16>
    %c2_168 = arith.constant 2 : index
    %c0_169 = arith.constant 0 : index
    %184 = vector.load %arg19[%c2_168, %c0_169] : memref<12x256xbf16, #tpu.memory_space<vmem>>, vector<8x256xbf16>
    tpu.vector_store %arg19[%c2_168, %c0_169], %183 {strides = array<i32>} : memref<12x256xbf16, #tpu.memory_space<vmem>>, vector<8x256xbf16>,
    %cst_170 = arith.constant 0.000000e+00 : bf16
    %185 = vector.broadcast %cst_170 : bf16 to vector<2x256xbf16>
    %c0_171 = arith.constant 0 : index
    %c0_172 = arith.constant 0 : index
    %186 = vector.load %arg19[%c0_171, %c0_172] : memref<12x256xbf16, #tpu.memory_space<vmem>>, vector<2x256xbf16>
    tpu.vector_store %arg19[%c0_171, %c0_172], %185 {strides = array<i32>} : memref<12x256xbf16, #tpu.memory_space<vmem>>, vector<2x256xbf16>,
    %c10 = arith.constant 10 : index
    %c0_173 = arith.constant 0 : index
    %187 = vector.load %arg19[%c10, %c0_173] : memref<12x256xbf16, #tpu.memory_space<vmem>>, vector<2x256xbf16>
    tpu.vector_store %arg19[%c10, %c0_173], %185 {strides = array<i32>} : memref<12x256xbf16, #tpu.memory_space<vmem>>, vector<2x256xbf16>,
    %c3_i32_174 = arith.constant 3 : i32
    %188 = tpu.memref_slice %arg24[%c3_i32_174] : memref<4x!tpu.dma_semaphore, #tpu.memory_space<semaphore_mem>> -> memref<1x!tpu.dma_semaphore, #tpu.memory_space<semaphore_mem>>
    %189 = tpu.memref_squeeze %188 : memref<1x!tpu.dma_semaphore, #tpu.memory_space<semaphore_mem>> -> memref<!tpu.dma_semaphore, #tpu.memory_space<semaphore_mem>>
    tpu.wait_dma2 semaphore(%189 : memref<!tpu.dma_semaphore, #tpu.memory_space<semaphore_mem>>) src(%arg13 : memref<4x256x128xbf16, #tpu.memory_space<any>>) dst(%arg23 : memref<4x256x128xbf16, #tpu.memory_space<vmem>>)
    %c0_175 = arith.constant 0 : index
    %c0_176 = arith.constant 0 : index
    %190 = vector.load %arg19[%c0_175, %c0_176] : memref<12x256xbf16, #tpu.memory_space<vmem>>, vector<6x256xbf16>
    %c0_177 = arith.constant 0 : index
    %c0_178 = arith.constant 0 : index
    %c0_179 = arith.constant 0 : index
    %191 = vector.load %arg23[%c0_177, %c0_178, %c0_179] : memref<4x256x128xbf16, #tpu.memory_space<vmem>>, vector<1x256x128xbf16>
    %192 = vector.shape_cast %191 : vector<1x256x128xbf16> to vector<256x128xbf16>
    %cst_180 = arith.constant dense<0.000000e+00> : vector<6x128xf32>
    %193 = tpu.matmul %190, %192, %cst_180 {dimension_numbers = #tpu.dot_dimension_numbers<[1], [0], [0], [1], [0, 0, 1, 1], [], []>} : vector<6x256xbf16>, vector<256x128xbf16>, vector<6x128xf32> -> vector<6x128xf32>
    %c2_181 = arith.constant 2 : index
    %c0_182 = arith.constant 0 : index
    %194 = vector.load %arg19[%c2_181, %c0_182] : memref<12x256xbf16, #tpu.memory_space<vmem>>, vector<6x256xbf16>
    %c1_183 = arith.constant 1 : index
    %c0_184 = arith.constant 0 : index
    %c0_185 = arith.constant 0 : index
    %195 = vector.load %arg23[%c1_183, %c0_184, %c0_185] : memref<4x256x128xbf16, #tpu.memory_space<vmem>>, vector<1x256x128xbf16>
    %196 = vector.shape_cast %195 : vector<1x256x128xbf16> to vector<256x128xbf16>
    %cst_186 = arith.constant dense<0.000000e+00> : vector<6x128xf32>
    %197 = tpu.matmul %194, %196, %cst_186 {dimension_numbers = #tpu.dot_dimension_numbers<[1], [0], [0], [1], [0, 0, 1, 1], [], []>} : vector<6x256xbf16>, vector<256x128xbf16>, vector<6x128xf32> -> vector<6x128xf32>
    %198 = arith.addf %193, %197 : vector<6x128xf32>
    %c4 = arith.constant 4 : index
    %c0_187 = arith.constant 0 : index
    %199 = vector.load %arg19[%c4, %c0_187] : memref<12x256xbf16, #tpu.memory_space<vmem>>, vector<6x256xbf16>
    %c2_188 = arith.constant 2 : index
    %c0_189 = arith.constant 0 : index
    %c0_190 = arith.constant 0 : index
    %200 = vector.load %arg23[%c2_188, %c0_189, %c0_190] : memref<4x256x128xbf16, #tpu.memory_space<vmem>>, vector<1x256x128xbf16>
    %201 = vector.shape_cast %200 : vector<1x256x128xbf16> to vector<256x128xbf16>
    %cst_191 = arith.constant dense<0.000000e+00> : vector<6x128xf32>
    %202 = tpu.matmul %199, %201, %cst_191 {dimension_numbers = #tpu.dot_dimension_numbers<[1], [0], [0], [1], [0, 0, 1, 1], [], []>} : vector<6x256xbf16>, vector<256x128xbf16>, vector<6x128xf32> -> vector<6x128xf32>
    %203 = arith.addf %198, %202 : vector<6x128xf32>
    %c6 = arith.constant 6 : index
    %c0_192 = arith.constant 0 : index
    %204 = vector.load %arg19[%c6, %c0_192] : memref<12x256xbf16, #tpu.memory_space<vmem>>, vector<6x256xbf16>
    %c3_193 = arith.constant 3 : index
    %c0_194 = arith.constant 0 : index
    %c0_195 = arith.constant 0 : index
    %205 = vector.load %arg23[%c3_193, %c0_194, %c0_195] : memref<4x256x128xbf16, #tpu.memory_space<vmem>>, vector<1x256x128xbf16>
    %206 = vector.shape_cast %205 : vector<1x256x128xbf16> to vector<256x128xbf16>
    %cst_196 = arith.constant dense<0.000000e+00> : vector<6x128xf32>
    %207 = tpu.matmul %204, %206, %cst_196 {dimension_numbers = #tpu.dot_dimension_numbers<[1], [0], [0], [1], [0, 0, 1, 1], [], []>} : vector<6x256xbf16>, vector<256x128xbf16>, vector<6x128xf32> -> vector<6x128xf32>
    %208 = arith.addf %203, %207 : vector<6x128xf32>
    %c0_197 = arith.constant 0 : index
    %c0_198 = arith.constant 0 : index
    %209 = vector.load %arg14[%c0_197, %c0_198] : memref<1x128xf32, #tpu.memory_space<vmem>>, vector<1x128xf32>
    %210 = vector.broadcast %209 : vector<1x128xf32> to vector<6x128xf32>
    %211 = arith.addf %208, %210 : vector<6x128xf32>
    %c0_199 = arith.constant 0 : index
    %c0_200 = arith.constant 0 : index
    %212 = vector.load %arg15[%c0_199, %c0_200] : memref<6x128xf32, #tpu.memory_space<vmem>>, vector<6x128xf32>
    tpu.vector_store %arg15[%c0_199, %c0_200], %211 {strides = array<i32>} : memref<6x128xf32, #tpu.memory_space<vmem>>, vector<6x128xf32>,
    return
  }
  func.func @transform_0(%arg0: i32) -> (i32, i32, i32) {
    %c0_i32 = arith.constant 0 : i32
    %c0_i32_0 = arith.constant 0 : i32
    %c0_i32_1 = arith.constant 0 : i32
    %c0_i32_2 = arith.constant 0 : i32
    return %c0_i32, %c0_i32_0, %c0_i32_1 : i32, i32, i32
  }
  func.func @transform_1(%arg0: i32) -> (i32, i32, i32) {
    %c0_i32 = arith.constant 0 : i32
    %c0_i32_0 = arith.constant 0 : i32
    %c0_i32_1 = arith.constant 0 : i32
    %c0_i32_2 = arith.constant 0 : i32
    return %c0_i32, %c0_i32_0, %c0_i32_1 : i32, i32, i32
  }
  func.func @transform_2(%arg0: i32) -> (i32, i32) {
    %c0_i32 = arith.constant 0 : i32
    %c0_i32_0 = arith.constant 0 : i32
    %c0_i32_1 = arith.constant 0 : i32
    return %c0_i32, %c0_i32_0 : i32, i32
  }
  func.func @transform_3(%arg0: i32) -> (i32, i32, i32) {
    %c0_i32 = arith.constant 0 : i32
    %c0_i32_0 = arith.constant 0 : i32
    %c0_i32_1 = arith.constant 0 : i32
    %c0_i32_2 = arith.constant 0 : i32
    return %c0_i32, %c0_i32_0, %c0_i32_1 : i32, i32, i32
  }
  func.func @transform_5(%arg0: i32) -> (i32, i32) {
    %c0_i32 = arith.constant 0 : i32
    %c0_i32_0 = arith.constant 0 : i32
    %c0_i32_1 = arith.constant 0 : i32
    return %c0_i32, %c0_i32_0 : i32, i32
  }
  func.func @transform_6(%arg0: i32) -> (i32, i32, i32) {
    %c0_i32 = arith.constant 0 : i32
    %c0_i32_0 = arith.constant 0 : i32
    %c0_i32_1 = arith.constant 0 : i32
    %c0_i32_2 = arith.constant 0 : i32
    return %c0_i32, %c0_i32_0, %c0_i32_1 : i32, i32, i32
  }
  func.func @transform_8(%arg0: i32) -> (i32, i32) {
    %c0_i32 = arith.constant 0 : i32
    %c0_i32_0 = arith.constant 0 : i32
    %c0_i32_1 = arith.constant 0 : i32
    return %c0_i32, %c0_i32_0 : i32, i32
  }
  func.func @transform_9(%arg0: i32) -> (i32, i32, i32) {
    %c0_i32 = arith.constant 0 : i32
    %c0_i32_0 = arith.constant 0 : i32
    %c0_i32_1 = arith.constant 0 : i32
    %c0_i32_2 = arith.constant 0 : i32
    return %c0_i32, %c0_i32_0, %c0_i32_1 : i32, i32, i32
  }
  func.func @transform_11(%arg0: i32) -> (i32, i32) {
    %c0_i32 = arith.constant 0 : i32
    %c0_i32_0 = arith.constant 0 : i32
    %c0_i32_1 = arith.constant 0 : i32
    return %c0_i32, %c0_i32_0 : i32, i32
  }
  func.func @transform_13(%arg0: i32) -> (i32, i32) {
    %c0_i32 = arith.constant 0 : i32
    %c0_i32_0 = arith.constant 0 : i32
    %c0_i32_1 = arith.constant 0 : i32
    return %c0_i32, %c0_i32_0 : i32, i32
  }
  func.func @transform_14(%arg0: i32) -> (i32, i32) {
    %c0_i32 = arith.constant 0 : i32
    %c0_i32_0 = arith.constant 0 : i32
    %c0_i32_1 = arith.constant 0 : i32
    return %c0_i32, %c0_i32_0 : i32, i32
  }
}

</mosaic_0001>

<bundles_post_ra>
// kernel: forward.1
= control target key start
LH: loop header
LB: loop body
LE: loop exit
PB: predicated region body
PF: predicated region fallthrough
CT: control target
= control target key end

     0   :  { %s13260_s0 = inlined_call_operand.vmem [shape: bf16[2,66,256], index: 0, kind: input, shape index: {}]   ;;  %s13261_s1 = inlined_call_operand.vmem [shape: bf16[4,256,256], index: 1, kind: input, shape index: {}]   ;;  %s13262_s2 = inlined_call_operand.vmem [shape: f32[1,256], index: 2, kind: input, shape index: {}]   ;;  %s13263_s3 = inlined_call_operand.vmem [shape: bf16[2,34,64], index: 3, kind: input, shape index: {}]   ;;  %s13264_s4 = inlined_call_operand.vmem [shape: bf16[4,256,256], index: 4, kind: input, shape index: {}]   ;;  %s13265_s5 = inlined_call_operand.vmem [shape: f32[1,256], index: 5, kind: input, shape index: {}]   ;;  %s13266_s6 = inlined_call_operand.vmem [shape: bf16[2,18,32], index: 6, kind: input, shape index: {}]   ;;  %s13267_s7 = inlined_call_operand.vmem [shape: bf16[4,256,256], index: 7, kind: input, shape index: {}]   ;;  %s13268_s8 = inlined_call_operand.vmem [shape: f32[1,256], index: 8, kind: input, shape index: {}]   ;;  %s13269_s9 = inlined_call_operand.vmem [shape: bf16[2,10,16], index: 9, kind: input, shape index: {}]   ;;  %s13270_s10 = inlined_call_operand.vmem [shape: bf16[4,256,256], index: 10, kind: input, shape index: {}]   ;;  %s13271_s11 = inlined_call_operand.vmem [shape: f32[1,256], index: 11, kind: input, shape index: {}]   ;;  %s13272_s12 = inlined_call_operand.vmem [shape: bf16[4,256,128], index: 12, kind: input, shape index: {}]   ;;  %s13273_s13 = inlined_call_operand.vmem [shape: f32[1,128], index: 13, kind: input, shape index: {}]   ;;  %s13274_s14 = inlined_call_operand.vmem [shape: f32[6,128], index: 14, kind: output, shape index: {}]  }
   0x1   :  { %v50_v0 = vld [vmem:[%s13264_s4] sm:$0xff]  ;;  %v52_v1 = vld [vmem:[%s13264_s4 + $0x8] sm:$0xff]  ;;  %v54_v2 = vld [vmem:[%s13264_s4 + $0x10] sm:$0xff] }
   0x2   :  { %51 = vst [vmem:[#allocation6] sm:$0xff] %v50_v0  ;;  %v56_v3 = vld [vmem:[%s13264_s4 + $0x18] sm:$0xff]  ;;  %v58_v4 = vld [vmem:[%s13264_s4 + $0x20] sm:$0xff]  ;;  %v60_v5 = vld [vmem:[%s13264_s4 + $0x28] sm:$0xff] }
   0x3   :  { %53 = vst [vmem:[#allocation6 + $0x8] sm:$0xff] %v52_v1  ;;  %v62_v6 = vld [vmem:[%s13264_s4 + $0x30] sm:$0xff]  ;;  %v64_v7 = vld [vmem:[%s13264_s4 + $0x38] sm:$0xff]  ;;  %v66_v8 = vld [vmem:[%s13264_s4 + $0x40] sm:$0xff] }
   0x4   :  { %55 = vst [vmem:[#allocation6 + $0x10] sm:$0xff] %v54_v2  ;;  %v68_v9 = vld [vmem:[%s13264_s4 + $0x48] sm:$0xff]  ;;  %v70_v10 = vld [vmem:[%s13264_s4 + $0x50] sm:$0xff]  ;;  %v72_v11 = vld [vmem:[%s13264_s4 + $0x58] sm:$0xff] }
   0x5   :  { %57 = vst [vmem:[#allocation6 + $0x18] sm:$0xff] %v56_v3  ;;  %v74_v12 = vld [vmem:[%s13264_s4 + $0x60] sm:$0xff]  ;;  %v76_v13 = vld [vmem:[%s13264_s4 + $0x68] sm:$0xff]  ;;  %v78_v14 = vld [vmem:[%s13264_s4 + $0x70] sm:$0xff] }
   0x6   :  { %59 = vst [vmem:[#allocation6 + $0x20] sm:$0xff] %v58_v4  ;;  %v80_v15 = vld [vmem:[%s13264_s4 + $0x78] sm:$0xff]  ;;  %v82_v16 = vld [vmem:[%s13264_s4 + $0x80] sm:$0xff]  ;;  %v84_v17 = vld [vmem:[%s13264_s4 + $0x88] sm:$0xff] }
   0x7   :  { %61 = vst [vmem:[#allocation6 + $0x28] sm:$0xff] %v60_v5  ;;  %v86_v18 = vld [vmem:[%s13264_s4 + $0x90] sm:$0xff]  ;;  %v88_v19 = vld [vmem:[%s13264_s4 + $0x98] sm:$0xff]  ;;  %v90_v20 = vld [vmem:[%s13264_s4 + $0xa0] sm:$0xff] }
   0x8   :  { %63 = vst [vmem:[#allocation6 + $0x30] sm:$0xff] %v62_v6  ;;  %v92_v21 = vld [vmem:[%s13264_s4 + $0xa8] sm:$0xff]  ;;  %v94_v22 = vld [vmem:[%s13264_s4 + $0xb0] sm:$0xff]  ;;  %v96_v23 = vld [vmem:[%s13264_s4 + $0xb8] sm:$0xff] }
   0x9   :  { %65 = vst [vmem:[#allocation6 + $0x38] sm:$0xff] %v64_v7  ;;  %v98_v24 = vld [vmem:[%s13264_s4 + $0xc0] sm:$0xff]  ;;  %v100_v25 = vld [vmem:[%s13264_s4 + $0xc8] sm:$0xff]  ;;  %v102_v26 = vld [vmem:[%s13264_s4 + $0xd0] sm:$0xff] }
   0xa   :  { %67 = vst [vmem:[#allocation6 + $0x40] sm:$0xff] %v66_v8  ;;  %v104_v27 = vld [vmem:[%s13264_s4 + $0xd8] sm:$0xff]  ;;  %v106_v28 = vld [vmem:[%s13264_s4 + $0xe0] sm:$0xff]  ;;  %v108_v29 = vld [vmem:[%s13264_s4 + $0xe8] sm:$0xff] }
   0xb   :  { %69 = vst [vmem:[#allocation6 + $0x48] sm:$0xff] %v68_v9  ;;  %v110_v30 = vld [vmem:[%s13264_s4 + $0xf0] sm:$0xff]  ;;  %v112_v31 = vld [vmem:[%s13264_s4 + $0xf8] sm:$0xff]  ;;  %v114_v32 = vld [vmem:[%s13264_s4 + $0x100] sm:$0xff] }
   0xc   :  { %71 = vst [vmem:[#allocation6 + $0x50] sm:$0xff] %v70_v10  ;;  %v116_v33 = vld [vmem:[%s13264_s4 + $0x108] sm:$0xff]  ;;  %v118_v34 = vld [vmem:[%s13264_s4 + $0x110] sm:$0xff]  ;;  %v120_v35 = vld [vmem:[%s13264_s4 + $0x118] sm:$0xff] }
   0xd   :  { %73 = vst [vmem:[#allocation6 + $0x58] sm:$0xff] %v72_v11  ;;  %v122_v36 = vld [vmem:[%s13264_s4 + $0x120] sm:$0xff]  ;;  %v124_v37 = vld [vmem:[%s13264_s4 + $0x128] sm:$0xff]  ;;  %v126_v38 = vld [vmem:[%s13264_s4 + $0x130] sm:$0xff] }
   0xe   :  { %75 = vst [vmem:[#allocation6 + $0x60] sm:$0xff] %v74_v12  ;;  %v128_v39 = vld [vmem:[%s13264_s4 + $0x138] sm:$0xff]  ;;  %v130_v40 = vld [vmem:[%s13264_s4 + $0x140] sm:$0xff]  ;;  %v132_v41 = vld [vmem:[%s13264_s4 + $0x148] sm:$0xff] }
   0xf   :  { %77 = vst [vmem:[#allocation6 + $0x68] sm:$0xff] %v76_v13  ;;  %v134_v42 = vld [vmem:[%s13264_s4 + $0x150] sm:$0xff]  ;;  %v136_v43 = vld [vmem:[%s13264_s4 + $0x158] sm:$0xff]  ;;  %v138_v44 = vld [vmem:[%s13264_s4 + $0x160] sm:$0xff] }
  0x10   :  { %79 = vst [vmem:[#allocation6 + $0x70] sm:$0xff] %v78_v14  ;;  %v140_v45 = vld [vmem:[%s13264_s4 + $0x168] sm:$0xff]  ;;  %v142_v46 = vld [vmem:[%s13264_s4 + $0x170] sm:$0xff]  ;;  %v144_v47 = vld [vmem:[%s13264_s4 + $0x178] sm:$0xff] }
  0x11   :  { %81 = vst [vmem:[#allocation6 + $0x78] sm:$0xff] %v80_v15  ;;  %v146_v48 = vld [vmem:[%s13264_s4 + $0x180] sm:$0xff]  ;;  %v148_v49 = vld [vmem:[%s13264_s4 + $0x188] sm:$0xff]  ;;  %v150_v50 = vld [vmem:[%s13264_s4 + $0x190] sm:$0xff] }
  0x12   :  { %83 = vst [vmem:[#allocation6 + $0x80] sm:$0xff] %v82_v16  ;;  %v152_v51 = vld [vmem:[%s13264_s4 + $0x198] sm:$0xff]  ;;  %v154_v52 = vld [vmem:[%s13264_s4 + $0x1a0] sm:$0xff]  ;;  %v156_v53 = vld [vmem:[%s13264_s4 + $0x1a8] sm:$0xff] }
  0x13   :  { %85 = vst [vmem:[#allocation6 + $0x88] sm:$0xff] %v84_v17  ;;  %v158_v54 = vld [vmem:[%s13264_s4 + $0x1b0] sm:$0xff]  ;;  %v160_v55 = vld [vmem:[%s13264_s4 + $0x1b8] sm:$0xff]  ;;  %v162_v56 = vld [vmem:[%s13264_s4 + $0x1c0] sm:$0xff] }
  0x14   :  { %87 = vst [vmem:[#allocation6 + $0x90] sm:$0xff] %v86_v18  ;;  %v164_v57 = vld [vmem:[%s13264_s4 + $0x1c8] sm:$0xff]  ;;  %v166_v58 = vld [vmem:[%s13264_s4 + $0x1d0] sm:$0xff]  ;;  %v168_v59 = vld [vmem:[%s13264_s4 + $0x1d8] sm:$0xff] }
  0x15   :  { %89 = vst [vmem:[#allocation6 + $0x98] sm:$0xff] %v88_v19  ;;  %v170_v60 = vld [vmem:[%s13264_s4 + $0x1e0] sm:$0xff]  ;;  %v172_v61 = vld [vmem:[%s13264_s4 + $0x1e8] sm:$0xff]  ;;  %v174_v62 = vld [vmem:[%s13264_s4 + $0x1f0] sm:$0xff] }
  0x16   :  { %91 = vst [vmem:[#allocation6 + $0xa0] sm:$0xff] %v90_v20  ;;  %v176_v63 = vld [vmem:[%s13264_s4 + $0x1f8] sm:$0xff]  ;;  %v178_v0 = vld [vmem:[%s13264_s4 + $0x200] sm:$0xff]  ;;  %v180_v1 = vld [vmem:[%s13264_s4 + $0x208] sm:$0xff] }
  0x17   :  { %93 = vst [vmem:[#allocation6 + $0xa8] sm:$0xff] %v92_v21  ;;  %v182_v2 = vld [vmem:[%s13264_s4 + $0x210] sm:$0xff]  ;;  %v184_v3 = vld [vmem:[%s13264_s4 + $0x218] sm:$0xff]  ;;  %v186_v4 = vld [vmem:[%s13264_s4 + $0x220] sm:$0xff] }
  0x18   :  { %95 = vst [vmem:[#allocation6 + $0xb0] sm:$0xff] %v94_v22  ;;  %v188_v5 = vld [vmem:[%s13264_s4 + $0x228] sm:$0xff]  ;;  %v190_v6 = vld [vmem:[%s13264_s4 + $0x230] sm:$0xff]  ;;  %v192_v7 = vld [vmem:[%s13264_s4 + $0x238] sm:$0xff] }
  0x19   :  { %97 = vst [vmem:[#allocation6 + $0xb8] sm:$0xff] %v96_v23  ;;  %v194_v8 = vld [vmem:[%s13264_s4 + $0x240] sm:$0xff]  ;;  %v196_v9 = vld [vmem:[%s13264_s4 + $0x248] sm:$0xff]  ;;  %v198_v10 = vld [vmem:[%s13264_s4 + $0x250] sm:$0xff] }
  0x1a   :  { %99 = vst [vmem:[#allocation6 + $0xc0] sm:$0xff] %v98_v24  ;;  %v200_v11 = vld [vmem:[%s13264_s4 + $0x258] sm:$0xff]  ;;  %v202_v12 = vld [vmem:[%s13264_s4 + $0x260] sm:$0xff]  ;;  %v204_v13 = vld [vmem:[%s13264_s4 + $0x268] sm:$0xff] }
  0x1b   :  { %101 = vst [vmem:[#allocation6 + $0xc8] sm:$0xff] %v100_v25  ;;  %v206_v14 = vld [vmem:[%s13264_s4 + $0x270] sm:$0xff]  ;;  %v208_v15 = vld [vmem:[%s13264_s4 + $0x278] sm:$0xff]  ;;  %v210_v16 = vld [vmem:[%s13264_s4 + $0x280] sm:$0xff] }
  0x1c   :  { %103 = vst [vmem:[#allocation6 + $0xd0] sm:$0xff] %v102_v26  ;;  %v212_v17 = vld [vmem:[%s13264_s4 + $0x288] sm:$0xff]  ;;  %v214_v18 = vld [vmem:[%s13264_s4 + $0x290] sm:$0xff]  ;;  %v216_v19 = vld [vmem:[%s13264_s4 + $0x298] sm:$0xff] }
  0x1d   :  { %105 = vst [vmem:[#allocation6 + $0xd8] sm:$0xff] %v104_v27  ;;  %v218_v20 = vld [vmem:[%s13264_s4 + $0x2a0] sm:$0xff]  ;;  %v220_v21 = vld [vmem:[%s13264_s4 + $0x2a8] sm:$0xff]  ;;  %v222_v22 = vld [vmem:[%s13264_s4 + $0x2b0] sm:$0xff] }
  0x1e   :  { %107 = vst [vmem:[#allocation6 + $0xe0] sm:$0xff] %v106_v28  ;;  %v224_v23 = vld [vmem:[%s13264_s4 + $0x2b8] sm:$0xff]  ;;  %v226_v24 = vld [vmem:[%s13264_s4 + $0x2c0] sm:$0xff]  ;;  %v228_v25 = vld [vmem:[%s13264_s4 + $0x2c8] sm:$0xff] }
  0x1f   :  { %109 = vst [vmem:[#allocation6 + $0xe8] sm:$0xff] %v108_v29  ;;  %v230_v26 = vld [vmem:[%s13264_s4 + $0x2d0] sm:$0xff]  ;;  %v232_v27 = vld [vmem:[%s13264_s4 + $0x2d8] sm:$0xff]  ;;  %v234_v28 = vld [vmem:[%s13264_s4 + $0x2e0] sm:$0xff] }
  0x20   :  { %111 = vst [vmem:[#allocation6 + $0xf0] sm:$0xff] %v110_v30  ;;  %v236_v29 = vld [vmem:[%s13264_s4 + $0x2e8] sm:$0xff]  ;;  %v238_v30 = vld [vmem:[%s13264_s4 + $0x2f0] sm:$0xff] }
  0x21   :  { %113 = vst [vmem:[#allocation6 + $0xf8] sm:$0xff] %v112_v31  ;;  %v240_v31 = vld [vmem:[%s13264_s4 + $0x2f8] sm:$0xff] }
  0x22   :  { %115 = vst [vmem:[#allocation6 + $0x100] sm:$0xff] %v114_v32  ;;  %v242_v32 = vld [vmem:[%s13264_s4 + $0x300] sm:$0xff] }
  0x23   :  { %117 = vst [vmem:[#allocation6 + $0x108] sm:$0xff] %v116_v33  ;;  %v244_v33 = vld [vmem:[%s13264_s4 + $0x308] sm:$0xff] }
  0x24   :  { %119 = vst [vmem:[#allocation6 + $0x110] sm:$0xff] %v118_v34  ;;  %v246_v34 = vld [vmem:[%s13264_s4 + $0x310] sm:$0xff] }
  0x25   :  { %121 = vst [vmem:[#allocation6 + $0x118] sm:$0xff] %v120_v35  ;;  %v248_v35 = vld [vmem:[%s13264_s4 + $0x318] sm:$0xff] }
  0x26   :  { %123 = vst [vmem:[#allocation6 + $0x120] sm:$0xff] %v122_v36  ;;  %v250_v36 = vld [vmem:[%s13264_s4 + $0x320] sm:$0xff] }
  0x27   :  { %125 = vst [vmem:[#allocation6 + $0x128] sm:$0xff] %v124_v37  ;;  %v252_v37 = vld [vmem:[%s13264_s4 + $0x328] sm:$0xff] }
  0x28   :  { %127 = vst [vmem:[#allocation6 + $0x130] sm:$0xff] %v126_v38  ;;  %v254_v38 = vld [vmem:[%s13264_s4 + $0x330] sm:$0xff] }
  0x29   :  { %129 = vst [vmem:[#allocation6 + $0x138] sm:$0xff] %v128_v39  ;;  %v256_v39 = vld [vmem:[%s13264_s4 + $0x338] sm:$0xff] }
  0x2a   :  { %131 = vst [vmem:[#allocation6 + $0x140] sm:$0xff] %v130_v40  ;;  %v258_v40 = vld [vmem:[%s13264_s4 + $0x340] sm:$0xff] }
  0x2b   :  { %133 = vst [vmem:[#allocation6 + $0x148] sm:$0xff] %v132_v41  ;;  %v260_v41 = vld [vmem:[%s13264_s4 + $0x348] sm:$0xff] }
  0x2c   :  { %135 = vst [vmem:[#allocation6 + $0x150] sm:$0xff] %v134_v42  ;;  %v262_v42 = vld [vmem:[%s13264_s4 + $0x350] sm:$0xff] }
  0x2d   :  { %137 = vst [vmem:[#allocation6 + $0x158] sm:$0xff] %v136_v43  ;;  %v264_v43 = vld [vmem:[%s13264_s4 + $0x358] sm:$0xff] }
  0x2e   :  { %139 = vst [vmem:[#allocation6 + $0x160] sm:$0xff] %v138_v44  ;;  %v266_v44 = vld [vmem:[%s13264_s4 + $0x360] sm:$0xff] }
  0x2f   :  { %141 = vst [vmem:[#allocation6 + $0x168] sm:$0xff] %v140_v45  ;;  %v268_v45 = vld [vmem:[%s13264_s4 + $0x368] sm:$0xff] }
  0x30   :  { %143 = vst [vmem:[#allocation6 + $0x170] sm:$0xff] %v142_v46  ;;  %v270_v46 = vld [vmem:[%s13264_s4 + $0x370] sm:$0xff] }
  0x31   :  { %145 = vst [vmem:[#allocation6 + $0x178] sm:$0xff] %v144_v47  ;;  %v272_v47 = vld [vmem:[%s13264_s4 + $0x378] sm:$0xff] }
  0x32   :  { %147 = vst [vmem:[#allocation6 + $0x180] sm:$0xff] %v146_v48  ;;  %v274_v48 = vld [vmem:[%s13264_s4 + $0x380] sm:$0xff] }
  0x33   :  { %149 = vst [vmem:[#allocation6 + $0x188] sm:$0xff] %v148_v49  ;;  %v276_v49 = vld [vmem:[%s13264_s4 + $0x388] sm:$0xff] }
  0x34   :  { %151 = vst [vmem:[#allocation6 + $0x190] sm:$0xff] %v150_v50  ;;  %v278_v50 = vld [vmem:[%s13264_s4 + $0x390] sm:$0xff] }
  0x35   :  { %153 = vst [vmem:[#allocation6 + $0x198] sm:$0xff] %v152_v51  ;;  %v280_v51 = vld [vmem:[%s13264_s4 + $0x398] sm:$0xff] }
  0x36   :  { %155 = vst [vmem:[#allocation6 + $0x1a0] sm:$0xff] %v154_v52  ;;  %v282_v52 = vld [vmem:[%s13264_s4 + $0x3a0] sm:$0xff] }
  0x37   :  { %157 = vst [vmem:[#allocation6 + $0x1a8] sm:$0xff] %v156_v53  ;;  %v284_v53 = vld [vmem:[%s13264_s4 + $0x3a8] sm:$0xff] }
  0x38   :  { %159 = vst [vmem:[#allocation6 + $0x1b0] sm:$0xff] %v158_v54  ;;  %v286_v54 = vld [vmem:[%s13264_s4 + $0x3b0] sm:$0xff] }
  0x39   :  { %161 = vst [vmem:[#allocation6 + $0x1b8] sm:$0xff] %v160_v55  ;;  %v288_v55 = vld [vmem:[%s13264_s4 + $0x3b8] sm:$0xff] }
  0x3a   :  { %163 = vst [vmem:[#allocation6 + $0x1c0] sm:$0xff] %v162_v56  ;;  %v290_v56 = vld [vmem:[%s13264_s4 + $0x3c0] sm:$0xff] }
  0x3b   :  { %165 = vst [vmem:[#allocation6 + $0x1c8] sm:$0xff] %v164_v57  ;;  %v292_v57 = vld [vmem:[%s13264_s4 + $0x3c8] sm:$0xff] }
  0x3c   :  { %167 = vst [vmem:[#allocation6 + $0x1d0] sm:$0xff] %v166_v58  ;;  %v294_v58 = vld [vmem:[%s13264_s4 + $0x3d0] sm:$0xff] }
  0x3d   :  { %169 = vst [vmem:[#allocation6 + $0x1d8] sm:$0xff] %v168_v59  ;;  %v296_v59 = vld [vmem:[%s13264_s4 + $0x3d8] sm:$0xff] }
  0x3e   :  { %171 = vst [vmem:[#allocation6 + $0x1e0] sm:$0xff] %v170_v60  ;;  %v298_v60 = vld [vmem:[%s13264_s4 + $0x3e0] sm:$0xff] }
  0x3f   :  { %173 = vst [vmem:[#allocation6 + $0x1e8] sm:$0xff] %v172_v61  ;;  %v300_v61 = vld [vmem:[%s13264_s4 + $0x3e8] sm:$0xff] }
  0x40   :  { %175 = vst [vmem:[#allocation6 + $0x1f0] sm:$0xff] %v174_v62  ;;  %v302_v62 = vld [vmem:[%s13264_s4 + $0x3f0] sm:$0xff] }
  0x41   :  { %177 = vst [vmem:[#allocation6 + $0x1f8] sm:$0xff] %v176_v63  ;;  %v304_v63 = vld [vmem:[%s13264_s4 + $0x3f8] sm:$0xff] }
  0x42   :  { %179 = vst [vmem:[#allocation6 + $0x200] sm:$0xff] %v178_v0 }
  0x43   :  { %181 = vst [vmem:[#allocation6 + $0x208] sm:$0xff] %v180_v1 }
  0x44   :  { %183 = vst [vmem:[#allocation6 + $0x210] sm:$0xff] %v182_v2 }
  0x45   :  { %185 = vst [vmem:[#allocation6 + $0x218] sm:$0xff] %v184_v3 }
  0x46   :  { %187 = vst [vmem:[#allocation6 + $0x220] sm:$0xff] %v186_v4 }
  0x47   :  { %189 = vst [vmem:[#allocation6 + $0x228] sm:$0xff] %v188_v5 }
  0x48   :  { %191 = vst [vmem:[#allocation6 + $0x230] sm:$0xff] %v190_v6 }
  0x49   :  { %193 = vst [vmem:[#allocation6 + $0x238] sm:$0xff] %v192_v7 }
  0x4a   :  { %195 = vst [vmem:[#allocation6 + $0x240] sm:$0xff] %v194_v8 }
  0x4b   :  { %197 = vst [vmem:[#allocation6 + $0x248] sm:$0xff] %v196_v9 }
  0x4c   :  { %199 = vst [vmem:[#allocation6 + $0x250] sm:$0xff] %v198_v10 }
  0x4d   :  { %201 = vst [vmem:[#allocation6 + $0x258] sm:$0xff] %v200_v11 }
  0x4e   :  { %203 = vst [vmem:[#allocation6 + $0x260] sm:$0xff] %v202_v12 }
  0x4f   :  { %205 = vst [vmem:[#allocation6 + $0x268] sm:$0xff] %v204_v13 }
  0x50   :  { %207 = vst [vmem:[#allocation6 + $0x270] sm:$0xff] %v206_v14 }
  0x51   :  { %209 = vst [vmem:[#allocation6 + $0x278] sm:$0xff] %v208_v15 }
  0x52   :  { %211 = vst [vmem:[#allocation6 + $0x280] sm:$0xff] %v210_v16 }
  0x53   :  { %213 = vst [vmem:[#allocation6 + $0x288] sm:$0xff] %v212_v17 }
  0x54   :  { %215 = vst [vmem:[#allocation6 + $0x290] sm:$0xff] %v214_v18 }
  0x55   :  { %217 = vst [vmem:[#allocation6 + $0x298] sm:$0xff] %v216_v19 }
  0x56   :  { %219 = vst [vmem:[#allocation6 + $0x2a0] sm:$0xff] %v218_v20 }
  0x57   :  { %221 = vst [vmem:[#allocation6 + $0x2a8] sm:$0xff] %v220_v21 }
  0x58   :  { %223 = vst [vmem:[#allocation6 + $0x2b0] sm:$0xff] %v222_v22 }
  0x59   :  { %225 = vst [vmem:[#allocation6 + $0x2b8] sm:$0xff] %v224_v23 }
  0x5a   :  { %227 = vst [vmem:[#allocation6 + $0x2c0] sm:$0xff] %v226_v24 }
  0x5b   :  { %229 = vst [vmem:[#allocation6 + $0x2c8] sm:$0xff] %v228_v25 }
  0x5c   :  { %231 = vst [vmem:[#allocation6 + $0x2d0] sm:$0xff] %v230_v26 }
  0x5d   :  { %233 = vst [vmem:[#allocation6 + $0x2d8] sm:$0xff] %v232_v27 }
  0x5e   :  { %235 = vst [vmem:[#allocation6 + $0x2e0] sm:$0xff] %v234_v28 }
  0x5f   :  { %237 = vst [vmem:[#allocation6 + $0x2e8] sm:$0xff] %v236_v29 }
  0x60   :  { %239 = vst [vmem:[#allocation6 + $0x2f0] sm:$0xff] %v238_v30 }
  0x61   :  { %241 = vst [vmem:[#allocation6 + $0x2f8] sm:$0xff] %v240_v31 }
  0x62   :  { %243 = vst [vmem:[#allocation6 + $0x300] sm:$0xff] %v242_v32 }
  0x63   :  { %245 = vst [vmem:[#allocation6 + $0x308] sm:$0xff] %v244_v33 }
  0x64   :  { %247 = vst [vmem:[#allocation6 + $0x310] sm:$0xff] %v246_v34 }
  0x65   :  { %249 = vst [vmem:[#allocation6 + $0x318] sm:$0xff] %v248_v35 }
  0x66   :  { %251 = vst [vmem:[#allocation6 + $0x320] sm:$0xff] %v250_v36 }
  0x67   :  { %253 = vst [vmem:[#allocation6 + $0x328] sm:$0xff] %v252_v37 }
  0x68   :  { %255 = vst [vmem:[#allocation6 + $0x330] sm:$0xff] %v254_v38 }
  0x69   :  { %257 = vst [vmem:[#allocation6 + $0x338] sm:$0xff] %v256_v39 }
  0x6a   :  { %259 = vst [vmem:[#allocation6 + $0x340] sm:$0xff] %v258_v40 }
  0x6b   :  { %261 = vst [vmem:[#allocation6 + $0x348] sm:$0xff] %v260_v41 }
  0x6c   :  { %263 = vst [vmem:[#allocation6 + $0x350] sm:$0xff] %v262_v42 }
  0x6d   :  { %265 = vst [vmem:[#allocation6 + $0x358] sm:$0xff] %v264_v43 }
  0x6e   :  { %267 = vst [vmem:[#allocation6 + $0x360] sm:$0xff] %v266_v44 }
  0x6f   :  { %269 = vst [vmem:[#allocation6 + $0x368] sm:$0xff] %v268_v45 }
  0x70   :  { %271 = vst [vmem:[#allocation6 + $0x370] sm:$0xff] %v270_v46 }
  0x71   :  { %273 = vst [vmem:[#allocation6 + $0x378] sm:$0xff] %v272_v47 }
  0x72   :  { %275 = vst [vmem:[#allocation6 + $0x380] sm:$0xff] %v274_v48 }
  0x73   :  { %277 = vst [vmem:[#allocation6 + $0x388] sm:$0xff] %v276_v49 }
  0x74   :  { %279 = vst [vmem:[#allocation6 + $0x390] sm:$0xff] %v278_v50 }
  0x75   :  { %281 = vst [vmem:[#allocation6 + $0x398] sm:$0xff] %v280_v51 }
  0x76   :  { %283 = vst [vmem:[#allocation6 + $0x3a0] sm:$0xff] %v282_v52 }
  0x77   :  { %285 = vst [vmem:[#allocation6 + $0x3a8] sm:$0xff] %v284_v53 }
  0x78   :  { %287 = vst [vmem:[#allocation6 + $0x3b0] sm:$0xff] %v286_v54 }
  0x79   :  { %289 = vst [vmem:[#allocation6 + $0x3b8] sm:$0xff] %v288_v55 }
  0x7a   :  { %291 = vst [vmem:[#allocation6 + $0x3c0] sm:$0xff] %v290_v56 }
  0x7b   :  { %293 = vst [vmem:[#allocation6 + $0x3c8] sm:$0xff] %v292_v57 }
  0x7c   :  { %295 = vst [vmem:[#allocation6 + $0x3d0] sm:$0xff] %v294_v58 }
  0x7d   :  { %297 = vst [vmem:[#allocation6 + $0x3d8] sm:$0xff] %v296_v59 }
  0x7e   :  { %299 = vst [vmem:[#allocation6 + $0x3e0] sm:$0xff] %v298_v60 }
  0x7f   :  { %301 = vst [vmem:[#allocation6 + $0x3e8] sm:$0xff] %v300_v61 }
  0x80   :  { %303 = vst [vmem:[#allocation6 + $0x3f0] sm:$0xff] %v302_v62 }
  0x81   :  { %305 = vst [vmem:[#allocation6 + $0x3f8] sm:$0xff] %v304_v63 }
  0x82   :  { %311 = vsyncadd [#allocation10], 16384  ;;  %v323_v0 = vld [vmem:[%s13267_s7] sm:$0xff]  ;;  %v325_v1 = vld [vmem:[%s13267_s7 + $0x8] sm:$0xff] }
  0x83   :  { %324 = vst [vmem:[#allocation7] sm:$0xff] %v323_v0  ;;  %v327_v2 = vld [vmem:[%s13267_s7 + $0x10] sm:$0xff]  ;;  %v329_v3 = vld [vmem:[%s13267_s7 + $0x18] sm:$0xff]  ;;  %v331_v4 = vld [vmem:[%s13267_s7 + $0x20] sm:$0xff] }
  0x84   :  { %326 = vst [vmem:[#allocation7 + $0x8] sm:$0xff] %v325_v1  ;;  %v333_v5 = vld [vmem:[%s13267_s7 + $0x28] sm:$0xff]  ;;  %v335_v6 = vld [vmem:[%s13267_s7 + $0x30] sm:$0xff]  ;;  %v337_v7 = vld [vmem:[%s13267_s7 + $0x38] sm:$0xff] }
  0x85   :  { %328 = vst [vmem:[#allocation7 + $0x10] sm:$0xff] %v327_v2  ;;  %v339_v8 = vld [vmem:[%s13267_s7 + $0x40] sm:$0xff]  ;;  %v341_v9 = vld [vmem:[%s13267_s7 + $0x48] sm:$0xff]  ;;  %v343_v10 = vld [vmem:[%s13267_s7 + $0x50] sm:$0xff] }
  0x86   :  { %330 = vst [vmem:[#allocation7 + $0x18] sm:$0xff] %v329_v3  ;;  %v345_v11 = vld [vmem:[%s13267_s7 + $0x58] sm:$0xff]  ;;  %v347_v12 = vld [vmem:[%s13267_s7 + $0x60] sm:$0xff]  ;;  %v349_v13 = vld [vmem:[%s13267_s7 + $0x68] sm:$0xff] }
  0x87   :  { %332 = vst [vmem:[#allocation7 + $0x20] sm:$0xff] %v331_v4  ;;  %v351_v14 = vld [vmem:[%s13267_s7 + $0x70] sm:$0xff]  ;;  %v353_v15 = vld [vmem:[%s13267_s7 + $0x78] sm:$0xff]  ;;  %v355_v16 = vld [vmem:[%s13267_s7 + $0x80] sm:$0xff] }
  0x88   :  { %334 = vst [vmem:[#allocation7 + $0x28] sm:$0xff] %v333_v5  ;;  %v357_v17 = vld [vmem:[%s13267_s7 + $0x88] sm:$0xff]  ;;  %v359_v18 = vld [vmem:[%s13267_s7 + $0x90] sm:$0xff]  ;;  %v361_v19 = vld [vmem:[%s13267_s7 + $0x98] sm:$0xff] }
  0x89   :  { %336 = vst [vmem:[#allocation7 + $0x30] sm:$0xff] %v335_v6  ;;  %v363_v20 = vld [vmem:[%s13267_s7 + $0xa0] sm:$0xff]  ;;  %v365_v21 = vld [vmem:[%s13267_s7 + $0xa8] sm:$0xff]  ;;  %v367_v22 = vld [vmem:[%s13267_s7 + $0xb0] sm:$0xff] }
  0x8a   :  { %338 = vst [vmem:[#allocation7 + $0x38] sm:$0xff] %v337_v7  ;;  %v369_v23 = vld [vmem:[%s13267_s7 + $0xb8] sm:$0xff]  ;;  %v371_v24 = vld [vmem:[%s13267_s7 + $0xc0] sm:$0xff]  ;;  %v373_v25 = vld [vmem:[%s13267_s7 + $0xc8] sm:$0xff] }
  0x8b   :  { %340 = vst [vmem:[#allocation7 + $0x40] sm:$0xff] %v339_v8  ;;  %v375_v26 = vld [vmem:[%s13267_s7 + $0xd0] sm:$0xff]  ;;  %v377_v27 = vld [vmem:[%s13267_s7 + $0xd8] sm:$0xff]  ;;  %v379_v28 = vld [vmem:[%s13267_s7 + $0xe0] sm:$0xff] }
  0x8c   :  { %342 = vst [vmem:[#allocation7 + $0x48] sm:$0xff] %v341_v9  ;;  %v381_v29 = vld [vmem:[%s13267_s7 + $0xe8] sm:$0xff]  ;;  %v383_v30 = vld [vmem:[%s13267_s7 + $0xf0] sm:$0xff]  ;;  %v385_v31 = vld [vmem:[%s13267_s7 + $0xf8] sm:$0xff] }
  0x8d   :  { %344 = vst [vmem:[#allocation7 + $0x50] sm:$0xff] %v343_v10  ;;  %v387_v32 = vld [vmem:[%s13267_s7 + $0x100] sm:$0xff]  ;;  %v389_v33 = vld [vmem:[%s13267_s7 + $0x108] sm:$0xff]  ;;  %v391_v34 = vld [vmem:[%s13267_s7 + $0x110] sm:$0xff] }
  0x8e   :  { %346 = vst [vmem:[#allocation7 + $0x58] sm:$0xff] %v345_v11  ;;  %v393_v35 = vld [vmem:[%s13267_s7 + $0x118] sm:$0xff]  ;;  %v395_v36 = vld [vmem:[%s13267_s7 + $0x120] sm:$0xff]  ;;  %v397_v37 = vld [vmem:[%s13267_s7 + $0x128] sm:$0xff] }
  0x8f   :  { %348 = vst [vmem:[#allocation7 + $0x60] sm:$0xff] %v347_v12  ;;  %v399_v38 = vld [vmem:[%s13267_s7 + $0x130] sm:$0xff]  ;;  %v401_v39 = vld [vmem:[%s13267_s7 + $0x138] sm:$0xff]  ;;  %v403_v40 = vld [vmem:[%s13267_s7 + $0x140] sm:$0xff] }
  0x90   :  { %350 = vst [vmem:[#allocation7 + $0x68] sm:$0xff] %v349_v13  ;;  %v405_v41 = vld [vmem:[%s13267_s7 + $0x148] sm:$0xff]  ;;  %v407_v42 = vld [vmem:[%s13267_s7 + $0x150] sm:$0xff]  ;;  %v409_v43 = vld [vmem:[%s13267_s7 + $0x158] sm:$0xff] }
  0x91   :  { %352 = vst [vmem:[#allocation7 + $0x70] sm:$0xff] %v351_v14  ;;  %v411_v44 = vld [vmem:[%s13267_s7 + $0x160] sm:$0xff]  ;;  %v413_v45 = vld [vmem:[%s13267_s7 + $0x168] sm:$0xff]  ;;  %v415_v46 = vld [vmem:[%s13267_s7 + $0x170] sm:$0xff] }
  0x92   :  { %354 = vst [vmem:[#allocation7 + $0x78] sm:$0xff] %v353_v15  ;;  %v417_v47 = vld [vmem:[%s13267_s7 + $0x178] sm:$0xff]  ;;  %v419_v48 = vld [vmem:[%s13267_s7 + $0x180] sm:$0xff]  ;;  %v421_v49 = vld [vmem:[%s13267_s7 + $0x188] sm:$0xff] }
  0x93   :  { %356 = vst [vmem:[#allocation7 + $0x80] sm:$0xff] %v355_v16  ;;  %v423_v50 = vld [vmem:[%s13267_s7 + $0x190] sm:$0xff]  ;;  %v425_v51 = vld [vmem:[%s13267_s7 + $0x198] sm:$0xff]  ;;  %v427_v52 = vld [vmem:[%s13267_s7 + $0x1a0] sm:$0xff] }
  0x94   :  { %358 = vst [vmem:[#allocation7 + $0x88] sm:$0xff] %v357_v17  ;;  %v429_v53 = vld [vmem:[%s13267_s7 + $0x1a8] sm:$0xff]  ;;  %v431_v54 = vld [vmem:[%s13267_s7 + $0x1b0] sm:$0xff]  ;;  %v433_v55 = vld [vmem:[%s13267_s7 + $0x1b8] sm:$0xff] }
  0x95   :  { %360 = vst [vmem:[#allocation7 + $0x90] sm:$0xff] %v359_v18  ;;  %v435_v56 = vld [vmem:[%s13267_s7 + $0x1c0] sm:$0xff]  ;;  %v437_v57 = vld [vmem:[%s13267_s7 + $0x1c8] sm:$0xff]  ;;  %v439_v58 = vld [vmem:[%s13267_s7 + $0x1d0] sm:$0xff] }
  0x96   :  { %362 = vst [vmem:[#allocation7 + $0x98] sm:$0xff] %v361_v19  ;;  %v441_v59 = vld [vmem:[%s13267_s7 + $0x1d8] sm:$0xff]  ;;  %v443_v60 = vld [vmem:[%s13267_s7 + $0x1e0] sm:$0xff]  ;;  %v445_v61 = vld [vmem:[%s13267_s7 + $0x1e8] sm:$0xff] }
  0x97   :  { %364 = vst [vmem:[#allocation7 + $0xa0] sm:$0xff] %v363_v20  ;;  %v447_v62 = vld [vmem:[%s13267_s7 + $0x1f0] sm:$0xff]  ;;  %v449_v63 = vld [vmem:[%s13267_s7 + $0x1f8] sm:$0xff]  ;;  %v451_v0 = vld [vmem:[%s13267_s7 + $0x200] sm:$0xff] }
  0x98   :  { %366 = vst [vmem:[#allocation7 + $0xa8] sm:$0xff] %v365_v21  ;;  %v453_v1 = vld [vmem:[%s13267_s7 + $0x208] sm:$0xff]  ;;  %v455_v2 = vld [vmem:[%s13267_s7 + $0x210] sm:$0xff]  ;;  %v457_v3 = vld [vmem:[%s13267_s7 + $0x218] sm:$0xff] }
  0x99   :  { %368 = vst [vmem:[#allocation7 + $0xb0] sm:$0xff] %v367_v22  ;;  %v459_v4 = vld [vmem:[%s13267_s7 + $0x220] sm:$0xff]  ;;  %v461_v5 = vld [vmem:[%s13267_s7 + $0x228] sm:$0xff]  ;;  %v463_v6 = vld [vmem:[%s13267_s7 + $0x230] sm:$0xff] }
  0x9a   :  { %370 = vst [vmem:[#allocation7 + $0xb8] sm:$0xff] %v369_v23  ;;  %v465_v7 = vld [vmem:[%s13267_s7 + $0x238] sm:$0xff]  ;;  %v467_v8 = vld [vmem:[%s13267_s7 + $0x240] sm:$0xff]  ;;  %v469_v9 = vld [vmem:[%s13267_s7 + $0x248] sm:$0xff] }
  0x9b   :  { %372 = vst [vmem:[#allocation7 + $0xc0] sm:$0xff] %v371_v24  ;;  %v471_v10 = vld [vmem:[%s13267_s7 + $0x250] sm:$0xff]  ;;  %v473_v11 = vld [vmem:[%s13267_s7 + $0x258] sm:$0xff]  ;;  %v475_v12 = vld [vmem:[%s13267_s7 + $0x260] sm:$0xff] }
  0x9c   :  { %374 = vst [vmem:[#allocation7 + $0xc8] sm:$0xff] %v373_v25  ;;  %v477_v13 = vld [vmem:[%s13267_s7 + $0x268] sm:$0xff]  ;;  %v479_v14 = vld [vmem:[%s13267_s7 + $0x270] sm:$0xff]  ;;  %v481_v15 = vld [vmem:[%s13267_s7 + $0x278] sm:$0xff] }
  0x9d   :  { %376 = vst [vmem:[#allocation7 + $0xd0] sm:$0xff] %v375_v26  ;;  %v483_v16 = vld [vmem:[%s13267_s7 + $0x280] sm:$0xff]  ;;  %v485_v17 = vld [vmem:[%s13267_s7 + $0x288] sm:$0xff]  ;;  %v487_v18 = vld [vmem:[%s13267_s7 + $0x290] sm:$0xff] }
  0x9e   :  { %378 = vst [vmem:[#allocation7 + $0xd8] sm:$0xff] %v377_v27  ;;  %v489_v19 = vld [vmem:[%s13267_s7 + $0x298] sm:$0xff]  ;;  %v491_v20 = vld [vmem:[%s13267_s7 + $0x2a0] sm:$0xff]  ;;  %v493_v21 = vld [vmem:[%s13267_s7 + $0x2a8] sm:$0xff] }
  0x9f   :  { %380 = vst [vmem:[#allocation7 + $0xe0] sm:$0xff] %v379_v28  ;;  %v495_v22 = vld [vmem:[%s13267_s7 + $0x2b0] sm:$0xff]  ;;  %v497_v23 = vld [vmem:[%s13267_s7 + $0x2b8] sm:$0xff]  ;;  %v499_v24 = vld [vmem:[%s13267_s7 + $0x2c0] sm:$0xff] }
  0xa0   :  { %382 = vst [vmem:[#allocation7 + $0xe8] sm:$0xff] %v381_v29  ;;  %v501_v25 = vld [vmem:[%s13267_s7 + $0x2c8] sm:$0xff]  ;;  %v503_v26 = vld [vmem:[%s13267_s7 + $0x2d0] sm:$0xff]  ;;  %v505_v27 = vld [vmem:[%s13267_s7 + $0x2d8] sm:$0xff] }
  0xa1   :  { %384 = vst [vmem:[#allocation7 + $0xf0] sm:$0xff] %v383_v30  ;;  %v507_v28 = vld [vmem:[%s13267_s7 + $0x2e0] sm:$0xff]  ;;  %v509_v29 = vld [vmem:[%s13267_s7 + $0x2e8] sm:$0xff]  ;;  %v511_v30 = vld [vmem:[%s13267_s7 + $0x2f0] sm:$0xff] }
  0xa2   :  { %386 = vst [vmem:[#allocation7 + $0xf8] sm:$0xff] %v385_v31  ;;  %v513_v31 = vld [vmem:[%s13267_s7 + $0x2f8] sm:$0xff] }
  0xa3   :  { %388 = vst [vmem:[#allocation7 + $0x100] sm:$0xff] %v387_v32  ;;  %v515_v32 = vld [vmem:[%s13267_s7 + $0x300] sm:$0xff] }
  0xa4   :  { %390 = vst [vmem:[#allocation7 + $0x108] sm:$0xff] %v389_v33  ;;  %v517_v33 = vld [vmem:[%s13267_s7 + $0x308] sm:$0xff] }
  0xa5   :  { %392 = vst [vmem:[#allocation7 + $0x110] sm:$0xff] %v391_v34  ;;  %v519_v34 = vld [vmem:[%s13267_s7 + $0x310] sm:$0xff] }
  0xa6   :  { %394 = vst [vmem:[#allocation7 + $0x118] sm:$0xff] %v393_v35  ;;  %v521_v35 = vld [vmem:[%s13267_s7 + $0x318] sm:$0xff] }
  0xa7   :  { %396 = vst [vmem:[#allocation7 + $0x120] sm:$0xff] %v395_v36  ;;  %v523_v36 = vld [vmem:[%s13267_s7 + $0x320] sm:$0xff] }
  0xa8   :  { %398 = vst [vmem:[#allocation7 + $0x128] sm:$0xff] %v397_v37  ;;  %v525_v37 = vld [vmem:[%s13267_s7 + $0x328] sm:$0xff] }
  0xa9   :  { %400 = vst [vmem:[#allocation7 + $0x130] sm:$0xff] %v399_v38  ;;  %v527_v38 = vld [vmem:[%s13267_s7 + $0x330] sm:$0xff] }
  0xaa   :  { %402 = vst [vmem:[#allocation7 + $0x138] sm:$0xff] %v401_v39  ;;  %v529_v39 = vld [vmem:[%s13267_s7 + $0x338] sm:$0xff] }
  0xab   :  { %404 = vst [vmem:[#allocation7 + $0x140] sm:$0xff] %v403_v40  ;;  %v531_v40 = vld [vmem:[%s13267_s7 + $0x340] sm:$0xff] }
  0xac   :  { %406 = vst [vmem:[#allocation7 + $0x148] sm:$0xff] %v405_v41  ;;  %v533_v41 = vld [vmem:[%s13267_s7 + $0x348] sm:$0xff] }
  0xad   :  { %408 = vst [vmem:[#allocation7 + $0x150] sm:$0xff] %v407_v42  ;;  %v535_v42 = vld [vmem:[%s13267_s7 + $0x350] sm:$0xff] }
  0xae   :  { %410 = vst [vmem:[#allocation7 + $0x158] sm:$0xff] %v409_v43  ;;  %v537_v43 = vld [vmem:[%s13267_s7 + $0x358] sm:$0xff] }
  0xaf   :  { %412 = vst [vmem:[#allocation7 + $0x160] sm:$0xff] %v411_v44  ;;  %v539_v44 = vld [vmem:[%s13267_s7 + $0x360] sm:$0xff] }
  0xb0   :  { %414 = vst [vmem:[#allocation7 + $0x168] sm:$0xff] %v413_v45  ;;  %v541_v45 = vld [vmem:[%s13267_s7 + $0x368] sm:$0xff] }
  0xb1   :  { %416 = vst [vmem:[#allocation7 + $0x170] sm:$0xff] %v415_v46  ;;  %v543_v46 = vld [vmem:[%s13267_s7 + $0x370] sm:$0xff] }
  0xb2   :  { %418 = vst [vmem:[#allocation7 + $0x178] sm:$0xff] %v417_v47  ;;  %v545_v47 = vld [vmem:[%s13267_s7 + $0x378] sm:$0xff] }
  0xb3   :  { %420 = vst [vmem:[#allocation7 + $0x180] sm:$0xff] %v419_v48  ;;  %v547_v48 = vld [vmem:[%s13267_s7 + $0x380] sm:$0xff] }
  0xb4   :  { %422 = vst [vmem:[#allocation7 + $0x188] sm:$0xff] %v421_v49  ;;  %v549_v49 = vld [vmem:[%s13267_s7 + $0x388] sm:$0xff] }
  0xb5   :  { %424 = vst [vmem:[#allocation7 + $0x190] sm:$0xff] %v423_v50  ;;  %v551_v50 = vld [vmem:[%s13267_s7 + $0x390] sm:$0xff] }
  0xb6   :  { %426 = vst [vmem:[#allocation7 + $0x198] sm:$0xff] %v425_v51  ;;  %v553_v51 = vld [vmem:[%s13267_s7 + $0x398] sm:$0xff] }
  0xb7   :  { %428 = vst [vmem:[#allocation7 + $0x1a0] sm:$0xff] %v427_v52  ;;  %v555_v52 = vld [vmem:[%s13267_s7 + $0x3a0] sm:$0xff] }
  0xb8   :  { %430 = vst [vmem:[#allocation7 + $0x1a8] sm:$0xff] %v429_v53  ;;  %v557_v53 = vld [vmem:[%s13267_s7 + $0x3a8] sm:$0xff] }
  0xb9   :  { %432 = vst [vmem:[#allocation7 + $0x1b0] sm:$0xff] %v431_v54  ;;  %v559_v54 = vld [vmem:[%s13267_s7 + $0x3b0] sm:$0xff] }
  0xba   :  { %434 = vst [vmem:[#allocation7 + $0x1b8] sm:$0xff] %v433_v55  ;;  %v561_v55 = vld [vmem:[%s13267_s7 + $0x3b8] sm:$0xff] }
  0xbb   :  { %436 = vst [vmem:[#allocation7 + $0x1c0] sm:$0xff] %v435_v56  ;;  %v563_v56 = vld [vmem:[%s13267_s7 + $0x3c0] sm:$0xff] }
  0xbc   :  { %438 = vst [vmem:[#allocation7 + $0x1c8] sm:$0xff] %v437_v57  ;;  %v565_v57 = vld [vmem:[%s13267_s7 + $0x3c8] sm:$0xff] }
  0xbd   :  { %440 = vst [vmem:[#allocation7 + $0x1d0] sm:$0xff] %v439_v58  ;;  %v567_v58 = vld [vmem:[%s13267_s7 + $0x3d0] sm:$0xff] }
  0xbe   :  { %442 = vst [vmem:[#allocation7 + $0x1d8] sm:$0xff] %v441_v59  ;;  %v569_v59 = vld [vmem:[%s13267_s7 + $0x3d8] sm:$0xff] }
  0xbf   :  { %444 = vst [vmem:[#allocation7 + $0x1e0] sm:$0xff] %v443_v60  ;;  %v571_v60 = vld [vmem:[%s13267_s7 + $0x3e0] sm:$0xff] }
  0xc0   :  { %446 = vst [vmem:[#allocation7 + $0x1e8] sm:$0xff] %v445_v61  ;;  %v573_v61 = vld [vmem:[%s13267_s7 + $0x3e8] sm:$0xff] }
  0xc1   :  { %448 = vst [vmem:[#allocation7 + $0x1f0] sm:$0xff] %v447_v62  ;;  %v575_v62 = vld [vmem:[%s13267_s7 + $0x3f0] sm:$0xff] }
  0xc2   :  { %450 = vst [vmem:[#allocation7 + $0x1f8] sm:$0xff] %v449_v63  ;;  %v577_v63 = vld [vmem:[%s13267_s7 + $0x3f8] sm:$0xff] }
  0xc3   :  { %452 = vst [vmem:[#allocation7 + $0x200] sm:$0xff] %v451_v0 }
  0xc4   :  { %454 = vst [vmem:[#allocation7 + $0x208] sm:$0xff] %v453_v1 }
  0xc5   :  { %456 = vst [vmem:[#allocation7 + $0x210] sm:$0xff] %v455_v2 }
  0xc6   :  { %458 = vst [vmem:[#allocation7 + $0x218] sm:$0xff] %v457_v3 }
  0xc7   :  { %460 = vst [vmem:[#allocation7 + $0x220] sm:$0xff] %v459_v4 }
  0xc8   :  { %462 = vst [vmem:[#allocation7 + $0x228] sm:$0xff] %v461_v5 }
  0xc9   :  { %464 = vst [vmem:[#allocation7 + $0x230] sm:$0xff] %v463_v6 }
  0xca   :  { %466 = vst [vmem:[#allocation7 + $0x238] sm:$0xff] %v465_v7 }
  0xcb   :  { %468 = vst [vmem:[#allocation7 + $0x240] sm:$0xff] %v467_v8 }
  0xcc   :  { %470 = vst [vmem:[#allocation7 + $0x248] sm:$0xff] %v469_v9 }
  0xcd   :  { %472 = vst [vmem:[#allocation7 + $0x250] sm:$0xff] %v471_v10 }
  0xce   :  { %474 = vst [vmem:[#allocation7 + $0x258] sm:$0xff] %v473_v11 }
  0xcf   :  { %476 = vst [vmem:[#allocation7 + $0x260] sm:$0xff] %v475_v12 }
  0xd0   :  { %478 = vst [vmem:[#allocation7 + $0x268] sm:$0xff] %v477_v13 }
  0xd1   :  { %480 = vst [vmem:[#allocation7 + $0x270] sm:$0xff] %v479_v14 }
  0xd2   :  { %482 = vst [vmem:[#allocation7 + $0x278] sm:$0xff] %v481_v15 }
  0xd3   :  { %484 = vst [vmem:[#allocation7 + $0x280] sm:$0xff] %v483_v16 }
  0xd4   :  { %486 = vst [vmem:[#allocation7 + $0x288] sm:$0xff] %v485_v17 }
  0xd5   :  { %488 = vst [vmem:[#allocation7 + $0x290] sm:$0xff] %v487_v18 }
  0xd6   :  { %490 = vst [vmem:[#allocation7 + $0x298] sm:$0xff] %v489_v19 }
  0xd7   :  { %492 = vst [vmem:[#allocation7 + $0x2a0] sm:$0xff] %v491_v20 }
  0xd8   :  { %494 = vst [vmem:[#allocation7 + $0x2a8] sm:$0xff] %v493_v21 }
  0xd9   :  { %496 = vst [vmem:[#allocation7 + $0x2b0] sm:$0xff] %v495_v22 }
  0xda   :  { %498 = vst [vmem:[#allocation7 + $0x2b8] sm:$0xff] %v497_v23 }
  0xdb   :  { %500 = vst [vmem:[#allocation7 + $0x2c0] sm:$0xff] %v499_v24 }
  0xdc   :  { %502 = vst [vmem:[#allocation7 + $0x2c8] sm:$0xff] %v501_v25 }
  0xdd   :  { %504 = vst [vmem:[#allocation7 + $0x2d0] sm:$0xff] %v503_v26 }
  0xde   :  { %506 = vst [vmem:[#allocation7 + $0x2d8] sm:$0xff] %v505_v27 }
  0xdf   :  { %508 = vst [vmem:[#allocation7 + $0x2e0] sm:$0xff] %v507_v28 }
  0xe0   :  { %510 = vst [vmem:[#allocation7 + $0x2e8] sm:$0xff] %v509_v29 }
  0xe1   :  { %512 = vst [vmem:[#allocation7 + $0x2f0] sm:$0xff] %v511_v30 }
  0xe2   :  { %514 = vst [vmem:[#allocation7 + $0x2f8] sm:$0xff] %v513_v31 }
  0xe3   :  { %516 = vst [vmem:[#allocation7 + $0x300] sm:$0xff] %v515_v32 }
  0xe4   :  { %518 = vst [vmem:[#allocation7 + $0x308] sm:$0xff] %v517_v33 }
  0xe5   :  { %520 = vst [vmem:[#allocation7 + $0x310] sm:$0xff] %v519_v34 }
  0xe6   :  { %522 = vst [vmem:[#allocation7 + $0x318] sm:$0xff] %v521_v35 }
  0xe7   :  { %524 = vst [vmem:[#allocation7 + $0x320] sm:$0xff] %v523_v36 }
  0xe8   :  { %526 = vst [vmem:[#allocation7 + $0x328] sm:$0xff] %v525_v37 }
  0xe9   :  { %528 = vst [vmem:[#allocation7 + $0x330] sm:$0xff] %v527_v38 }
  0xea   :  { %530 = vst [vmem:[#allocation7 + $0x338] sm:$0xff] %v529_v39 }
  0xeb   :  { %532 = vst [vmem:[#allocation7 + $0x340] sm:$0xff] %v531_v40 }
  0xec   :  { %534 = vst [vmem:[#allocation7 + $0x348] sm:$0xff] %v533_v41 }
  0xed   :  { %536 = vst [vmem:[#allocation7 + $0x350] sm:$0xff] %v535_v42 }
  0xee   :  { %538 = vst [vmem:[#allocation7 + $0x358] sm:$0xff] %v537_v43 }
  0xef   :  { %540 = vst [vmem:[#allocation7 + $0x360] sm:$0xff] %v539_v44 }
  0xf0   :  { %542 = vst [vmem:[#allocation7 + $0x368] sm:$0xff] %v541_v45 }
  0xf1   :  { %544 = vst [vmem:[#allocation7 + $0x370] sm:$0xff] %v543_v46 }
  0xf2   :  { %546 = vst [vmem:[#allocation7 + $0x378] sm:$0xff] %v545_v47 }
  0xf3   :  { %548 = vst [vmem:[#allocation7 + $0x380] sm:$0xff] %v547_v48 }
  0xf4   :  { %550 = vst [vmem:[#allocation7 + $0x388] sm:$0xff] %v549_v49 }
  0xf5   :  { %552 = vst [vmem:[#allocation7 + $0x390] sm:$0xff] %v551_v50 }
  0xf6   :  { %554 = vst [vmem:[#allocation7 + $0x398] sm:$0xff] %v553_v51 }
  0xf7   :  { %556 = vst [vmem:[#allocation7 + $0x3a0] sm:$0xff] %v555_v52 }
  0xf8   :  { %558 = vst [vmem:[#allocation7 + $0x3a8] sm:$0xff] %v557_v53 }
  0xf9   :  { %560 = vst [vmem:[#allocation7 + $0x3b0] sm:$0xff] %v559_v54 }
  0xfa   :  { %562 = vst [vmem:[#allocation7 + $0x3b8] sm:$0xff] %v561_v55 }
  0xfb   :  { %564 = vst [vmem:[#allocation7 + $0x3c0] sm:$0xff] %v563_v56 }
  0xfc   :  { %566 = vst [vmem:[#allocation7 + $0x3c8] sm:$0xff] %v565_v57 }
  0xfd   :  { %568 = vst [vmem:[#allocation7 + $0x3d0] sm:$0xff] %v567_v58 }
  0xfe   :  { %570 = vst [vmem:[#allocation7 + $0x3d8] sm:$0xff] %v569_v59 }
  0xff   :  { %572 = vst [vmem:[#allocation7 + $0x3e0] sm:$0xff] %v571_v60 }
 0x100   :  { %574 = vst [vmem:[#allocation7 + $0x3e8] sm:$0xff] %v573_v61 }
 0x101   :  { %576 = vst [vmem:[#allocation7 + $0x3f0] sm:$0xff] %v575_v62 }
 0x102   :  { %578 = vst [vmem:[#allocation7 + $0x3f8] sm:$0xff] %v577_v63 }
 0x103   :  { %584 = vsyncadd [#allocation10 + $0x1], 16384  ;;  %v596_v0 = vld [vmem:[%s13270_s10] sm:$0xff]  ;;  %v598_v1 = vld [vmem:[%s13270_s10 + $0x8] sm:$0xff] }
 0x104   :  { %597 = vst [vmem:[#allocation8] sm:$0xff] %v596_v0  ;;  %v600_v2 = vld [vmem:[%s13270_s10 + $0x10] sm:$0xff]  ;;  %v602_v3 = vld [vmem:[%s13270_s10 + $0x18] sm:$0xff]  ;;  %v604_v4 = vld [vmem:[%s13270_s10 + $0x20] sm:$0xff] }
 0x105   :  { %599 = vst [vmem:[#allocation8 + $0x8] sm:$0xff] %v598_v1  ;;  %v606_v5 = vld [vmem:[%s13270_s10 + $0x28] sm:$0xff]  ;;  %v608_v6 = vld [vmem:[%s13270_s10 + $0x30] sm:$0xff]  ;;  %v610_v7 = vld [vmem:[%s13270_s10 + $0x38] sm:$0xff] }
 0x106   :  { %601 = vst [vmem:[#allocation8 + $0x10] sm:$0xff] %v600_v2  ;;  %v612_v8 = vld [vmem:[%s13270_s10 + $0x40] sm:$0xff]  ;;  %v614_v9 = vld [vmem:[%s13270_s10 + $0x48] sm:$0xff]  ;;  %v616_v10 = vld [vmem:[%s13270_s10 + $0x50] sm:$0xff] }
 0x107   :  { %603 = vst [vmem:[#allocation8 + $0x18] sm:$0xff] %v602_v3  ;;  %v618_v11 = vld [vmem:[%s13270_s10 + $0x58] sm:$0xff]  ;;  %v620_v12 = vld [vmem:[%s13270_s10 + $0x60] sm:$0xff]  ;;  %v622_v13 = vld [vmem:[%s13270_s10 + $0x68] sm:$0xff] }
 0x108   :  { %605 = vst [vmem:[#allocation8 + $0x20] sm:$0xff] %v604_v4  ;;  %v624_v14 = vld [vmem:[%s13270_s10 + $0x70] sm:$0xff]  ;;  %v626_v15 = vld [vmem:[%s13270_s10 + $0x78] sm:$0xff]  ;;  %v628_v16 = vld [vmem:[%s13270_s10 + $0x80] sm:$0xff] }
 0x109   :  { %607 = vst [vmem:[#allocation8 + $0x28] sm:$0xff] %v606_v5  ;;  %v630_v17 = vld [vmem:[%s13270_s10 + $0x88] sm:$0xff]  ;;  %v632_v18 = vld [vmem:[%s13270_s10 + $0x90] sm:$0xff]  ;;  %v634_v19 = vld [vmem:[%s13270_s10 + $0x98] sm:$0xff] }
 0x10a   :  { %609 = vst [vmem:[#allocation8 + $0x30] sm:$0xff] %v608_v6  ;;  %v636_v20 = vld [vmem:[%s13270_s10 + $0xa0] sm:$0xff]  ;;  %v638_v21 = vld [vmem:[%s13270_s10 + $0xa8] sm:$0xff]  ;;  %v640_v22 = vld [vmem:[%s13270_s10 + $0xb0] sm:$0xff] }
 0x10b   :  { %611 = vst [vmem:[#allocation8 + $0x38] sm:$0xff] %v610_v7  ;;  %v642_v23 = vld [vmem:[%s13270_s10 + $0xb8] sm:$0xff]  ;;  %v644_v24 = vld [vmem:[%s13270_s10 + $0xc0] sm:$0xff]  ;;  %v646_v25 = vld [vmem:[%s13270_s10 + $0xc8] sm:$0xff] }
 0x10c   :  { %613 = vst [vmem:[#allocation8 + $0x40] sm:$0xff] %v612_v8  ;;  %v648_v26 = vld [vmem:[%s13270_s10 + $0xd0] sm:$0xff]  ;;  %v650_v27 = vld [vmem:[%s13270_s10 + $0xd8] sm:$0xff]  ;;  %v652_v28 = vld [vmem:[%s13270_s10 + $0xe0] sm:$0xff] }
 0x10d   :  { %615 = vst [vmem:[#allocation8 + $0x48] sm:$0xff] %v614_v9  ;;  %v654_v29 = vld [vmem:[%s13270_s10 + $0xe8] sm:$0xff]  ;;  %v656_v30 = vld [vmem:[%s13270_s10 + $0xf0] sm:$0xff]  ;;  %v658_v31 = vld [vmem:[%s13270_s10 + $0xf8] sm:$0xff] }
 0x10e   :  { %617 = vst [vmem:[#allocation8 + $0x50] sm:$0xff] %v616_v10  ;;  %v660_v32 = vld [vmem:[%s13270_s10 + $0x100] sm:$0xff]  ;;  %v662_v33 = vld [vmem:[%s13270_s10 + $0x108] sm:$0xff]  ;;  %v664_v34 = vld [vmem:[%s13270_s10 + $0x110] sm:$0xff] }
 0x10f   :  { %619 = vst [vmem:[#allocation8 + $0x58] sm:$0xff] %v618_v11  ;;  %v666_v35 = vld [vmem:[%s13270_s10 + $0x118] sm:$0xff]  ;;  %v668_v36 = vld [vmem:[%s13270_s10 + $0x120] sm:$0xff]  ;;  %v670_v37 = vld [vmem:[%s13270_s10 + $0x128] sm:$0xff] }
 0x110   :  { %621 = vst [vmem:[#allocation8 + $0x60] sm:$0xff] %v620_v12  ;;  %v672_v38 = vld [vmem:[%s13270_s10 + $0x130] sm:$0xff]  ;;  %v674_v39 = vld [vmem:[%s13270_s10 + $0x138] sm:$0xff]  ;;  %v676_v40 = vld [vmem:[%s13270_s10 + $0x140] sm:$0xff] }
 0x111   :  { %623 = vst [vmem:[#allocation8 + $0x68] sm:$0xff] %v622_v13  ;;  %v678_v41 = vld [vmem:[%s13270_s10 + $0x148] sm:$0xff]  ;;  %v680_v42 = vld [vmem:[%s13270_s10 + $0x150] sm:$0xff]  ;;  %v682_v43 = vld [vmem:[%s13270_s10 + $0x158] sm:$0xff] }
 0x112   :  { %625 = vst [vmem:[#allocation8 + $0x70] sm:$0xff] %v624_v14  ;;  %v684_v44 = vld [vmem:[%s13270_s10 + $0x160] sm:$0xff]  ;;  %v686_v45 = vld [vmem:[%s13270_s10 + $0x168] sm:$0xff]  ;;  %v688_v46 = vld [vmem:[%s13270_s10 + $0x170] sm:$0xff] }
 0x113   :  { %627 = vst [vmem:[#allocation8 + $0x78] sm:$0xff] %v626_v15  ;;  %v690_v47 = vld [vmem:[%s13270_s10 + $0x178] sm:$0xff]  ;;  %v692_v48 = vld [vmem:[%s13270_s10 + $0x180] sm:$0xff]  ;;  %v694_v49 = vld [vmem:[%s13270_s10 + $0x188] sm:$0xff] }
 0x114   :  { %629 = vst [vmem:[#allocation8 + $0x80] sm:$0xff] %v628_v16  ;;  %v696_v50 = vld [vmem:[%s13270_s10 + $0x190] sm:$0xff]  ;;  %v698_v51 = vld [vmem:[%s13270_s10 + $0x198] sm:$0xff]  ;;  %v700_v52 = vld [vmem:[%s13270_s10 + $0x1a0] sm:$0xff] }
 0x115   :  { %631 = vst [vmem:[#allocation8 + $0x88] sm:$0xff] %v630_v17  ;;  %v702_v53 = vld [vmem:[%s13270_s10 + $0x1a8] sm:$0xff]  ;;  %v704_v54 = vld [vmem:[%s13270_s10 + $0x1b0] sm:$0xff]  ;;  %v706_v55 = vld [vmem:[%s13270_s10 + $0x1b8] sm:$0xff] }
 0x116   :  { %633 = vst [vmem:[#allocation8 + $0x90] sm:$0xff] %v632_v18  ;;  %v708_v56 = vld [vmem:[%s13270_s10 + $0x1c0] sm:$0xff]  ;;  %v710_v57 = vld [vmem:[%s13270_s10 + $0x1c8] sm:$0xff]  ;;  %v712_v58 = vld [vmem:[%s13270_s10 + $0x1d0] sm:$0xff] }
 0x117   :  { %635 = vst [vmem:[#allocation8 + $0x98] sm:$0xff] %v634_v19  ;;  %v714_v59 = vld [vmem:[%s13270_s10 + $0x1d8] sm:$0xff]  ;;  %v716_v60 = vld [vmem:[%s13270_s10 + $0x1e0] sm:$0xff]  ;;  %v718_v61 = vld [vmem:[%s13270_s10 + $0x1e8] sm:$0xff] }
 0x118   :  { %637 = vst [vmem:[#allocation8 + $0xa0] sm:$0xff] %v636_v20  ;;  %v720_v62 = vld [vmem:[%s13270_s10 + $0x1f0] sm:$0xff]  ;;  %v722_v63 = vld [vmem:[%s13270_s10 + $0x1f8] sm:$0xff]  ;;  %v724_v0 = vld [vmem:[%s13270_s10 + $0x200] sm:$0xff] }
 0x119   :  { %639 = vst [vmem:[#allocation8 + $0xa8] sm:$0xff] %v638_v21  ;;  %v726_v1 = vld [vmem:[%s13270_s10 + $0x208] sm:$0xff]  ;;  %v728_v2 = vld [vmem:[%s13270_s10 + $0x210] sm:$0xff]  ;;  %v730_v3 = vld [vmem:[%s13270_s10 + $0x218] sm:$0xff] }
 0x11a   :  { %641 = vst [vmem:[#allocation8 + $0xb0] sm:$0xff] %v640_v22  ;;  %v732_v4 = vld [vmem:[%s13270_s10 + $0x220] sm:$0xff]  ;;  %v734_v5 = vld [vmem:[%s13270_s10 + $0x228] sm:$0xff]  ;;  %v736_v6 = vld [vmem:[%s13270_s10 + $0x230] sm:$0xff] }
 0x11b   :  { %643 = vst [vmem:[#allocation8 + $0xb8] sm:$0xff] %v642_v23  ;;  %v738_v7 = vld [vmem:[%s13270_s10 + $0x238] sm:$0xff]  ;;  %v740_v8 = vld [vmem:[%s13270_s10 + $0x240] sm:$0xff]  ;;  %v742_v9 = vld [vmem:[%s13270_s10 + $0x248] sm:$0xff] }
 0x11c   :  { %645 = vst [vmem:[#allocation8 + $0xc0] sm:$0xff] %v644_v24  ;;  %v744_v10 = vld [vmem:[%s13270_s10 + $0x250] sm:$0xff]  ;;  %v746_v11 = vld [vmem:[%s13270_s10 + $0x258] sm:$0xff]  ;;  %v748_v12 = vld [vmem:[%s13270_s10 + $0x260] sm:$0xff] }
 0x11d   :  { %647 = vst [vmem:[#allocation8 + $0xc8] sm:$0xff] %v646_v25  ;;  %v750_v13 = vld [vmem:[%s13270_s10 + $0x268] sm:$0xff]  ;;  %v752_v14 = vld [vmem:[%s13270_s10 + $0x270] sm:$0xff]  ;;  %v754_v15 = vld [vmem:[%s13270_s10 + $0x278] sm:$0xff] }
 0x11e   :  { %649 = vst [vmem:[#allocation8 + $0xd0] sm:$0xff] %v648_v26  ;;  %v756_v16 = vld [vmem:[%s13270_s10 + $0x280] sm:$0xff]  ;;  %v758_v17 = vld [vmem:[%s13270_s10 + $0x288] sm:$0xff]  ;;  %v760_v18 = vld [vmem:[%s13270_s10 + $0x290] sm:$0xff] }
 0x11f   :  { %651 = vst [vmem:[#allocation8 + $0xd8] sm:$0xff] %v650_v27  ;;  %v762_v19 = vld [vmem:[%s13270_s10 + $0x298] sm:$0xff]  ;;  %v764_v20 = vld [vmem:[%s13270_s10 + $0x2a0] sm:$0xff]  ;;  %v766_v21 = vld [vmem:[%s13270_s10 + $0x2a8] sm:$0xff] }
 0x120   :  { %653 = vst [vmem:[#allocation8 + $0xe0] sm:$0xff] %v652_v28  ;;  %v768_v22 = vld [vmem:[%s13270_s10 + $0x2b0] sm:$0xff]  ;;  %v770_v23 = vld [vmem:[%s13270_s10 + $0x2b8] sm:$0xff]  ;;  %v772_v24 = vld [vmem:[%s13270_s10 + $0x2c0] sm:$0xff] }
 0x121   :  { %655 = vst [vmem:[#allocation8 + $0xe8] sm:$0xff] %v654_v29  ;;  %v774_v25 = vld [vmem:[%s13270_s10 + $0x2c8] sm:$0xff]  ;;  %v776_v26 = vld [vmem:[%s13270_s10 + $0x2d0] sm:$0xff]  ;;  %v778_v27 = vld [vmem:[%s13270_s10 + $0x2d8] sm:$0xff] }
 0x122   :  { %657 = vst [vmem:[#allocation8 + $0xf0] sm:$0xff] %v656_v30  ;;  %v780_v28 = vld [vmem:[%s13270_s10 + $0x2e0] sm:$0xff]  ;;  %v782_v29 = vld [vmem:[%s13270_s10 + $0x2e8] sm:$0xff]  ;;  %v784_v30 = vld [vmem:[%s13270_s10 + $0x2f0] sm:$0xff] }
 0x123   :  { %659 = vst [vmem:[#allocation8 + $0xf8] sm:$0xff] %v658_v31  ;;  %v786_v31 = vld [vmem:[%s13270_s10 + $0x2f8] sm:$0xff] }
 0x124   :  { %661 = vst [vmem:[#allocation8 + $0x100] sm:$0xff] %v660_v32  ;;  %v788_v32 = vld [vmem:[%s13270_s10 + $0x300] sm:$0xff] }
 0x125   :  { %663 = vst [vmem:[#allocation8 + $0x108] sm:$0xff] %v662_v33  ;;  %v790_v33 = vld [vmem:[%s13270_s10 + $0x308] sm:$0xff] }
 0x126   :  { %665 = vst [vmem:[#allocation8 + $0x110] sm:$0xff] %v664_v34  ;;  %v792_v34 = vld [vmem:[%s13270_s10 + $0x310] sm:$0xff] }
 0x127   :  { %667 = vst [vmem:[#allocation8 + $0x118] sm:$0xff] %v666_v35  ;;  %v794_v35 = vld [vmem:[%s13270_s10 + $0x318] sm:$0xff] }
 0x128   :  { %669 = vst [vmem:[#allocation8 + $0x120] sm:$0xff] %v668_v36  ;;  %v796_v36 = vld [vmem:[%s13270_s10 + $0x320] sm:$0xff] }
 0x129   :  { %671 = vst [vmem:[#allocation8 + $0x128] sm:$0xff] %v670_v37  ;;  %v798_v37 = vld [vmem:[%s13270_s10 + $0x328] sm:$0xff] }
 0x12a   :  { %673 = vst [vmem:[#allocation8 + $0x130] sm:$0xff] %v672_v38  ;;  %v800_v38 = vld [vmem:[%s13270_s10 + $0x330] sm:$0xff] }
 0x12b   :  { %675 = vst [vmem:[#allocation8 + $0x138] sm:$0xff] %v674_v39  ;;  %v802_v39 = vld [vmem:[%s13270_s10 + $0x338] sm:$0xff] }
 0x12c   :  { %677 = vst [vmem:[#allocation8 + $0x140] sm:$0xff] %v676_v40  ;;  %v804_v40 = vld [vmem:[%s13270_s10 + $0x340] sm:$0xff] }
 0x12d   :  { %679 = vst [vmem:[#allocation8 + $0x148] sm:$0xff] %v678_v41  ;;  %v806_v41 = vld [vmem:[%s13270_s10 + $0x348] sm:$0xff] }
 0x12e   :  { %681 = vst [vmem:[#allocation8 + $0x150] sm:$0xff] %v680_v42  ;;  %v808_v42 = vld [vmem:[%s13270_s10 + $0x350] sm:$0xff] }
 0x12f   :  { %683 = vst [vmem:[#allocation8 + $0x158] sm:$0xff] %v682_v43  ;;  %v810_v43 = vld [vmem:[%s13270_s10 + $0x358] sm:$0xff] }
 0x130   :  { %685 = vst [vmem:[#allocation8 + $0x160] sm:$0xff] %v684_v44  ;;  %v812_v44 = vld [vmem:[%s13270_s10 + $0x360] sm:$0xff] }
 0x131   :  { %687 = vst [vmem:[#allocation8 + $0x168] sm:$0xff] %v686_v45  ;;  %v814_v45 = vld [vmem:[%s13270_s10 + $0x368] sm:$0xff] }
 0x132   :  { %689 = vst [vmem:[#allocation8 + $0x170] sm:$0xff] %v688_v46  ;;  %v816_v46 = vld [vmem:[%s13270_s10 + $0x370] sm:$0xff] }
 0x133   :  { %691 = vst [vmem:[#allocation8 + $0x178] sm:$0xff] %v690_v47  ;;  %v818_v47 = vld [vmem:[%s13270_s10 + $0x378] sm:$0xff] }
 0x134   :  { %693 = vst [vmem:[#allocation8 + $0x180] sm:$0xff] %v692_v48  ;;  %v820_v48 = vld [vmem:[%s13270_s10 + $0x380] sm:$0xff] }
 0x135   :  { %695 = vst [vmem:[#allocation8 + $0x188] sm:$0xff] %v694_v49  ;;  %v822_v49 = vld [vmem:[%s13270_s10 + $0x388] sm:$0xff] }
 0x136   :  { %697 = vst [vmem:[#allocation8 + $0x190] sm:$0xff] %v696_v50  ;;  %v824_v50 = vld [vmem:[%s13270_s10 + $0x390] sm:$0xff] }
 0x137   :  { %699 = vst [vmem:[#allocation8 + $0x198] sm:$0xff] %v698_v51  ;;  %v826_v51 = vld [vmem:[%s13270_s10 + $0x398] sm:$0xff] }
 0x138   :  { %701 = vst [vmem:[#allocation8 + $0x1a0] sm:$0xff] %v700_v52  ;;  %v828_v52 = vld [vmem:[%s13270_s10 + $0x3a0] sm:$0xff] }
 0x139   :  { %703 = vst [vmem:[#allocation8 + $0x1a8] sm:$0xff] %v702_v53  ;;  %v830_v53 = vld [vmem:[%s13270_s10 + $0x3a8] sm:$0xff] }
 0x13a   :  { %705 = vst [vmem:[#allocation8 + $0x1b0] sm:$0xff] %v704_v54  ;;  %v832_v54 = vld [vmem:[%s13270_s10 + $0x3b0] sm:$0xff] }
 0x13b   :  { %707 = vst [vmem:[#allocation8 + $0x1b8] sm:$0xff] %v706_v55  ;;  %v834_v55 = vld [vmem:[%s13270_s10 + $0x3b8] sm:$0xff] }
 0x13c   :  { %709 = vst [vmem:[#allocation8 + $0x1c0] sm:$0xff] %v708_v56  ;;  %v836_v56 = vld [vmem:[%s13270_s10 + $0x3c0] sm:$0xff] }
 0x13d   :  { %711 = vst [vmem:[#allocation8 + $0x1c8] sm:$0xff] %v710_v57  ;;  %v838_v57 = vld [vmem:[%s13270_s10 + $0x3c8] sm:$0xff] }
 0x13e   :  { %713 = vst [vmem:[#allocation8 + $0x1d0] sm:$0xff] %v712_v58  ;;  %v840_v58 = vld [vmem:[%s13270_s10 + $0x3d0] sm:$0xff] }
 0x13f   :  { %715 = vst [vmem:[#allocation8 + $0x1d8] sm:$0xff] %v714_v59  ;;  %v842_v59 = vld [vmem:[%s13270_s10 + $0x3d8] sm:$0xff] }
 0x140   :  { %717 = vst [vmem:[#allocation8 + $0x1e0] sm:$0xff] %v716_v60  ;;  %v844_v60 = vld [vmem:[%s13270_s10 + $0x3e0] sm:$0xff] }
 0x141   :  { %719 = vst [vmem:[#allocation8 + $0x1e8] sm:$0xff] %v718_v61  ;;  %v846_v61 = vld [vmem:[%s13270_s10 + $0x3e8] sm:$0xff] }
 0x142   :  { %721 = vst [vmem:[#allocation8 + $0x1f0] sm:$0xff] %v720_v62  ;;  %v848_v62 = vld [vmem:[%s13270_s10 + $0x3f0] sm:$0xff] }
 0x143   :  { %723 = vst [vmem:[#allocation8 + $0x1f8] sm:$0xff] %v722_v63  ;;  %v850_v63 = vld [vmem:[%s13270_s10 + $0x3f8] sm:$0xff] }
 0x144   :  { %725 = vst [vmem:[#allocation8 + $0x200] sm:$0xff] %v724_v0 }
 0x145   :  { %727 = vst [vmem:[#allocation8 + $0x208] sm:$0xff] %v726_v1 }
 0x146   :  { %729 = vst [vmem:[#allocation8 + $0x210] sm:$0xff] %v728_v2 }
 0x147   :  { %731 = vst [vmem:[#allocation8 + $0x218] sm:$0xff] %v730_v3 }
 0x148   :  { %733 = vst [vmem:[#allocation8 + $0x220] sm:$0xff] %v732_v4 }
 0x149   :  { %735 = vst [vmem:[#allocation8 + $0x228] sm:$0xff] %v734_v5 }
 0x14a   :  { %737 = vst [vmem:[#allocation8 + $0x230] sm:$0xff] %v736_v6 }
 0x14b   :  { %739 = vst [vmem:[#allocation8 + $0x238] sm:$0xff] %v738_v7 }
 0x14c   :  { %741 = vst [vmem:[#allocation8 + $0x240] sm:$0xff] %v740_v8 }
 0x14d   :  { %743 = vst [vmem:[#allocation8 + $0x248] sm:$0xff] %v742_v9 }
 0x14e   :  { %745 = vst [vmem:[#allocation8 + $0x250] sm:$0xff] %v744_v10 }
 0x14f   :  { %747 = vst [vmem:[#allocation8 + $0x258] sm:$0xff] %v746_v11 }
 0x150   :  { %749 = vst [vmem:[#allocation8 + $0x260] sm:$0xff] %v748_v12 }
 0x151   :  { %751 = vst [vmem:[#allocation8 + $0x268] sm:$0xff] %v750_v13 }
 0x152   :  { %753 = vst [vmem:[#allocation8 + $0x270] sm:$0xff] %v752_v14 }
 0x153   :  { %755 = vst [vmem:[#allocation8 + $0x278] sm:$0xff] %v754_v15 }
 0x154   :  { %757 = vst [vmem:[#allocation8 + $0x280] sm:$0xff] %v756_v16 }
 0x155   :  { %759 = vst [vmem:[#allocation8 + $0x288] sm:$0xff] %v758_v17 }
 0x156   :  { %761 = vst [vmem:[#allocation8 + $0x290] sm:$0xff] %v760_v18 }
 0x157   :  { %763 = vst [vmem:[#allocation8 + $0x298] sm:$0xff] %v762_v19 }
 0x158   :  { %765 = vst [vmem:[#allocation8 + $0x2a0] sm:$0xff] %v764_v20 }
 0x159   :  { %767 = vst [vmem:[#allocation8 + $0x2a8] sm:$0xff] %v766_v21 }
 0x15a   :  { %769 = vst [vmem:[#allocation8 + $0x2b0] sm:$0xff] %v768_v22 }
 0x15b   :  { %771 = vst [vmem:[#allocation8 + $0x2b8] sm:$0xff] %v770_v23 }
 0x15c   :  { %773 = vst [vmem:[#allocation8 + $0x2c0] sm:$0xff] %v772_v24 }
 0x15d   :  { %775 = vst [vmem:[#allocation8 + $0x2c8] sm:$0xff] %v774_v25 }
 0x15e   :  { %777 = vst [vmem:[#allocation8 + $0x2d0] sm:$0xff] %v776_v26 }
 0x15f   :  { %779 = vst [vmem:[#allocation8 + $0x2d8] sm:$0xff] %v778_v27 }
 0x160   :  { %781 = vst [vmem:[#allocation8 + $0x2e0] sm:$0xff] %v780_v28 }
 0x161   :  { %783 = vst [vmem:[#allocation8 + $0x2e8] sm:$0xff] %v782_v29 }
 0x162   :  { %785 = vst [vmem:[#allocation8 + $0x2f0] sm:$0xff] %v784_v30 }
 0x163   :  { %787 = vst [vmem:[#allocation8 + $0x2f8] sm:$0xff] %v786_v31 }
 0x164   :  { %789 = vst [vmem:[#allocation8 + $0x300] sm:$0xff] %v788_v32 }
 0x165   :  { %791 = vst [vmem:[#allocation8 + $0x308] sm:$0xff] %v790_v33 }
 0x166   :  { %793 = vst [vmem:[#allocation8 + $0x310] sm:$0xff] %v792_v34 }
 0x167   :  { %795 = vst [vmem:[#allocation8 + $0x318] sm:$0xff] %v794_v35 }
 0x168   :  { %797 = vst [vmem:[#allocation8 + $0x320] sm:$0xff] %v796_v36 }
 0x169   :  { %799 = vst [vmem:[#allocation8 + $0x328] sm:$0xff] %v798_v37 }
 0x16a   :  { %801 = vst [vmem:[#allocation8 + $0x330] sm:$0xff] %v800_v38 }
 0x16b   :  { %803 = vst [vmem:[#allocation8 + $0x338] sm:$0xff] %v802_v39 }
 0x16c   :  { %805 = vst [vmem:[#allocation8 + $0x340] sm:$0xff] %v804_v40 }
 0x16d   :  { %807 = vst [vmem:[#allocation8 + $0x348] sm:$0xff] %v806_v41 }
 0x16e   :  { %809 = vst [vmem:[#allocation8 + $0x350] sm:$0xff] %v808_v42 }
 0x16f   :  { %811 = vst [vmem:[#allocation8 + $0x358] sm:$0xff] %v810_v43 }
 0x170   :  { %813 = vst [vmem:[#allocation8 + $0x360] sm:$0xff] %v812_v44 }
 0x171   :  { %815 = vst [vmem:[#allocation8 + $0x368] sm:$0xff] %v814_v45 }
 0x172   :  { %817 = vst [vmem:[#allocation8 + $0x370] sm:$0xff] %v816_v46 }
 0x173   :  { %819 = vst [vmem:[#allocation8 + $0x378] sm:$0xff] %v818_v47 }
 0x174   :  { %821 = vst [vmem:[#allocation8 + $0x380] sm:$0xff] %v820_v48 }
 0x175   :  { %823 = vst [vmem:[#allocation8 + $0x388] sm:$0xff] %v822_v49 }
 0x176   :  { %825 = vst [vmem:[#allocation8 + $0x390] sm:$0xff] %v824_v50 }
 0x177   :  { %827 = vst [vmem:[#allocation8 + $0x398] sm:$0xff] %v826_v51 }
 0x178   :  { %829 = vst [vmem:[#allocation8 + $0x3a0] sm:$0xff] %v828_v52 }
 0x179   :  { %831 = vst [vmem:[#allocation8 + $0x3a8] sm:$0xff] %v830_v53 }
 0x17a   :  { %833 = vst [vmem:[#allocation8 + $0x3b0] sm:$0xff] %v832_v54 }
 0x17b   :  { %835 = vst [vmem:[#allocation8 + $0x3b8] sm:$0xff] %v834_v55 }
 0x17c   :  { %837 = vst [vmem:[#allocation8 + $0x3c0] sm:$0xff] %v836_v56 }
 0x17d   :  { %839 = vst [vmem:[#allocation8 + $0x3c8] sm:$0xff] %v838_v57 }
 0x17e   :  { %841 = vst [vmem:[#allocation8 + $0x3d0] sm:$0xff] %v840_v58 }
 0x17f   :  { %843 = vst [vmem:[#allocation8 + $0x3d8] sm:$0xff] %v842_v59 }
 0x180   :  { %845 = vst [vmem:[#allocation8 + $0x3e0] sm:$0xff] %v844_v60 }
 0x181   :  { %847 = vst [vmem:[#allocation8 + $0x3e8] sm:$0xff] %v846_v61 }
 0x182   :  { %849 = vst [vmem:[#allocation8 + $0x3f0] sm:$0xff] %v848_v62 }
 0x183   :  { %851 = vst [vmem:[#allocation8 + $0x3f8] sm:$0xff] %v850_v63 }
 0x184   :  { %857 = vsyncadd [#allocation10 + $0x2], 16384  ;;  %v869_v0 = vld [vmem:[%s13272_s12] sm:$0xff]  ;;  %v871_v1 = vld [vmem:[%s13272_s12 + $0x8] sm:$0xff] }
 0x185   :  { %870 = vst [vmem:[#allocation9 + $0xb0] sm:$0xff] %v869_v0  ;;  %v873_v2 = vld [vmem:[%s13272_s12 + $0x10] sm:$0xff]  ;;  %v875_v3 = vld [vmem:[%s13272_s12 + $0x18] sm:$0xff]  ;;  %v877_v4 = vld [vmem:[%s13272_s12 + $0x20] sm:$0xff] }
 0x186   :  { %872 = vst [vmem:[#allocation9 + $0x1b0] sm:$0xff] %v871_v1  ;;  %v879_v5 = vld [vmem:[%s13272_s12 + $0x28] sm:$0xff]  ;;  %v881_v6 = vld [vmem:[%s13272_s12 + $0x30] sm:$0xff]  ;;  %v883_v7 = vld [vmem:[%s13272_s12 + $0x38] sm:$0xff] }
 0x187   :  { %874 = vst [vmem:[#allocation9 + $0xd8] sm:$0xff] %v873_v2  ;;  %v885_v8 = vld [vmem:[%s13272_s12 + $0x40] sm:$0xff]  ;;  %v887_v9 = vld [vmem:[%s13272_s12 + $0x48] sm:$0xff]  ;;  %v889_v10 = vld [vmem:[%s13272_s12 + $0x50] sm:$0xff] }
 0x188   :  { %876 = vst [vmem:[#allocation9 + $0x18] sm:$0xff] %v875_v3  ;;  %v891_v11 = vld [vmem:[%s13272_s12 + $0x58] sm:$0xff]  ;;  %v893_v12 = vld [vmem:[%s13272_s12 + $0x60] sm:$0xff]  ;;  %v895_v13 = vld [vmem:[%s13272_s12 + $0x68] sm:$0xff] }
 0x189   :  { %878 = vst [vmem:[#allocation9 + $0x50] sm:$0xff] %v877_v4  ;;  %v897_v14 = vld [vmem:[%s13272_s12 + $0x70] sm:$0xff]  ;;  %v899_v15 = vld [vmem:[%s13272_s12 + $0x78] sm:$0xff]  ;;  %v901_v16 = vld [vmem:[%s13272_s12 + $0x80] sm:$0xff] }
 0x18a   :  { %880 = vst [vmem:[#allocation9 + $0x168] sm:$0xff] %v879_v5  ;;  %v903_v17 = vld [vmem:[%s13272_s12 + $0x88] sm:$0xff]  ;;  %v905_v18 = vld [vmem:[%s13272_s12 + $0x90] sm:$0xff]  ;;  %v907_v19 = vld [vmem:[%s13272_s12 + $0x98] sm:$0xff] }
 0x18b   :  { %882 = vst [vmem:[#allocation9 + $0x130] sm:$0xff] %v881_v6  ;;  %v909_v20 = vld [vmem:[%s13272_s12 + $0xa0] sm:$0xff]  ;;  %v911_v21 = vld [vmem:[%s13272_s12 + $0xa8] sm:$0xff]  ;;  %v913_v22 = vld [vmem:[%s13272_s12 + $0xb0] sm:$0xff] }
 0x18c   :  { %884 = vst [vmem:[#allocation9 + $0x48] sm:$0xff] %v883_v7  ;;  %v915_v23 = vld [vmem:[%s13272_s12 + $0xb8] sm:$0xff]  ;;  %v917_v24 = vld [vmem:[%s13272_s12 + $0xc0] sm:$0xff]  ;;  %v919_v25 = vld [vmem:[%s13272_s12 + $0xc8] sm:$0xff] }
 0x18d   :  { %886 = vst [vmem:[#allocation9 + $0x180] sm:$0xff] %v885_v8  ;;  %v921_v26 = vld [vmem:[%s13272_s12 + $0xd0] sm:$0xff]  ;;  %v923_v27 = vld [vmem:[%s13272_s12 + $0xd8] sm:$0xff]  ;;  %v925_v28 = vld [vmem:[%s13272_s12 + $0xe0] sm:$0xff] }
 0x18e   :  { %888 = vst [vmem:[#allocation9 + $0x110] sm:$0xff] %v887_v9  ;;  %v927_v29 = vld [vmem:[%s13272_s12 + $0xe8] sm:$0xff]  ;;  %v929_v30 = vld [vmem:[%s13272_s12 + $0xf0] sm:$0xff]  ;;  %v931_v31 = vld [vmem:[%s13272_s12 + $0xf8] sm:$0xff] }
 0x18f   :  { %890 = vst [vmem:[#allocation9 + $0x118] sm:$0xff] %v889_v10  ;;  %v933_v32 = vld [vmem:[%s13272_s12 + $0x100] sm:$0xff]  ;;  %v935_v33 = vld [vmem:[%s13272_s12 + $0x108] sm:$0xff]  ;;  %v937_v34 = vld [vmem:[%s13272_s12 + $0x110] sm:$0xff] }
 0x190   :  { %892 = vst [vmem:[#allocation9 + $0x98] sm:$0xff] %v891_v11  ;;  %v939_v35 = vld [vmem:[%s13272_s12 + $0x118] sm:$0xff]  ;;  %v941_v36 = vld [vmem:[%s13272_s12 + $0x120] sm:$0xff]  ;;  %v943_v37 = vld [vmem:[%s13272_s12 + $0x128] sm:$0xff] }
 0x191   :  { %894 = vst [vmem:[#allocation9 + $0x120] sm:$0xff] %v893_v12  ;;  %v945_v38 = vld [vmem:[%s13272_s12 + $0x130] sm:$0xff]  ;;  %v947_v39 = vld [vmem:[%s13272_s12 + $0x138] sm:$0xff]  ;;  %v949_v40 = vld [vmem:[%s13272_s12 + $0x140] sm:$0xff] }
 0x192   :  { %896 = vst [vmem:[#allocation9 + $0x150] sm:$0xff] %v895_v13  ;;  %v951_v41 = vld [vmem:[%s13272_s12 + $0x148] sm:$0xff]  ;;  %v953_v42 = vld [vmem:[%s13272_s12 + $0x150] sm:$0xff]  ;;  %v955_v43 = vld [vmem:[%s13272_s12 + $0x158] sm:$0xff] }
 0x193   :  { %898 = vst [vmem:[#allocation9 + $0x108] sm:$0xff] %v897_v14  ;;  %v957_v44 = vld [vmem:[%s13272_s12 + $0x160] sm:$0xff]  ;;  %v959_v45 = vld [vmem:[%s13272_s12 + $0x168] sm:$0xff]  ;;  %v961_v46 = vld [vmem:[%s13272_s12 + $0x170] sm:$0xff] }
 0x194   :  { %900 = vst [vmem:[#allocation9 + $0x60] sm:$0xff] %v899_v15  ;;  %v963_v47 = vld [vmem:[%s13272_s12 + $0x178] sm:$0xff]  ;;  %v965_v48 = vld [vmem:[%s13272_s12 + $0x180] sm:$0xff]  ;;  %v967_v49 = vld [vmem:[%s13272_s12 + $0x188] sm:$0xff] }
 0x195   :  { %902 = vst [vmem:[#allocation9 + $0xe0] sm:$0xff] %v901_v16  ;;  %v969_v50 = vld [vmem:[%s13272_s12 + $0x190] sm:$0xff]  ;;  %v971_v51 = vld [vmem:[%s13272_s12 + $0x198] sm:$0xff]  ;;  %v973_v52 = vld [vmem:[%s13272_s12 + $0x1a0] sm:$0xff] }
 0x196   :  { %904 = vst [vmem:[#allocation9 + $0x188] sm:$0xff] %v903_v17  ;;  %v975_v53 = vld [vmem:[%s13272_s12 + $0x1a8] sm:$0xff]  ;;  %v977_v54 = vld [vmem:[%s13272_s12 + $0x1b0] sm:$0xff]  ;;  %v979_v55 = vld [vmem:[%s13272_s12 + $0x1b8] sm:$0xff] }
 0x197   :  { %906 = vst [vmem:[#allocation9 + $0x138] sm:$0xff] %v905_v18  ;;  %v981_v56 = vld [vmem:[%s13272_s12 + $0x1c0] sm:$0xff]  ;;  %v983_v57 = vld [vmem:[%s13272_s12 + $0x1c8] sm:$0xff]  ;;  %v985_v58 = vld [vmem:[%s13272_s12 + $0x1d0] sm:$0xff] }
 0x198   :  { %908 = vst [vmem:[#allocation9 + $0x140] sm:$0xff] %v907_v19  ;;  %v987_v59 = vld [vmem:[%s13272_s12 + $0x1d8] sm:$0xff]  ;;  %v989_v60 = vld [vmem:[%s13272_s12 + $0x1e0] sm:$0xff]  ;;  %v991_v61 = vld [vmem:[%s13272_s12 + $0x1e8] sm:$0xff] }
 0x199   :  { %910 = vst [vmem:[#allocation9 + $0x80] sm:$0xff] %v909_v20  ;;  %v993_v62 = vld [vmem:[%s13272_s12 + $0x1f0] sm:$0xff]  ;;  %v995_v63 = vld [vmem:[%s13272_s12 + $0x1f8] sm:$0xff] }
 0x19a   :  { %912 = vst [vmem:[#allocation9 + $0x1a8] sm:$0xff] %v911_v21 }
 0x19b   :  { %914 = vst [vmem:[#allocation9 + $0x1b8] sm:$0xff] %v913_v22 }
 0x19c   :  { %916 = vst [vmem:[#allocation9 + $0x28] sm:$0xff] %v915_v23 }
 0x19d   :  { %918 = vst [vmem:[#allocation9 + $0x1e8] sm:$0xff] %v917_v24 }
 0x19e   :  { %920 = vst [vmem:[#allocation9 + $0xf8] sm:$0xff] %v919_v25 }
 0x19f   :  { %922 = vst [vmem:[#allocation9 + $0x160] sm:$0xff] %v921_v26 }
 0x1a0   :  { %924 = vst [vmem:[#allocation9 + $0x30] sm:$0xff] %v923_v27 }
 0x1a1   :  { %926 = vst [vmem:[#allocation9 + $0x1e0] sm:$0xff] %v925_v28 }
 0x1a2   :  { %928 = vst [vmem:[#allocation9] sm:$0xff] %v927_v29 }
 0x1a3   :  { %930 = vst [vmem:[#allocation9 + $0xf0] sm:$0xff] %v929_v30 }
 0x1a4   :  { %932 = vst [vmem:[#allocation9 + $0x8] sm:$0xff] %v931_v31 }
 0x1a5   :  { %934 = vst [vmem:[#allocation9 + $0x148] sm:$0xff] %v933_v32 }
 0x1a6   :  { %936 = vst [vmem:[#allocation9 + $0x1d0] sm:$0xff] %v935_v33 }
 0x1a7   :  { %938 = vst [vmem:[#allocation9 + $0x100] sm:$0xff] %v937_v34 }
 0x1a8   :  { %940 = vst [vmem:[#allocation9 + $0xc8] sm:$0xff] %v939_v35 }
 0x1a9   :  { %942 = vst [vmem:[#allocation9 + $0x40] sm:$0xff] %v941_v36 }
 0x1aa   :  { %944 = vst [vmem:[#allocation9 + $0x1f8] sm:$0xff] %v943_v37 }
 0x1ab   :  { %946 = vst [vmem:[#allocation9 + $0x20] sm:$0xff] %v945_v38 }
 0x1ac   :  { %948 = vst [vmem:[#allocation9 + $0x128] sm:$0xff] %v947_v39 }
 0x1ad   :  { %950 = vst [vmem:[#allocation9 + $0x1a0] sm:$0xff] %v949_v40 }
 0x1ae   :  { %952 = vst [vmem:[#allocation9 + $0x1f0] sm:$0xff] %v951_v41 }
 0x1af   :  { %954 = vst [vmem:[#allocation9 + $0xe8] sm:$0xff] %v953_v42 }
 0x1b0   :  { %956 = vst [vmem:[#allocation9 + $0x78] sm:$0xff] %v955_v43 }
 0x1b1   :  { %958 = vst [vmem:[#allocation9 + $0x70] sm:$0xff] %v957_v44 }
 0x1b2   :  { %960 = vst [vmem:[#allocation9 + $0x90] sm:$0xff] %v959_v45 }
 0x1b3   :  { %962 = vst [vmem:[#allocation9 + $0x1d8] sm:$0xff] %v961_v46 }
 0x1b4   :  { %964 = vst [vmem:[#allocation9 + $0xd0] sm:$0xff] %v963_v47 }
 0x1b5   :  { %966 = vst [vmem:[#allocation9 + $0xb8] sm:$0xff] %v965_v48 }
 0x1b6   :  { %968 = vst [vmem:[#allocation9 + $0x88] sm:$0xff] %v967_v49 }
 0x1b7   :  { %970 = vst [vmem:[#allocation9 + $0xa8] sm:$0xff] %v969_v50 }
 0x1b8   :  { %972 = vst [vmem:[#allocation9 + $0x1c8] sm:$0xff] %v971_v51 }
 0x1b9   :  { %974 = vst [vmem:[#allocation9 + $0x170] sm:$0xff] %v973_v52 }
 0x1ba   :  { %976 = vst [vmem:[#allocation9 + $0x178] sm:$0xff] %v975_v53 }
 0x1bb   :  { %978 = vst [vmem:[#allocation9 + $0x68] sm:$0xff] %v977_v54 }
 0x1bc   :  { %980 = vst [vmem:[#allocation9 + $0x190] sm:$0xff] %v979_v55 }
 0x1bd   :  { %982 = vst [vmem:[#allocation9 + $0x198] sm:$0xff] %v981_v56 }
 0x1be   :  { %984 = vst [vmem:[#allocation9 + $0x38] sm:$0xff] %v983_v57 }
 0x1bf   :  { %986 = vst [vmem:[#allocation9 + $0xc0] sm:$0xff] %v985_v58 }
 0x1c0   :  { %988 = vst [vmem:[#allocation9 + $0x1c0] sm:$0xff] %v987_v59 }
 0x1c1   :  { %990 = vst [vmem:[#allocation9 + $0x158] sm:$0xff] %v989_v60 }
 0x1c2   :  { %992 = vst [vmem:[#allocation9 + $0x10] sm:$0xff] %v991_v61 }
 0x1c3   :  { %994 = vst [vmem:[#allocation9 + $0x58] sm:$0xff] %v993_v62 }
 0x1c4   :  { %996 = vst [vmem:[#allocation9 + $0xa0] sm:$0xff] %v995_v63 }
 0x1c5   :  { %1002 = vsyncadd [#allocation10 + $0x3], 8192  ;;  %v7240_v0 = vld [vmem:[%s13261_s1 + $0x170] sm:$0xf]  ;;  %v9916_v1 = vld [vmem:[%s13261_s1 + $0x174] sm:$0xf0] }
 0x1c6   :  { %v7241_v2 = vor.u32 %v9916_v1, %v7240_v0  ;;  %v7304_v3 = vld [vmem:[%s13261_s1 + $0x1f0] sm:$0xf]  ;;  %v9932_v4 = vld [vmem:[%s13261_s1 + $0x1f4] sm:$0xf0]  ;;  %v9915_v5 = vld [vmem:[%s13261_s1 + $0x174] sm:$0xf] }
 0x1c7   :  { %v7305_v6 = vor.u32 %v9932_v4, %v7304_v3  ;;  %v7242_v7 = vld [vmem:[%s13261_s1 + $0x178] sm:$0xf0]  ;;  %v9931_v8 = vld [vmem:[%s13261_s1 + $0x1f4] sm:$0xf]  ;;  %v7232_v12 = vld [vmem:[%s13261_s1 + $0x160] sm:$0xf] }
 0x1c8   :  { %v7306_v9 = vld [vmem:[%s13261_s1 + $0x1f8] sm:$0xf0]  ;;  %1285 = vmatpush.bf16.msra.mxu0 %v7241_v2  ;;  %v7245_v10 = vor.u32 %v9915_v5, %v7242_v7  ;;  %v9914_v13 = vld [vmem:[%s13261_s1 + $0x164] sm:$0xf0]  ;;  %v7296_v14 = vld [vmem:[%s13261_s1 + $0x1e0] sm:$0xf] }
 0x1c9   :  { %v7309_v11 = vor.u32 %v9931_v8, %v7306_v9  ;;  %1314 = vmatpush.bf16.msra.mxu1 %v7305_v6  ;;  %v7233_v15 = vor.u32 %v9914_v13, %v7232_v12  ;;  %v9930_v16 = vld [vmem:[%s13261_s1 + $0x1e4] sm:$0xf0]  ;;  %v9913_v17 = vld [vmem:[%s13261_s1 + $0x164] sm:$0xf]  ;;  %v7234_v18 = vld [vmem:[%s13261_s1 + $0x168] sm:$0xf0] }
 0x1ca   :  { %1343 = vmatpush.bf16.msra.mxu2 %v7245_v10  ;;  %v7297_v19 = vor.u32 %v9930_v16, %v7296_v14  ;;  %v7237_v20 = vor.u32 %v9913_v17, %v7234_v18  ;;  %v9929_v21 = vld [vmem:[%s13261_s1 + $0x1e4] sm:$0xf]  ;;  %v7298_v22 = vld [vmem:[%s13261_s1 + $0x1e8] sm:$0xf0]  ;;  %v7224_v23 = vld [vmem:[%s13261_s1 + $0x150] sm:$0xf] }
 0x1cb   :  { %1372 = vmatpush.bf16.msra.mxu3 %v7309_v11  ;;  %v7301_v24 = vor.u32 %v9929_v21, %v7298_v22  ;;  %v9912_v25 = vld [vmem:[%s13261_s1 + $0x154] sm:$0xf0]  ;;  %v7288_v26 = vld [vmem:[%s13261_s1 + $0x1d0] sm:$0xf]  ;;  %v9911_v29 = vld [vmem:[%s13261_s1 + $0x154] sm:$0xf] }
 0x1cc   :  { %v9928_v27 = vld [vmem:[%s13261_s1 + $0x1d4] sm:$0xf0]  ;;  %1286 = vmatpush.bf16.msra.mxu0 %v7233_v15  ;;  %v7225_v28 = vor.u32 %v9912_v25, %v7224_v23  ;;  %v7226_v30 = vld [vmem:[%s13261_s1 + $0x158] sm:$0xf0]  ;;  %v9927_v31 = vld [vmem:[%s13261_s1 + $0x1d4] sm:$0xf] }
 0x1cd   :  { %1315 = vmatpush.bf16.msra.mxu1 %v7297_v19  ;;  %v7289_v32 = vor.u32 %v9928_v27, %v7288_v26  ;;  %v7290_v33 = vld [vmem:[%s13261_s1 + $0x1d8] sm:$0xf0]  ;;  %v7216_v34 = vld [vmem:[%s13261_s1 + $0x140] sm:$0xf]  ;;  %v9910_v35 = vld [vmem:[%s13261_s1 + $0x144] sm:$0xf0]  ;;  %v7229_v36 = vor.u32 %v9911_v29, %v7226_v30 }
 0x1ce   :  { %1344 = vmatpush.bf16.msra.mxu2 %v7237_v20  ;;  %v7293_v37 = vor.u32 %v9927_v31, %v7290_v33  ;;  %v7280_v38 = vld [vmem:[%s13261_s1 + $0x1c0] sm:$0xf]  ;;  %v9926_v39 = vld [vmem:[%s13261_s1 + $0x1c4] sm:$0xf0]  ;;  %v9909_v40 = vld [vmem:[%s13261_s1 + $0x144] sm:$0xf]  ;;  %v7217_v44 = vor.u32 %v9910_v35, %v7216_v34 }
 0x1cf   :  { %1373 = vmatpush.bf16.msra.mxu3 %v7301_v24  ;;  %v7218_v41 = vld [vmem:[%s13261_s1 + $0x148] sm:$0xf0]  ;;  %v9925_v42 = vld [vmem:[%s13261_s1 + $0x1c4] sm:$0xf]  ;;  %v7281_v45 = vor.u32 %v9926_v39, %v7280_v38  ;;  %v7208_v46 = vld [vmem:[%s13261_s1 + $0x130] sm:$0xf] }
 0x1d0   :  { %v7282_v43 = vld [vmem:[%s13261_s1 + $0x1c8] sm:$0xf0]  ;;  %1287 = vmatpush.bf16.msra.mxu0 %v7225_v28  ;;  %v9908_v47 = vld [vmem:[%s13261_s1 + $0x134] sm:$0xf0]  ;;  %v7221_v48 = vor.u32 %v9909_v40, %v7218_v41  ;;  %v7272_v50 = vld [vmem:[%s13261_s1 + $0x1b0] sm:$0xf] }
 0x1d1   :  { %1316 = vmatpush.bf16.msra.mxu1 %v7289_v32  ;;  %v7285_v49 = vor.u32 %v9925_v42, %v7282_v43  ;;  %v9924_v51 = vld [vmem:[%s13261_s1 + $0x1b4] sm:$0xf0]  ;;  %v9907_v52 = vld [vmem:[%s13261_s1 + $0x134] sm:$0xf]  ;;  %v7210_v53 = vld [vmem:[%s13261_s1 + $0x138] sm:$0xf0]  ;;  %v7209_v56 = vor.u32 %v9908_v47, %v7208_v46 }
 0x1d2   :  { %1345 = vmatpush.bf16.msra.mxu2 %v7229_v36  ;;  %v9923_v54 = vld [vmem:[%s13261_s1 + $0x1b4] sm:$0xf]  ;;  %v7274_v55 = vld [vmem:[%s13261_s1 + $0x1b8] sm:$0xf0]  ;;  %v7273_v57 = vor.u32 %v9924_v51, %v7272_v50  ;;  %v7200_v58 = vld [vmem:[%s13261_s1 + $0x120] sm:$0xf]  ;;  %v7213_v60 = vor.u32 %v9907_v52, %v7210_v53 }
 0x1d3   :  { %1374 = vmatpush.bf16.msra.mxu3 %v7293_v37  ;;  %v9906_v59 = vld [vmem:[%s13261_s1 + $0x124] sm:$0xf0]  ;;  %v7277_v61 = vor.u32 %v9923_v54, %v7274_v55  ;;  %v7264_v62 = vld [vmem:[%s13261_s1 + $0x1a0] sm:$0xf]  ;;  %v9905_v0 = vld [vmem:[%s13261_s1 + $0x124] sm:$0xf] }
 0x1d4   :  { %1288 = vmatpush.bf16.msra.mxu0 %v7217_v44  ;;  %v9922_v63 = vld [vmem:[%s13261_s1 + $0x1a4] sm:$0xf0]  ;;  %v7202_v1 = vld [vmem:[%s13261_s1 + $0x128] sm:$0xf0]  ;;  %v9921_v2 = vld [vmem:[%s13261_s1 + $0x1a4] sm:$0xf]  ;;  %v7201_v4 = vor.u32 %v9906_v59, %v7200_v58 }
 0x1d5   :  { %1317 = vmatpush.bf16.msra.mxu1 %v7281_v45  ;;  %v7266_v3 = vld [vmem:[%s13261_s1 + $0x1a8] sm:$0xf0]  ;;  %v7265_v5 = vor.u32 %v9922_v63, %v7264_v62  ;;  %v7192_v6 = vld [vmem:[%s13261_s1 + $0x110] sm:$0xf]  ;;  %v9904_v7 = vld [vmem:[%s13261_s1 + $0x114] sm:$0xf0]  ;;  %v7205_v8 = vor.u32 %v9905_v0, %v7202_v1 }
 0x1d6   :  { %1346 = vmatpush.bf16.msra.mxu2 %v7221_v48  ;;  %v7269_v9 = vor.u32 %v9921_v2, %v7266_v3  ;;  %v7256_v10 = vld [vmem:[%s13261_s1 + $0x190] sm:$0xf]  ;;  %v9920_v11 = vld [vmem:[%s13261_s1 + $0x194] sm:$0xf0]  ;;  %v9903_v12 = vld [vmem:[%s13261_s1 + $0x114] sm:$0xf]  ;;  %v7193_v16 = vor.u32 %v9904_v7, %v7192_v6 }
 0x1d7   :  { %1375 = vmatpush.bf16.msra.mxu3 %v7285_v49  ;;  %v7194_v13 = vld [vmem:[%s13261_s1 + $0x118] sm:$0xf0]  ;;  %v9919_v14 = vld [vmem:[%s13261_s1 + $0x194] sm:$0xf]  ;;  %v7257_v17 = vor.u32 %v9920_v11, %v7256_v10  ;;  %v7184_v18 = vld [vmem:[%s13261_s1 + $0x100] sm:$0xf] }
 0x1d8   :  { %1289 = vmatpush.bf16.msra.mxu0 %v7209_v56  ;;  %v7258_v15 = vld [vmem:[%s13261_s1 + $0x198] sm:$0xf0]  ;;  %v9902_v19 = vld [vmem:[%s13261_s1 + $0x104] sm:$0xf0]  ;;  %v7197_v20 = vor.u32 %v9903_v12, %v7194_v13  ;;  %v7248_v22 = vld [vmem:[%s13261_s1 + $0x180] sm:$0xf] }
 0x1d9   :  { %1318 = vmatpush.bf16.msra.mxu1 %v7273_v57  ;;  %v7261_v21 = vor.u32 %v9919_v14, %v7258_v15  ;;  %v9918_v23 = vld [vmem:[%s13261_s1 + $0x184] sm:$0xf0]  ;;  %v9901_v24 = vld [vmem:[%s13261_s1 + $0x104] sm:$0xf]  ;;  %v7186_v25 = vld [vmem:[%s13261_s1 + $0x108] sm:$0xf0]  ;;  %v7185_v28 = vor.u32 %v9902_v19, %v7184_v18 }
 0x1da   :  { %1347 = vmatpush.bf16.msra.mxu2 %v7213_v60  ;;  %v9917_v26 = vld [vmem:[%s13261_s1 + $0x184] sm:$0xf]  ;;  %v7250_v27 = vld [vmem:[%s13261_s1 + $0x188] sm:$0xf0]  ;;  %v7152_v29 = vld [vmem:[%s13260_s0 + $0x48] sm:$0xf]  ;;  %v7249_v31 = vor.u32 %v9918_v23, %v7248_v22  ;;  %v7189_v34 = vor.u32 %v9901_v24, %v7186_v25 }
 0x1db   :  { %1376 = vmatpush.bf16.msra.mxu3 %v7277_v61  ;;  %v9894_v30 = vld [vmem:[%s13260_s0 + $0x4c] sm:$0xf0]  ;;  %v9893_v32 = vld [vmem:[%s13260_s0 + $0x4c] sm:$0xf]  ;;  %v7154_v33 = vld [vmem:[%s13260_s0 + $0x50] sm:$0xf0]  ;;  %v7253_v35 = vor.u32 %v9917_v26, %v7250_v27 }
 0x1dc   :  { %1290 = vmatpush.bf16.msra.mxu0 %v7201_v4  ;;  %v7153_v36 = vor.u32 %v9894_v30, %v7152_v29  ;;  %v7157_v37 = vor.u32 %v9893_v32, %v7154_v33  ;;  %v7400_v38 = vld [vmem:[%s13261_s1 + $0x70] sm:$0xf]  ;;  %v9876_v39 = vld [vmem:[%s13261_s1 + $0x74] sm:$0xf0]  ;;  %v9875_v43 = vld [vmem:[%s13261_s1 + $0x74] sm:$0xf] }
 0x1dd   :  { %1319 = vmatpush.bf16.msra.mxu1 %v7265_v5  ;;  %v7464_v40 = vld [vmem:[%s13261_s1 + $0xf0] sm:$0xf]  ;;  %v7401_v41 = vor.u32 %v9876_v39, %v7400_v38  ;;  %v9892_v42 = vld [vmem:[%s13261_s1 + $0xf4] sm:$0xf0]  ;;  %v7402_v44 = vld [vmem:[%s13261_s1 + $0x78] sm:$0xf0] }
 0x1de   :  { %1348 = vmatpush.bf16.msra.mxu2 %v7205_v8  ;;  %v7465_v45 = vor.u32 %v9892_v42, %v7464_v40  ;;  %v7405_v46 = vor.u32 %v9875_v43, %v7402_v44  ;;  %v9891_v47 = vld [vmem:[%s13261_s1 + $0xf4] sm:$0xf]  ;;  %v7466_v48 = vld [vmem:[%s13261_s1 + $0xf8] sm:$0xf0]  ;;  %v7392_v49 = vld [vmem:[%s13261_s1 + $0x60] sm:$0xf] }
 0x1df   :  { %1377 = vmatpush.bf16.msra.mxu3 %v7269_v9  ;;  %v7469_v50 = vor.u32 %v9891_v47, %v7466_v48  ;;  %v9874_v51 = vld [vmem:[%s13261_s1 + $0x64] sm:$0xf0]  ;;  %v7456_v52 = vld [vmem:[%s13261_s1 + $0xe0] sm:$0xf]  ;;  %v9873_v56 = vld [vmem:[%s13261_s1 + $0x64] sm:$0xf] }
 0x1e0   :  { %1291 = vmatpush.bf16.msra.mxu0 %v7193_v16  ;;  %v9890_v53 = vld [vmem:[%s13261_s1 + $0xe4] sm:$0xf0]  ;;  %v7393_v54 = vor.u32 %v9874_v51, %v7392_v49  ;;  %v7394_v57 = vld [vmem:[%s13261_s1 + $0x68] sm:$0xf0]  ;;  %v9889_v58 = vld [vmem:[%s13261_s1 + $0xe4] sm:$0xf] }
 0x1e1   :  { %1320 = vmatpush.bf16.msra.mxu1 %v7257_v17  ;;  %v7457_v55 = vor.u32 %v9890_v53, %v7456_v52  ;;  %v7397_v59 = vor.u32 %v9873_v56, %v7394_v57  ;;  %v7458_v60 = vld [vmem:[%s13261_s1 + $0xe8] sm:$0xf0]  ;;  %v7384_v61 = vld [vmem:[%s13261_s1 + $0x50] sm:$0xf]  ;;  %v9872_v62 = vld [vmem:[%s13261_s1 + $0x54] sm:$0xf0] }
 0x1e2   :  { %1349 = vmatpush.bf16.msra.mxu2 %v7197_v20  ;;  %v7461_v63 = vor.u32 %v9889_v58, %v7458_v60  ;;  %v7448_v0 = vld [vmem:[%s13261_s1 + $0xd0] sm:$0xf]  ;;  %v9888_v1 = vld [vmem:[%s13261_s1 + $0xd4] sm:$0xf0]  ;;  %v9871_v2 = vld [vmem:[%s13261_s1 + $0x54] sm:$0xf]  ;;  %v7385_v4 = vor.u32 %v9872_v62, %v7384_v61 }
 0x1e3   :  { %1378 = vmatpush.bf16.msra.mxu3 %v7261_v21  ;;  %v7160_v3 = vld [vmem:[%s13260_s0 + $0x58] sm:$0xf]  ;;  %v7386_v5 = vld [vmem:[%s13261_s1 + $0x58] sm:$0xf0]  ;;  %v9887_v6 = vld [vmem:[%s13261_s1 + $0xd4] sm:$0xf]  ;;  %v7449_v9 = vor.u32 %v9888_v1, %v7448_v0 }
 0x1e4   :  { %1292 = vmatpush.bf16.msra.mxu0 %v7185_v28  ;;  %v7450_v7 = vld [vmem:[%s13261_s1 + $0xd8] sm:$0xf0]  ;;  %v9896_v8 = vld [vmem:[%s13260_s0 + $0x5c] sm:$0xf0]  ;;  %v7389_v10 = vor.u32 %v9871_v2, %v7386_v5  ;;  %v9870_v12 = vld [vmem:[%s13261_s1 + $0x44] sm:$0xf0] }
 0x1e5   :  { %1321 = vmatpush.bf16.msra.mxu1 %v7249_v31  ;;  %v7376_v11 = vld [vmem:[%s13261_s1 + $0x40] sm:$0xf]  ;;  %v9895_v13 = vld [vmem:[%s13260_s0 + $0x5c] sm:$0xf]  ;;  %v7453_v14 = vor.u32 %v9887_v6, %v7450_v7  ;;  %v9886_v16 = vld [vmem:[%s13261_s1 + $0xc4] sm:$0xf0]  ;;  %v7161_v21 = vor.u32 %v9896_v8, %v7160_v3 }
 0x1e6   :  { %1350 = vmatpush.bf16.msra.mxu2 %v7189_v34  ;;  %v7440_v15 = vld [vmem:[%s13261_s1 + $0xc0] sm:$0xf]  ;;  %v7162_v17 = vld [vmem:[%s13260_s0 + $0x60] sm:$0xf0]  ;;  %v7378_v19 = vld [vmem:[%s13261_s1 + $0x48] sm:$0xf0]  ;;  %v7377_v20 = vor.u32 %v9870_v12, %v7376_v11 }
 0x1e7   :  { %1379 = vmatpush.bf16.msra.mxu3 %v7253_v35  ;;  %1293 = vmatmul.bf16.vlgmr.msra.gmra.mxu0 %v7153_v36  ;;  %v9869_v18 = vld [vmem:[%s13261_s1 + $0x44] sm:$0xf]  ;;  %v7441_v22 = vor.u32 %v9886_v16, %v7440_v15  ;;  %v7442_v24 = vld [vmem:[%s13261_s1 + $0xc8] sm:$0xf0]  ;;  %v7165_v25 = vor.u32 %v9895_v13, %v7162_v17  ;;  %v7368_v28 = vld [vmem:[%s13261_s1 + $0x30] sm:$0xf] }
 0x1e8   :  { %1322 = vmatmul.bf16.vlgmr.msra.gmra.mxu1 %v7157_v37  ;;  %1601 = vmatpush.bf16.msrb.mxu0 %v7401_v41  ;;  %v9885_v23 = vld [vmem:[%s13261_s1 + $0xc4] sm:$0xf]  ;;  %v7381_v26 = vor.u32 %v9869_v18, %v7378_v19  ;;  %v9868_v29 = vld [vmem:[%s13261_s1 + $0x34] sm:$0xf0]  ;;  %v7432_v30 = vld [vmem:[%s13261_s1 + $0xb0] sm:$0xf] }
 0x1e9   :  { %1351 = vmatmul.bf16.vlgmr.msra.gmra.mxu2 %v7153_v36  ;;  %1630 = vmatpush.bf16.msrb.mxu1 %v7465_v45  ;;  %v7445_v27 = vor.u32 %v9885_v23, %v7442_v24  ;;  %v7369_v31 = vor.u32 %v9868_v29, %v7368_v28  ;;  %v9884_v32 = vld [vmem:[%s13261_s1 + $0xb4] sm:$0xf0]  ;;  %v9867_v33 = vld [vmem:[%s13261_s1 + $0x34] sm:$0xf]  ;;  %v7370_v34 = vld [vmem:[%s13261_s1 + $0x38] sm:$0xf0] }
 0x1ea   :  { %1380 = vmatmul.bf16.vlgmr.msra.gmra.mxu3 %v7157_v37  ;;  %1659 = vmatpush.bf16.msrb.mxu2 %v7405_v46  ;;  %v7433_v35 = vor.u32 %v9884_v32, %v7432_v30  ;;  %v7373_v36 = vor.u32 %v9867_v33, %v7370_v34  ;;  %v9883_v37 = vld [vmem:[%s13261_s1 + $0xb4] sm:$0xf]  ;;  %v7434_v38 = vld [vmem:[%s13261_s1 + $0xb8] sm:$0xf0]  ;;  %v7360_v39 = vld [vmem:[%s13261_s1 + $0x20] sm:$0xf] }
 0x1eb   :  { %1688 = vmatpush.bf16.msrb.mxu3 %v7469_v50  ;;  %v7437_v40 = vor.u32 %v9883_v37, %v7434_v38  ;;  %v9866_v41 = vld [vmem:[%s13261_s1 + $0x24] sm:$0xf0]  ;;  %v7424_v42 = vld [vmem:[%s13261_s1 + $0xa0] sm:$0xf]  ;;  %v9865_v46 = vld [vmem:[%s13261_s1 + $0x24] sm:$0xf] }
 0x1ec   :  { %1602 = vmatpush.bf16.msrb.mxu0 %v7393_v54  ;;  %v9882_v43 = vld [vmem:[%s13261_s1 + $0xa4] sm:$0xf0]  ;;  %v7361_v44 = vor.u32 %v9866_v41, %v7360_v39  ;;  %v7362_v47 = vld [vmem:[%s13261_s1 + $0x28] sm:$0xf0]  ;;  %v9881_v48 = vld [vmem:[%s13261_s1 + $0xa4] sm:$0xf] }
 0x1ed   :  { %1631 = vmatpush.bf16.msrb.mxu1 %v7457_v55  ;;  %v7425_v45 = vor.u32 %v9882_v43, %v7424_v42  ;;  %v7365_v49 = vor.u32 %v9865_v46, %v7362_v47  ;;  %v7426_v50 = vld [vmem:[%s13261_s1 + $0xa8] sm:$0xf0]  ;;  %v7352_v51 = vld [vmem:[%s13261_s1 + $0x10] sm:$0xf]  ;;  %v9864_v52 = vld [vmem:[%s13261_s1 + $0x14] sm:$0xf0] }
 0x1ee   :  { %1660 = vmatpush.bf16.msrb.mxu2 %v7397_v59  ;;  %v7416_v53 = vld [vmem:[%s13261_s1 + $0x90] sm:$0xf]  ;;  %v9880_v54 = vld [vmem:[%s13261_s1 + $0x94] sm:$0xf0]  ;;  %v9863_v55 = vld [vmem:[%s13261_s1 + $0x14] sm:$0xf]  ;;  %v7429_v58 = vor.u32 %v9881_v48, %v7426_v50  ;;  %v7353_v59 = vor.u32 %v9864_v52, %v7352_v51 }
 0x1ef   :  { %1689 = vmatpush.bf16.msrb.mxu3 %v7461_v63  ;;  %v7168_v56 = vld [vmem:[%s13260_s0 + $0x68] sm:$0xf]  ;;  %v9898_v57 = vld [vmem:[%s13260_s0 + $0x6c] sm:$0xf0]  ;;  %v7354_v60 = vld [vmem:[%s13261_s1 + $0x18] sm:$0xf0]  ;;  %v7417_v62 = vor.u32 %v9880_v54, %v7416_v53 }
 0x1f0   :  { %1603 = vmatpush.bf16.msrb.mxu0 %v7385_v4  ;;  %v9879_v61 = vld [vmem:[%s13261_s1 + $0x94] sm:$0xf]  ;;  %v7418_v63 = vld [vmem:[%s13261_s1 + $0x98] sm:$0xf0]  ;;  %v7344_v0 = vld [vmem:[%s13261_s1] sm:$0xf]  ;;  %v7357_v3 = vor.u32 %v9863_v55, %v7354_v60  ;;  %v7169_v11 = vor.u32 %v9898_v57, %v7168_v56 }
 0x1f1   :  { %1632 = vmatpush.bf16.msrb.mxu1 %v7449_v9  ;;  %v9862_v1 = vld [vmem:[%s13261_s1 + $0x4] sm:$0xf0]  ;;  %v9897_v2 = vld [vmem:[%s13260_s0 + $0x6c] sm:$0xf]  ;;  %v7408_v4 = vld [vmem:[%s13261_s1 + $0x80] sm:$0xf]  ;;  %v7421_v9 = vor.u32 %v9879_v61, %v7418_v63 }
 0x1f2   :  { %1661 = vmatpush.bf16.msrb.mxu2 %v7389_v10  ;;  %v9878_v5 = vld [vmem:[%s13261_s1 + $0x84] sm:$0xf0]  ;;  %v7170_v6 = vld [vmem:[%s13260_s0 + $0x70] sm:$0xf0]  ;;  %v9861_v7 = vld [vmem:[%s13261_s1 + $0x4] sm:$0xf]  ;;  %v7345_v10 = vor.u32 %v9862_v1, %v7344_v0 }
 0x1f3   :  { %1690 = vmatpush.bf16.msrb.mxu3 %v7453_v14  ;;  %v7346_v8 = vld [vmem:[%s13261_s1 + $0x8] sm:$0xf0]  ;;  %v7409_v12 = vor.u32 %v9878_v5, %v7408_v4  ;;  %v9877_v13 = vld [vmem:[%s13261_s1 + $0x84] sm:$0xf]  ;;  %v7173_v15 = vor.u32 %v9897_v2, %v7170_v6  ;;  %v7176_v18 = vld [vmem:[%s13260_s0 + $0x78] sm:$0xf] }
 0x1f4   :  { %1604 = vmatpush.bf16.msrb.mxu0 %v7377_v20  ;;  %v7410_v14 = vld [vmem:[%s13261_s1 + $0x88] sm:$0xf0]  ;;  %v7349_v16 = vor.u32 %v9861_v7, %v7346_v8  ;;  %v9900_v19 = vld [vmem:[%s13260_s0 + $0x7c] sm:$0xf0]  ;;  %v9899_v20 = vld [vmem:[%s13260_s0 + $0x7c] sm:$0xf] }
 0x1f5   :  { %1633 = vmatpush.bf16.msrb.mxu1 %v7441_v22  ;;  %v7413_v17 = vor.u32 %v9877_v13, %v7410_v14  ;;  %v7177_v22 = vor.u32 %v9900_v19, %v7176_v18  ;;  %v7312_v24 = vld [vmem:[%s13260_s0] sm:$0xf]  ;;  %v7592_v30 = vld [vmem:[%s13261_s1 + $0x270] sm:$0xf]  ;;  %v9972_v34 = vld [vmem:[%s13261_s1 + $0x2f4] sm:$0xf0] }
 0x1f6   :  { %1662 = vmatpush.bf16.msrb.mxu2 %v7381_v26  ;;  %v9853_v26 = vld [vmem:[%s13260_s0 + $0x4] sm:$0xf]  ;;  %v7656_v32 = vld [vmem:[%s13261_s1 + $0x2f0] sm:$0xf]  ;;  %v9971_v39 = vld [vmem:[%s13261_s1 + $0x2f4] sm:$0xf] }
 0x1f7   :  { %1298 = vmatmul.bf16.gmra.mxu0 %v7161_v21  ;;  %1691 = vmatpush.bf16.msrb.mxu3 %v7445_v27  ;;  %v7314_v27 = vld [vmem:[%s13260_s0 + $0x8] sm:$0xf0]  ;;  %v7657_v37 = vor.u32 %v9972_v34, %v7656_v32  ;;  %v7584_v41 = vld [vmem:[%s13261_s1 + $0x260] sm:$0xf]  ;;  %v9954_v43 = vld [vmem:[%s13261_s1 + $0x264] sm:$0xf0] }
 0x1f8   :  { %1327 = vmatmul.bf16.gmra.mxu1 %v7165_v25  ;;  %1605 = vmatpush.bf16.msrb.mxu0 %v7369_v31  ;;  %v7317_v29 = vor.u32 %v9853_v26, %v7314_v27  ;;  %v9956_v31 = vld [vmem:[%s13261_s1 + $0x274] sm:$0xf0]  ;;  %v7585_v46 = vor.u32 %v9954_v43, %v7584_v41  ;;  %v9953_v48 = vld [vmem:[%s13261_s1 + $0x264] sm:$0xf]  ;;  %v7650_v52 = vld [vmem:[%s13261_s1 + $0x2e8] sm:$0xf0] }
 0x1f9   :  { %1356 = vmatmul.bf16.gmra.mxu2 %v7161_v21  ;;  %1634 = vmatpush.bf16.msrb.mxu1 %v7433_v35  ;;  %v7178_v21 = vld [vmem:[%s13260_s0 + $0x80] sm:$0xf0]  ;;  %v7593_v33 = vor.u32 %v9956_v31, %v7592_v30  ;;  %v9955_v35 = vld [vmem:[%s13261_s1 + $0x274] sm:$0xf]  ;;  %v7576_v53 = vld [vmem:[%s13261_s1 + $0x250] sm:$0xf] }
 0x1fa   :  { %1385 = vmatmul.bf16.gmra.mxu3 %v7165_v25  ;;  %1663 = vmatpush.bf16.msrb.mxu2 %v7373_v36  ;;  %v7181_v23 = vor.u32 %v9899_v20, %v7178_v21  ;;  %v9854_v25 = vld [vmem:[%s13260_s0 + $0x4] sm:$0xf0]  ;;  %v7594_v36 = vld [vmem:[%s13261_s1 + $0x278] sm:$0xf0]  ;;  %v9969_v50 = vld [vmem:[%s13261_s1 + $0x2e4] sm:$0xf] }
 0x1fb   :  { %1692 = vmatpush.bf16.msrb.mxu3 %v7437_v40  ;;  %v7313_v28 = vor.u32 %v9854_v25, %v7312_v24  ;;  %v7597_v38 = vor.u32 %v9955_v35, %v7594_v36  ;;  %v7658_v40 = vld [vmem:[%s13261_s1 + $0x2f8] sm:$0xf0]  ;;  %v9952_v54 = vld [vmem:[%s13261_s1 + $0x254] sm:$0xf0]  ;;  %v7653_v55 = vor.u32 %v9969_v50, %v7650_v52  ;;  %v7640_v56 = vld [vmem:[%s13261_s1 + $0x2d0] sm:$0xf] }
 0x1fc   :  { %1606 = vmatpush.bf16.msrb.mxu0 %v7361_v44  ;;  %v7661_v42 = vor.u32 %v9971_v39, %v7658_v40  ;;  %v7648_v44 = vld [vmem:[%s13261_s1 + $0x2e0] sm:$0xf]  ;;  %v9968_v57 = vld [vmem:[%s13261_s1 + $0x2d4] sm:$0xf0]  ;;  %v7577_v60 = vor.u32 %v9952_v54, %v7576_v53  ;;  %v7578_v61 = vld [vmem:[%s13261_s1 + $0x258] sm:$0xf0] }
 0x1fd   :  { %1635 = vmatpush.bf16.msrb.mxu1 %v7425_v45  ;;  %v9970_v45 = vld [vmem:[%s13261_s1 + $0x2e4] sm:$0xf0]  ;;  %v7642_v63 = vld [vmem:[%s13261_s1 + $0x2d8] sm:$0xf0]  ;;  %v9856_v0 = vld [vmem:[%s13260_s0 + $0x14] sm:$0xf0]  ;;  %v7641_v1 = vor.u32 %v9968_v57, %v7640_v56 }
 0x1fe   :  { %1664 = vmatpush.bf16.msrb.mxu2 %v7365_v49  ;;  %v7649_v47 = vor.u32 %v9970_v45, %v7648_v44  ;;  %v7586_v49 = vld [vmem:[%s13261_s1 + $0x268] sm:$0xf0]  ;;  %v9950_v4 = vld [vmem:[%s13261_s1 + $0x244] sm:$0xf0]  ;;  %v9855_v5 = vld [vmem:[%s13260_s0 + $0x14] sm:$0xf] }
 0x1ff   :  { %1693 = vmatpush.bf16.msrb.mxu3 %v7429_v58  ;;  %v7589_v51 = vor.u32 %v9953_v48, %v7586_v49  ;;  %v9951_v58 = vld [vmem:[%s13261_s1 + $0x254] sm:$0xf]  ;;  %v7632_v7 = vld [vmem:[%s13261_s1 + $0x2c0] sm:$0xf]  ;;  %v9966_v8 = vld [vmem:[%s13261_s1 + $0x2c4] sm:$0xf0] }
 0x200   :  { %1607 = vmatpush.bf16.msrb.mxu0 %v7353_v59  ;;  %v7320_v59 = vld [vmem:[%s13260_s0 + $0x10] sm:$0xf]  ;;  %v7581_v2 = vor.u32 %v9951_v58, %v7578_v61  ;;  %v7633_v14 = vor.u32 %v9966_v8, %v7632_v7  ;;  %v9948_v21 = vld [vmem:[%s13261_s1 + $0x234] sm:$0xf0]  ;;  %v9947_v25 = vld [vmem:[%s13261_s1 + $0x234] sm:$0xf] }
 0x201   :  { %1636 = vmatpush.bf16.msrb.mxu1 %v7417_v62  ;;  %v9967_v62 = vld [vmem:[%s13261_s1 + $0x2d4] sm:$0xf]  ;;  %v7321_v13 = vor.u32 %v9856_v0, %v7320_v59  ;;  %v7560_v20 = vld [vmem:[%s13261_s1 + $0x230] sm:$0xf]  ;;  %v9964_v24 = vld [vmem:[%s13261_s1 + $0x2b4] sm:$0xf0] }
 0x202   :  { %1665 = vmatpush.bf16.msrb.mxu2 %v7357_v3  ;;  %v7568_v3 = vld [vmem:[%s13261_s1 + $0x240] sm:$0xf]  ;;  %v7645_v6 = vor.u32 %v9967_v62, %v7642_v63  ;;  %v7562_v26 = vld [vmem:[%s13261_s1 + $0x238] sm:$0xf0]  ;;  %v9962_v35 = vld [vmem:[%s13261_s1 + $0x2a4] sm:$0xf0] }
 0x203   :  { %1694 = vmatpush.bf16.msrb.mxu3 %v7421_v9  ;;  %v7322_v9 = vld [vmem:[%s13260_s0 + $0x18] sm:$0xf0]  ;;  %v7552_v31 = vld [vmem:[%s13261_s1 + $0x220] sm:$0xf]  ;;  %v7554_v39 = vld [vmem:[%s13261_s1 + $0x228] sm:$0xf0] }
 0x204   :  { %1608 = vmatpush.bf16.msrb.mxu0 %v7345_v10  ;;  %v9949_v10 = vld [vmem:[%s13261_s1 + $0x244] sm:$0xf]  ;;  %v7626_v30 = vld [vmem:[%s13261_s1 + $0x2b8] sm:$0xf0]  ;;  %v7616_v34 = vld [vmem:[%s13261_s1 + $0x2a0] sm:$0xf] }
 0x205   :  { %1637 = vmatpush.bf16.msrb.mxu1 %v7409_v12  ;;  %v7569_v12 = vor.u32 %v9950_v4, %v7568_v3  ;;  %v9961_v40 = vld [vmem:[%s13261_s1 + $0x2a4] sm:$0xf]  ;;  %v7544_v43 = vld [vmem:[%s13261_s1 + $0x210] sm:$0xf]  ;;  %v9944_v44 = vld [vmem:[%s13261_s1 + $0x214] sm:$0xf0] }
 0x206   :  { %1666 = vmatpush.bf16.msrb.mxu2 %v7349_v16  ;;  %v7634_v16 = vld [vmem:[%s13261_s1 + $0x2c8] sm:$0xf0]  ;;  %v7608_v45 = vld [vmem:[%s13261_s1 + $0x290] sm:$0xf]  ;;  %v7545_v49 = vor.u32 %v9944_v44, %v7544_v43  ;;  %v7546_v50 = vld [vmem:[%s13261_s1 + $0x218] sm:$0xf0] }
 0x207   :  { %1303 = vmatmul.bf16.gmra.mxu0 %v7169_v11  ;;  %1695 = vmatpush.bf16.msrb.mxu3 %v7413_v17  ;;  %v7325_v17 = vor.u32 %v9855_v5, %v7322_v9  ;;  %v9959_v52 = vld [vmem:[%s13261_s1 + $0x294] sm:$0xf]  ;;  %v7610_v53 = vld [vmem:[%s13261_s1 + $0x298] sm:$0xf0]  ;;  %v7328_v54 = vld [vmem:[%s13260_s0 + $0x20] sm:$0xf] }
 0x208   :  { %1332 = vmatmul.bf16.gmra.mxu1 %v7173_v15  ;;  %1983 = vmatpush.bf16.msra.mxu0 %v7593_v33  ;;  %v9946_v33 = vld [vmem:[%s13261_s1 + $0x224] sm:$0xf0]  ;;  %v9857_v57 = vld [vmem:[%s13260_s0 + $0x24] sm:$0xf]  ;;  %v7330_v58 = vld [vmem:[%s13260_s0 + $0x28] sm:$0xf0]  ;;  %v7613_v59 = vor.u32 %v9959_v52, %v7610_v53 }
 0x209   :  { %1361 = vmatmul.bf16.gmra.mxu2 %v7169_v11  ;;  %2012 = vmatpush.bf16.msra.mxu1 %v7657_v37  ;;  %v7570_v11 = vld [vmem:[%s13261_s1 + $0x248] sm:$0xf0]  ;;  %v7553_v36 = vor.u32 %v9946_v33, %v7552_v31  ;;  %v7617_v37 = vor.u32 %v9962_v35, %v7616_v34  ;;  %v7536_v61 = vld [vmem:[%s13261_s1 + $0x200] sm:$0xf]  ;;  %v9942_v62 = vld [vmem:[%s13261_s1 + $0x204] sm:$0xf0]  ;;  %v7333_v0 = vor.u32 %v9857_v57, %v7330_v58 }
 0x20a   :  { %1390 = vmatmul.bf16.gmra.mxu3 %v7173_v15  ;;  %2041 = vmatpush.bf16.msra.mxu2 %v7597_v38  ;;  %v9965_v15 = vld [vmem:[%s13261_s1 + $0x2c4] sm:$0xf]  ;;  %v7573_v18 = vor.u32 %v9949_v10, %v7570_v11  ;;  %v7600_v63 = vld [vmem:[%s13261_s1 + $0x280] sm:$0xf]  ;;  %v7538_v4 = vld [vmem:[%s13261_s1 + $0x208] sm:$0xf0] }
 0x20b   :  { %2070 = vmatpush.bf16.msra.mxu3 %v7661_v42  ;;  %v7637_v19 = vor.u32 %v9965_v15, %v7634_v16  ;;  %v9945_v38 = vld [vmem:[%s13261_s1 + $0x224] sm:$0xf]  ;;  %v7618_v42 = vld [vmem:[%s13261_s1 + $0x2a8] sm:$0xf0]  ;;  %v7336_v10 = vld [vmem:[%s13260_s0 + $0x30] sm:$0xf] }
 0x20c   :  { %1984 = vmatpush.bf16.msra.mxu0 %v7585_v46  ;;  %v7557_v41 = vor.u32 %v9945_v38, %v7554_v39  ;;  %v9960_v46 = vld [vmem:[%s13261_s1 + $0x294] sm:$0xf0]  ;;  %v7621_v48 = vor.u32 %v9961_v40, %v7618_v42  ;;  %v9941_v3 = vld [vmem:[%s13261_s1 + $0x204] sm:$0xf]  ;;  %v7602_v8 = vld [vmem:[%s13261_s1 + $0x288] sm:$0xf0] }
 0x20d   :  { %2013 = vmatpush.bf16.msra.mxu1 %v7649_v47  ;;  %v9943_v47 = vld [vmem:[%s13261_s1 + $0x214] sm:$0xf]  ;;  %v9957_v7 = vld [vmem:[%s13261_s1 + $0x284] sm:$0xf]  ;;  %v9860_v11 = vld [vmem:[%s13260_s0 + $0x34] sm:$0xf0] }
 0x20e   :  { %2042 = vmatpush.bf16.msra.mxu2 %v7589_v51  ;;  %v7609_v51 = vor.u32 %v9960_v46, %v7608_v45  ;;  %v7549_v56 = vor.u32 %v9943_v47, %v7546_v50  ;;  %v7605_v9 = vor.u32 %v9957_v7, %v7602_v8  ;;  %v7504_v16 = vld [vmem:[%s13260_s0] sm:$0xe]  ;;  %vm1796_vm0 = vcmask 1046528   ;;  %v9938_v38 = vld [vmem:[%s13260_s0 + $0x24] sm:$0xf0] }
 0x20f   :  { %2071 = vmatpush.bf16.msra.mxu3 %v7653_v55  ;;  %v9858_v55 = vld [vmem:[%s13260_s0 + $0x24] sm:$0xf0]  ;;  %v7793_v39 = vld [vmem:[%s13261_s1 + $0x370] sm:$0xf]  ;;  %v9996_v40 = vld [vmem:[%s13261_s1 + $0x374] sm:$0xf0] }
 0x210   :  { %1985 = vmatpush.bf16.msra.mxu0 %v7577_v60  ;;  %v7329_v60 = vor.u32 %v9858_v55, %v7328_v54  ;;  %v7857_v42 = vld [vmem:[%s13261_s1 + $0x3f0] sm:$0xf]  ;;  %v10012_v43 = vld [vmem:[%s13261_s1 + $0x3f4] sm:$0xf0]  ;;  %v9995_v44 = vld [vmem:[%s13261_s1 + $0x374] sm:$0xf] }
 0x211   :  { %2014 = vmatpush.bf16.msra.mxu1 %v7641_v1  ;;  %v7537_v1 = vor.u32 %v9942_v62, %v7536_v61  ;;  %v7858_v45 = vor.u32 %v10012_v43, %v7857_v42  ;;  %v7795_v46 = vld [vmem:[%s13261_s1 + $0x378] sm:$0xf0]  ;;  %v10011_v47 = vld [vmem:[%s13261_s1 + $0x3f4] sm:$0xf]  ;;  %v7522_v50 = vld [vmem:[%s13260_s0 + $0x28] sm:$0xf0] }
 0x212   :  { %2043 = vmatpush.bf16.msra.mxu2 %v7581_v2  ;;  %v9958_v2 = vld [vmem:[%s13261_s1 + $0x284] sm:$0xf0]  ;;  %v7785_v53 = vld [vmem:[%s13261_s1 + $0x360] sm:$0xf]  ;;  %v9993_v61 = vld [vmem:[%s13261_s1 + $0x364] sm:$0xf] }
 0x213   :  { %2072 = vmatpush.bf16.msra.mxu3 %v7645_v6  ;;  %v7601_v5 = vor.u32 %v9958_v2, %v7600_v63  ;;  %v7541_v6 = vor.u32 %v9941_v3, %v7538_v4  ;;  %v9994_v54 = vld [vmem:[%s13261_s1 + $0x364] sm:$0xf0]  ;;  %v7849_v55 = vld [vmem:[%s13261_s1 + $0x3e0] sm:$0xf]  ;;  %v7787_v62 = vld [vmem:[%s13261_s1 + $0x368] sm:$0xf0] }
 0x214   :  { %1986 = vmatpush.bf16.msra.mxu0 %v7569_v12  ;;  %v9859_v12 = vld [vmem:[%s13260_s0 + $0x34] sm:$0xf]  ;;  %v7790_v4 = vor.u32 %v9993_v61, %v7787_v62  ;;  %v7835_v42 = vld [vmem:[%s13261_s1 + $0x3c8] sm:$0xf0]  ;;  %v9986_v61 = vld [vmem:[%s13261_s1 + $0x324] sm:$0xf0] }
 0x215   :  { %2015 = vmatpush.bf16.msra.mxu1 %v7633_v14  ;;  %v7337_v14 = vor.u32 %v9860_v11, %v7336_v10  ;;  %v9992_v10 = vld [vmem:[%s13261_s1 + $0x354] sm:$0xf0]  ;;  %v7841_v11 = vld [vmem:[%s13261_s1 + $0x3d0] sm:$0xf]  ;;  %v7817_v62 = vld [vmem:[%s13261_s1 + $0x3a0] sm:$0xf] }
 0x216   :  { %2044 = vmatpush.bf16.msra.mxu2 %v7573_v18  ;;  %v7512_v18 = vld [vmem:[%s13260_s0 + $0x10] sm:$0xf] }
 0x217   :  { %1308 = vmatmul.bf16.gmra.mxu0 %v7177_v22  ;;  %2073 = vmatpush.bf16.msra.mxu3 %v7637_v19  ;;  %v9936_v19 = vld [vmem:[%s13260_s0 + $0x14] sm:$0xf0] }
 0x218   :  { %1337 = vmatmul.bf16.gmra.mxu1 %v7181_v23 }
 0x219   :  { %1366 = vmatmul.bf16.gmra.mxu2 %v7177_v22  ;;  %v7624_v22 = vld [vmem:[%s13261_s1 + $0x2b0] sm:$0xf] }
 0x21a   :  { %1395 = vmatmul.bf16.gmra.mxu3 %v7181_v23  ;;  %v7561_v23 = vor.u32 %v9948_v21, %v7560_v20  ;;  %v7625_v27 = vor.u32 %v9964_v24, %v7624_v22  ;;  %v9933_v20 = vld [vmem:[%s13260_s0 + $0x4] sm:$0xe]  ;;  %v7506_v21 = vld [vmem:[%s13260_s0 + $0x8] sm:$0xf0]  ;;  %v9935_v22 = vld [vmem:[%s13260_s0 + $0x14] sm:$0xf] }
 0x21c   :  { %1987 = vmatpush.bf16.msra.mxu0 %v7561_v23  ;;  %2016 = vmatpush.bf16.msra.mxu1 %v7625_v27  ;;  %v7514_v23 = vld [vmem:[%s13260_s0 + $0x18] sm:$0xf0] }
 0x21d   :  { %v7517_v27 = vor.u32 %v9935_v22, %v7514_v23  ;;  %v7769_v23 = vld [vmem:[%s13261_s1 + $0x340] sm:$0xf] }
 0x21f   :  { %v12629_v31 = vrot.slane %v7517_v27, 1 }
 0x220   :  { %1988 = vmatpush.bf16.msra.mxu0 %v7553_v36  ;;  %2017 = vmatpush.bf16.msra.mxu1 %v7617_v37  ;;  %v7520_v37 = vld [vmem:[%s13260_s0 + $0x20] sm:$0xf] }
 0x221   :  { %v7521_v58 = vor.u32 %v9938_v38, %v7520_v37 }
 0x224   :  { %1989 = vmatpush.bf16.msra.mxu0 %v7545_v49  ;;  %2018 = vmatpush.bf16.msra.mxu1 %v7609_v51  ;;  %v9937_v49 = vld [vmem:[%s13260_s0 + $0x24] sm:$0xf]  ;;  %v7798_v51 = vor.u32 %v9995_v44, %v7795_v46  ;;  %v9988_v46 = vld [vmem:[%s13261_s1 + $0x334] sm:$0xf0] }
 0x225   :  { %v7525_v2 = vor.u32 %v9937_v49, %v7522_v50  ;;  %v10004_v49 = vld [vmem:[%s13261_s1 + $0x3b4] sm:$0xf0]  ;;  %v9987_v50 = vld [vmem:[%s13261_s1 + $0x334] sm:$0xf] }
 0x227   :  { %1609 = vmatmul.bf16.vlgmr.msrb.gmra.mxu0 %v7313_v28 }
 0x228   :  { %1638 = vmatmul.bf16.vlgmr.msrb.gmra.mxu1 %v7317_v29  ;;  %1990 = vmatpush.bf16.msra.mxu0 %v7537_v1 }
 0x229   :  { %1667 = vmatmul.bf16.vlgmr.msrb.gmra.mxu2 %v7313_v28  ;;  %v7565_v28 = vor.u32 %v9947_v25, %v7562_v26  ;;  %2019 = vmatpush.bf16.msra.mxu1 %v7601_v5  ;;  %v7513_v25 = vor.u32 %v9936_v19, %v7512_v18  ;;  %v7509_v26 = vor.u32 %v9933_v20, %v7506_v21  ;;  %v10009_v5 = vld [vmem:[%s13261_s1 + $0x3e4] sm:$0xf]  ;;  %v10007_v19 = vld [vmem:[%s13261_s1 + $0x3d4] sm:$0xf]  ;;  %v7843_v20 = vld [vmem:[%s13261_s1 + $0x3d8] sm:$0xf0] }
 0x22a   :  { %1696 = vmatmul.bf16.vlgmr.msrb.gmra.mxu3 %v7317_v29  ;;  %v9963_v29 = vld [vmem:[%s13261_s1 + $0x2b4] sm:$0xf]  ;;  %v12727_v21 = vrot.slane %v7525_v2, 1  ;;  %v7846_v22 = vor.u32 %v10007_v19, %v7843_v20  ;;  %v7745_v19 = vld [vmem:[%s13261_s1 + $0x310] sm:$0xf] }
 0x22b   :  { %v7629_v32 = vor.u32 %v9963_v29, %v7626_v30  ;;  %2045 = vmatpush.bf16.msra.mxu2 %v7565_v28  ;;  %v12627_v29 = vrot.slane %v7513_v25, 1  ;;  %v1800_v30 = vrot.slane %v7509_v26, 1  ;;  %v7833_v25 = vld [vmem:[%s13261_s1 + $0x3c0] sm:$0xf]  ;;  %v9984_v20 = vld [vmem:[%s13261_s1 + $0x314] sm:$0xf0] }
 0x22d   :  { %2074 = vmatpush.bf16.msra.mxu3 %v7629_v32  ;;  %v1802_v35 = vsel %vm1796_vm0, %v1800_v30, %v12629_v31  ;;  %2409 = vmatpush.bf16.msrb.mxu1 %v7858_v45  ;;  %v7528_v45 = vld [vmem:[%s13260_s0 + $0x30] sm:$0xf] }
 0x22f   :  { %2046 = vmatpush.bf16.msra.mxu2 %v7557_v41  ;;  %v7794_v41 = vor.u32 %v9996_v40, %v7793_v39 }
 0x231   :  { %2075 = vmatpush.bf16.msra.mxu3 %v7621_v48  ;;  %v7859_v48 = vld [vmem:[%s13261_s1 + $0x3f8] sm:$0xf0]  ;;  %2380 = vmatpush.bf16.msrb.mxu0 %v7794_v41  ;;  %v10005_v41 = vld [vmem:[%s13261_s1 + $0x3c4] sm:$0xf] }
 0x232   :  { %v7862_v52 = vor.u32 %v10011_v47, %v7859_v48  ;;  %v7838_v44 = vor.u32 %v10005_v41, %v7835_v42  ;;  %v7825_v47 = vld [vmem:[%s13261_s1 + $0x3b0] sm:$0xf] }
 0x233   :  { %2047 = vmatpush.bf16.msra.mxu2 %v7549_v56 }
 0x235   :  { %2076 = vmatpush.bf16.msra.mxu3 %v7613_v59  ;;  %v7786_v59 = vor.u32 %v9994_v54, %v7785_v53  ;;  %v7826_v53 = vor.u32 %v10004_v49, %v7825_v47 }
 0x237   :  { %1614 = vmatmul.bf16.gmra.mxu0 %v7321_v13  ;;  %2048 = vmatpush.bf16.msra.mxu2 %v7541_v6  ;;  %v7851_v6 = vld [vmem:[%s13261_s1 + $0x3e8] sm:$0xf0] }
 0x238   :  { %1643 = vmatmul.bf16.gmra.mxu1 %v7325_v17  ;;  %2381 = vmatpush.bf16.msrb.mxu0 %v7786_v59  ;;  %v7854_v8 = vor.u32 %v10009_v5, %v7851_v6  ;;  %v9985_v5 = vld [vmem:[%s13261_s1 + $0x324] sm:$0xf]  ;;  %v7755_v6 = vld [vmem:[%s13261_s1 + $0x328] sm:$0xf0] }
 0x239   :  { %1672 = vmatmul.bf16.gmra.mxu2 %v7321_v13  ;;  %2077 = vmatpush.bf16.msra.mxu3 %v7605_v9  ;;  %v7338_v13 = vld [vmem:[%s13260_s0 + $0x38] sm:$0xf0]  ;;  %v7777_v9 = vld [vmem:[%s13261_s1 + $0x350] sm:$0xf] }
 0x23a   :  { %1701 = vmatmul.bf16.gmra.mxu3 %v7325_v17  ;;  %v7341_v15 = vor.u32 %v9859_v12, %v7338_v13  ;;  %v9934_v17 = vld [vmem:[%s13260_s0 + $0x4] sm:$0xf0]  ;;  %v7778_v12 = vor.u32 %v9992_v10, %v7777_v9  ;;  %v10008_v13 = vld [vmem:[%s13261_s1 + $0x3d4] sm:$0xf0] }
 0x23b   :  { %v7505_v24 = vor.u32 %v9934_v17, %v7504_v16  ;;  %2438 = vmatpush.bf16.msrb.mxu2 %v7798_v51  ;;  %v12719_v16 = vrot.slane %v7521_v58, 1  ;;  %v7842_v17 = vor.u32 %v10008_v13, %v7841_v11  ;;  %v7763_v51 = vld [vmem:[%s13261_s1 + $0x338] sm:$0xf0]  ;;  %v7758_v13 = vor.u32 %v9985_v5, %v7755_v6 }
 0x23c   :  { %2382 = vmatpush.bf16.msrb.mxu0 %v7778_v12  ;;  %v7766_v54 = vor.u32 %v9987_v50, %v7763_v51  ;;  %v7530_v58 = vld [vmem:[%s13260_s0 + $0x38] sm:$0xf0]  ;;  %v1725_v50 = vld [vmem:[%s13260_s0 + $0x40] sm:$0x11] }
 0x23d   :  { %v1797_v28 = vrot.slane %v7505_v24, 1  ;;  %2467 = vmatpush.bf16.msrb.mxu3 %v7862_v52  ;;  %v9990_v24 = vld [vmem:[%s13261_s1 + $0x344] sm:$0xf0]  ;;  %v9940_v52 = vld [vmem:[%s13260_s0 + $0x34] sm:$0xf0] }
 0x23e   :  { %v7770_v30 = vor.u32 %v9990_v24, %v7769_v23  ;;  %v7529_v2 = vor.u32 %v9940_v52, %v7528_v45  ;;  %v7746_v23 = vor.u32 %v9984_v20, %v7745_v19  ;;  %v10000_v24 = vld [vmem:[%s13261_s1 + $0x394] sm:$0xf0]  ;;  %v9998_v45 = vld [vmem:[%s13261_s1 + $0x384] sm:$0xf0]  ;;  %v9976_v20 = vld [vmem:[%s13260_s0 + $0x5c] sm:$0xf0] }
 0x23f   :  { %v1799_v33 = vsel %vm1796_vm0, %v1797_v28, %v12627_v29  ;;  %2439 = vmatpush.bf16.msrb.mxu2 %v7790_v4  ;;  %v1804_v28 = vsel %vm1796_vm0, %v12627_v29, %v12719_v16  ;;  %v1806_v29 = vsel %vm1796_vm0, %v12629_v31, %v12727_v21  ;;  %v7761_v31 = vld [vmem:[%s13261_s1 + $0x330] sm:$0xf]  ;;  %v10002_v4 = vld [vmem:[%s13261_s1 + $0x3a4] sm:$0xf0]  ;;  %v7713_v19 = vld [vmem:[%s13260_s0 + $0x58] sm:$0xf] }
 0x240   :  { %2383 = vmatpush.bf16.msrb.mxu0 %v7770_v30  ;;  %v7762_v48 = vor.u32 %v9988_v46, %v7761_v31  ;;  %v7818_v12 = vor.u32 %v10002_v4, %v7817_v62  ;;  %v9981_v31 = vld [vmem:[%s13261_s1 + $0x304] sm:$0xf]  ;;  %v7739_v46 = vld [vmem:[%s13261_s1 + $0x308] sm:$0xf0] }
 0x241   :  { %2468 = vmatpush.bf16.msrb.mxu3 %v7854_v8  ;;  %v7742_v52 = vor.u32 %v9981_v31, %v7739_v46 }
 0x244   :  { %2384 = vmatpush.bf16.msrb.mxu0 %v7762_v48 }
 0x245   :  { %2469 = vmatpush.bf16.msrb.mxu3 %v7846_v22  ;;  %v7809_v22 = vld [vmem:[%s13261_s1 + $0x390] sm:$0xf] }
 0x247   :  { %1619 = vmatmul.bf16.gmra.mxu0 %v7329_v60 }
 0x248   :  { %1648 = vmatmul.bf16.gmra.mxu1 %v7333_v0 }
 0x249   :  { %1677 = vmatmul.bf16.gmra.mxu2 %v7329_v60  ;;  %v10010_v60 = vld [vmem:[%s13261_s1 + $0x3e4] sm:$0xf0]  ;;  %2470 = vmatpush.bf16.msrb.mxu3 %v7838_v44 }
 0x24a   :  { %1706 = vmatmul.bf16.gmra.mxu3 %v7333_v0  ;;  %v7850_v3 = vor.u32 %v10010_v60, %v7849_v55  ;;  %v10003_v55 = vld [vmem:[%s13261_s1 + $0x3b4] sm:$0xf]  ;;  %v7753_v60 = vld [vmem:[%s13261_s1 + $0x320] sm:$0xf] }
 0x24c   :  { %2410 = vmatpush.bf16.msrb.mxu1 %v7850_v3  ;;  %v7754_v3 = vor.u32 %v9986_v61, %v7753_v60 }
 0x24e   :  { %2385 = vmatpush.bf16.msrb.mxu0 %v7754_v3 }
 0x250   :  { %2411 = vmatpush.bf16.msrb.mxu1 %v7842_v17 }
 0x252   :  { %2386 = vmatpush.bf16.msrb.mxu0 %v7746_v23  ;;  %v7707_v23 = vld [vmem:[%s13260_s0 + $0x50] sm:$0xf0] }
 0x257   :  { %1624 = vmatmul.bf16.gmra.mxu0 %v7337_v14 }
 0x258   :  { %1653 = vmatmul.bf16.gmra.mxu1 %v7341_v15 }
 0x259   :  { %1682 = vmatmul.bf16.gmra.mxu2 %v7337_v14  ;;  %v9991_v14 = vld [vmem:[%s13261_s1 + $0x354] sm:$0xf] }
 0x25a   :  { %1711 = vmatmul.bf16.gmra.mxu3 %v7341_v15  ;;  %v7779_v15 = vld [vmem:[%s13261_s1 + $0x358] sm:$0xf0] }
 0x25b   :  { %v7782_v18 = vor.u32 %v9991_v14, %v7779_v15  ;;  %v10001_v14 = vld [vmem:[%s13261_s1 + $0x3a4] sm:$0xf]  ;;  %v7819_v15 = vld [vmem:[%s13261_s1 + $0x3a8] sm:$0xf0] }
 0x25d   :  { %2440 = vmatpush.bf16.msrb.mxu2 %v7782_v18  ;;  %v7822_v18 = vor.u32 %v10001_v14, %v7819_v15  ;;  %v7705_v15 = vld [vmem:[%s13260_s0 + $0x48] sm:$0xe] }
 0x264   :  { %v1294_v32 = vpop.f32.mrf.mxu0 }
 0x265   :  { %v1323_v34 = vpop.f32.mrf.mxu1 }
 0x266   :  { %v12635_v36 = vadd.f32 %v1323_v34, %v1294_v32  ;;  %v10006_v32 = vld [vmem:[%s13261_s1 + $0x3c4] sm:$0xf0]  ;;  %v7771_v34 = vld [vmem:[%s13261_s1 + $0x348] sm:$0xf0] }
 0x267   :  { %1991 = vmatmul.bf16.vlgmr.msra.gmra.mxu0 %v1799_v33  ;;  %v7834_v39 = vor.u32 %v10006_v32, %v7833_v25  ;;  %v9983_v25 = vld [vmem:[%s13261_s1 + $0x314] sm:$0xf] }
 0x268   :  { %2020 = vmatmul.bf16.vlgmr.msra.gmra.mxu1 %v1802_v35  ;;  %v9999_v32 = vld [vmem:[%s13261_s1 + $0x394] sm:$0xf] }
 0x269   :  { %2049 = vmatmul.bf16.vlgmr.msra.gmra.mxu2 %v1799_v33  ;;  %v9989_v33 = vld [vmem:[%s13261_s1 + $0x344] sm:$0xf]  ;;  %2412 = vmatpush.bf16.msrb.mxu1 %v7834_v39  ;;  %v7801_v39 = vld [vmem:[%s13261_s1 + $0x380] sm:$0xf] }
 0x26a   :  { %2078 = vmatmul.bf16.vlgmr.msra.gmra.mxu3 %v1802_v35  ;;  %v7774_v40 = vor.u32 %v9989_v33, %v7771_v34  ;;  %v7811_v33 = vld [vmem:[%s13261_s1 + $0x398] sm:$0xf0]  ;;  %v7802_v51 = vor.u32 %v9998_v45, %v7801_v39 }
 0x26c   :  { %v1352_v56 = vpop.f32.mrf.mxu2  ;;  %v1296_v0 = vpop.f32.mrf.mxu0  ;;  %2441 = vmatpush.bf16.msrb.mxu2 %v7774_v40 }
 0x26d   :  { %v1381_v57 = vpop.f32.mrf.mxu3  ;;  %v1325_v1 = vpop.f32.mrf.mxu1  ;;  %2413 = vmatpush.bf16.msrb.mxu1 %v7826_v53  ;;  %v9997_v53 = vld [vmem:[%s13261_s1 + $0x384] sm:$0xf] }
 0x26e   :  { %v12691_v63 = vadd.f32 %v1381_v57, %v1352_v56  ;;  %v12699_v7 = vadd.f32 %v1325_v1, %v1296_v0  ;;  %v7827_v56 = vld [vmem:[%s13261_s1 + $0x3b8] sm:$0xf0]  ;;  %v9939_v57 = vld [vmem:[%s13260_s0 + $0x34] sm:$0xf] }
 0x26f   :  { %v7830_v59 = vor.u32 %v10003_v55, %v7827_v56  ;;  %v7533_v11 = vor.u32 %v9939_v57, %v7530_v58  ;;  %v1785_v57 = vunpack.c.h.b16 %v1725_v50 }
 0x270   :  { %2442 = vmatpush.bf16.msrb.mxu2 %v7766_v54  ;;  %v7803_v54 = vld [vmem:[%s13261_s1 + $0x388] sm:$0xf0] }
 0x271   :  { %2471 = vmatpush.bf16.msrb.mxu3 %v7830_v59  ;;  %2414 = vmatpush.bf16.msrb.mxu1 %v7818_v12  ;;  %v1809_v34 = vrot.slane %v7533_v11, 1  ;;  %v7806_v56 = vor.u32 %v9997_v53, %v7803_v54  ;;  %v9978_v53 = vld [vmem:[%s13260_s0 + $0x6c] sm:$0xf0]  ;;  %v9977_v54 = vld [vmem:[%s13260_s0 + $0x6c] sm:$0xf] }
 0x274   :  { %v1354_v26 = vpop.f32.mrf.mxu2  ;;  %v1299_v37 = vpop.f32.mrf.mxu0  ;;  %2443 = vmatpush.bf16.msrb.mxu2 %v7758_v13 }
 0x275   :  { %v1383_v27 = vpop.f32.mrf.mxu3  ;;  %v1328_v38 = vpop.f32.mrf.mxu1  ;;  %2472 = vmatpush.bf16.msrb.mxu3 %v7822_v18  ;;  %v9974_v18 = vld [vmem:[%s13260_s0 + $0x4c] sm:$0xf0] }
 0x276   :  { %v12750_v35 = vadd.f32 %v1383_v27, %v1354_v26  ;;  %v12761_v43 = vadd.f32 %v1328_v38, %v1299_v37  ;;  %v7747_v26 = vld [vmem:[%s13261_s1 + $0x318] sm:$0xf0]  ;;  %v1807_v27 = vrot.slane %v7529_v2, 1  ;;  %v7814_v37 = vor.u32 %v9999_v32, %v7811_v33  ;;  %v7737_v38 = vld [vmem:[%s13261_s1 + $0x300] sm:$0xf] }
 0x277   :  { %1996 = vmatmul.bf16.gmra.mxu0 %v1804_v28  ;;  %v7750_v30 = vor.u32 %v9983_v25, %v7747_v26  ;;  %v7715_v25 = vld [vmem:[%s13260_s0 + $0x60] sm:$0xf0] }
 0x278   :  { %2025 = vmatmul.bf16.gmra.mxu1 %v1806_v29  ;;  %v1808_v42 = vsel %vm1796_vm0, %v12719_v16, %v1807_v27  ;;  %v1810_v16 = vsel %vm1796_vm0, %v12727_v21, %v1809_v34  ;;  %v1784_v21 = vunpack.c.l.b16 %v1725_v50 }
 0x279   :  { %2054 = vmatmul.bf16.gmra.mxu2 %v1804_v28  ;;  %v7810_v28 = vor.u32 %v10000_v24, %v7809_v22  ;;  %2473 = vmatpush.bf16.msrb.mxu3 %v7814_v37  ;;  %v9973_v22 = vld [vmem:[%s13260_s0 + $0x4c] sm:$0xe]  ;;  %v9975_v24 = vld [vmem:[%s13260_s0 + $0x5c] sm:$0xf] }
 0x27a   :  { %2083 = vmatmul.bf16.gmra.mxu3 %v1806_v29  ;;  %v9982_v29 = vld [vmem:[%s13261_s1 + $0x304] sm:$0xf0]  ;;  %2444 = vmatpush.bf16.msrb.mxu2 %v7750_v30  ;;  %v1794_v60 = vpack.c.b16 %v1784_v21, %v1784_v21  ;;  %v7714_v30 = vor.u32 %v9976_v20, %v7713_v19  ;;  %v7710_v37 = vor.u32 %v9973_v22, %v7707_v23  ;;  %v9979_v19 = vld [vmem:[%s13260_s0 + $0x7c] sm:$0xf] }
 0x27b   :  { %2415 = vmatpush.bf16.msrb.mxu1 %v7810_v28  ;;  %v7738_v44 = vor.u32 %v9982_v29, %v7737_v38  ;;  %v7706_v28 = vor.u32 %v9974_v18, %v7705_v15  ;;  %v7718_v38 = vor.u32 %v9975_v24, %v7715_v25  ;;  %v7729_v15 = vld [vmem:[%s13260_s0 + $0x78] sm:$0xf]  ;;  %v9980_v18 = vld [vmem:[%s13260_s0 + $0x7c] sm:$0xf0] }
 0x27c   :  { %v1357_v0 = vpop.f32.mrf.mxu2  ;;  %v1301_v9 = vpop.f32.mrf.mxu0  ;;  %v1811_v3 = vrot.slane %v1794_v60, 1  ;;  %v7730_v23 = vor.u32 %v9980_v18, %v7729_v15 }
 0x27d   :  { %v1386_v1 = vpop.f32.mrf.mxu3  ;;  %v1330_v10 = vpop.f32.mrf.mxu1  ;;  %2387 = vmatpush.bf16.msrb.mxu0 %v7738_v44  ;;  %2474 = vmatpush.bf16.msrb.mxu3 %v7806_v56  ;;  %v2194_v39 = vrot.slane %v7706_v28, 1 }
 0x27e   :  { %v12817_v8 = vadd.f32 %v1386_v1, %v1357_v0  ;;  %v12825_v17 = vadd.f32 %v1330_v10, %v1301_v9  ;;  %2445 = vmatpush.bf16.msrb.mxu2 %v7742_v52  ;;  %v1795_v1 = vpack.c.b16 %v1785_v57, %v1785_v57  ;;  %v1812_v9 = vsel %vm1796_vm0, %v1807_v27, %v1811_v3  ;;  %v7721_v52 = vld [vmem:[%s13260_s0 + $0x68] sm:$0xf] }
 0x27f   :  { %2416 = vmatpush.bf16.msrb.mxu1 %v7802_v51  ;;  %v7722_v57 = vor.u32 %v9978_v53, %v7721_v52 }
 0x280   :  { %v1813_v4 = vrot.slane %v1795_v1, 1 }
 0x281   :  { %v2200_v1 = vrot.slane %v7722_v57, 1 }
 0x282   :  { %v1814_v13 = vsel %vm1796_vm0, %v1809_v34, %v1813_v4 }
 0x284   :  { %v1359_v40 = vpop.f32.mrf.mxu2  ;;  %v1304_v48 = vpop.f32.mrf.mxu0 }
 0x285   :  { %v1388_v41 = vpop.f32.mrf.mxu3  ;;  %v1333_v49 = vpop.f32.mrf.mxu1 }
 0x286   :  { %v12871_v47 = vadd.f32 %v1388_v41, %v1359_v40  ;;  %v12884_v55 = vadd.f32 %v1333_v49, %v1304_v48  ;;  %v2195_v40 = vrot.slane %v7714_v30, 1  ;;  %v2197_v41 = vrot.slane %v7710_v37, 1 }
 0x287   :  { %2001 = vmatmul.bf16.gmra.mxu0 %v1808_v42  ;;  %v2204_v30 = vrot.slane %v7730_v23, 1 }
 0x288   :  { %2030 = vmatmul.bf16.gmra.mxu1 %v1810_v16  ;;  %v2196_v31 = vsel %vm1796_vm0, %v2194_v39, %v2195_v40 }
 0x289   :  { %2059 = vmatmul.bf16.gmra.mxu2 %v1808_v42  ;;  %v2198_v42 = vrot.slane %v7718_v38, 1  ;;  %v2205_v38 = vsel %vm1796_vm0, %v2200_v1, %v2204_v30 }
 0x28a   :  { %2088 = vmatmul.bf16.gmra.mxu3 %v1810_v16 }
 0x28b   :  { %v2199_v16 = vsel %vm1796_vm0, %v2197_v41, %v2198_v42 }
 0x28c   :  { %v1362_v58 = vpop.f32.mrf.mxu2  ;;  %v1306_v62 = vpop.f32.mrf.mxu0 }
 0x28d   :  { %v1391_v59 = vpop.f32.mrf.mxu3  ;;  %v1335_v0 = vpop.f32.mrf.mxu1 }
 0x28e   :  { %v12886_v61 = vadd.f32 %v1391_v59, %v1362_v58  ;;  %v12888_v2 = vadd.f32 %v1335_v0, %v1306_v62 }
 0x294   :  { %v1364_v5 = vpop.f32.mrf.mxu2  ;;  %v1309_v11 = vpop.f32.mrf.mxu0 }
 0x295   :  { %v1393_v6 = vpop.f32.mrf.mxu3  ;;  %v1338_v12 = vpop.f32.mrf.mxu1 }
 0x296   :  { %v12891_v10 = vadd.f32 %v1393_v6, %v1364_v5  ;;  %v12894_v14 = vadd.f32 %v1338_v12, %v1309_v11  ;;  %v2201_v6 = vsel %vm1796_vm0, %v2195_v40, %v2200_v1 }
 0x297   :  { %2006 = vmatmul.bf16.gmra.mxu0 %v1812_v9 }
 0x298   :  { %2035 = vmatmul.bf16.gmra.mxu1 %v1814_v13 }
 0x299   :  { %2064 = vmatmul.bf16.gmra.mxu2 %v1812_v9 }
 0x29a   :  { %2093 = vmatmul.bf16.gmra.mxu3 %v1814_v13 }
 0x29c   :  { %v1367_v26 = vpop.f32.mrf.mxu2  ;;  %v1311_v33 = vpop.f32.mrf.mxu0 }
 0x29d   :  { %v1396_v27 = vpop.f32.mrf.mxu3  ;;  %v1340_v34 = vpop.f32.mrf.mxu1 }
 0x29e   :  { %v12920_v32 = vadd.f32 %v1396_v27, %v1367_v26  ;;  %v12922_v29 = vadd.f32 %v1340_v34, %v1311_v33 }
 0x2a4   :  { %v1369_v44 = vpop.f32.mrf.mxu2  ;;  %v1610_v48 = vpop.f32.mrf.mxu0 }
 0x2a5   :  { %v1398_v45 = vpop.f32.mrf.mxu3  ;;  %v1639_v49 = vpop.f32.mrf.mxu1  ;;  %v1611_v50 = vadd.f32 %v1610_v48, %v12635_v36  ;;  %v7723_v36 = vld [vmem:[%s13260_s0 + $0x70] sm:$0xf0] }
 0x2a6   :  { %v12925_v46 = vadd.f32 %v1398_v45, %v1369_v44  ;;  %v7726_v62 = vor.u32 %v9977_v54, %v7723_v36 }
 0x2a7   :  { %2388 = vmatmul.bf16.vlgmr.msrb.gmra.mxu0 %v2196_v31  ;;  %v12929_v51 = vadd.f32 %v1639_v49, %v1611_v50 }
 0x2a8   :  { %2417 = vmatmul.bf16.vlgmr.msrb.gmra.mxu1 %v2199_v16  ;;  %v2202_v3 = vrot.slane %v7726_v62, 1 }
 0x2a9   :  { %2446 = vmatmul.bf16.vlgmr.msrb.gmra.mxu2 %v2196_v31 }
 0x2aa   :  { %2475 = vmatmul.bf16.vlgmr.msrb.gmra.mxu3 %v2199_v16  ;;  %v2203_v12 = vsel %vm1796_vm0, %v2198_v42, %v2202_v3 }
 0x2ac   :  { %v1668_v56 = vpop.f32.mrf.mxu2  ;;  %v12944_v59 = vpop.f32.mrf.mxu0 }
 0x2ad   :  { %v1697_v21 = vpop.f32.mrf.mxu3  ;;  %v1669_v58 = vadd.f32 %v1668_v56, %v12691_v63  ;;  %v12946_v60 = vpop.f32.mrf.mxu1 }
 0x2af   :  { %v12948_v0 = vadd.f32 %v1697_v21, %v1669_v58 }
 0x2b4   :  { %v12950_v4 = vpop.f32.mrf.mxu2  ;;  %v1615_v9 = vpop.f32.mrf.mxu0 }
 0x2b5   :  { %v12952_v5 = vpop.f32.mrf.mxu3  ;;  %v1644_v11 = vpop.f32.mrf.mxu1  ;;  %v1616_v63 = vadd.f32 %v1615_v9, %v12761_v43  ;;  %v7731_v43 = vld [vmem:[%s13260_s0 + $0x80] sm:$0xf0] }
 0x2b6   :  { %v7734_v27 = vor.u32 %v9979_v19, %v7731_v43 }
 0x2b7   :  { %2393 = vmatmul.bf16.gmra.mxu0 %v2201_v6  ;;  %v12957_v13 = vadd.f32 %v1644_v11, %v1616_v63 }
 0x2b8   :  { %2422 = vmatmul.bf16.gmra.mxu1 %v2203_v12  ;;  %v2206_v33 = vrot.slane %v7734_v27, 1 }
 0x2b9   :  { %2451 = vmatmul.bf16.gmra.mxu2 %v2201_v6 }
 0x2ba   :  { %2480 = vmatmul.bf16.gmra.mxu3 %v2203_v12  ;;  %v2207_v41 = vsel %vm1796_vm0, %v2202_v3, %v2206_v33 }
 0x2bc   :  { %v1673_v20 = vpop.f32.mrf.mxu2  ;;  %v12972_v25 = vpop.f32.mrf.mxu0 }
 0x2bd   :  { %v1702_v22 = vpop.f32.mrf.mxu3  ;;  %v1674_v24 = vadd.f32 %v1673_v20, %v12817_v8  ;;  %v12974_v26 = vpop.f32.mrf.mxu1  ;;  %v7670_v8 = vld [vmem:[%s13260_s0 + $0x88] sm:$0x11] }
 0x2be   :  { %v2182_v45 = vunpack.c.l.b16 %v7670_v8  ;;  %v2183_v31 = vunpack.c.h.b16 %v7670_v8 }
 0x2bf   :  { %v12976_v28 = vadd.f32 %v1702_v22, %v1674_v24 }
 0x2c0   :  { %v2192_v16 = vpack.c.b16 %v2182_v45, %v2182_v45  ;;  %v2193_v54 = vpack.c.b16 %v2183_v31, %v2183_v31 }
 0x2c2   :  { %v2210_v56 = vrot.slane %v2193_v54, 1 }
 0x2c4   :  { %v12978_v34 = vpop.f32.mrf.mxu2  ;;  %v1620_v39 = vpop.f32.mrf.mxu0  ;;  %v2211_v3 = vsel %vm1796_vm0, %v2206_v33, %v2210_v56 }
 0x2c5   :  { %v12980_v37 = vpop.f32.mrf.mxu3  ;;  %v1649_v40 = vpop.f32.mrf.mxu1  ;;  %v1621_v42 = vadd.f32 %v1620_v39, %v12884_v55  ;;  %v2208_v55 = vrot.slane %v2192_v16, 1 }
 0x2c7   :  { %2398 = vmatmul.bf16.gmra.mxu0 %v2205_v38  ;;  %v12988_v44 = vadd.f32 %v1649_v40, %v1621_v42  ;;  %v2209_v58 = vsel %vm1796_vm0, %v2204_v30, %v2208_v55 }
 0x2c8   :  { %2427 = vmatmul.bf16.gmra.mxu1 %v2207_v41 }
 0x2c9   :  { %2456 = vmatmul.bf16.gmra.mxu2 %v2205_v38 }
 0x2ca   :  { %2485 = vmatmul.bf16.gmra.mxu3 %v2207_v41 }
 0x2cc   :  { %v1678_v48 = vpop.f32.mrf.mxu2  ;;  %v12991_v52 = vpop.f32.mrf.mxu0 }
 0x2cd   :  { %v1707_v49 = vpop.f32.mrf.mxu3  ;;  %v1679_v50 = vadd.f32 %v1678_v48, %v12886_v61  ;;  %v12993_v53 = vpop.f32.mrf.mxu1 }
 0x2cf   :  { %v12995_v36 = vadd.f32 %v1707_v49, %v1679_v50 }
 0x2d4   :  { %v12997_v21 = vpop.f32.mrf.mxu2  ;;  %v1625_v62 = vpop.f32.mrf.mxu0 }
 0x2d5   :  { %v12999_v57 = vpop.f32.mrf.mxu3  ;;  %v1654_v1 = vpop.f32.mrf.mxu1  ;;  %v1626_v61 = vadd.f32 %v1625_v62, %v12894_v14 }
 0x2d7   :  { %2403 = vmatmul.bf16.gmra.mxu0 %v2209_v58  ;;  %v13004_v6 = vadd.f32 %v1654_v1, %v1626_v61 }
 0x2d8   :  { %2432 = vmatmul.bf16.gmra.mxu1 %v2211_v3 }
 0x2d9   :  { %2461 = vmatmul.bf16.gmra.mxu2 %v2209_v58 }
 0x2da   :  { %2490 = vmatmul.bf16.gmra.mxu3 %v2211_v3 }
 0x2dc   :  { %v1683_v9 = vpop.f32.mrf.mxu2  ;;  %v1627_v63 = vpop.f32.mrf.mxu0 }
 0x2dd   :  { %v1712_v11 = vpop.f32.mrf.mxu3  ;;  %v1684_v12 = vadd.f32 %v1683_v9, %v12920_v32  ;;  %v1656_v15 = vpop.f32.mrf.mxu1  ;;  %v1628_v18 = vadd.f32 %v1627_v63, %v12922_v29  ;;  %v1613_v32 = vadd.f32 %v12944_v59, %v12699_v7 }
 0x2df   :  { %v13008_v19 = vadd.f32 %v1712_v11, %v1684_v12  ;;  %v13010_v43 = vadd.f32 %v1656_v15, %v1628_v18  ;;  %v1642_v8 = vadd.f32 %v12946_v60, %v1613_v32 }
 0x2e4   :  { %v1685_v20 = vpop.f32.mrf.mxu2  ;;  %v1992_v23 = vpop.f32.mrf.mxu0 }
 0x2e5   :  { %v1714_v14 = vpop.f32.mrf.mxu3  ;;  %v1686_v22 = vadd.f32 %v1685_v20, %v12925_v46  ;;  %v2021_v24 = vpop.f32.mrf.mxu1 }
 0x2e6   :  { %v2022_v27 = vadd.f32 %v2021_v24, %v1992_v23 }
 0x2e7   :  { %v13013_v30 = vadd.f32 %v1714_v14, %v1686_v22 }
 0x2e8   :  { %v13016_v33 = vadd.f32 %v2022_v27, %v12929_v51  ;;  %v1671_v51 = vadd.f32 %v12950_v4, %v12750_v35 }
 0x2ea   :  { %v1700_v7 = vadd.f32 %v12952_v5, %v1671_v51 }
 0x2ec   :  { %v2050_v29 = vpop.f32.mrf.mxu2  ;;  %v1994_v40 = vpop.f32.mrf.mxu0 }
 0x2ed   :  { %v2079_v38 = vpop.f32.mrf.mxu3  ;;  %v2023_v41 = vpop.f32.mrf.mxu1 }
 0x2ee   :  { %v2080_v39 = vadd.f32 %v2079_v38, %v2050_v29  ;;  %v2024_v42 = vadd.f32 %v2023_v41, %v1994_v40 }
 0x2f0   :  { %v13022_v46 = vadd.f32 %v2080_v39, %v12948_v0  ;;  %v13024_v45 = vadd.f32 %v2024_v42, %v1642_v8  ;;  %v1618_v0 = vadd.f32 %v12972_v25, %v12825_v17 }
 0x2f2   :  { %v1647_v62 = vadd.f32 %v12974_v26, %v1618_v0 }
 0x2f4   :  { %v2052_v31 = vpop.f32.mrf.mxu2  ;;  %v1997_v49 = vpop.f32.mrf.mxu0 }
 0x2f5   :  { %v2081_v48 = vpop.f32.mrf.mxu3  ;;  %v2026_v16 = vpop.f32.mrf.mxu1 }
 0x2f6   :  { %v2082_v59 = vadd.f32 %v2081_v48, %v2052_v31  ;;  %v2027_v50 = vadd.f32 %v2026_v16, %v1997_v49 }
 0x2f8   :  { %v13029_v54 = vadd.f32 %v2082_v59, %v1700_v7  ;;  %v13032_v60 = vadd.f32 %v2027_v50, %v12957_v13  ;;  %v1676_v13 = vadd.f32 %v12978_v34, %v12871_v47 }
 0x2fa   :  { %v1705_v17 = vadd.f32 %v12980_v37, %v1676_v13 }
 0x2fc   :  { %v2055_v55 = vpop.f32.mrf.mxu2  ;;  %v1999_v35 = vpop.f32.mrf.mxu0 }
 0x2fd   :  { %v2084_v56 = vpop.f32.mrf.mxu3  ;;  %v2028_v4 = vpop.f32.mrf.mxu1 }
 0x2fe   :  { %v2085_v58 = vadd.f32 %v2084_v56, %v2055_v55  ;;  %v2029_v5 = vadd.f32 %v2028_v4, %v1999_v35 }
 0x300   :  { %v13038_v1 = vadd.f32 %v2085_v58, %v12976_v28  ;;  %v13040_v3 = vadd.f32 %v2029_v5, %v1647_v62  ;;  %v1623_v28 = vadd.f32 %v12991_v52, %v12888_v2 }
 0x302   :  { %v1652_v22 = vadd.f32 %v12993_v53, %v1623_v28 }
 0x304   :  { %v2057_v61 = vpop.f32.mrf.mxu2  ;;  %v2002_v11 = vpop.f32.mrf.mxu0 }
 0x305   :  { %v2086_v9 = vpop.f32.mrf.mxu3  ;;  %v2031_v12 = vpop.f32.mrf.mxu1 }
 0x306   :  { %v2087_v25 = vadd.f32 %v2086_v9, %v2057_v61  ;;  %v2032_v63 = vadd.f32 %v2031_v12, %v2002_v11 }
 0x308   :  { %v13045_v15 = vadd.f32 %v2087_v25, %v1705_v17  ;;  %v13048_v26 = vadd.f32 %v2032_v63, %v12988_v44  ;;  %v1681_v44 = vadd.f32 %v12997_v21, %v12891_v10 }
 0x30a   :  { %v1710_v2 = vadd.f32 %v12999_v57, %v1681_v44 }
 0x30c   :  { %v2060_v18 = vpop.f32.mrf.mxu2  ;;  %v2004_v47 = vpop.f32.mrf.mxu0 }
 0x30d   :  { %v2089_v20 = vpop.f32.mrf.mxu3  ;;  %v2033_v34 = vpop.f32.mrf.mxu1 }
 0x30e   :  { %v2090_v14 = vadd.f32 %v2089_v20, %v2060_v18  ;;  %v2034_v37 = vadd.f32 %v2033_v34, %v2004_v47 }
 0x310   :  { %v13054_v23 = vadd.f32 %v2090_v14, %v12995_v36  ;;  %v13056_v24 = vadd.f32 %v2034_v37, %v1652_v22 }
 0x314   :  { %v2062_v27 = vpop.f32.mrf.mxu2  ;;  %v2007_v29 = vpop.f32.mrf.mxu0 }
 0x315   :  { %v2091_v32 = vpop.f32.mrf.mxu3  ;;  %v2036_v38 = vpop.f32.mrf.mxu1 }
 0x316   :  { %v2092_v52 = vadd.f32 %v2091_v32, %v2062_v27  ;;  %v2037_v39 = vadd.f32 %v2036_v38, %v2007_v29 }
 0x318   :  { %v13061_v40 = vadd.f32 %v2092_v52, %v1710_v2  ;;  %v13064_v53 = vadd.f32 %v2037_v39, %v13004_v6  ;;  %v2512_v6 = vld [vmem:[%s13262_s2] sm:$0x3] }
 0x319   :  { %v13081_v49 = vperm.slane %v2512_v6, 0  ;;  %v13086_v62 = vperm.slane %v2512_v6, 1 }
 0x31c   :  { %v2065_v36 = vpop.f32.mrf.mxu2  ;;  %v13066_v42 = vpop.f32.mrf.mxu0 }
 0x31d   :  { %v2094_v41 = vpop.f32.mrf.mxu3  ;;  %v13068_v51 = vpop.f32.mrf.mxu1 }
 0x31e   :  { %v2095_v8 = vadd.f32 %v2094_v41, %v2065_v36 }
 0x320   :  { %v13071_v10 = vadd.f32 %v2095_v8, %v13008_v19 }
 0x324   :  { %v13073_v21 = vpop.f32.mrf.mxu2  ;;  %v2389_v31 = vpop.f32.mrf.mxu0 }
 0x325   :  { %v13075_v57 = vpop.f32.mrf.mxu3  ;;  %v2418_v48 = vpop.f32.mrf.mxu1 }
 0x326   :  { %v2419_v7 = vadd.f32 %v2418_v48, %v2389_v31 }
 0x328   :  { %v2496_v59 = vadd.f32 %v2419_v7, %v13016_v33 }
 0x32a   :  { %v2518_v56 = vadd.f32 %v13081_v49, %v2496_v59 }
 0x32c   :  { %v2447_v16 = vpop.f32.mrf.mxu2  ;;  %v2391_v19 = vpop.f32.mrf.mxu0  ;;  %v2550_v5 = vmul.f32 0.2, %v2518_v56  ;;  %vm2534_vm1 = vcmp.ge.f32.partialorder %v2518_v56, 0.0 }
 0x32d   :  { %v2476_v50 = vpop.f32.mrf.mxu3  ;;  %v2420_v55 = vpop.f32.mrf.mxu1 }
 0x32e   :  { %v2477_v0 = vadd.f32 %v2476_v50, %v2447_v16  ;;  %v2421_v58 = vadd.f32 %v2420_v55, %v2391_v19  ;;  %v2566_v28 = vsel %vm2534_vm1, %v2518_v56, %v2550_v5 }
 0x330   :  { %v2497_v35 = vadd.f32 %v2477_v0, %v13022_v46  ;;  %v2498_v4 = vadd.f32 %v2421_v58, %v13024_v45 }
 0x332   :  { %v2520_v13 = vadd.f32 %v13081_v49, %v2498_v4  ;;  %v2519_v17 = vadd.f32 %v13086_v62, %v2497_v35 }
 0x334   :  { %v2552_v33 = vmul.f32 0.2, %v2520_v13  ;;  %v2449_v61 = vpop.f32.mrf.mxu2  ;;  %vm2536_vm2 = vcmp.ge.f32.partialorder %v2520_v13, 0.0  ;;  %v2394_v11 = vpop.f32.mrf.mxu0  ;;  %v2551_v20 = vmul.f32 0.2, %v2519_v17  ;;  %vm2535_vm3 = vcmp.ge.f32.partialorder %v2519_v17, 0.0 }
 0x335   :  { %v2478_v9 = vpop.f32.mrf.mxu3  ;;  %v2423_v12 = vpop.f32.mrf.mxu1 }
 0x336   :  { %v2479_v25 = vadd.f32 %v2478_v9, %v2449_v61  ;;  %v2424_v63 = vadd.f32 %v2423_v12, %v2394_v11  ;;  %v2568_v46 = vsel %vm2536_vm2, %v2520_v13, %v2552_v33  ;;  %v2567_v2 = vsel %vm2535_vm3, %v2519_v17, %v2551_v20 }
 0x337   :  { %v13091_v18 = vpack.c.bf16 %v2568_v46, %v2566_v28  ;;  %vm2608_vm2 = vcmask 523264  }
 0x338   :  { %v2499_v45 = vadd.f32 %v2479_v25, %v13029_v54  ;;  %v2500_v47 = vadd.f32 %v2424_v63, %v13032_v60 }
 0x33a   :  { %v2521_v14 = vadd.f32 %v13086_v62, %v2499_v45  ;;  %v2522_v29 = vadd.f32 %v13081_v49, %v2500_v47 }
 0x33c   :  { %v2553_v34 = vmul.f32 0.2, %v2521_v14  ;;  %vm2537_vm4 = vcmp.ge.f32.partialorder %v2521_v14, 0.0  ;;  %v2452_v22 = vpop.f32.mrf.mxu2  ;;  %v2396_v27 = vpop.f32.mrf.mxu0  ;;  %v2554_v60 = vmul.f32 0.2, %v2522_v29  ;;  %vm2538_vm5 = vcmp.ge.f32.partialorder %v2522_v29, 0.0 }
 0x33d   :  { %v2481_v37 = vpop.f32.mrf.mxu3  ;;  %v2425_v32 = vpop.f32.mrf.mxu1 }
 0x33e   :  { %v2482_v44 = vadd.f32 %v2481_v37, %v2452_v22  ;;  %v2569_v52 = vsel %vm2537_vm4, %v2521_v14, %v2553_v34  ;;  %v2426_v54 = vadd.f32 %v2425_v32, %v2396_v27  ;;  %v2570_v0 = vsel %vm2538_vm5, %v2522_v29, %v2554_v60 }
 0x33f   :  { %v13096_v38 = vpack.c.bf16 %v2569_v52, %v2567_v2  ;;  %v2039_v52 = vadd.f32 %v13068_v51, %v13066_v42 }
 0x340   :  { %v2502_v39 = vadd.f32 %v2426_v54, %v13040_v3  ;;  %v2501_v36 = vadd.f32 %v2482_v44, %v13038_v1 }
 0x342   :  { %v2524_v41 = vadd.f32 %v13081_v49, %v2502_v39  ;;  %v2523_v7 = vadd.f32 %v13086_v62, %v2501_v36 }
 0x344   :  { %v2556_v8 = vmul.f32 0.2, %v2524_v41  ;;  %v2454_v31 = vpop.f32.mrf.mxu2  ;;  %vm2540_vm6 = vcmp.ge.f32.partialorder %v2524_v41, 0.0  ;;  %v2399_v59 = vpop.f32.mrf.mxu0  ;;  %v2555_v1 = vmul.f32 0.2, %v2523_v7  ;;  %vm2539_vm7 = vcmp.ge.f32.partialorder %v2523_v7, 0.0 }
 0x345   :  { %v2483_v48 = vpop.f32.mrf.mxu3  ;;  %v2428_v16 = vpop.f32.mrf.mxu1 }
 0x346   :  { %v2484_v6 = vadd.f32 %v2483_v48, %v2454_v31  ;;  %v2429_v50 = vadd.f32 %v2428_v16, %v2399_v59  ;;  %v2572_v19 = vsel %vm2540_vm6, %v2524_v41, %v2556_v8  ;;  %v2571_v9 = vsel %vm2539_vm7, %v2523_v7, %v2555_v1 }
 0x347   :  { %v13103_v55 = vpack.c.bf16 %v2572_v19, %v2570_v0 }
 0x348   :  { %v2503_v3 = vadd.f32 %v2484_v6, %v13045_v15  ;;  %v2504_v58 = vadd.f32 %v2429_v50, %v13048_v26 }
 0x34a   :  { %v2525_v56 = vadd.f32 %v13086_v62, %v2503_v3  ;;  %v2526_v25 = vadd.f32 %v13081_v49, %v2504_v58 }
 0x34c   :  { %v2557_v35 = vmul.f32 0.2, %v2525_v56  ;;  %vm2541_vm8 = vcmp.ge.f32.partialorder %v2525_v56, 0.0  ;;  %v2457_v4 = vpop.f32.mrf.mxu2  ;;  %v2401_v33 = vpop.f32.mrf.mxu0  ;;  %v2558_v26 = vmul.f32 0.2, %v2526_v25  ;;  %vm2542_vm9 = vcmp.ge.f32.partialorder %v2526_v25, 0.0 }
 0x34d   :  { %v2486_v5 = vpop.f32.mrf.mxu3  ;;  %v2430_v61 = vpop.f32.mrf.mxu1 }
 0x34e   :  { %v2487_v13 = vadd.f32 %v2486_v5, %v2457_v4  ;;  %v2573_v17 = vsel %vm2541_vm8, %v2525_v56, %v2557_v35  ;;  %v2431_v15 = vadd.f32 %v2430_v61, %v2401_v33  ;;  %v2574_v44 = vsel %vm2542_vm9, %v2526_v25, %v2558_v26  ;;  %v10013_v33 = vld [vmem:[%s13263_s3] sm:$0xff]  ;;  %v2594_v61 = vld [vmem:[%s13263_s3 + $0x10] sm:$0x1] }
 0x34f   :  { %v13108_v11 = vpack.c.bf16 %v2573_v17, %v2571_v9  ;;  %v2604_v17 = vunpack.c.l.b16 %v2594_v61 }
 0x350   :  { %v2506_v12 = vadd.f32 %v2431_v15, %v13056_v24  ;;  %v2505_v63 = vadd.f32 %v2487_v13, %v13054_v23 }
 0x351   :  { %v2607_v15 = vpack.c.b16 %v2604_v17, %v2604_v17 }
 0x352   :  { %v2528_v28 = vadd.f32 %v13081_v49, %v2506_v12  ;;  %v2527_v14 = vadd.f32 %v13086_v62, %v2505_v63 }
 0x354   :  { %v2560_v46 = vmul.f32 0.2, %v2528_v28  ;;  %v2459_v45 = vpop.f32.mrf.mxu2  ;;  %vm2544_vm10 = vcmp.ge.f32.partialorder %v2528_v28, 0.0  ;;  %v2404_v34 = vpop.f32.mrf.mxu0  ;;  %v2559_v23 = vmul.f32 0.2, %v2527_v14  ;;  %vm2543_vm11 = vcmp.ge.f32.partialorder %v2527_v14, 0.0 }
 0x355   :  { %v2488_v20 = vpop.f32.mrf.mxu3  ;;  %v2433_v22 = vpop.f32.mrf.mxu1 }
 0x356   :  { %v2489_v47 = vadd.f32 %v2488_v20, %v2459_v45  ;;  %v2434_v37 = vadd.f32 %v2433_v22, %v2404_v34  ;;  %v2576_v27 = vsel %vm2544_vm10, %v2528_v28, %v2560_v46  ;;  %v2575_v31 = vsel %vm2543_vm11, %v2527_v14, %v2559_v23 }
 0x357   :  { %v2586_v32 = vpack.c.bf16 %v2576_v27, %v2574_v44 }
 0x358   :  { %v2507_v24 = vadd.f32 %v2489_v47, %v13061_v40  ;;  %v2508_v29 = vadd.f32 %v2434_v37, %v13064_v53  ;;  %v2113_v40 = vadd.f32 %v2039_v52, %v13010_v43  ;;  %v2097_v53 = vadd.f32 %v13075_v57, %v13073_v21 }
 0x35a   :  { %v2529_v2 = vadd.f32 %v13086_v62, %v2507_v24  ;;  %v2530_v7 = vadd.f32 %v13081_v49, %v2508_v29  ;;  %v2114_v43 = vadd.f32 %v2097_v53, %v13013_v30 }
 0x35c   :  { %v2561_v54 = vmul.f32 0.2, %v2529_v2  ;;  %vm2545_vm12 = vcmp.ge.f32.partialorder %v2529_v2, 0.0  ;;  %v2462_v39 = vpop.f32.mrf.mxu2  ;;  %v2406_v41 = vpop.f32.mrf.mxu0  ;;  %v2562_v51 = vmul.f32 0.2, %v2530_v7  ;;  %vm2546_vm13 = vcmp.ge.f32.partialorder %v2530_v7, 0.0 }
 0x35d   :  { %v2491_v36 = vpop.f32.mrf.mxu3  ;;  %v2435_v8 = vpop.f32.mrf.mxu1 }
 0x35e   :  { %v2492_v60 = vadd.f32 %v2491_v36, %v2462_v39  ;;  %v2577_v48 = vsel %vm2545_vm12, %v2529_v2, %v2561_v54  ;;  %v2436_v6 = vadd.f32 %v2435_v8, %v2406_v41  ;;  %v2578_v58 = vsel %vm2546_vm13, %v2530_v7, %v2562_v51 }
 0x35f   :  { %v2587_v59 = vpack.c.bf16 %v2577_v48, %v2575_v31 }
 0x360   :  { %v2510_v16 = vadd.f32 %v2436_v6, %v2113_v40  ;;  %v2509_v42 = vadd.f32 %v2492_v60, %v13071_v10 }
 0x362   :  { %v2532_v50 = vadd.f32 %v13081_v49, %v2510_v16  ;;  %v2531_v1 = vadd.f32 %v13086_v62, %v2509_v42 }
 0x364   :  { %vm2548_vm14 = vcmp.ge.f32.partialorder %v2532_v50, 0.0  ;;  %v2564_v0 = vmul.f32 0.2, %v2532_v50  ;;  %v2464_v19 = vpop.f32.mrf.mxu2  ;;  %v2563_v21 = vmul.f32 0.2, %v2531_v1  ;;  %vm2547_vm15 = vcmp.ge.f32.partialorder %v2531_v1, 0.0 }
 0x365   :  { %v2493_v3 = vpop.f32.mrf.mxu3 }
 0x366   :  { %v2494_v56 = vadd.f32 %v2493_v3, %v2464_v19  ;;  %v2580_v35 = vsel %vm2548_vm14, %v2532_v50, %v2564_v0  ;;  %v2579_v49 = vsel %vm2547_vm15, %v2531_v1, %v2563_v21 }
 0x367   :  { %v2588_v5 = vpack.c.bf16 %v2580_v35, %v2578_v58 }
 0x368   :  { %v2511_v4 = vadd.f32 %v2494_v56, %v2114_v43 }
 0x369   :  { %2622 = vmatpush.bf16.msra.mxu0 %v2588_v5  ;;  %2706 = vmatpush.bf16.msra.mxu2 %v2588_v5 }
 0x36a   :  { %v2533_v10 = vadd.f32 %v13086_v62, %v2511_v4  ;;  %v10015_v62 = vld [vmem:[%s13263_s3 + $0x14] sm:$0xff] }
 0x36c   :  { %vm2549_vm1 = vcmp.ge.f32.partialorder %v2533_v10, 0.0  ;;  %v2565_v57 = vmul.f32 0.2, %v2533_v10 }
 0x36d   :  { %2623 = vmatpush.bf16.msra.mxu0 %v2586_v32  ;;  %2707 = vmatpush.bf16.msra.mxu2 %v2586_v32 }
 0x36e   :  { %v2581_v13 = vsel %vm2549_vm1, %v2533_v10, %v2565_v57 }
 0x36f   :  { %v2589_v30 = vpack.c.bf16 %v2581_v13, %v2579_v49 }
 0x371   :  { %2645 = vmatpush.bf16.msra.mxu1 %v2589_v30  ;;  %2729 = vmatpush.bf16.msra.mxu3 %v2589_v30 }
 0x372   :  { %2624 = vmatpush.bf16.msra.mxu0 %v13103_v55  ;;  %2708 = vmatpush.bf16.msra.mxu2 %v13103_v55  ;;  %v10014_v55 = vld [vmem:[%s13263_s3 + $0x8] sm:$0xff] }
 0x375   :  { %2646 = vmatpush.bf16.msra.mxu1 %v2587_v59  ;;  %2730 = vmatpush.bf16.msra.mxu3 %v2587_v59 }
 0x376   :  { %2625 = vmatpush.bf16.msra.mxu0 %v13091_v18  ;;  %2709 = vmatpush.bf16.msra.mxu2 %v13091_v18  ;;  %v10016_v18 = vld [vmem:[%s13263_s3 + $0x1c] sm:$0xff] }
 0x379   :  { %2647 = vmatpush.bf16.msra.mxu1 %v13108_v11  ;;  %2731 = vmatpush.bf16.msra.mxu3 %v13108_v11 }
 0x37a   :  { %7890 = vmatmul.msk.bf16.vlgmr.msra.gmra.mxu2 %vm2608_vm2, %v10015_v62  ;;  %7871 = vmatmul.msk.bf16.vlgmr.msra.gmra.mxu0 %vm2608_vm2, %v10013_v33 }
 0x37d   :  { %2648 = vmatpush.bf16.msra.mxu1 %v13096_v38  ;;  %2732 = vmatpush.bf16.msra.mxu3 %v13096_v38  ;;  %v7881_v38 = vld [vmem:[%s13263_s3 + $0x24] sm:$0x1] }
 0x37e   :  { %v2689_v9 = vunpack.c.l.b16 %v7881_v38 }
 0x380   :  { %7893 = vmatmul.msk.bf16.vlgmr.msra.gmra.mxu3 %vm2608_vm2, %v10015_v62  ;;  %7874 = vmatmul.msk.bf16.vlgmr.msra.gmra.mxu1 %vm2608_vm2, %v10013_v33  ;;  %v2692_v25 = vpack.c.b16 %v2689_v9, %v2689_v9 }
 0x38a   :  { %7891 = vmatmul.msk.bf16.gmra.mxu2 %vm2608_vm2, %v10016_v18  ;;  %7872 = vmatmul.msk.bf16.gmra.mxu0 %vm2608_vm2, %v10014_v55 }
 0x390   :  { %7894 = vmatmul.msk.bf16.gmra.mxu3 %vm2608_vm2, %v10016_v18  ;;  %7875 = vmatmul.msk.bf16.gmra.mxu1 %vm2608_vm2, %v10014_v55 }
 0x39a   :  { %7892 = vmatmul.msk.bf16.gmra.mxu2 %vm2608_vm2, %v2692_v25  ;;  %7873 = vmatmul.msk.bf16.gmra.mxu0 %vm2608_vm2, %v2607_v15 }
 0x3a0   :  { %7895 = vmatmul.msk.bf16.gmra.mxu3 %vm2608_vm2, %v2692_v25  ;;  %7876 = vmatmul.msk.bf16.gmra.mxu1 %vm2608_vm2, %v2607_v15 }
 0x3f7   :  { %v2627_v11 = vpop.f32.mrf.mxu0 }
 0x3fd   :  { %v2650_v12 = vpop.f32.mrf.mxu1  ;;  %v2711_v63 = vpop.f32.mrf.mxu2 }
 0x3fe   :  { %v2664_v26 = vpack.c.bf16 %v2650_v12, %v2627_v11 }
 0x3ff   :  { %v2629_v28 = vpop.f32.mrf.mxu0 }
 0x400   :  { %2669 = vst [vmem:[#allocation2] sm:$0xff] %v2664_v26 }
 0x403   :  { %v2734_v46 = vpop.f32.mrf.mxu3 }
 0x404   :  { %v2748_v45 = vpack.c.bf16 %v2734_v46, %v2711_v63 }
 0x405   :  { %v2652_v20 = vpop.f32.mrf.mxu1  ;;  %v2713_v14 = vpop.f32.mrf.mxu2 }
 0x406   :  { %2754 = vst [vmem:[#allocation2 + $0x28] sm:$0xff] %v2748_v45  ;;  %v2665_v47 = vpack.c.bf16 %v2652_v20, %v2629_v28 }
 0x407   :  { %v2632_v34 = vpop.f32.mrf.mxu0 }
 0x408   :  { %2670 = vst [vmem:[#allocation2 + $0x8] sm:$0xff] %v2665_v47 }
 0x40b   :  { %v2736_v22 = vpop.f32.mrf.mxu3 }
 0x40c   :  { %v2749_v37 = vpack.c.bf16 %v2736_v22, %v2713_v14 }
 0x40d   :  { %v2655_v44 = vpop.f32.mrf.mxu1  ;;  %v2716_v27 = vpop.f32.mrf.mxu2 }
 0x40e   :  { %2755 = vst [vmem:[#allocation2 + $0x30] sm:$0xff] %v2749_v37  ;;  %v2666_v24 = vpack.c.bf16 %v2655_v44, %v2632_v34 }
 0x40f   :  { %v2634_v32 = vpop.f32.mrf.mxu0 }
 0x410   :  { %2671 = vst [vmem:[#allocation2 + $0x10] sm:$0xff] %v2666_v24 }
 0x413   :  { %v2739_v23 = vpop.f32.mrf.mxu3 }
 0x414   :  { %v2750_v2 = vpack.c.bf16 %v2739_v23, %v2716_v27 }
 0x415   :  { %v2657_v52 = vpop.f32.mrf.mxu1  ;;  %v2718_v29 = vpop.f32.mrf.mxu2 }
 0x416   :  { %2756 = vst [vmem:[#allocation2 + $0x38] sm:$0xff] %v2750_v2  ;;  %v2667_v54 = vpack.c.bf16 %v2657_v52, %v2634_v32 }
 0x417   :  { %v2637_v39 = vpop.f32.mrf.mxu0 }
 0x418   :  { %2672 = vst [vmem:[#allocation2 + $0x18] sm:$0xff] %v2667_v54 }
 0x41b   :  { %v2741_v36 = vpop.f32.mrf.mxu3 }
 0x41c   :  { %v2751_v60 = vpack.c.bf16 %v2741_v36, %v2718_v29 }
 0x41d   :  { %v2660_v41 = vpop.f32.mrf.mxu1  ;;  %v2721_v8 = vpop.f32.mrf.mxu2 }
 0x41e   :  { %2757 = vst [vmem:[#allocation2 + $0x40] sm:$0xff] %v2751_v60  ;;  %v2668_v31 = vpack.c.bf16 %v2660_v41, %v2637_v39 }
 0x41f   :  { %v2639_v48 = vpop.f32.mrf.mxu0 }
 0x420   :  { %2673 = vst [vmem:[#allocation2 + $0x20] sm:$0x11] %v2668_v31 }
 0x423   :  { %v2744_v40 = vpop.f32.mrf.mxu3 }
 0x424   :  { %v2752_v7 = vpack.c.bf16 %v2744_v40, %v2721_v8 }
 0x425   :  { %v2662_v6 = vpop.f32.mrf.mxu1  ;;  %v2723_v59 = vpop.f32.mrf.mxu2 }
 0x426   :  { %2758 = vst [vmem:[#allocation2 + $0x48] sm:$0x11] %v2752_v7 }
 0x42b   :  { %v2746_v16 = vpop.f32.mrf.mxu3 }
 0x42c   :  { %10503 = dma.done.wait [#allocation10], 16384 }
 0x42d   :  { %10504 = vsyncadd [#allocation10], 4294950912  ;;  %v7970_v53 = vld [vmem:[#allocation6 + $0x170] sm:$0xf]  ;;  %v10072_v42 = vld [vmem:[#allocation6 + $0x174] sm:$0xf0] }
 0x42e   :  { %v8034_v51 = vld [vmem:[#allocation6 + $0x1f0] sm:$0xf]  ;;  %v7971_v50 = vor.u32 %v10072_v42, %v7970_v53  ;;  %v10088_v0 = vld [vmem:[#allocation6 + $0x1f4] sm:$0xf0]  ;;  %v10071_v19 = vld [vmem:[#allocation6 + $0x174] sm:$0xf] }
 0x42f   :  { %v7972_v3 = vld [vmem:[#allocation6 + $0x178] sm:$0xf0]  ;;  %v8035_v43 = vor.u32 %v10088_v0, %v8034_v51  ;;  %v10087_v56 = vld [vmem:[#allocation6 + $0x1f4] sm:$0xf]  ;;  %v7962_v35 = vld [vmem:[#allocation6 + $0x160] sm:$0xf] }
 0x430   :  { %v7975_v1 = vor.u32 %v10071_v19, %v7972_v3  ;;  %v8036_v58 = vld [vmem:[#allocation6 + $0x1f8] sm:$0xf0]  ;;  %3017 = vmatpush.bf16.msrb.mxu0 %v7971_v50  ;;  %v10070_v5 = vld [vmem:[#allocation6 + $0x164] sm:$0xf0]  ;;  %v8026_v21 = vld [vmem:[#allocation6 + $0x1e0] sm:$0xf] }
 0x431   :  { %v8039_v4 = vor.u32 %v10087_v56, %v8036_v58  ;;  %v10086_v10 = vld [vmem:[#allocation6 + $0x1e4] sm:$0xf0]  ;;  %3036 = vmatpush.bf16.msrb.mxu1 %v8035_v43  ;;  %v7963_v57 = vor.u32 %v10070_v5, %v7962_v35  ;;  %v10069_v13 = vld [vmem:[#allocation6 + $0x164] sm:$0xf]  ;;  %v7964_v30 = vld [vmem:[#allocation6 + $0x168] sm:$0xf0] }
 0x432   :  { %3055 = vmatpush.bf16.msrb.mxu2 %v7975_v1  ;;  %v8027_v49 = vor.u32 %v10086_v10, %v8026_v21  ;;  %v10085_v62 = vld [vmem:[#allocation6 + $0x1e4] sm:$0xf]  ;;  %v7967_v33 = vor.u32 %v10069_v13, %v7964_v30  ;;  %v8028_v18 = vld [vmem:[#allocation6 + $0x1e8] sm:$0xf0]  ;;  %v7954_v55 = vld [vmem:[#allocation6 + $0x150] sm:$0xf] }
 0x433   :  { %3074 = vmatpush.bf16.msrb.mxu3 %v8039_v4  ;;  %v10068_v38 = vld [vmem:[#allocation6 + $0x154] sm:$0xf0]  ;;  %v8031_v61 = vor.u32 %v10085_v62, %v8028_v18  ;;  %v8018_v9 = vld [vmem:[#allocation6 + $0x1d0] sm:$0xf]  ;;  %v10067_v25 = vld [vmem:[#allocation6 + $0x154] sm:$0xf] }
 0x434   :  { %v10084_v17 = vld [vmem:[#allocation6 + $0x1d4] sm:$0xf0]  ;;  %3018 = vmatpush.bf16.msrb.mxu0 %v7963_v57  ;;  %v7955_v15 = vor.u32 %v10068_v38, %v7954_v55  ;;  %v7956_v11 = vld [vmem:[#allocation6 + $0x158] sm:$0xf0]  ;;  %v10083_v12 = vld [vmem:[#allocation6 + $0x1d4] sm:$0xf] }
 0x435   :  { %v8020_v63 = vld [vmem:[#allocation6 + $0x1d8] sm:$0xf0]  ;;  %3037 = vmatpush.bf16.msrb.mxu1 %v8027_v49  ;;  %v8019_v26 = vor.u32 %v10084_v17, %v8018_v9  ;;  %v7959_v28 = vor.u32 %v10067_v25, %v7956_v11  ;;  %v7946_v46 = vld [vmem:[#allocation6 + $0x140] sm:$0xf]  ;;  %v10066_v45 = vld [vmem:[#allocation6 + $0x144] sm:$0xf0] }
 0x436   :  { %3056 = vmatpush.bf16.msrb.mxu2 %v7967_v33  ;;  %v8010_v20 = vld [vmem:[#allocation6 + $0x1c0] sm:$0xf]  ;;  %v8023_v14 = vor.u32 %v10083_v12, %v8020_v63  ;;  %v10082_v47 = vld [vmem:[#allocation6 + $0x1c4] sm:$0xf0]  ;;  %v10065_v34 = vld [vmem:[#allocation6 + $0x144] sm:$0xf]  ;;  %v7947_v27 = vor.u32 %v10066_v45, %v7946_v46 }
 0x437   :  { %3075 = vmatpush.bf16.msrb.mxu3 %v8031_v61  ;;  %v7948_v22 = vld [vmem:[#allocation6 + $0x148] sm:$0xf0]  ;;  %v10081_v37 = vld [vmem:[#allocation6 + $0x1c4] sm:$0xf]  ;;  %v8011_v24 = vor.u32 %v10082_v47, %v8010_v20  ;;  %v7938_v23 = vld [vmem:[#allocation6 + $0x130] sm:$0xf] }
 0x438   :  { %v8012_v44 = vld [vmem:[#allocation6 + $0x1c8] sm:$0xf0]  ;;  %3019 = vmatpush.bf16.msrb.mxu0 %v7955_v15  ;;  %v7951_v32 = vor.u32 %v10065_v34, %v7948_v22  ;;  %v10064_v2 = vld [vmem:[#allocation6 + $0x134] sm:$0xf0]  ;;  %v8002_v52 = vld [vmem:[#allocation6 + $0x1b0] sm:$0xf] }
 0x439   :  { %3038 = vmatpush.bf16.msrb.mxu1 %v8019_v26  ;;  %v8015_v29 = vor.u32 %v10081_v37, %v8012_v44  ;;  %v10080_v54 = vld [vmem:[#allocation6 + $0x1b4] sm:$0xf0]  ;;  %v10063_v39 = vld [vmem:[#allocation6 + $0x134] sm:$0xf]  ;;  %v7940_v36 = vld [vmem:[#allocation6 + $0x138] sm:$0xf0]  ;;  %v7939_v8 = vor.u32 %v10064_v2, %v7938_v23 }
 0x43a   :  { %3057 = vmatpush.bf16.msrb.mxu2 %v7959_v28  ;;  %v10079_v60 = vld [vmem:[#allocation6 + $0x1b4] sm:$0xf]  ;;  %v8004_v41 = vld [vmem:[#allocation6 + $0x1b8] sm:$0xf0]  ;;  %v8003_v31 = vor.u32 %v10080_v54, %v8002_v52  ;;  %v7943_v48 = vor.u32 %v10063_v39, %v7940_v36  ;;  %v7930_v40 = vld [vmem:[#allocation6 + $0x120] sm:$0xf] }
 0x43b   :  { %3076 = vmatpush.bf16.msrb.mxu3 %v8023_v14  ;;  %v10062_v7 = vld [vmem:[#allocation6 + $0x124] sm:$0xf0]  ;;  %v7994_v6 = vld [vmem:[#allocation6 + $0x1a0] sm:$0xf]  ;;  %v8007_v59 = vor.u32 %v10079_v60, %v8004_v41  ;;  %v10061_v53 = vld [vmem:[#allocation6 + $0x124] sm:$0xf] }
 0x43c   :  { %3020 = vmatpush.bf16.msrb.mxu0 %v7947_v27  ;;  %v10078_v16 = vld [vmem:[#allocation6 + $0x1a4] sm:$0xf0]  ;;  %v7932_v42 = vld [vmem:[#allocation6 + $0x128] sm:$0xf0]  ;;  %v10077_v51 = vld [vmem:[#allocation6 + $0x1a4] sm:$0xf]  ;;  %v7931_v0 = vor.u32 %v10062_v7, %v7930_v40 }
 0x43d   :  { %3039 = vmatpush.bf16.msrb.mxu1 %v8011_v24  ;;  %v7996_v50 = vld [vmem:[#allocation6 + $0x1a8] sm:$0xf0]  ;;  %v7995_v19 = vor.u32 %v10078_v16, %v7994_v6  ;;  %v7935_v3 = vor.u32 %v10061_v53, %v7932_v42  ;;  %v7922_v43 = vld [vmem:[#allocation6 + $0x110] sm:$0xf]  ;;  %v10060_v1 = vld [vmem:[#allocation6 + $0x114] sm:$0xf0] }
 0x43e   :  { %3058 = vmatpush.bf16.msrb.mxu2 %v7951_v32  ;;  %v7986_v56 = vld [vmem:[#allocation6 + $0x190] sm:$0xf]  ;;  %v7999_v58 = vor.u32 %v10077_v51, %v7996_v50  ;;  %v10076_v35 = vld [vmem:[#allocation6 + $0x194] sm:$0xf0]  ;;  %v10059_v4 = vld [vmem:[#allocation6 + $0x114] sm:$0xf]  ;;  %v7923_v57 = vor.u32 %v10060_v1, %v7922_v43 }
 0x43f   :  { %3077 = vmatpush.bf16.msrb.mxu3 %v8015_v29  ;;  %v7924_v5 = vld [vmem:[#allocation6 + $0x118] sm:$0xf0]  ;;  %v10075_v21 = vld [vmem:[#allocation6 + $0x194] sm:$0xf]  ;;  %v7914_v49 = vld [vmem:[#allocation6 + $0x100] sm:$0xf]  ;;  %v7987_v30 = vor.u32 %v10076_v35, %v7986_v56 }
 0x440   :  { %3021 = vmatpush.bf16.msrb.mxu0 %v7939_v8  ;;  %v7988_v10 = vld [vmem:[#allocation6 + $0x198] sm:$0xf0]  ;;  %v10058_v13 = vld [vmem:[#allocation6 + $0x104] sm:$0xf0]  ;;  %v7927_v62 = vor.u32 %v10059_v4, %v7924_v5  ;;  %v7978_v33 = vld [vmem:[#allocation6 + $0x180] sm:$0xf] }
 0x441   :  { %3040 = vmatpush.bf16.msrb.mxu1 %v8003_v31  ;;  %v10074_v18 = vld [vmem:[#allocation6 + $0x184] sm:$0xf0]  ;;  %v10057_v55 = vld [vmem:[#allocation6 + $0x104] sm:$0xf]  ;;  %v7991_v38 = vor.u32 %v10075_v21, %v7988_v10  ;;  %v7916_v61 = vld [vmem:[#allocation6 + $0x108] sm:$0xf0]  ;;  %v7915_v12 = vor.u32 %v10058_v13, %v7914_v49 }
 0x442   :  { %3059 = vmatpush.bf16.msrb.mxu2 %v7943_v48  ;;  %v10073_v9 = vld [vmem:[#allocation6 + $0x184] sm:$0xf]  ;;  %v7980_v17 = vld [vmem:[#allocation6 + $0x188] sm:$0xf0]  ;;  %v7898_v25 = vld [vmem:[#allocation2 + $0x28] sm:$0xf]  ;;  %v7979_v46 = vor.u32 %v10074_v18, %v7978_v33  ;;  %v7919_v45 = vor.u32 %v10057_v55, %v7916_v61 }
 0x443   :  { %3078 = vmatpush.bf16.msrb.mxu3 %v8007_v59  ;;  %v8114_v15 = vld [vmem:[#allocation6 + $0x70] sm:$0xf]  ;;  %v10036_v11 = vld [vmem:[#allocation6 + $0x74] sm:$0xf0]  ;;  %v10054_v63 = vld [vmem:[#allocation2 + $0x2c] sm:$0xf0]  ;;  %v7983_v47 = vor.u32 %v10073_v9, %v7980_v17 }
 0x444   :  { %3022 = vmatpush.bf16.msrb.mxu0 %v7931_v0  ;;  %v8178_v26 = vld [vmem:[#allocation6 + $0xf0] sm:$0xf]  ;;  %v10052_v28 = vld [vmem:[#allocation6 + $0xf4] sm:$0xf0]  ;;  %v10053_v20 = vld [vmem:[#allocation2 + $0x2c] sm:$0xf]  ;;  %v8115_v34 = vor.u32 %v10036_v11, %v8114_v15  ;;  %v7899_v27 = vor.u32 %v10054_v63, %v7898_v25 }
 0x445   :  { %3041 = vmatpush.bf16.msrb.mxu1 %v7995_v19  ;;  %v7900_v14 = vld [vmem:[#allocation2 + $0x30] sm:$0xf0]  ;;  %v10035_v22 = vld [vmem:[#allocation6 + $0x74] sm:$0xf]  ;;  %v8116_v37 = vld [vmem:[#allocation6 + $0x78] sm:$0xf0]  ;;  %v8179_v24 = vor.u32 %v10052_v28, %v8178_v26 }
 0x446   :  { %3060 = vmatpush.bf16.msrb.mxu2 %v7935_v3  ;;  %v10051_v44 = vld [vmem:[#allocation6 + $0xf4] sm:$0xf]  ;;  %v8180_v32 = vld [vmem:[#allocation6 + $0xf8] sm:$0xf0]  ;;  %v8106_v23 = vld [vmem:[#allocation6 + $0x60] sm:$0xf]  ;;  %v7903_v52 = vor.u32 %v10053_v20, %v7900_v14  ;;  %v8119_v39 = vor.u32 %v10035_v22, %v8116_v37 }
 0x447   :  { %3079 = vmatpush.bf16.msrb.mxu3 %v7999_v58  ;;  %v10034_v2 = vld [vmem:[#allocation6 + $0x64] sm:$0xf0]  ;;  %v8170_v29 = vld [vmem:[#allocation6 + $0xe0] sm:$0xf]  ;;  %v8183_v36 = vor.u32 %v10051_v44, %v8180_v32  ;;  %v10033_v41 = vld [vmem:[#allocation6 + $0x64] sm:$0xf] }
 0x448   :  { %3023 = vmatpush.bf16.msrb.mxu0 %v7923_v57  ;;  %v10050_v54 = vld [vmem:[#allocation6 + $0xe4] sm:$0xf0]  ;;  %v8107_v60 = vor.u32 %v10034_v2, %v8106_v23  ;;  %v8108_v8 = vld [vmem:[#allocation6 + $0x68] sm:$0xf0]  ;;  %v10049_v31 = vld [vmem:[#allocation6 + $0xe4] sm:$0xf] }
 0x449   :  { %3042 = vmatpush.bf16.msrb.mxu1 %v7987_v30  ;;  %v8171_v48 = vor.u32 %v10050_v54, %v8170_v29  ;;  %v8172_v40 = vld [vmem:[#allocation6 + $0xe8] sm:$0xf0]  ;;  %v8098_v7 = vld [vmem:[#allocation6 + $0x50] sm:$0xf]  ;;  %v10032_v6 = vld [vmem:[#allocation6 + $0x54] sm:$0xf0]  ;;  %v8111_v53 = vor.u32 %v10033_v41, %v8108_v8 }
 0x44a   :  { %3061 = vmatpush.bf16.msrb.mxu2 %v7927_v62  ;;  %v8162_v59 = vld [vmem:[#allocation6 + $0xd0] sm:$0xf]  ;;  %v10048_v16 = vld [vmem:[#allocation6 + $0xd4] sm:$0xf0]  ;;  %v8175_v42 = vor.u32 %v10049_v31, %v8172_v40  ;;  %v8099_v51 = vor.u32 %v10032_v6, %v8098_v7  ;;  %v10031_v50 = vld [vmem:[#allocation6 + $0x54] sm:$0xf] }
 0x44b   :  { %3080 = vmatpush.bf16.msrb.mxu3 %v7991_v38  ;;  %v8100_v0 = vld [vmem:[#allocation6 + $0x58] sm:$0xf0]  ;;  %v10047_v19 = vld [vmem:[#allocation6 + $0xd4] sm:$0xf]  ;;  %v8163_v3 = vor.u32 %v10048_v16, %v8162_v59  ;;  %v8090_v1 = vld [vmem:[#allocation6 + $0x40] sm:$0xf] }
 0x44c   :  { %3024 = vmatpush.bf16.msrb.mxu0 %v7915_v12  ;;  %v8164_v43 = vld [vmem:[#allocation6 + $0xd8] sm:$0xf0]  ;;  %v10030_v56 = vld [vmem:[#allocation6 + $0x44] sm:$0xf0]  ;;  %v8154_v58 = vld [vmem:[#allocation6 + $0xc0] sm:$0xf]  ;;  %v8103_v4 = vor.u32 %v10031_v50, %v8100_v0 }
 0x44d   :  { %3043 = vmatpush.bf16.msrb.mxu1 %v7979_v46  ;;  %v10046_v35 = vld [vmem:[#allocation6 + $0xc4] sm:$0xf0]  ;;  %v10029_v5 = vld [vmem:[#allocation6 + $0x44] sm:$0xf]  ;;  %v8167_v21 = vor.u32 %v10047_v19, %v8164_v43  ;;  %v8091_v10 = vor.u32 %v10030_v56, %v8090_v1  ;;  %v8092_v57 = vld [vmem:[#allocation6 + $0x48] sm:$0xf0] }
 0x44e   :  { %3062 = vmatpush.bf16.msrb.mxu2 %v7919_v45  ;;  %v10045_v49 = vld [vmem:[#allocation6 + $0xc4] sm:$0xf]  ;;  %v8156_v13 = vld [vmem:[#allocation6 + $0xc8] sm:$0xf0]  ;;  %v8155_v30 = vor.u32 %v10046_v35, %v8154_v58  ;;  %v7906_v62 = vld [vmem:[#allocation2 + $0x38] sm:$0xf]  ;;  %v8095_v9 = vor.u32 %v10029_v5, %v8092_v57 }
 0x44f   :  { %3081 = vmatpush.bf16.msrb.mxu3 %v7983_v47  ;;  %3025 = vmatmul.bf16.vlgmr.msrb.gmra.mxu0 %v7899_v27  ;;  %v8082_v33 = vld [vmem:[#allocation6 + $0x30] sm:$0xf]  ;;  %v10028_v18 = vld [vmem:[#allocation6 + $0x34] sm:$0xf0]  ;;  %v10055_v17 = vld [vmem:[#allocation2 + $0x3c] sm:$0xf]  ;;  %v8159_v15 = vor.u32 %v10045_v49, %v8156_v13 }
 0x450   :  { %3273 = vmatpush.bf16.msra.mxu0 %v8115_v34  ;;  %3044 = vmatmul.bf16.vlgmr.msrb.gmra.mxu1 %v7903_v52  ;;  %v10056_v55 = vld [vmem:[#allocation2 + $0x3c] sm:$0xf0]  ;;  %v10044_v61 = vld [vmem:[#allocation6 + $0xb4] sm:$0xf0]  ;;  %v7908_v25 = vld [vmem:[#allocation2 + $0x40] sm:$0xf0]  ;;  %v8083_v11 = vor.u32 %v10028_v18, %v8082_v33 }
 0x451   :  { %3292 = vmatpush.bf16.msra.mxu1 %v8179_v24  ;;  %3063 = vmatmul.bf16.vlgmr.msrb.gmra.mxu2 %v7899_v27  ;;  %v8146_v38 = vld [vmem:[#allocation6 + $0xb0] sm:$0xf]  ;;  %v10027_v12 = vld [vmem:[#allocation6 + $0x34] sm:$0xf]  ;;  %v8084_v63 = vld [vmem:[#allocation6 + $0x38] sm:$0xf0]  ;;  %v7907_v28 = vor.u32 %v10056_v55, %v7906_v62  ;;  %v7911_v47 = vor.u32 %v10055_v17, %v7908_v25 }
 0x452   :  { %3082 = vmatmul.bf16.vlgmr.msrb.gmra.mxu3 %v7903_v52  ;;  %3311 = vmatpush.bf16.msra.mxu2 %v8119_v39  ;;  %v10043_v26 = vld [vmem:[#allocation6 + $0xb4] sm:$0xf]  ;;  %v8147_v46 = vor.u32 %v10044_v61, %v8146_v38  ;;  %v8148_v45 = vld [vmem:[#allocation6 + $0xb8] sm:$0xf0]  ;;  %v8074_v20 = vld [vmem:[#allocation6 + $0x20] sm:$0xf]  ;;  %v8087_v37 = vor.u32 %v10027_v12, %v8084_v63 }
 0x453   :  { %3330 = vmatpush.bf16.msra.mxu3 %v8183_v36  ;;  %v10026_v14 = vld [vmem:[#allocation6 + $0x24] sm:$0xf0]  ;;  %v8138_v34 = vld [vmem:[#allocation6 + $0xa0] sm:$0xf]  ;;  %v8151_v44 = vor.u32 %v10043_v26, %v8148_v45  ;;  %v10025_v24 = vld [vmem:[#allocation6 + $0x24] sm:$0xf] }
 0x454   :  { %3274 = vmatpush.bf16.msra.mxu0 %v8107_v60  ;;  %v10042_v22 = vld [vmem:[#allocation6 + $0xa4] sm:$0xf0]  ;;  %v8075_v27 = vor.u32 %v10026_v14, %v8074_v20  ;;  %v8076_v32 = vld [vmem:[#allocation6 + $0x28] sm:$0xf0]  ;;  %v10041_v23 = vld [vmem:[#allocation6 + $0xa4] sm:$0xf] }
 0x455   :  { %3293 = vmatpush.bf16.msra.mxu1 %v8171_v48  ;;  %v8139_v2 = vor.u32 %v10042_v22, %v8138_v34  ;;  %v8140_v52 = vld [vmem:[#allocation6 + $0xa8] sm:$0xf0]  ;;  %v8066_v29 = vld [vmem:[#allocation6 + $0x10] sm:$0xf]  ;;  %v10024_v54 = vld [vmem:[#allocation6 + $0x14] sm:$0xf0]  ;;  %v8079_v60 = vor.u32 %v10025_v24, %v8076_v32 }
 0x456   :  { %3312 = vmatpush.bf16.msra.mxu2 %v8111_v53  ;;  %v8130_v39 = vld [vmem:[#allocation6 + $0x90] sm:$0xf]  ;;  %v10040_v36 = vld [vmem:[#allocation6 + $0x94] sm:$0xf0]  ;;  %v10023_v41 = vld [vmem:[#allocation6 + $0x14] sm:$0xf]  ;;  %v8143_v8 = vor.u32 %v10041_v23, %v8140_v52  ;;  %v8067_v31 = vor.u32 %v10024_v54, %v8066_v29 }
 0x457   :  { %3331 = vmatpush.bf16.msra.mxu3 %v8175_v42  ;;  %v8068_v48 = vld [vmem:[#allocation6 + $0x18] sm:$0xf0]  ;;  %v10039_v40 = vld [vmem:[#allocation6 + $0x94] sm:$0xf]  ;;  %v8131_v6 = vor.u32 %v10040_v36, %v8130_v39  ;;  %v8058_v59 = vld [vmem:[#allocation6] sm:$0xf] }
 0x458   :  { %3275 = vmatpush.bf16.msra.mxu0 %v8099_v51  ;;  %v8132_v7 = vld [vmem:[#allocation6 + $0x98] sm:$0xf0]  ;;  %v10022_v16 = vld [vmem:[#allocation6 + $0x4] sm:$0xf0]  ;;  %v8122_v53 = vld [vmem:[#allocation6 + $0x80] sm:$0xf]  ;;  %v8071_v0 = vor.u32 %v10023_v41, %v8068_v48 }
 0x459   :  { %3294 = vmatpush.bf16.msra.mxu1 %v8163_v3  ;;  %v10038_v42 = vld [vmem:[#allocation6 + $0x84] sm:$0xf0]  ;;  %v8258_v51 = vld [vmem:[#allocation6 + $0x270] sm:$0xf]  ;;  %v10108_v50 = vld [vmem:[#allocation6 + $0x274] sm:$0xf0]  ;;  %v8135_v1 = vor.u32 %v10039_v40, %v8132_v7  ;;  %v8059_v56 = vor.u32 %v10022_v16, %v8058_v59 }
 0x45a   :  { %3313 = vmatpush.bf16.msra.mxu2 %v8103_v4  ;;  %v10021_v19 = vld [vmem:[#allocation6 + $0x4] sm:$0xf]  ;;  %v8322_v3 = vld [vmem:[#allocation6 + $0x2f0] sm:$0xf]  ;;  %v10124_v43 = vld [vmem:[#allocation6 + $0x2f4] sm:$0xf0]  ;;  %v8123_v5 = vor.u32 %v10038_v42, %v8122_v53 }
 0x45b   :  { %3332 = vmatpush.bf16.msra.mxu3 %v8167_v21  ;;  %v8060_v58 = vld [vmem:[#allocation6 + $0x8] sm:$0xf0]  ;;  %v10037_v35 = vld [vmem:[#allocation6 + $0x84] sm:$0xf]  ;;  %v8042_v21 = vld [vmem:[#allocation2] sm:$0xf] }
 0x45c   :  { %3276 = vmatpush.bf16.msra.mxu0 %v8091_v10  ;;  %v8124_v4 = vld [vmem:[#allocation6 + $0x88] sm:$0xf0]  ;;  %v8259_v10 = vor.u32 %v10108_v50, %v8258_v51  ;;  %v10107_v57 = vld [vmem:[#allocation6 + $0x274] sm:$0xf]  ;;  %v8260_v49 = vld [vmem:[#allocation6 + $0x278] sm:$0xf0]  ;;  %v8063_v18 = vor.u32 %v10021_v19, %v8060_v58 }
 0x45d   :  { %3295 = vmatpush.bf16.msra.mxu1 %v8155_v30  ;;  %v10018_v13 = vld [vmem:[#allocation2 + $0x4] sm:$0xf0]  ;;  %v8323_v30 = vor.u32 %v10124_v43, %v8322_v3  ;;  %v10123_v62 = vld [vmem:[#allocation6 + $0x2f4] sm:$0xf]  ;;  %v8324_v33 = vld [vmem:[#allocation6 + $0x2f8] sm:$0xf0]  ;;  %v8127_v61 = vor.u32 %v10037_v35, %v8124_v4 }
 0x45e   :  { %3314 = vmatpush.bf16.msra.mxu2 %v8095_v9  ;;  %v10017_v55 = vld [vmem:[#allocation2 + $0x4] sm:$0xf]  ;;  %v8044_v38 = vld [vmem:[#allocation2 + $0x8] sm:$0xf0]  ;;  %v8263_v9 = vor.u32 %v10107_v57, %v8260_v49  ;;  %v8250_v17 = vld [vmem:[#allocation6 + $0x260] sm:$0xf]  ;;  %v8327_v12 = vor.u32 %v10123_v62, %v8324_v33 }
 0x45f   :  { %3333 = vmatpush.bf16.msra.mxu3 %v8159_v15  ;;  %3030 = vmatmul.bf16.gmra.mxu0 %v7907_v28  ;;  %v10106_v25 = vld [vmem:[#allocation6 + $0x264] sm:$0xf0]  ;;  %v8314_v15 = vld [vmem:[#allocation6 + $0x2e0] sm:$0xf]  ;;  %v10105_v26 = vld [vmem:[#allocation6 + $0x264] sm:$0xf] }
 0x460   :  { %3277 = vmatpush.bf16.msra.mxu0 %v8083_v11  ;;  %3049 = vmatmul.bf16.gmra.mxu1 %v7911_v47  ;;  %v8043_v11 = vor.u32 %v10018_v13, %v8042_v21  ;;  %v10122_v63 = vld [vmem:[#allocation6 + $0x2e4] sm:$0xf0]  ;;  %v10121_v45 = vld [vmem:[#allocation6 + $0x2e4] sm:$0xf]  ;;  %v8316_v20 = vld [vmem:[#allocation6 + $0x2e8] sm:$0xf0]  ;;  %v8251_v14 = vor.u32 %v10106_v25, %v8250_v17 }
 0x461   :  { %3296 = vmatpush.bf16.msra.mxu1 %v8147_v46  ;;  %3068 = vmatmul.bf16.gmra.mxu2 %v7907_v28  ;;  %v8252_v28 = vld [vmem:[#allocation6 + $0x268] sm:$0xf0]  ;;  %v8047_v46 = vor.u32 %v10017_v55, %v8044_v38  ;;  %v8242_v22 = vld [vmem:[#allocation6 + $0x250] sm:$0xf]  ;;  %v10120_v24 = vld [vmem:[#allocation6 + $0x2d4] sm:$0xf0] }
 0x462   :  { %3087 = vmatmul.bf16.gmra.mxu3 %v7911_v47  ;;  %3315 = vmatpush.bf16.msra.mxu2 %v8087_v37  ;;  %v8315_v47 = vor.u32 %v10122_v63, %v8314_v15  ;;  %v8255_v34 = vor.u32 %v10105_v26, %v8252_v28  ;;  %v10104_v37 = vld [vmem:[#allocation6 + $0x254] sm:$0xf0]  ;;  %v10103_v32 = vld [vmem:[#allocation6 + $0x254] sm:$0xf]  ;;  %v8244_v23 = vld [vmem:[#allocation6 + $0x258] sm:$0xf0] }
 0x463   :  { %3334 = vmatpush.bf16.msra.mxu3 %v8151_v44  ;;  %v8306_v44 = vld [vmem:[#allocation6 + $0x2d0] sm:$0xf]  ;;  %v8308_v52 = vld [vmem:[#allocation6 + $0x2d8] sm:$0xf0]  ;;  %v8243_v29 = vor.u32 %v10104_v37, %v8242_v22  ;;  %v8247_v39 = vor.u32 %v10103_v32, %v8244_v23  ;;  %v8234_v36 = vld [vmem:[#allocation6 + $0x240] sm:$0xf] }
 0x464   :  { %3278 = vmatpush.bf16.msra.mxu0 %v8075_v27  ;;  %v8319_v27 = vor.u32 %v10121_v45, %v8316_v20  ;;  %v8307_v54 = vor.u32 %v10120_v24, %v8306_v44  ;;  %v8298_v41 = vld [vmem:[#allocation6 + $0x2c0] sm:$0xf]  ;;  %v10101_v48 = vld [vmem:[#allocation6 + $0x244] sm:$0xf]  ;;  %v8236_v40 = vld [vmem:[#allocation6 + $0x248] sm:$0xf0] }
 0x465   :  { %3297 = vmatpush.bf16.msra.mxu1 %v8139_v2  ;;  %v10119_v2 = vld [vmem:[#allocation6 + $0x2d4] sm:$0xf]  ;;  %v10117_v7 = vld [vmem:[#allocation6 + $0x2c4] sm:$0xf]  ;;  %v8239_v53 = vor.u32 %v10101_v48, %v8236_v40  ;;  %v8050_v42 = vld [vmem:[#allocation2 + $0x10] sm:$0xf] }
 0x466   :  { %3316 = vmatpush.bf16.msra.mxu2 %v8079_v60  ;;  %v10102_v60 = vld [vmem:[#allocation6 + $0x244] sm:$0xf0]  ;;  %v8226_v51 = vld [vmem:[#allocation6 + $0x230] sm:$0xf]  ;;  %v10100_v50 = vld [vmem:[#allocation6 + $0x234] sm:$0xf0] }
 0x467   :  { %3335 = vmatpush.bf16.msra.mxu3 %v8143_v8  ;;  %v8311_v8 = vor.u32 %v10119_v2, %v8308_v52  ;;  %v8235_v59 = vor.u32 %v10102_v60, %v8234_v36  ;;  %v10116_v3 = vld [vmem:[#allocation6 + $0x2b4] sm:$0xf0]  ;;  %v10099_v43 = vld [vmem:[#allocation6 + $0x234] sm:$0xf]  ;;  %v8292_v35 = vld [vmem:[#allocation6 + $0x2b8] sm:$0xf0]  ;;  %v8227_v21 = vor.u32 %v10100_v50, %v8226_v51 }
 0x468   :  { %3279 = vmatpush.bf16.msra.mxu0 %v8067_v31  ;;  %v10118_v31 = vld [vmem:[#allocation6 + $0x2c4] sm:$0xf0]  ;;  %v10115_v58 = vld [vmem:[#allocation6 + $0x2b4] sm:$0xf]  ;;  %v10019_v4 = vld [vmem:[#allocation2 + $0x14] sm:$0xf] }
 0x469   :  { %3298 = vmatpush.bf16.msra.mxu1 %v8131_v6  ;;  %v8300_v6 = vld [vmem:[#allocation6 + $0x2c8] sm:$0xf0]  ;;  %v8299_v16 = vor.u32 %v10118_v31, %v8298_v41  ;;  %v8218_v49 = vld [vmem:[#allocation6 + $0x220] sm:$0xf]  ;;  %v10098_v13 = vld [vmem:[#allocation6 + $0x224] sm:$0xf0]  ;;  %v8295_v33 = vor.u32 %v10115_v58, %v8292_v35 }
 0x46a   :  { %3317 = vmatpush.bf16.msra.mxu2 %v8071_v0  ;;  %v8290_v0 = vld [vmem:[#allocation6 + $0x2b0] sm:$0xf]  ;;  %v8303_v19 = vor.u32 %v10117_v7, %v8300_v6  ;;  %v10097_v55 = vld [vmem:[#allocation6 + $0x224] sm:$0xf]  ;;  %v8220_v38 = vld [vmem:[#allocation6 + $0x228] sm:$0xf0]  ;;  %v8219_v25 = vor.u32 %v10098_v13, %v8218_v49 }
 0x46b   :  { %3336 = vmatpush.bf16.msra.mxu3 %v8135_v1  ;;  %v8228_v1 = vld [vmem:[#allocation6 + $0x238] sm:$0xf0]  ;;  %v8284_v17 = vld [vmem:[#allocation6 + $0x2a8] sm:$0xf0]  ;;  %v8210_v15 = vld [vmem:[#allocation6 + $0x210] sm:$0xf]  ;;  %v8223_v63 = vor.u32 %v10097_v55, %v8220_v38 }
 0x46c   :  { %3280 = vmatpush.bf16.msra.mxu0 %v8059_v56  ;;  %v10020_v56 = vld [vmem:[#allocation2 + $0x14] sm:$0xf0]  ;;  %v8231_v57 = vor.u32 %v10099_v43, %v8228_v1  ;;  %v8274_v26 = vld [vmem:[#allocation6 + $0x290] sm:$0xf]  ;;  %v10112_v28 = vld [vmem:[#allocation6 + $0x294] sm:$0xf0] }
 0x46d   :  { %3299 = vmatpush.bf16.msra.mxu1 %v8123_v5  ;;  %v8052_v5 = vld [vmem:[#allocation2 + $0x18] sm:$0xf0]  ;;  %v8051_v62 = vor.u32 %v10020_v56, %v8050_v42  ;;  %v8212_v20 = vld [vmem:[#allocation6 + $0x218] sm:$0xf0]  ;;  %v10094_v22 = vld [vmem:[#allocation6 + $0x204] sm:$0xf0] }
 0x46e   :  { %3318 = vmatpush.bf16.msra.mxu2 %v8063_v18  ;;  %v10114_v18 = vld [vmem:[#allocation6 + $0x2a4] sm:$0xf0]  ;;  %v8186_v37 = vld [vmem:[#allocation2] sm:$0xe]  ;;  %v10090_v44 = vld [vmem:[#allocation2 + $0x4] sm:$0xf0] }
 0x46f   :  { %3337 = vmatpush.bf16.msra.mxu3 %v8127_v61  ;;  %3281 = vmatmul.bf16.vlgmr.msra.gmra.mxu0 %v8043_v11  ;;  %v8055_v61 = vor.u32 %v10019_v4, %v8052_v5  ;;  %v8266_v24 = vld [vmem:[#allocation6 + $0x280] sm:$0xf]  ;;  %v10110_v32 = vld [vmem:[#allocation6 + $0x284] sm:$0xf0]  ;;  %v10093_v23 = vld [vmem:[#allocation6 + $0x204] sm:$0xf]  ;;  %v8187_v7 = vor.u32 %v10090_v44, %v8186_v37 }
 0x470   :  { %3582 = vmatpush.bf16.msrb.mxu0 %v8259_v10  ;;  %3300 = vmatmul.bf16.vlgmr.msra.gmra.mxu1 %v8047_v46  ;;  %v8291_v10 = vor.u32 %v10116_v3, %v8290_v0  ;;  %v8194_v2 = vld [vmem:[#allocation2 + $0x10] sm:$0xf]  ;;  %v10092_v52 = vld [vmem:[#allocation2 + $0x14] sm:$0xf0]  ;;  %v8188_v36 = vld [vmem:[#allocation2 + $0x8] sm:$0xf0]  ;;  %v8267_v43 = vor.u32 %v10110_v32, %v8266_v24 }
 0x471   :  { %3601 = vmatpush.bf16.msrb.mxu1 %v8323_v30  ;;  %3319 = vmatmul.bf16.vlgmr.msra.gmra.mxu2 %v8043_v11  ;;  %v8282_v30 = vld [vmem:[#allocation6 + $0x2a0] sm:$0xf]  ;;  %v10096_v11 = vld [vmem:[#allocation6 + $0x214] sm:$0xf0]  ;;  %v10091_v60 = vld [vmem:[#allocation2 + $0x14] sm:$0xf]  ;;  %v8195_v6 = vor.u32 %v10092_v52, %v8194_v2 }
 0x472   :  { %3620 = vmatpush.bf16.msrb.mxu2 %v8263_v9  ;;  %3338 = vmatmul.bf16.vlgmr.msra.gmra.mxu3 %v8047_v46  ;;  %v10113_v9 = vld [vmem:[#allocation6 + $0x2a4] sm:$0xf]  ;;  %v10095_v46 = vld [vmem:[#allocation6 + $0x214] sm:$0xf]  ;;  %v8196_v41 = vld [vmem:[#allocation2 + $0x18] sm:$0xf0] }
 0x473   :  { %3639 = vmatpush.bf16.msrb.mxu3 %v8327_v12  ;;  %v8283_v12 = vor.u32 %v10114_v18, %v8282_v30  ;;  %v8287_v45 = vor.u32 %v10113_v9, %v8284_v17  ;;  %v8204_v31 = vld [vmem:[#allocation6 + $0x208] sm:$0xf0]  ;;  %v10109_v48 = vld [vmem:[#allocation6 + $0x284] sm:$0xf]  ;;  %v8199_v50 = vor.u32 %v10091_v60, %v8196_v41  ;;  %v10160_v0 = vld [vmem:[#allocation6 + $0x3f4] sm:$0xf0] }
 0x474   :  { %3583 = vmatpush.bf16.msrb.mxu0 %v8251_v14  ;;  %v10111_v14 = vld [vmem:[#allocation6 + $0x294] sm:$0xf]  ;;  %v8268_v40 = vld [vmem:[#allocation6 + $0x288] sm:$0xf0]  ;;  %v8404_v3 = vld [vmem:[#allocation6 + $0x378] sm:$0xf0]  ;;  %v8207_v1 = vor.u32 %v10093_v23, %v8204_v31 }
 0x475   :  { %3602 = vmatpush.bf16.msrb.mxu1 %v8315_v47  ;;  %v8276_v47 = vld [vmem:[#allocation6 + $0x298] sm:$0xf0]  ;;  %v10159_v56 = vld [vmem:[#allocation6 + $0x3f4] sm:$0xf]  ;;  %v8271_v35 = vor.u32 %v10109_v48, %v8268_v40  ;;  %v3408_v5 = vrot.slane %v8187_v7, 1  ;;  %v13168_v13 = vrot.slane %v8199_v50, 1 }
 0x476   :  { %3621 = vmatpush.bf16.msrb.mxu2 %v8255_v34  ;;  %v8202_v34 = vld [vmem:[#allocation6 + $0x200] sm:$0xf]  ;;  %v8468_v58 = vld [vmem:[#allocation6 + $0x3f8] sm:$0xf0]  ;;  %v10158_v55 = vld [vmem:[#allocation6 + $0x3e4] sm:$0xf0] }
 0x477   :  { %3640 = vmatpush.bf16.msrb.mxu3 %v8319_v27  ;;  %v8211_v27 = vor.u32 %v10096_v11, %v8210_v15  ;;  %v8203_v42 = vor.u32 %v10094_v22, %v8202_v34  ;;  %v8471_v30 = vor.u32 %v10159_v56, %v8468_v58  ;;  %v8458_v18 = vld [vmem:[#allocation6 + $0x3e0] sm:$0xf]  ;;  %v10141_v38 = vld [vmem:[#allocation6 + $0x364] sm:$0xf]  ;;  %v8388_v34 = vld [vmem:[#allocation6 + $0x358] sm:$0xf0] }
 0x478   :  { %3584 = vmatpush.bf16.msrb.mxu0 %v8243_v29  ;;  %v10089_v29 = vld [vmem:[#allocation2 + $0x4] sm:$0xe]  ;;  %v10157_v17 = vld [vmem:[#allocation6 + $0x3e4] sm:$0xf]  ;;  %v8452_v37 = vld [vmem:[#allocation6 + $0x3d8] sm:$0xf0] }
 0x479   :  { %3603 = vmatpush.bf16.msrb.mxu1 %v8307_v54  ;;  %v8275_v54 = vor.u32 %v10112_v28, %v8274_v26  ;;  %v8191_v51 = vor.u32 %v10089_v29, %v8188_v36  ;;  %v8386_v28 = vld [vmem:[#allocation6 + $0x350] sm:$0xf]  ;;  %v10155_v22 = vld [vmem:[#allocation6 + $0x3d4] sm:$0xf]  ;;  %v8378_v2 = vld [vmem:[#allocation6 + $0x340] sm:$0xf] }
 0x47a   :  { %3622 = vmatpush.bf16.msrb.mxu2 %v8247_v39  ;;  %v8215_v39 = vor.u32 %v10095_v46, %v8212_v20  ;;  %v10140_v46 = vld [vmem:[#allocation6 + $0x354] sm:$0xf0]  ;;  %v10138_v52 = vld [vmem:[#allocation6 + $0x344] sm:$0xf0]  ;;  %v8442_v29 = vld [vmem:[#allocation6 + $0x3c0] sm:$0xf] }
 0x47b   :  { %3641 = vmatpush.bf16.msrb.mxu3 %v8311_v8  ;;  %v8279_v8 = vor.u32 %v10111_v14, %v8276_v47  ;;  %v3411_v49 = vrot.slane %v8191_v51, 1  ;;  %v10156_v14 = vld [vmem:[#allocation6 + $0x3d4] sm:$0xf0]  ;;  %v10139_v47 = vld [vmem:[#allocation6 + $0x354] sm:$0xf]  ;;  %v8379_v48 = vor.u32 %v10138_v52, %v8378_v2  ;;  %vm4036_vm11 = vcmask 261120  }
 0x47c   :  { %3585 = vmatpush.bf16.msrb.mxu0 %v8235_v59  ;;  %v8402_v59 = vld [vmem:[#allocation6 + $0x370] sm:$0xf]  ;;  %v8391_v23 = vor.u32 %v10139_v47, %v8388_v34  ;;  %v10137_v36 = vld [vmem:[#allocation6 + $0x344] sm:$0xf]  ;;  %v8380_v60 = vld [vmem:[#allocation6 + $0x348] sm:$0xf0] }
 0x47d   :  { %3604 = vmatpush.bf16.msrb.mxu1 %v8299_v16  ;;  %v10144_v16 = vld [vmem:[#allocation6 + $0x374] sm:$0xf0]  ;;  %v3413_v15 = vsel %vm1796_vm0, %v3411_v49, %v13168_v13  ;;  %v10153_v41 = vld [vmem:[#allocation6 + $0x3c4] sm:$0xf]  ;;  %v10135_v50 = vld [vmem:[#allocation6 + $0x334] sm:$0xf] }
 0x47e   :  { %3623 = vmatpush.bf16.msrb.mxu2 %v8239_v53  ;;  %v8466_v53 = vld [vmem:[#allocation6 + $0x3f0] sm:$0xf]  ;;  %v8403_v4 = vor.u32 %v10144_v16, %v8402_v59  ;;  %v10136_v16 = vld [vmem:[#allocation6 + $0x334] sm:$0xf0]  ;;  %v10150_v49 = vld [vmem:[#allocation6 + $0x3a4] sm:$0xf0] }
 0x47f   :  { %3642 = vmatpush.bf16.msrb.mxu3 %v8303_v19  ;;  %3286 = vmatmul.bf16.gmra.mxu0 %v8051_v62  ;;  %v10143_v19 = vld [vmem:[#allocation6 + $0x374] sm:$0xf]  ;;  %v8370_v59 = vld [vmem:[#allocation6 + $0x330] sm:$0xf]  ;;  %v10152_v51 = vld [vmem:[#allocation6 + $0x3b4] sm:$0xf0] }
 0x480   :  { %3586 = vmatpush.bf16.msrb.mxu0 %v8227_v21  ;;  %3305 = vmatmul.bf16.gmra.mxu1 %v8055_v61  ;;  %v13166_v21 = vrot.slane %v8195_v6, 1  ;;  %v8383_v6 = vor.u32 %v10137_v36, %v8380_v60  ;;  %v8371_v56 = vor.u32 %v10136_v16, %v8370_v59  ;;  %v8410_v34 = vld [vmem:[#allocation6 + $0x380] sm:$0xf]  ;;  %v8340_v2 = vld [vmem:[#allocation2 + $0x40] sm:$0xf0] }
 0x481   :  { %3605 = vmatpush.bf16.msrb.mxu1 %v8291_v10  ;;  %3324 = vmatmul.bf16.gmra.mxu2 %v8051_v62  ;;  %v8467_v10 = vor.u32 %v10160_v0, %v8466_v53  ;;  %v8394_v62 = vld [vmem:[#allocation6 + $0x360] sm:$0xf]  ;;  %v8434_v53 = vld [vmem:[#allocation6 + $0x3b0] sm:$0xf]  ;;  %v8372_v0 = vld [vmem:[#allocation6 + $0x338] sm:$0xf0] }
 0x482   :  { %3624 = vmatpush.bf16.msrb.mxu2 %v8231_v57  ;;  %3343 = vmatmul.bf16.gmra.mxu3 %v8055_v61  ;;  %v8407_v57 = vor.u32 %v10143_v19, %v8404_v3  ;;  %v8396_v61 = vld [vmem:[#allocation6 + $0x368] sm:$0xf0]  ;;  %v3410_v9 = vsel %vm1796_vm0, %v3408_v5, %v13166_v21  ;;  %v10151_v3 = vld [vmem:[#allocation6 + $0x3b4] sm:$0xf]  ;;  %v8435_v58 = vor.u32 %v10152_v51, %v8434_v53  ;;  %v10134_v5 = vld [vmem:[#allocation6 + $0x324] sm:$0xf0] }
 0x483   :  { %3643 = vmatpush.bf16.msrb.mxu3 %v8295_v33  ;;  %v10142_v33 = vld [vmem:[#allocation6 + $0x364] sm:$0xf0]  ;;  %v8399_v26 = vor.u32 %v10141_v38, %v8396_v61  ;;  %v10145_v36 = vld [vmem:[#allocation6 + $0x384] sm:$0xf]  ;;  %v8412_v60 = vld [vmem:[#allocation6 + $0x388] sm:$0xf0] }
 0x484   :  { %3587 = vmatpush.bf16.msrb.mxu0 %v8219_v25  ;;  %v8460_v25 = vld [vmem:[#allocation6 + $0x3e8] sm:$0xf0]  ;;  %v8395_v11 = vor.u32 %v10142_v33, %v8394_v62  ;;  %v8415_v59 = vor.u32 %v10145_v36, %v8412_v60 }
 0x485   :  { %3606 = vmatpush.bf16.msrb.mxu1 %v8283_v12  ;;  %v3353_v12 = vld [vmem:[#allocation2 + $0x20] sm:$0x11]  ;;  %v8463_v20 = vor.u32 %v10157_v17, %v8460_v25  ;;  %v8364_v62 = vld [vmem:[#allocation6 + $0x328] sm:$0xf0]  ;;  %v10132_v17 = vld [vmem:[#allocation6 + $0x314] sm:$0xf0] }
 0x486   :  { %3625 = vmatpush.bf16.msrb.mxu2 %v8223_v63  ;;  %v8459_v63 = vor.u32 %v10158_v55, %v8458_v18  ;;  %v3400_v44 = vunpack.c.l.b16 %v3353_v12  ;;  %v3401_v24 = vunpack.c.h.b16 %v3353_v12  ;;  %v10149_v18 = vld [vmem:[#allocation6 + $0x3a4] sm:$0xf]  ;;  %v8428_v55 = vld [vmem:[#allocation6 + $0x3a8] sm:$0xf0]  ;;  %v10148_v12 = vld [vmem:[#allocation6 + $0x394] sm:$0xf0] }
 0x487   :  { %3644 = vmatpush.bf16.msrb.mxu3 %v8287_v45  ;;  %v8450_v45 = vld [vmem:[#allocation6 + $0x3d0] sm:$0xf] }
 0x488   :  { %3588 = vmatpush.bf16.msrb.mxu0 %v8211_v27  ;;  %v8387_v27 = vor.u32 %v10140_v46, %v8386_v28  ;;  %v8451_v32 = vor.u32 %v10156_v14, %v8450_v45  ;;  %v3406_v31 = vpack.c.b16 %v3400_v44, %v3400_v44  ;;  %v3407_v40 = vpack.c.b16 %v3401_v24, %v3401_v24  ;;  %v10147_v28 = vld [vmem:[#allocation6 + $0x394] sm:$0xf]  ;;  %v8420_v46 = vld [vmem:[#allocation6 + $0x398] sm:$0xf0]  ;;  %v10130_v45 = vld [vmem:[#allocation6 + $0x304] sm:$0xf0] }
 0x489   :  { %3607 = vmatpush.bf16.msrb.mxu1 %v8275_v54  ;;  %v8455_v54 = vor.u32 %v10155_v22, %v8452_v37  ;;  %v10126_v14 = vld [vmem:[#allocation2 + $0x2c] sm:$0xf0]  ;;  %v8338_v22 = vld [vmem:[#allocation2 + $0x38] sm:$0xf]  ;;  %v10128_v37 = vld [vmem:[#allocation2 + $0x3c] sm:$0xf0]  ;;  %v8423_v52 = vor.u32 %v10147_v28, %v8420_v46 }
 0x48a   :  { %3626 = vmatpush.bf16.msrb.mxu2 %v8215_v39  ;;  %v10154_v39 = vld [vmem:[#allocation6 + $0x3c4] sm:$0xf0]  ;;  %v3414_v19 = vrot.slane %v3406_v31, 1  ;;  %v10125_v44 = vld [vmem:[#allocation2 + $0x2c] sm:$0xe] }
 0x48b   :  { %3645 = vmatpush.bf16.msrb.mxu3 %v8279_v8  ;;  %v8444_v8 = vld [vmem:[#allocation6 + $0x3c8] sm:$0xf0]  ;;  %v8443_v7 = vor.u32 %v10154_v39, %v8442_v29  ;;  %v10146_v29 = vld [vmem:[#allocation6 + $0x384] sm:$0xf0] }
 0x48c   :  { %3589 = vmatpush.bf16.msrb.mxu0 %v8203_v42  ;;  %v8447_v42 = vor.u32 %v10153_v41, %v8444_v8  ;;  %v3415_v33 = vsel %vm1796_vm0, %v13166_v21, %v3414_v19  ;;  %v8356_v21 = vld [vmem:[#allocation6 + $0x318] sm:$0xf0]  ;;  %v8348_v39 = vld [vmem:[#allocation6 + $0x308] sm:$0xf0]  ;;  %v8339_v8 = vor.u32 %v10128_v37, %v8338_v22 }
 0x48d   :  { %3608 = vmatpush.bf16.msrb.mxu1 %v8267_v43  ;;  %v8436_v43 = vld [vmem:[#allocation6 + $0x3b8] sm:$0xf0] }
 0x48e   :  { %3627 = vmatpush.bf16.msrb.mxu2 %v8207_v1  ;;  %v3416_v1 = vrot.slane %v3407_v40, 1  ;;  %v3726_v53 = vrot.slane %v8339_v8, 1  ;;  %v3670_v19 = vld [vmem:[#allocation2 + $0x48] sm:$0x11] }
 0x48f   :  { %3646 = vmatpush.bf16.msrb.mxu3 %v8271_v35  ;;  %3590 = vmatmul.bf16.vlgmr.msrb.gmra.mxu0 %v3410_v9  ;;  %v8375_v35 = vor.u32 %v10135_v50, %v8372_v0 }
 0x490   :  { %3899 = vmatpush.bf16.msra.mxu0 %v8403_v4  ;;  %3609 = vmatmul.bf16.vlgmr.msrb.gmra.mxu1 %v3413_v15  ;;  %v8362_v4 = vld [vmem:[#allocation6 + $0x320] sm:$0xf]  ;;  %v3417_v38 = vsel %vm1796_vm0, %v13168_v13, %v3416_v1 }
 0x491   :  { %3918 = vmatpush.bf16.msra.mxu1 %v8467_v10  ;;  %3628 = vmatmul.bf16.vlgmr.msrb.gmra.mxu2 %v3410_v9  ;;  %v8426_v10 = vld [vmem:[#allocation6 + $0x3a0] sm:$0xf]  ;;  %v8363_v61 = vor.u32 %v10134_v5, %v8362_v4  ;;  %v8354_v9 = vld [vmem:[#allocation6 + $0x310] sm:$0xf] }
 0x492   :  { %3937 = vmatpush.bf16.msra.mxu2 %v8407_v57  ;;  %3647 = vmatmul.bf16.vlgmr.msrb.gmra.mxu3 %v3413_v15  ;;  %v8439_v57 = vor.u32 %v10151_v3, %v8436_v43  ;;  %v8427_v25 = vor.u32 %v10150_v49, %v8426_v10  ;;  %v8346_v13 = vld [vmem:[#allocation6 + $0x300] sm:$0xf]  ;;  %v8355_v47 = vor.u32 %v10132_v17, %v8354_v9  ;;  %v3717_v3 = vunpack.c.l.b16 %v3670_v19 }
 0x493   :  { %3956 = vmatpush.bf16.msra.mxu3 %v8471_v30  ;;  %v10133_v30 = vld [vmem:[#allocation6 + $0x324] sm:$0xf]  ;;  %v8347_v31 = vor.u32 %v10130_v45, %v8346_v13  ;;  %v3718_v43 = vunpack.c.h.b16 %v3670_v19 }
 0x494   :  { %3900 = vmatpush.bf16.msra.mxu0 %v8395_v11  ;;  %v8367_v15 = vor.u32 %v10133_v30, %v8364_v62  ;;  %v8418_v11 = vld [vmem:[#allocation6 + $0x390] sm:$0xf]  ;;  %v3723_v1 = vpack.c.b16 %v3717_v3, %v3717_v3 }
 0x495   :  { %3919 = vmatpush.bf16.msra.mxu1 %v8459_v63  ;;  %v10131_v63 = vld [vmem:[#allocation6 + $0x314] sm:$0xf] }
 0x496   :  { %3938 = vmatpush.bf16.msra.mxu2 %v8399_v26  ;;  %v8431_v26 = vor.u32 %v10149_v18, %v8428_v55  ;;  %v8359_v24 = vor.u32 %v10131_v63, %v8356_v21 }
 0x497   :  { %3957 = vmatpush.bf16.msra.mxu3 %v8463_v20  ;;  %v8330_v20 = vld [vmem:[#allocation2 + $0x28] sm:$0xe] }
 0x498   :  { %3901 = vmatpush.bf16.msra.mxu0 %v8387_v27  ;;  %v8419_v27 = vor.u32 %v10148_v12, %v8418_v11  ;;  %v8331_v41 = vor.u32 %v10126_v14, %v8330_v20 }
 0x499   :  { %3920 = vmatpush.bf16.msra.mxu1 %v8451_v32  ;;  %v8332_v32 = vld [vmem:[#allocation2 + $0x30] sm:$0xf0] }
 0x49a   :  { %3939 = vmatpush.bf16.msra.mxu2 %v8391_v23  ;;  %v10127_v23 = vld [vmem:[#allocation2 + $0x3c] sm:$0xf]  ;;  %v3725_v16 = vrot.slane %v8331_v41, 1 }
 0x49b   :  { %3958 = vmatpush.bf16.msra.mxu3 %v8455_v54  ;;  %v10129_v54 = vld [vmem:[#allocation6 + $0x304] sm:$0xf]  ;;  %v8343_v40 = vor.u32 %v10127_v23, %v8340_v2 }
 0x49c   :  { %3902 = vmatpush.bf16.msra.mxu0 %v8379_v48  ;;  %v8335_v48 = vor.u32 %v10125_v44, %v8332_v32  ;;  %v3727_v50 = vsel %vm1796_vm0, %v3725_v16, %v3726_v53 }
 0x49d   :  { %3921 = vmatpush.bf16.msra.mxu1 %v8443_v7  ;;  %v8411_v7 = vor.u32 %v10146_v29, %v8410_v34  ;;  %v3729_v51 = vrot.slane %v8343_v40, 1 }
 0x49e   :  { %3940 = vmatpush.bf16.msra.mxu2 %v8383_v6  ;;  %v8351_v6 = vor.u32 %v10129_v54, %v8348_v39 }
 0x49f   :  { %3959 = vmatpush.bf16.msra.mxu3 %v8447_v42  ;;  %3595 = vmatmul.bf16.gmra.mxu0 %v3415_v33  ;;  %v3728_v42 = vrot.slane %v8335_v48, 1 }
 0x4a0   :  { %3903 = vmatpush.bf16.msra.mxu0 %v8371_v56  ;;  %3614 = vmatmul.bf16.gmra.mxu1 %v3417_v38  ;;  %v3724_v56 = vpack.c.b16 %v3718_v43, %v3718_v43 }
 0x4a1   :  { %3922 = vmatpush.bf16.msra.mxu1 %v8435_v58  ;;  %3633 = vmatmul.bf16.gmra.mxu2 %v3415_v33  ;;  %v3730_v0 = vsel %vm1796_vm0, %v3728_v42, %v3729_v51  ;;  %v3731_v58 = vrot.slane %v3723_v1, 1 }
 0x4a2   :  { %3941 = vmatpush.bf16.msra.mxu2 %v8375_v35  ;;  %3652 = vmatmul.bf16.gmra.mxu3 %v3417_v38  ;;  %v3733_v35 = vrot.slane %v3724_v56, 1 }
 0x4a3   :  { %3960 = vmatpush.bf16.msra.mxu3 %v8439_v57  ;;  %v3732_v4 = vsel %vm1796_vm0, %v3726_v53, %v3731_v58 }
 0x4a4   :  { %3904 = vmatpush.bf16.msra.mxu0 %v8363_v61  ;;  %v3734_v5 = vsel %vm1796_vm0, %v3729_v51, %v3733_v35 }
 0x4a5   :  { %3923 = vmatpush.bf16.msra.mxu1 %v8427_v25 }
 0x4a6   :  { %3942 = vmatpush.bf16.msra.mxu2 %v8367_v15 }
 0x4a7   :  { %3961 = vmatpush.bf16.msra.mxu3 %v8431_v26 }
 0x4a8   :  { %3905 = vmatpush.bf16.msra.mxu0 %v8355_v47 }
 0x4a9   :  { %3924 = vmatpush.bf16.msra.mxu1 %v8419_v27 }
 0x4aa   :  { %3943 = vmatpush.bf16.msra.mxu2 %v8359_v24 }
 0x4ab   :  { %3962 = vmatpush.bf16.msra.mxu3 %v8423_v52 }
 0x4ac   :  { %3906 = vmatpush.bf16.msra.mxu0 %v8347_v31 }
 0x4ad   :  { %3925 = vmatpush.bf16.msra.mxu1 %v8411_v7 }
 0x4ae   :  { %3944 = vmatpush.bf16.msra.mxu2 %v8351_v6 }
 0x4af   :  { %3963 = vmatpush.bf16.msra.mxu3 %v8415_v59  ;;  %3907 = vmatmul.bf16.vlgmr.msra.gmra.mxu0 %v3727_v50 }
 0x4b0   :  { %3926 = vmatmul.bf16.vlgmr.msra.gmra.mxu1 %v3730_v0 }
 0x4b1   :  { %3945 = vmatmul.bf16.vlgmr.msra.gmra.mxu2 %v3727_v50 }
 0x4b2   :  { %3964 = vmatmul.bf16.vlgmr.msra.gmra.mxu3 %v3730_v0 }
 0x4bf   :  { %3912 = vmatmul.bf16.gmra.mxu0 %v3732_v4 }
 0x4c0   :  { %3931 = vmatmul.bf16.gmra.mxu1 %v3734_v5 }
 0x4c1   :  { %3950 = vmatmul.bf16.gmra.mxu2 %v3732_v4 }
 0x4c2   :  { %3969 = vmatmul.bf16.gmra.mxu3 %v3734_v5 }
 0x4cc   :  { %v3026_v10 = vpop.f32.mrf.mxu0 }
 0x4cd   :  { %v3045_v57 = vpop.f32.mrf.mxu1 }
 0x4ce   :  { %v3046_v49 = vadd.f32 %v3045_v57, %v3026_v10 }
 0x4d4   :  { %v3064_v30 = vpop.f32.mrf.mxu2  ;;  %v3028_v33 = vpop.f32.mrf.mxu0 }
 0x4d5   :  { %v3083_v62 = vpop.f32.mrf.mxu3  ;;  %v3047_v55 = vpop.f32.mrf.mxu1 }
 0x4d6   :  { %v3084_v18 = vadd.f32 %v3083_v62, %v3064_v30  ;;  %v3048_v38 = vadd.f32 %v3047_v55, %v3028_v33 }
 0x4dc   :  { %v3066_v61 = vpop.f32.mrf.mxu2  ;;  %v3031_v17 = vpop.f32.mrf.mxu0 }
 0x4dd   :  { %v3085_v9 = vpop.f32.mrf.mxu3  ;;  %v3050_v15 = vpop.f32.mrf.mxu1 }
 0x4de   :  { %v3086_v25 = vadd.f32 %v3085_v9, %v3066_v61  ;;  %v3051_v11 = vadd.f32 %v3050_v15, %v3031_v17 }
 0x4e4   :  { %v3069_v12 = vpop.f32.mrf.mxu2  ;;  %v3033_v26 = vpop.f32.mrf.mxu0 }
 0x4e5   :  { %v3088_v63 = vpop.f32.mrf.mxu3  ;;  %v3052_v28 = vpop.f32.mrf.mxu1 }
 0x4e6   :  { %v3089_v21 = vadd.f32 %v3088_v63, %v3069_v12  ;;  %v13182_v46 = vadd.f32 %v3052_v28, %v3033_v26 }
 0x4ec   :  { %v3071_v13 = vpop.f32.mrf.mxu2  ;;  %v3282_v20 = vpop.f32.mrf.mxu0 }
 0x4ed   :  { %v3090_v45 = vpop.f32.mrf.mxu3  ;;  %v3283_v47 = vadd.f32 %v3282_v20, %v3046_v49  ;;  %v3301_v34 = vpop.f32.mrf.mxu1 }
 0x4ee   :  { %v13184_v14 = vadd.f32 %v3090_v45, %v3071_v13 }
 0x4ef   :  { %v3302_v22 = vadd.f32 %v3301_v34, %v3283_v47 }
 0x4f4   :  { %v3320_v37 = vpop.f32.mrf.mxu2  ;;  %v3284_v24 = vpop.f32.mrf.mxu0 }
 0x4f5   :  { %v3321_v44 = vadd.f32 %v3320_v37, %v3084_v18  ;;  %v3339_v27 = vpop.f32.mrf.mxu3  ;;  %v3285_v32 = vadd.f32 %v3284_v24, %v3048_v38  ;;  %v3303_v23 = vpop.f32.mrf.mxu1  ;;  %v3983_v38 = vld [vmem:[%s13265_s5] sm:$0x3] }
 0x4f7   :  { %v3340_v2 = vadd.f32 %v3339_v27, %v3321_v44  ;;  %v3304_v52 = vadd.f32 %v3303_v23, %v3285_v32  ;;  %v3986_v44 = vperm.slane %v3983_v38, 1 }
 0x4fc   :  { %v3322_v29 = vpop.f32.mrf.mxu2  ;;  %v3287_v36 = vpop.f32.mrf.mxu0 }
 0x4fd   :  { %v3323_v54 = vadd.f32 %v3322_v29, %v3086_v25  ;;  %v3341_v39 = vpop.f32.mrf.mxu3  ;;  %v3288_v60 = vadd.f32 %v3287_v36, %v3051_v11  ;;  %v3306_v41 = vpop.f32.mrf.mxu1  ;;  %v3985_v25 = vperm.slane %v3983_v38, 0 }
 0x4ff   :  { %v3342_v8 = vadd.f32 %v3341_v39, %v3323_v54  ;;  %v13186_v31 = vadd.f32 %v3306_v41, %v3288_v60 }
 0x504   :  { %v3325_v48 = vpop.f32.mrf.mxu2  ;;  %v3289_v6 = vpop.f32.mrf.mxu0 }
 0x505   :  { %v3326_v40 = vadd.f32 %v3325_v48, %v3089_v21  ;;  %v3344_v7 = vpop.f32.mrf.mxu3  ;;  %v13188_v59 = vpop.f32.mrf.mxu1 }
 0x507   :  { %v13190_v16 = vadd.f32 %v3344_v7, %v3326_v40 }
 0x50c   :  { %v13192_v53 = vpop.f32.mrf.mxu2  ;;  %v3591_v51 = vpop.f32.mrf.mxu0 }
 0x50d   :  { %v13194_v42 = vpop.f32.mrf.mxu3  ;;  %v3610_v50 = vpop.f32.mrf.mxu1 }
 0x50e   :  { %v3611_v30 = vadd.f32 %v3610_v50, %v3591_v51  ;;  %v3290_v51 = vadd.f32 %v3289_v6, %v13182_v46 }
 0x510   :  { %v3658_v61 = vadd.f32 %v3611_v30, %v3302_v22 }
 0x514   :  { %v3629_v0 = vpop.f32.mrf.mxu2  ;;  %v3593_v3 = vpop.f32.mrf.mxu0 }
 0x515   :  { %v3648_v19 = vpop.f32.mrf.mxu3  ;;  %v3612_v43 = vpop.f32.mrf.mxu1 }
 0x516   :  { %v3613_v9 = vadd.f32 %v3612_v43, %v3593_v3  ;;  %v3649_v15 = vadd.f32 %v3648_v19, %v3629_v0 }
 0x518   :  { %v3660_v28 = vadd.f32 %v3613_v9, %v3304_v52  ;;  %v3659_v20 = vadd.f32 %v3649_v15, %v3340_v2 }
 0x51c   :  { %v3631_v1 = vpop.f32.mrf.mxu2  ;;  %v3596_v58 = vpop.f32.mrf.mxu0 }
 0x51d   :  { %v3650_v56 = vpop.f32.mrf.mxu3  ;;  %v3615_v35 = vpop.f32.mrf.mxu1 }
 0x51e   :  { %v3651_v34 = vadd.f32 %v3650_v56, %v3631_v1  ;;  %v3616_v32 = vadd.f32 %v3615_v35, %v3596_v58  ;;  %v3309_v58 = vadd.f32 %v13188_v59, %v3290_v51 }
 0x520   :  { %v3661_v39 = vadd.f32 %v3651_v34, %v3342_v8  ;;  %v3662_v50 = vadd.f32 %v3616_v32, %v13186_v31 }
 0x524   :  { %v3634_v4 = vpop.f32.mrf.mxu2  ;;  %v3598_v10 = vpop.f32.mrf.mxu0 }
 0x525   :  { %v3653_v5 = vpop.f32.mrf.mxu3  ;;  %v3617_v57 = vpop.f32.mrf.mxu1 }
 0x526   :  { %v3618_v3 = vadd.f32 %v3617_v57, %v3598_v10  ;;  %v3654_v1 = vadd.f32 %v3653_v5, %v3634_v4  ;;  %v3328_v10 = vadd.f32 %v13192_v53, %v13184_v14 }
 0x528   :  { %v3664_v46 = vadd.f32 %v3618_v3, %v3309_v58  ;;  %v3663_v4 = vadd.f32 %v3654_v1, %v13190_v16  ;;  %v3347_v15 = vadd.f32 %v13194_v42, %v3328_v10 }
 0x52c   :  { %v13196_v49 = vpop.f32.mrf.mxu2  ;;  %v3908_v33 = vpop.f32.mrf.mxu0 }
 0x52d   :  { %v13198_v62 = vpop.f32.mrf.mxu3  ;;  %v3927_v18 = vpop.f32.mrf.mxu1 }
 0x52e   :  { %v3928_v55 = vadd.f32 %v3927_v18, %v3908_v33  ;;  %v3656_v57 = vadd.f32 %v13198_v62, %v13196_v49 }
 0x530   :  { %v3975_v17 = vadd.f32 %v3928_v55, %v3658_v61 }
 0x532   :  { %v3989_v13 = vadd.f32 %v3985_v25, %v3975_v17 }
 0x534   :  { %v3946_v11 = vpop.f32.mrf.mxu2  ;;  %v3910_v63 = vpop.f32.mrf.mxu0  ;;  %v4005_v27 = vmul.f32 0.2, %v3989_v13  ;;  %vm3997_vm3 = vcmp.ge.f32.partialorder %v3989_v13, 0.0 }
 0x535   :  { %v3965_v12 = vpop.f32.mrf.mxu3  ;;  %v3929_v21 = vpop.f32.mrf.mxu1 }
 0x536   :  { %v3966_v26 = vadd.f32 %v3965_v12, %v3946_v11  ;;  %v3930_v45 = vadd.f32 %v3929_v21, %v3910_v63  ;;  %v4013_v48 = vsel %vm3997_vm3, %v3989_v13, %v4005_v27 }
 0x538   :  { %v3977_v47 = vadd.f32 %v3930_v45, %v3660_v28  ;;  %v3976_v37 = vadd.f32 %v3966_v26, %v3659_v20  ;;  %v3665_v26 = vadd.f32 %v3656_v57, %v3347_v15 }
 0x53a   :  { %v3991_v24 = vadd.f32 %v3985_v25, %v3977_v47  ;;  %v3990_v36 = vadd.f32 %v3986_v44, %v3976_v37  ;;  %v10161_v47 = vld [vmem:[%s13266_s6] sm:$0xff]  ;;  %v8482_v37 = vld [vmem:[%s13266_s6 + $0x14] sm:$0x1] }
 0x53b   :  { %v4094_v27 = vunpack.c.l.b16 %v8482_v37 }
 0x53c   :  { %v3948_v22 = vpop.f32.mrf.mxu2  ;;  %v4007_v23 = vmul.f32 0.2, %v3991_v24  ;;  %v3913_v54 = vpop.f32.mrf.mxu0  ;;  %vm3999_vm4 = vcmp.ge.f32.partialorder %v3991_v24, 0.0  ;;  %v4006_v0 = vmul.f32 0.2, %v3990_v36  ;;  %vm3998_vm5 = vcmp.ge.f32.partialorder %v3990_v36, 0.0 }
 0x53d   :  { %v3967_v29 = vpop.f32.mrf.mxu3  ;;  %v3932_v52 = vpop.f32.mrf.mxu1 }
 0x53e   :  { %v3968_v60 = vadd.f32 %v3967_v29, %v3948_v22  ;;  %v3933_v41 = vadd.f32 %v3932_v52, %v3913_v54  ;;  %v4015_v2 = vsel %vm3999_vm4, %v3991_v24, %v4007_v23  ;;  %v4014_v55 = vsel %vm3998_vm5, %v3990_v36, %v4006_v0 }
 0x53f   :  { %v4021_v7 = vpack.c.bf16 %v4015_v2, %v4013_v48  ;;  %v4096_v22 = vpack.c.b16 %v4094_v27, %v4094_v27 }
 0x540   :  { %v3978_v40 = vadd.f32 %v3968_v60, %v3661_v39  ;;  %v3979_v43 = vadd.f32 %v3933_v41, %v3662_v50 }
 0x542   :  { %v3992_v19 = vadd.f32 %v3986_v44, %v3978_v40  ;;  %v3993_v6 = vadd.f32 %v3985_v25, %v3979_v43 }
 0x544   :  { %v4008_v56 = vmul.f32 0.2, %v3992_v19  ;;  %v3951_v8 = vpop.f32.mrf.mxu2  ;;  %vm4000_vm6 = vcmp.ge.f32.partialorder %v3992_v19, 0.0  ;;  %v3915_v30 = vpop.f32.mrf.mxu0  ;;  %v4009_v9 = vmul.f32 0.2, %v3993_v6  ;;  %vm4001_vm7 = vcmp.ge.f32.partialorder %v3993_v6, 0.0 }
 0x545   :  { %v3970_v35 = vpop.f32.mrf.mxu3  ;;  %v3934_v18 = vpop.f32.mrf.mxu1 }
 0x546   :  { %v3971_v33 = vadd.f32 %v3970_v35, %v3951_v8  ;;  %v4016_v38 = vsel %vm4000_vm6, %v3992_v19, %v4008_v56  ;;  %v3935_v31 = vadd.f32 %v3934_v18, %v3915_v30  ;;  %v4017_v14 = vsel %vm4001_vm7, %v3993_v6, %v4009_v9 }
 0x547   :  { %v4022_v61 = vpack.c.bf16 %v4016_v38, %v4014_v55 }
 0x548   :  { %v3981_v5 = vadd.f32 %v3935_v31, %v3664_v46  ;;  %v3980_v59 = vadd.f32 %v3971_v33, %v3663_v4 }
 0x54a   :  { %v3995_v17 = vadd.f32 %v3985_v25, %v3981_v5  ;;  %v3994_v21 = vadd.f32 %v3986_v44, %v3980_v59  ;;  %v10162_v25 = vld [vmem:[%s13266_s6 + $0xc] sm:$0xff] }
 0x54c   :  { %v3953_v11 = vpop.f32.mrf.mxu2  ;;  %vm4003_vm8 = vcmp.ge.f32.partialorder %v3995_v17, 0.0  ;;  %v4011_v12 = vmul.f32 0.2, %v3995_v17  ;;  %v4010_v45 = vmul.f32 0.2, %v3994_v21  ;;  %vm4002_vm9 = vcmp.ge.f32.partialorder %v3994_v21, 0.0 }
 0x54d   :  { %v3972_v63 = vpop.f32.mrf.mxu3 }
 0x54e   :  { %v3973_v28 = vadd.f32 %v3972_v63, %v3953_v11  ;;  %v4019_v53 = vsel %vm4003_vm8, %v3995_v17, %v4011_v12  ;;  %v4018_v42 = vsel %vm4002_vm9, %v3994_v21, %v4010_v45 }
 0x54f   :  { %v4023_v13 = vpack.c.bf16 %v4019_v53, %v4017_v14 }
 0x550   :  { %v3982_v16 = vadd.f32 %v3973_v28, %v3665_v26 }
 0x551   :  { %4049 = vmatpush.bf16.msrb.mxu0 %v4023_v13  ;;  %4109 = vmatpush.bf16.msrb.mxu2 %v4023_v13 }
 0x552   :  { %v3996_v20 = vadd.f32 %v3986_v44, %v3982_v16  ;;  %v4027_v44 = vld [vmem:[%s13266_s6 + $0x8] sm:$0x1] }
 0x553   :  { %v4033_v24 = vunpack.c.l.b16 %v4027_v44 }
 0x554   :  { %vm4004_vm10 = vcmp.ge.f32.partialorder %v3996_v20, 0.0  ;;  %v4012_v49 = vmul.f32 0.2, %v3996_v20 }
 0x555   :  { %4050 = vmatpush.bf16.msrb.mxu0 %v4021_v7  ;;  %4110 = vmatpush.bf16.msrb.mxu2 %v4021_v7  ;;  %v4035_v32 = vpack.c.b16 %v4033_v24, %v4033_v24 }
 0x556   :  { %v4020_v62 = vsel %vm4004_vm10, %v3996_v20, %v4012_v49 }
 0x557   :  { %v4024_v34 = vpack.c.bf16 %v4020_v62, %v4018_v42 }
 0x558   :  { %8487 = vmatmul.msk.bf16.vlgmr.msrb.gmra.mxu2 %vm4036_vm11, %v10162_v25  ;;  %8476 = vmatmul.msk.bf16.vlgmr.msrb.gmra.mxu0 %vm4036_vm11, %v10161_v47 }
 0x559   :  { %4067 = vmatpush.bf16.msrb.mxu1 %v4024_v34  ;;  %4127 = vmatpush.bf16.msrb.mxu3 %v4024_v34 }
 0x55d   :  { %4068 = vmatpush.bf16.msrb.mxu1 %v4022_v61  ;;  %4128 = vmatpush.bf16.msrb.mxu3 %v4022_v61 }
 0x560   :  { %8489 = vmatmul.msk.bf16.vlgmr.msrb.gmra.mxu3 %vm4036_vm11, %v10162_v25  ;;  %8478 = vmatmul.msk.bf16.vlgmr.msrb.gmra.mxu1 %vm4036_vm11, %v10161_v47 }
 0x568   :  { %8488 = vmatmul.msk.bf16.gmra.mxu2 %vm4036_vm11, %v4096_v22  ;;  %8477 = vmatmul.msk.bf16.gmra.mxu0 %vm4036_vm11, %v4035_v32 }
 0x570   :  { %8490 = vmatmul.msk.bf16.gmra.mxu3 %vm4036_vm11, %v4096_v22  ;;  %8479 = vmatmul.msk.bf16.gmra.mxu1 %vm4036_vm11, %v4035_v32 }
 0x5d5   :  { %v4052_v23 = vpop.f32.mrf.mxu0 }
 0x5db   :  { %v4112_v54 = vpop.f32.mrf.mxu2 }
 0x5dd   :  { %v4070_v29 = vpop.f32.mrf.mxu1  ;;  %v4054_v36 = vpop.f32.mrf.mxu0 }
 0x5de   :  { %v4079_v39 = vpack.c.bf16 %v4070_v29, %v4052_v23 }
 0x5e0   :  { %4082 = vst [vmem:[#allocation3] sm:$0xff] %v4079_v39 }
 0x5e3   :  { %v4130_v60 = vpop.f32.mrf.mxu3  ;;  %v4114_v48 = vpop.f32.mrf.mxu2 }
 0x5e4   :  { %v4139_v52 = vpack.c.bf16 %v4130_v60, %v4112_v54 }
 0x5e5   :  { %v4072_v41 = vpop.f32.mrf.mxu1  ;;  %v4057_v40 = vpop.f32.mrf.mxu0 }
 0x5e6   :  { %4143 = vst [vmem:[#allocation3 + $0x18] sm:$0xff] %v4139_v52  ;;  %v4080_v2 = vpack.c.bf16 %v4072_v41, %v4054_v36 }
 0x5e8   :  { %4083 = vst [vmem:[#allocation3 + $0x8] sm:$0xff] %v4080_v2 }
 0x5eb   :  { %v4132_v7 = vpop.f32.mrf.mxu3  ;;  %v4117_v0 = vpop.f32.mrf.mxu2 }
 0x5ec   :  { %v4140_v51 = vpack.c.bf16 %v4132_v7, %v4114_v48 }
 0x5ed   :  { %v4075_v50 = vpop.f32.mrf.mxu1  ;;  %v4059_v3 = vpop.f32.mrf.mxu0 }
 0x5ee   :  { %4144 = vst [vmem:[#allocation3 + $0x20] sm:$0xff] %v4140_v51  ;;  %v4081_v19 = vpack.c.bf16 %v4075_v50, %v4057_v40 }
 0x5f0   :  { %4084 = vst [vmem:[#allocation3 + $0x10] sm:$0x11] %v4081_v19 }
 0x5f3   :  { %v4135_v43 = vpop.f32.mrf.mxu3  ;;  %v4119_v8 = vpop.f32.mrf.mxu2 }
 0x5f4   :  { %v4141_v1 = vpack.c.bf16 %v4135_v43, %v4117_v0 }
 0x5f5   :  { %v4077_v56 = vpop.f32.mrf.mxu1 }
 0x5f6   :  { %4145 = vst [vmem:[#allocation3 + $0x28] sm:$0x11] %v4141_v1 }
 0x5fb   :  { %v4137_v58 = vpop.f32.mrf.mxu3 }
 0x5fc   :  { %10505 = dma.done.wait [#allocation10 + $0x1], 16384 }
 0x5fd   :  { %10506 = vsyncadd [#allocation10 + $0x1], 4294950912  ;;  %v8557_v35 = vld [vmem:[#allocation7 + $0x170] sm:$0xf]  ;;  %v10214_v30 = vld [vmem:[#allocation7 + $0x174] sm:$0xf0] }
 0x5fe   :  { %v8621_v33 = vld [vmem:[#allocation7 + $0x1f0] sm:$0xf]  ;;  %v8558_v18 = vor.u32 %v10214_v30, %v8557_v35  ;;  %v10230_v55 = vld [vmem:[#allocation7 + $0x1f4] sm:$0xf0]  ;;  %v10213_v38 = vld [vmem:[#allocation7 + $0x174] sm:$0xf] }
 0x5ff   :  { %v8559_v46 = vld [vmem:[#allocation7 + $0x178] sm:$0xf0]  ;;  %v8622_v6 = vor.u32 %v10230_v55, %v8621_v33  ;;  %v10229_v61 = vld [vmem:[#allocation7 + $0x1f4] sm:$0xf]  ;;  %v8549_v4 = vld [vmem:[#allocation7 + $0x160] sm:$0xf] }
 0x600   :  { %v8562_v31 = vor.u32 %v10213_v38, %v8559_v46  ;;  %v8623_v10 = vld [vmem:[#allocation7 + $0x1f8] sm:$0xf0]  ;;  %4387 = vmatpush.bf16.msra.mxu0 %v8558_v18  ;;  %v10212_v57 = vld [vmem:[#allocation7 + $0x164] sm:$0xf0]  ;;  %v8613_v59 = vld [vmem:[#allocation7 + $0x1e0] sm:$0xf] }
 0x601   :  { %v8626_v5 = vor.u32 %v10229_v61, %v8623_v10  ;;  %v10228_v9 = vld [vmem:[#allocation7 + $0x1e4] sm:$0xf0]  ;;  %4401 = vmatpush.bf16.msra.mxu1 %v8622_v6  ;;  %v8550_v17 = vor.u32 %v10212_v57, %v8549_v4  ;;  %v10211_v11 = vld [vmem:[#allocation7 + $0x164] sm:$0xf]  ;;  %v8551_v12 = vld [vmem:[#allocation7 + $0x168] sm:$0xf0] }
 0x602   :  { %4415 = vmatpush.bf16.msra.mxu2 %v8562_v31  ;;  %v8614_v15 = vor.u32 %v10228_v9, %v8613_v59  ;;  %v10227_v63 = vld [vmem:[#allocation7 + $0x1e4] sm:$0xf]  ;;  %v8554_v26 = vor.u32 %v10211_v11, %v8551_v12  ;;  %v8615_v21 = vld [vmem:[#allocation7 + $0x1e8] sm:$0xf0]  ;;  %v8541_v28 = vld [vmem:[#allocation7 + $0x150] sm:$0xf] }
 0x603   :  { %4429 = vmatpush.bf16.msra.mxu3 %v8626_v5  ;;  %v10210_v14 = vld [vmem:[#allocation7 + $0x154] sm:$0xf0]  ;;  %v8618_v53 = vor.u32 %v10227_v63, %v8615_v21  ;;  %v8605_v16 = vld [vmem:[#allocation7 + $0x1d0] sm:$0xf]  ;;  %v10209_v45 = vld [vmem:[#allocation7 + $0x154] sm:$0xf] }
 0x604   :  { %v10226_v13 = vld [vmem:[#allocation7 + $0x1d4] sm:$0xf0]  ;;  %4388 = vmatpush.bf16.msra.mxu0 %v8550_v17  ;;  %v8542_v20 = vor.u32 %v10210_v14, %v8541_v28  ;;  %v8543_v49 = vld [vmem:[#allocation7 + $0x158] sm:$0xf0]  ;;  %v10225_v42 = vld [vmem:[#allocation7 + $0x1d4] sm:$0xf] }
 0x605   :  { %v8607_v62 = vld [vmem:[#allocation7 + $0x1d8] sm:$0xf0]  ;;  %4402 = vmatpush.bf16.msra.mxu1 %v8614_v15  ;;  %v8606_v25 = vor.u32 %v10226_v13, %v8605_v16  ;;  %v8546_v47 = vor.u32 %v10209_v45, %v8543_v49  ;;  %v8533_v34 = vld [vmem:[#allocation7 + $0x140] sm:$0xf]  ;;  %v10208_v37 = vld [vmem:[#allocation7 + $0x144] sm:$0xf0] }
 0x606   :  { %4416 = vmatpush.bf16.msra.mxu2 %v8554_v26  ;;  %v8597_v44 = vld [vmem:[#allocation7 + $0x1c0] sm:$0xf]  ;;  %v8610_v27 = vor.u32 %v10225_v42, %v8607_v62  ;;  %v10224_v24 = vld [vmem:[#allocation7 + $0x1c4] sm:$0xf0]  ;;  %v10207_v22 = vld [vmem:[#allocation7 + $0x144] sm:$0xf]  ;;  %v8534_v54 = vor.u32 %v10208_v37, %v8533_v34 }
 0x607   :  { %4430 = vmatpush.bf16.msra.mxu3 %v8618_v53  ;;  %v8535_v32 = vld [vmem:[#allocation7 + $0x148] sm:$0xf0]  ;;  %v10223_v23 = vld [vmem:[#allocation7 + $0x1c4] sm:$0xf]  ;;  %v8598_v39 = vor.u32 %v10224_v24, %v8597_v44  ;;  %v8525_v60 = vld [vmem:[#allocation7 + $0x130] sm:$0xf] }
 0x608   :  { %v8599_v29 = vld [vmem:[#allocation7 + $0x1c8] sm:$0xf0]  ;;  %4389 = vmatpush.bf16.msra.mxu0 %v8542_v20  ;;  %v8538_v36 = vor.u32 %v10207_v22, %v8535_v32  ;;  %v10206_v52 = vld [vmem:[#allocation7 + $0x134] sm:$0xf0]  ;;  %v8589_v41 = vld [vmem:[#allocation7 + $0x1b0] sm:$0xf] }
 0x609   :  { %4403 = vmatpush.bf16.msra.mxu1 %v8606_v25  ;;  %v8602_v48 = vor.u32 %v10223_v23, %v8599_v29  ;;  %v10222_v2 = vld [vmem:[#allocation7 + $0x1b4] sm:$0xf0]  ;;  %v10205_v40 = vld [vmem:[#allocation7 + $0x134] sm:$0xf]  ;;  %v8527_v7 = vld [vmem:[#allocation7 + $0x138] sm:$0xf0]  ;;  %v8526_v0 = vor.u32 %v10206_v52, %v8525_v60 }
 0x60a   :  { %4417 = vmatpush.bf16.msra.mxu2 %v8546_v47  ;;  %v10221_v51 = vld [vmem:[#allocation7 + $0x1b4] sm:$0xf]  ;;  %v8591_v50 = vld [vmem:[#allocation7 + $0x1b8] sm:$0xf0]  ;;  %v8590_v19 = vor.u32 %v10222_v2, %v8589_v41  ;;  %v8530_v3 = vor.u32 %v10205_v40, %v8527_v7  ;;  %v8517_v43 = vld [vmem:[#allocation7 + $0x120] sm:$0xf] }
 0x60b   :  { %4431 = vmatpush.bf16.msra.mxu3 %v8610_v27  ;;  %v10204_v1 = vld [vmem:[#allocation7 + $0x124] sm:$0xf0]  ;;  %v8581_v56 = vld [vmem:[#allocation7 + $0x1a0] sm:$0xf]  ;;  %v8594_v8 = vor.u32 %v10221_v51, %v8591_v50  ;;  %v10203_v35 = vld [vmem:[#allocation7 + $0x124] sm:$0xf] }
 0x60c   :  { %4390 = vmatpush.bf16.msra.mxu0 %v8534_v54  ;;  %v10220_v58 = vld [vmem:[#allocation7 + $0x1a4] sm:$0xf0]  ;;  %v8519_v30 = vld [vmem:[#allocation7 + $0x128] sm:$0xf0]  ;;  %v10219_v33 = vld [vmem:[#allocation7 + $0x1a4] sm:$0xf]  ;;  %v8518_v55 = vor.u32 %v10204_v1, %v8517_v43 }
 0x60d   :  { %4404 = vmatpush.bf16.msra.mxu1 %v8598_v39  ;;  %v8583_v18 = vld [vmem:[#allocation7 + $0x1a8] sm:$0xf0]  ;;  %v8582_v38 = vor.u32 %v10220_v58, %v8581_v56  ;;  %v8522_v46 = vor.u32 %v10203_v35, %v8519_v30  ;;  %v8509_v6 = vld [vmem:[#allocation7 + $0x110] sm:$0xf]  ;;  %v10202_v31 = vld [vmem:[#allocation7 + $0x114] sm:$0xf0] }
 0x60e   :  { %4418 = vmatpush.bf16.msra.mxu2 %v8538_v36  ;;  %v8573_v61 = vld [vmem:[#allocation7 + $0x190] sm:$0xf]  ;;  %v8586_v10 = vor.u32 %v10219_v33, %v8583_v18  ;;  %v10218_v4 = vld [vmem:[#allocation7 + $0x194] sm:$0xf0]  ;;  %v10201_v5 = vld [vmem:[#allocation7 + $0x114] sm:$0xf]  ;;  %v8510_v17 = vor.u32 %v10202_v31, %v8509_v6 }
 0x60f   :  { %4432 = vmatpush.bf16.msra.mxu3 %v8602_v48  ;;  %v8511_v57 = vld [vmem:[#allocation7 + $0x118] sm:$0xf0]  ;;  %v10217_v59 = vld [vmem:[#allocation7 + $0x194] sm:$0xf]  ;;  %v8501_v15 = vld [vmem:[#allocation7 + $0x100] sm:$0xf]  ;;  %v8574_v12 = vor.u32 %v10218_v4, %v8573_v61 }
 0x610   :  { %4391 = vmatpush.bf16.msra.mxu0 %v8526_v0  ;;  %v8575_v9 = vld [vmem:[#allocation7 + $0x198] sm:$0xf0]  ;;  %v10200_v11 = vld [vmem:[#allocation7 + $0x104] sm:$0xf0]  ;;  %v8514_v63 = vor.u32 %v10201_v5, %v8511_v57  ;;  %v8565_v26 = vld [vmem:[#allocation7 + $0x180] sm:$0xf] }
 0x611   :  { %4405 = vmatpush.bf16.msra.mxu1 %v8590_v19  ;;  %v10216_v21 = vld [vmem:[#allocation7 + $0x184] sm:$0xf0]  ;;  %v10199_v28 = vld [vmem:[#allocation7 + $0x104] sm:$0xf]  ;;  %v8578_v14 = vor.u32 %v10217_v59, %v8575_v9  ;;  %v8503_v53 = vld [vmem:[#allocation7 + $0x108] sm:$0xf0]  ;;  %v8502_v42 = vor.u32 %v10200_v11, %v8501_v15 }
 0x612   :  { %4419 = vmatpush.bf16.msra.mxu2 %v8530_v3  ;;  %v10215_v16 = vld [vmem:[#allocation7 + $0x184] sm:$0xf]  ;;  %v8567_v13 = vld [vmem:[#allocation7 + $0x188] sm:$0xf0]  ;;  %v8693_v45 = vld [vmem:[#allocation7 + $0x70] sm:$0xf]  ;;  %v8566_v34 = vor.u32 %v10216_v21, %v8565_v26  ;;  %v8506_v37 = vor.u32 %v10199_v28, %v8503_v53 }
 0x613   :  { %4433 = vmatpush.bf16.msra.mxu3 %v8594_v8  ;;  %v10180_v20 = vld [vmem:[#allocation7 + $0x74] sm:$0xf0]  ;;  %v8757_v49 = vld [vmem:[#allocation7 + $0xf0] sm:$0xf]  ;;  %v10179_v25 = vld [vmem:[#allocation7 + $0x74] sm:$0xf]  ;;  %v8570_v24 = vor.u32 %v10215_v16, %v8567_v13 }
 0x614   :  { %4392 = vmatpush.bf16.msra.mxu0 %v8518_v55  ;;  %v10196_v62 = vld [vmem:[#allocation7 + $0xf4] sm:$0xf0]  ;;  %v8695_v47 = vld [vmem:[#allocation7 + $0x78] sm:$0xf0]  ;;  %v10195_v44 = vld [vmem:[#allocation7 + $0xf4] sm:$0xf]  ;;  %v8694_v22 = vor.u32 %v10180_v20, %v8693_v45 }
 0x615   :  { %4406 = vmatpush.bf16.msra.mxu1 %v8582_v38  ;;  %v8759_v27 = vld [vmem:[#allocation7 + $0xf8] sm:$0xf0]  ;;  %v8685_v32 = vld [vmem:[#allocation7 + $0x60] sm:$0xf]  ;;  %v8758_v23 = vor.u32 %v10196_v62, %v8757_v49  ;;  %v8698_v29 = vor.u32 %v10179_v25, %v8695_v47  ;;  %v10178_v54 = vld [vmem:[#allocation7 + $0x64] sm:$0xf0] }
 0x616   :  { %4420 = vmatpush.bf16.msra.mxu2 %v8522_v46  ;;  %v8749_v39 = vld [vmem:[#allocation7 + $0xe0] sm:$0xf]  ;;  %v10194_v36 = vld [vmem:[#allocation7 + $0xe4] sm:$0xf0]  ;;  %v8762_v60 = vor.u32 %v10195_v44, %v8759_v27  ;;  %v10177_v52 = vld [vmem:[#allocation7 + $0x64] sm:$0xf]  ;;  %v8686_v51 = vor.u32 %v10178_v54, %v8685_v32 }
 0x617   :  { %4434 = vmatpush.bf16.msra.mxu3 %v8586_v10  ;;  %v8687_v41 = vld [vmem:[#allocation7 + $0x68] sm:$0xf0]  ;;  %v10193_v48 = vld [vmem:[#allocation7 + $0xe4] sm:$0xf]  ;;  %v8493_v40 = vld [vmem:[#allocation3 + $0x18] sm:$0xf]  ;;  %v8750_v3 = vor.u32 %v10194_v36, %v8749_v39 }
 0x618   :  { %4393 = vmatpush.bf16.msra.mxu0 %v8510_v17  ;;  %v8751_v2 = vld [vmem:[#allocation7 + $0xe8] sm:$0xf0]  ;;  %v10198_v7 = vld [vmem:[#allocation3 + $0x1c] sm:$0xf0]  ;;  %v8677_v50 = vld [vmem:[#allocation7 + $0x50] sm:$0xf]  ;;  %v8690_v43 = vor.u32 %v10177_v52, %v8687_v41 }
 0x619   :  { %4407 = vmatpush.bf16.msra.mxu1 %v8574_v12  ;;  %v10176_v0 = vld [vmem:[#allocation7 + $0x54] sm:$0xf0]  ;;  %v8494_v19 = vor.u32 %v10198_v7, %v8493_v40  ;;  %v8741_v1 = vld [vmem:[#allocation7 + $0xd0] sm:$0xf]  ;;  %v10175_v8 = vld [vmem:[#allocation7 + $0x54] sm:$0xf]  ;;  %v8754_v58 = vor.u32 %v10193_v48, %v8751_v2 }
 0x61a   :  { %4421 = vmatpush.bf16.msra.mxu2 %v8514_v63  ;;  %v10192_v56 = vld [vmem:[#allocation7 + $0xd4] sm:$0xf0]  ;;  %v8679_v35 = vld [vmem:[#allocation7 + $0x58] sm:$0xf0]  ;;  %v8495_v33 = vld [vmem:[#allocation3 + $0x20] sm:$0xf0]  ;;  %v8678_v46 = vor.u32 %v10176_v0, %v8677_v50 }
 0x61b   :  { %4435 = vmatpush.bf16.msra.mxu3 %v8578_v14  ;;  %v10197_v30 = vld [vmem:[#allocation3 + $0x1c] sm:$0xf]  ;;  %v10191_v18 = vld [vmem:[#allocation7 + $0xd4] sm:$0xf]  ;;  %v8742_v6 = vor.u32 %v10192_v56, %v8741_v1  ;;  %v8682_v31 = vor.u32 %v10175_v8, %v8679_v35  ;;  %v8669_v61 = vld [vmem:[#allocation7 + $0x40] sm:$0xf] }
 0x61c   :  { %4394 = vmatpush.bf16.msra.mxu0 %v8502_v42  ;;  %v8743_v55 = vld [vmem:[#allocation7 + $0xd8] sm:$0xf0]  ;;  %v8498_v38 = vor.u32 %v10197_v30, %v8495_v33  ;;  %v10174_v10 = vld [vmem:[#allocation7 + $0x44] sm:$0xf0]  ;;  %v8733_v4 = vld [vmem:[#allocation7 + $0xc0] sm:$0xf] }
 0x61d   :  { %4408 = vmatpush.bf16.msra.mxu1 %v8566_v34  ;;  %v8746_v5 = vor.u32 %v10191_v18, %v8743_v55  ;;  %v10190_v57 = vld [vmem:[#allocation7 + $0xc4] sm:$0xf0]  ;;  %v10173_v59 = vld [vmem:[#allocation7 + $0x44] sm:$0xf]  ;;  %v8671_v9 = vld [vmem:[#allocation7 + $0x48] sm:$0xf0]  ;;  %v8670_v11 = vor.u32 %v10174_v10, %v8669_v61 }
 0x61e   :  { %4422 = vmatpush.bf16.msra.mxu2 %v8506_v37  ;;  %v10189_v17 = vld [vmem:[#allocation7 + $0xc4] sm:$0xf]  ;;  %v8735_v15 = vld [vmem:[#allocation7 + $0xc8] sm:$0xf0]  ;;  %v8734_v12 = vor.u32 %v10190_v57, %v8733_v4  ;;  %v8674_v63 = vor.u32 %v10173_v59, %v8671_v9  ;;  %v8661_v26 = vld [vmem:[#allocation7 + $0x30] sm:$0xf] }
 0x61f   :  { %4436 = vmatpush.bf16.msra.mxu3 %v8570_v24  ;;  %4395 = vmatmul.bf16.vlgmr.msra.gmra.mxu0 %v8494_v19  ;;  %v10172_v21 = vld [vmem:[#allocation7 + $0x34] sm:$0xf0]  ;;  %v8725_v28 = vld [vmem:[#allocation7 + $0xb0] sm:$0xf]  ;;  %v8738_v14 = vor.u32 %v10189_v17, %v8735_v15  ;;  %v10171_v16 = vld [vmem:[#allocation7 + $0x34] sm:$0xf] }
 0x620   :  { %4613 = vmatpush.bf16.msrb.mxu0 %v8694_v22  ;;  %4409 = vmatmul.bf16.vlgmr.msra.gmra.mxu1 %v8498_v38  ;;  %v10188_v53 = vld [vmem:[#allocation7 + $0xb4] sm:$0xf0]  ;;  %v8663_v13 = vld [vmem:[#allocation7 + $0x38] sm:$0xf0]  ;;  %v10187_v45 = vld [vmem:[#allocation7 + $0xb4] sm:$0xf]  ;;  %v8662_v49 = vor.u32 %v10172_v21, %v8661_v26 }
 0x621   :  { %4627 = vmatpush.bf16.msrb.mxu1 %v8758_v23  ;;  %4423 = vmatmul.bf16.vlgmr.msra.gmra.mxu2 %v8494_v19  ;;  %v8727_v20 = vld [vmem:[#allocation7 + $0xb8] sm:$0xf0]  ;;  %v8726_v42 = vor.u32 %v10188_v53, %v8725_v28  ;;  %v8666_v62 = vor.u32 %v10171_v16, %v8663_v13  ;;  %v8653_v25 = vld [vmem:[#allocation7 + $0x20] sm:$0xf]  ;;  %v10170_v47 = vld [vmem:[#allocation7 + $0x24] sm:$0xf0] }
 0x622   :  { %4641 = vmatpush.bf16.msrb.mxu2 %v8698_v29  ;;  %4437 = vmatmul.bf16.vlgmr.msra.gmra.mxu3 %v8498_v38  ;;  %v8717_v34 = vld [vmem:[#allocation7 + $0xa0] sm:$0xf]  ;;  %v8730_v37 = vor.u32 %v10187_v45, %v8727_v20  ;;  %v10186_v44 = vld [vmem:[#allocation7 + $0xa4] sm:$0xf0]  ;;  %v10169_v27 = vld [vmem:[#allocation7 + $0x24] sm:$0xf]  ;;  %v8654_v23 = vor.u32 %v10170_v47, %v8653_v25 }
 0x623   :  { %4655 = vmatpush.bf16.msrb.mxu3 %v8762_v60  ;;  %v8655_v24 = vld [vmem:[#allocation7 + $0x28] sm:$0xf0]  ;;  %v10185_v22 = vld [vmem:[#allocation7 + $0xa4] sm:$0xf]  ;;  %v8718_v29 = vor.u32 %v10186_v44, %v8717_v34  ;;  %v8645_v39 = vld [vmem:[#allocation7 + $0x10] sm:$0xf] }
 0x624   :  { %4614 = vmatpush.bf16.msrb.mxu0 %v8686_v51  ;;  %v8719_v32 = vld [vmem:[#allocation7 + $0xa8] sm:$0xf0]  ;;  %v8658_v54 = vor.u32 %v10169_v27, %v8655_v24  ;;  %v10168_v36 = vld [vmem:[#allocation7 + $0x14] sm:$0xf0]  ;;  %v8709_v60 = vld [vmem:[#allocation7 + $0x90] sm:$0xf] }
 0x625   :  { %4628 = vmatpush.bf16.msrb.mxu1 %v8750_v3  ;;  %v8722_v52 = vor.u32 %v10185_v22, %v8719_v32  ;;  %v10184_v41 = vld [vmem:[#allocation7 + $0x94] sm:$0xf0]  ;;  %v10167_v48 = vld [vmem:[#allocation7 + $0x14] sm:$0xf]  ;;  %v8647_v2 = vld [vmem:[#allocation7 + $0x18] sm:$0xf0]  ;;  %v8646_v51 = vor.u32 %v10168_v36, %v8645_v39 }
 0x626   :  { %4642 = vmatpush.bf16.msrb.mxu2 %v8690_v43  ;;  %v10183_v40 = vld [vmem:[#allocation7 + $0x94] sm:$0xf]  ;;  %v8711_v7 = vld [vmem:[#allocation7 + $0x98] sm:$0xf0]  ;;  %v8637_v50 = vld [vmem:[#allocation7] sm:$0xf]  ;;  %v8710_v3 = vor.u32 %v10184_v41, %v8709_v60  ;;  %v8650_v43 = vor.u32 %v10167_v48, %v8647_v2 }
 0x627   :  { %4656 = vmatpush.bf16.msrb.mxu3 %v8754_v58  ;;  %v10166_v0 = vld [vmem:[#allocation7 + $0x4] sm:$0xf0]  ;;  %v8701_v19 = vld [vmem:[#allocation7 + $0x80] sm:$0xf]  ;;  %v10165_v56 = vld [vmem:[#allocation7 + $0x4] sm:$0xf]  ;;  %v8714_v58 = vor.u32 %v10183_v40, %v8711_v7 }
 0x628   :  { %4615 = vmatpush.bf16.msrb.mxu0 %v8678_v46  ;;  %v10182_v1 = vld [vmem:[#allocation7 + $0x84] sm:$0xf0]  ;;  %v8639_v8 = vld [vmem:[#allocation7 + $0x8] sm:$0xf0]  ;;  %v10181_v35 = vld [vmem:[#allocation7 + $0x84] sm:$0xf]  ;;  %v8638_v46 = vor.u32 %v10166_v0, %v8637_v50 }
 0x629   :  { %4629 = vmatpush.bf16.msrb.mxu1 %v8742_v6  ;;  %v8703_v30 = vld [vmem:[#allocation7 + $0x88] sm:$0xf0]  ;;  %v8829_v33 = vld [vmem:[#allocation7 + $0x270] sm:$0xf]  ;;  %v10248_v18 = vld [vmem:[#allocation7 + $0x274] sm:$0xf0]  ;;  %v8702_v10 = vor.u32 %v10182_v1, %v8701_v19  ;;  %v8642_v4 = vor.u32 %v10165_v56, %v8639_v8 }
 0x62a   :  { %4643 = vmatpush.bf16.msrb.mxu2 %v8682_v31  ;;  %v8893_v55 = vld [vmem:[#allocation7 + $0x2f0] sm:$0xf]  ;;  %v10264_v38 = vld [vmem:[#allocation7 + $0x2f4] sm:$0xf0]  ;;  %v10247_v6 = vld [vmem:[#allocation7 + $0x274] sm:$0xf]  ;;  %v8706_v9 = vor.u32 %v10181_v35, %v8703_v30  ;;  %v8830_v17 = vor.u32 %v10248_v18, %v8829_v33 }
 0x62b   :  { %4657 = vmatpush.bf16.msrb.mxu3 %v8746_v5  ;;  %v8831_v31 = vld [vmem:[#allocation7 + $0x278] sm:$0xf0]  ;;  %v10263_v61 = vld [vmem:[#allocation7 + $0x2f4] sm:$0xf]  ;;  %v8629_v57 = vld [vmem:[#allocation3] sm:$0xf] }
 0x62c   :  { %4616 = vmatpush.bf16.msrb.mxu0 %v8670_v11  ;;  %v8895_v5 = vld [vmem:[#allocation7 + $0x2f8] sm:$0xf0]  ;;  %v10164_v59 = vld [vmem:[#allocation3 + $0x4] sm:$0xf0]  ;;  %v10163_v15 = vld [vmem:[#allocation3 + $0x4] sm:$0xf] }
 0x62d   :  { %4630 = vmatpush.bf16.msrb.mxu1 %v8734_v12  ;;  %v8631_v11 = vld [vmem:[#allocation3 + $0x8] sm:$0xf0]  ;;  %v8894_v12 = vor.u32 %v10264_v38, %v8893_v55  ;;  %v8821_v26 = vld [vmem:[#allocation7 + $0x260] sm:$0xf]  ;;  %v10246_v21 = vld [vmem:[#allocation7 + $0x264] sm:$0xf0]  ;;  %v8630_v53 = vor.u32 %v10164_v59, %v8629_v57 }
 0x62e   :  { %4644 = vmatpush.bf16.msrb.mxu2 %v8674_v63  ;;  %v8834_v63 = vor.u32 %v10247_v6, %v8831_v31  ;;  %v8885_v28 = vld [vmem:[#allocation7 + $0x2e0] sm:$0xf]  ;;  %v10262_v16 = vld [vmem:[#allocation7 + $0x2e4] sm:$0xf0]  ;;  %v10245_v13 = vld [vmem:[#allocation7 + $0x264] sm:$0xf]  ;;  %v8634_v20 = vor.u32 %v10163_v15, %v8631_v11 }
 0x62f   :  { %4658 = vmatpush.bf16.msrb.mxu3 %v8738_v14  ;;  %v8898_v14 = vor.u32 %v10263_v61, %v8895_v5  ;;  %v8823_v45 = vld [vmem:[#allocation7 + $0x268] sm:$0xf0]  ;;  %v8886_v25 = vor.u32 %v10262_v16, %v8885_v28  ;;  %v8813_v34 = vld [vmem:[#allocation7 + $0x250] sm:$0xf]  ;;  %v10260_v24 = vld [vmem:[#allocation7 + $0x2d4] sm:$0xf0] }
 0x630   :  { %4617 = vmatpush.bf16.msrb.mxu0 %v8662_v49  ;;  %v10261_v49 = vld [vmem:[#allocation7 + $0x2e4] sm:$0xf]  ;;  %v8826_v47 = vor.u32 %v10245_v13, %v8823_v45  ;;  %v8877_v44 = vld [vmem:[#allocation7 + $0x2d0] sm:$0xf]  ;;  %v10243_v22 = vld [vmem:[#allocation7 + $0x254] sm:$0xf] }
 0x631   :  { %4631 = vmatpush.bf16.msrb.mxu1 %v8726_v42  ;;  %v8887_v42 = vld [vmem:[#allocation7 + $0x2e8] sm:$0xf0]  ;;  %v8815_v32 = vld [vmem:[#allocation7 + $0x258] sm:$0xf0]  ;;  %v8878_v39 = vor.u32 %v10260_v24, %v8877_v44  ;;  %v8805_v60 = vld [vmem:[#allocation7 + $0x240] sm:$0xf] }
 0x632   :  { %4645 = vmatpush.bf16.msrb.mxu2 %v8666_v62  ;;  %v8822_v62 = vor.u32 %v10246_v21, %v8821_v26  ;;  %v8890_v27 = vor.u32 %v10261_v49, %v8887_v42  ;;  %v8818_v36 = vor.u32 %v10243_v22, %v8815_v32  ;;  %v8869_v41 = vld [vmem:[#allocation7 + $0x2c0] sm:$0xf]  ;;  %v10258_v2 = vld [vmem:[#allocation7 + $0x2c4] sm:$0xf0]  ;;  %v10241_v40 = vld [vmem:[#allocation7 + $0x244] sm:$0xf] }
 0x633   :  { %4659 = vmatpush.bf16.msrb.mxu3 %v8730_v37  ;;  %v10244_v37 = vld [vmem:[#allocation7 + $0x254] sm:$0xf0]  ;;  %v8807_v7 = vld [vmem:[#allocation7 + $0x248] sm:$0xf0]  ;;  %v8870_v19 = vor.u32 %v10258_v2, %v8869_v41  ;;  %v8861_v56 = vld [vmem:[#allocation7 + $0x2b0] sm:$0xf] }
 0x634   :  { %4618 = vmatpush.bf16.msrb.mxu0 %v8654_v23  ;;  %v10259_v23 = vld [vmem:[#allocation7 + $0x2d4] sm:$0xf]  ;;  %v8871_v50 = vld [vmem:[#allocation7 + $0x2c8] sm:$0xf0]  ;;  %v10240_v1 = vld [vmem:[#allocation7 + $0x234] sm:$0xf0] }
 0x635   :  { %4632 = vmatpush.bf16.msrb.mxu1 %v8718_v29  ;;  %v8879_v29 = vld [vmem:[#allocation7 + $0x2d8] sm:$0xf0]  ;;  %v10239_v35 = vld [vmem:[#allocation7 + $0x234] sm:$0xf]  ;;  %v8789_v38 = vld [vmem:[#allocation7 + $0x220] sm:$0xf] }
 0x636   :  { %4646 = vmatpush.bf16.msrb.mxu2 %v8658_v54  ;;  %v8814_v54 = vor.u32 %v10244_v37, %v8813_v34  ;;  %v8882_v48 = vor.u32 %v10259_v23, %v8879_v29  ;;  %v8799_v30 = vld [vmem:[#allocation7 + $0x238] sm:$0xf0]  ;;  %v10255_v33 = vld [vmem:[#allocation7 + $0x2b4] sm:$0xf]  ;;  %v10238_v31 = vld [vmem:[#allocation7 + $0x224] sm:$0xf0] }
 0x637   :  { %4660 = vmatpush.bf16.msrb.mxu3 %v8722_v52  ;;  %v10242_v52 = vld [vmem:[#allocation7 + $0x244] sm:$0xf0]  ;;  %v8863_v18 = vld [vmem:[#allocation7 + $0x2b8] sm:$0xf0]  ;;  %v8802_v6 = vor.u32 %v10239_v35, %v8799_v30  ;;  %v8853_v61 = vld [vmem:[#allocation7 + $0x2a0] sm:$0xf]  ;;  %v8790_v15 = vor.u32 %v10238_v31, %v8789_v38 }
 0x638   :  { %4619 = vmatpush.bf16.msrb.mxu0 %v8646_v51  ;;  %v10257_v51 = vld [vmem:[#allocation7 + $0x2c4] sm:$0xf]  ;;  %v8806_v0 = vor.u32 %v10242_v52, %v8805_v60  ;;  %v8791_v57 = vld [vmem:[#allocation7 + $0x228] sm:$0xf0]  ;;  %v4671_v59 = vld [vmem:[#allocation3 + $0x10] sm:$0x11] }
 0x639   :  { %4633 = vmatpush.bf16.msrb.mxu1 %v8710_v3  ;;  %v8810_v3 = vor.u32 %v10241_v40, %v8807_v7  ;;  %v8874_v8 = vor.u32 %v10257_v51, %v8871_v50  ;;  %v10237_v5 = vld [vmem:[#allocation7 + $0x224] sm:$0xf]  ;;  %v8781_v11 = vld [vmem:[#allocation7 + $0x210] sm:$0xf]  ;;  %v10252_v28 = vld [vmem:[#allocation7 + $0x294] sm:$0xf0]  ;;  %v4712_v16 = vunpack.c.l.b16 %v4671_v59  ;;  %v4713_v42 = vunpack.c.h.b16 %v4671_v59 }
 0x63a   :  { %4647 = vmatpush.bf16.msrb.mxu2 %v8650_v43  ;;  %v8797_v43 = vld [vmem:[#allocation7 + $0x230] sm:$0xf]  ;;  %v8794_v21 = vor.u32 %v10237_v5, %v8791_v57  ;;  %v10251_v45 = vld [vmem:[#allocation7 + $0x294] sm:$0xf]  ;;  %v10232_v49 = vld [vmem:[#allocation3 + $0x4] sm:$0xf0] }
 0x63b   :  { %4661 = vmatpush.bf16.msrb.mxu3 %v8714_v58  ;;  %v10256_v58 = vld [vmem:[#allocation7 + $0x2b4] sm:$0xf0]  ;;  %v8798_v55 = vor.u32 %v10240_v1, %v8797_v43  ;;  %v8773_v44 = vld [vmem:[#allocation7 + $0x200] sm:$0xf]  ;;  %v10250_v32 = vld [vmem:[#allocation7 + $0x284] sm:$0xf0] }
 0x63c   :  { %4620 = vmatpush.bf16.msrb.mxu0 %v8638_v46  ;;  %v8862_v46 = vor.u32 %v10256_v58, %v8861_v56  ;;  %v8837_v22 = vld [vmem:[#allocation7 + $0x280] sm:$0xf]  ;;  %v10233_v23 = vld [vmem:[#allocation7 + $0x204] sm:$0xf]  ;;  %v8839_v52 = vld [vmem:[#allocation7 + $0x288] sm:$0xf0] }
 0x63d   :  { %4634 = vmatpush.bf16.msrb.mxu1 %v8702_v10  ;;  %v10254_v10 = vld [vmem:[#allocation7 + $0x2a4] sm:$0xf0]  ;;  %v10249_v60 = vld [vmem:[#allocation7 + $0x284] sm:$0xf]  ;;  %v8965_v2 = vld [vmem:[#allocation7 + $0x370] sm:$0xf] }
 0x63e   :  { %4648 = vmatpush.bf16.msrb.mxu2 %v8642_v4  ;;  %v8866_v4 = vor.u32 %v10255_v33, %v8863_v18  ;;  %v8854_v26 = vor.u32 %v10254_v10, %v8853_v61  ;;  %v10282_v40 = vld [vmem:[#allocation7 + $0x374] sm:$0xf0]  ;;  %v9029_v7 = vld [vmem:[#allocation7 + $0x3f0] sm:$0xf]  ;;  %v10297_v1 = vld [vmem:[#allocation7 + $0x3f4] sm:$0xf]  ;;  %v8842_v35 = vor.u32 %v10249_v60, %v8839_v52 }
 0x63f   :  { %4662 = vmatpush.bf16.msrb.mxu3 %v8706_v9  ;;  %4621 = vmatmul.bf16.vlgmr.msrb.gmra.mxu0 %v8630_v53  ;;  %v10253_v9 = vld [vmem:[#allocation7 + $0x2a4] sm:$0xf]  ;;  %v10298_v50 = vld [vmem:[#allocation7 + $0x3f4] sm:$0xf0]  ;;  %v9031_v56 = vld [vmem:[#allocation7 + $0x3f8] sm:$0xf0]  ;;  %v8966_v30 = vor.u32 %v10282_v40, %v8965_v2 }
 0x640   :  { %4886 = vmatpush.bf16.msra.mxu0 %v8830_v17  ;;  %4635 = vmatmul.bf16.vlgmr.msrb.gmra.mxu1 %v8634_v20  ;;  %v8855_v17 = vld [vmem:[#allocation7 + $0x2a8] sm:$0xf0]  ;;  %v9021_v31 = vld [vmem:[#allocation7 + $0x3e0] sm:$0xf]  ;;  %v9034_v61 = vor.u32 %v10297_v1, %v9031_v56  ;;  %v10296_v10 = vld [vmem:[#allocation7 + $0x3e4] sm:$0xf0] }
 0x641   :  { %4900 = vmatpush.bf16.msra.mxu1 %v8894_v12  ;;  %4649 = vmatmul.bf16.vlgmr.msrb.gmra.mxu2 %v8630_v53  ;;  %v10236_v12 = vld [vmem:[#allocation7 + $0x214] sm:$0xf0]  ;;  %v8783_v53 = vld [vmem:[#allocation7 + $0x218] sm:$0xf0]  ;;  %v8858_v13 = vor.u32 %v10253_v9, %v8855_v17  ;;  %v8959_v5 = vld [vmem:[#allocation7 + $0x368] sm:$0xf0] }
 0x642   :  { %4914 = vmatpush.bf16.msra.mxu2 %v8834_v63  ;;  %4663 = vmatmul.bf16.vlgmr.msrb.gmra.mxu3 %v8634_v20  ;;  %v8845_v63 = vld [vmem:[#allocation7 + $0x290] sm:$0xf]  ;;  %v8765_v20 = vld [vmem:[#allocation3] sm:$0xe]  ;;  %v8782_v34 = vor.u32 %v10236_v12, %v8781_v11  ;;  %v10295_v59 = vld [vmem:[#allocation7 + $0x3e4] sm:$0xf]  ;;  %v9022_v11 = vor.u32 %v10296_v10, %v9021_v31 }
 0x643   :  { %4928 = vmatpush.bf16.msra.mxu3 %v8898_v14  ;;  %v10235_v14 = vld [vmem:[#allocation7 + $0x214] sm:$0xf]  ;;  %v8846_v37 = vor.u32 %v10252_v28, %v8845_v63  ;;  %v8766_v29 = vor.u32 %v10232_v49, %v8765_v20  ;;  %v9023_v9 = vld [vmem:[#allocation7 + $0x3e8] sm:$0xf0]  ;;  %v8949_v63 = vld [vmem:[#allocation7 + $0x350] sm:$0xf] }
 0x644   :  { %4887 = vmatpush.bf16.msra.mxu0 %v8822_v62  ;;  %v8847_v62 = vld [vmem:[#allocation7 + $0x298] sm:$0xf0]  ;;  %v8786_v24 = vor.u32 %v10235_v14, %v8783_v53  ;;  %v9026_v28 = vor.u32 %v10295_v59, %v9023_v9  ;;  %v10294_v14 = vld [vmem:[#allocation7 + $0x3d4] sm:$0xf0]  ;;  %v10277_v53 = vld [vmem:[#allocation7 + $0x354] sm:$0xf] }
 0x645   :  { %4901 = vmatpush.bf16.msra.mxu1 %v8886_v25  ;;  %v10231_v25 = vld [vmem:[#allocation3 + $0x4] sm:$0xe]  ;;  %v10290_v52 = vld [vmem:[#allocation7 + $0x3b4] sm:$0xf0]  ;;  %v10289_v2 = vld [vmem:[#allocation7 + $0x3b4] sm:$0xf] }
 0x646   :  { %4915 = vmatpush.bf16.msra.mxu2 %v8826_v47  ;;  %v8767_v47 = vld [vmem:[#allocation3 + $0x8] sm:$0xf0]  ;;  %v8999_v40 = vld [vmem:[#allocation7 + $0x3b8] sm:$0xf0]  ;;  %v10288_v56 = vld [vmem:[#allocation7 + $0x3a4] sm:$0xf0] }
 0x647   :  { %4929 = vmatpush.bf16.msra.mxu3 %v8890_v27  ;;  %v10234_v27 = vld [vmem:[#allocation7 + $0x204] sm:$0xf0]  ;;  %v8770_v41 = vor.u32 %v10231_v25, %v8767_v47  ;;  %v9005_v47 = vld [vmem:[#allocation7 + $0x3c0] sm:$0xf]  ;;  %v9002_v1 = vor.u32 %v10289_v2, %v8999_v40  ;;  %v10269_v10 = vld [vmem:[#allocation7 + $0x314] sm:$0xf] }
 0x648   :  { %4888 = vmatpush.bf16.msra.mxu0 %v8814_v54  ;;  %v4716_v54 = vpack.c.b16 %v4712_v16, %v4712_v16  ;;  %v8774_v51 = vor.u32 %v10234_v27, %v8773_v44  ;;  %v8951_v16 = vld [vmem:[#allocation7 + $0x358] sm:$0xf0]  ;;  %v10276_v25 = vld [vmem:[#allocation7 + $0x344] sm:$0xf0]  ;;  %v10275_v44 = vld [vmem:[#allocation7 + $0x344] sm:$0xf] }
 0x649   :  { %4902 = vmatpush.bf16.msra.mxu1 %v8878_v39  ;;  %v8850_v39 = vor.u32 %v10251_v45, %v8847_v62  ;;  %v4721_v33 = vrot.slane %v8770_v41, 1  ;;  %v9015_v45 = vld [vmem:[#allocation7 + $0x3d8] sm:$0xf0]  ;;  %v8941_v62 = vld [vmem:[#allocation7 + $0x340] sm:$0xf]  ;;  %vm5254_vm13 = vcmask 130048  }
 0x64a   :  { %4916 = vmatpush.bf16.msra.mxu2 %v8818_v36  ;;  %v8775_v36 = vld [vmem:[#allocation7 + $0x208] sm:$0xf0]  ;;  %v4719_v58 = vrot.slane %v4716_v54, 1  ;;  %v8933_v54 = vld [vmem:[#allocation7 + $0x330] sm:$0xf] }
 0x64b   :  { %4930 = vmatpush.bf16.msra.mxu3 %v8882_v48  ;;  %v4717_v48 = vpack.c.b16 %v4713_v42, %v4713_v42  ;;  %v8778_v43 = vor.u32 %v10233_v23, %v8775_v36  ;;  %v8954_v42 = vor.u32 %v10277_v53, %v8951_v16  ;;  %v8943_v27 = vld [vmem:[#allocation7 + $0x348] sm:$0xf0]  ;;  %v8997_v36 = vld [vmem:[#allocation7 + $0x3b0] sm:$0xf]  ;;  %v10273_v41 = vld [vmem:[#allocation7 + $0x334] sm:$0xf] }
 0x64c   :  { %4889 = vmatpush.bf16.msra.mxu0 %v8806_v0  ;;  %v10281_v0 = vld [vmem:[#allocation7 + $0x374] sm:$0xf]  ;;  %v8919_v9 = vld [vmem:[#allocation7 + $0x318] sm:$0xf0]  ;;  %v8909_v53 = vld [vmem:[#allocation7 + $0x300] sm:$0xf] }
 0x64d   :  { %4903 = vmatpush.bf16.msra.mxu1 %v8870_v19  ;;  %v8967_v19 = vld [vmem:[#allocation7 + $0x378] sm:$0xf0]  ;;  %v4722_v18 = vrot.slane %v4717_v48, 1  ;;  %v10268_v16 = vld [vmem:[#allocation7 + $0x304] sm:$0xf0] }
 0x64e   :  { %4917 = vmatpush.bf16.msra.mxu2 %v8810_v3  ;;  %v8838_v3 = vor.u32 %v10250_v32, %v8837_v22  ;;  %v8970_v38 = vor.u32 %v10281_v0, %v8967_v19  ;;  %v9007_v22 = vld [vmem:[#allocation7 + $0x3c8] sm:$0xf0]  ;;  %v8942_v32 = vor.u32 %v10276_v25, %v8941_v62  ;;  %v8935_v48 = vld [vmem:[#allocation7 + $0x338] sm:$0xf0]  ;;  %v10272_v19 = vld [vmem:[#allocation7 + $0x324] sm:$0xf0] }
 0x64f   :  { %4931 = vmatpush.bf16.msra.mxu3 %v8874_v8  ;;  %v4718_v8 = vrot.slane %v8766_v29, 1  ;;  %v4723_v17 = vsel %vm1796_vm0, %v4721_v33, %v4722_v18  ;;  %v8946_v29 = vor.u32 %v10275_v44, %v8943_v27  ;;  %v8938_v0 = vor.u32 %v10273_v41, %v8935_v48  ;;  %v8917_v33 = vld [vmem:[#allocation7 + $0x310] sm:$0xf]  ;;  %v10267_v62 = vld [vmem:[#allocation7 + $0x304] sm:$0xf] }
 0x650   :  { %4890 = vmatpush.bf16.msra.mxu0 %v8798_v55  ;;  %v9030_v55 = vor.u32 %v10298_v50, %v9029_v7  ;;  %v8998_v50 = vor.u32 %v10290_v52, %v8997_v36  ;;  %v8911_v25 = vld [vmem:[#allocation7 + $0x308] sm:$0xf0] }
 0x651   :  { %4904 = vmatpush.bf16.msra.mxu1 %v8862_v46  ;;  %v8957_v46 = vld [vmem:[#allocation7 + $0x360] sm:$0xf]  ;;  %v4720_v57 = vsel %vm1796_vm0, %v4718_v8, %v4719_v58  ;;  %v10271_v8 = vld [vmem:[#allocation7 + $0x324] sm:$0xf]  ;;  %v8927_v58 = vld [vmem:[#allocation7 + $0x328] sm:$0xf0] }
 0x652   :  { %4918 = vmatpush.bf16.msra.mxu2 %v8802_v6  ;;  %v10280_v6 = vld [vmem:[#allocation7 + $0x364] sm:$0xf0] }
 0x653   :  { %4932 = vmatpush.bf16.msra.mxu3 %v8866_v4  ;;  %v10279_v4 = vld [vmem:[#allocation7 + $0x364] sm:$0xf] }
 0x654   :  { %4891 = vmatpush.bf16.msra.mxu0 %v8790_v15  ;;  %v8958_v15 = vor.u32 %v10280_v6, %v8957_v46  ;;  %v8962_v12 = vor.u32 %v10279_v4, %v8959_v5  ;;  %v10286_v46 = vld [vmem:[#allocation7 + $0x394] sm:$0xf0]  ;;  %v10266_v5 = vld [vmem:[#allocation3 + $0x1c] sm:$0xf0] }
 0x655   :  { %4905 = vmatpush.bf16.msra.mxu1 %v8854_v26  ;;  %v10278_v26 = vld [vmem:[#allocation7 + $0x354] sm:$0xf0] }
 0x656   :  { %4919 = vmatpush.bf16.msra.mxu2 %v8794_v21  ;;  %v9013_v21 = vld [vmem:[#allocation7 + $0x3d0] sm:$0xf]  ;;  %v8950_v20 = vor.u32 %v10278_v26, %v8949_v63  ;;  %v8901_v4 = vld [vmem:[#allocation3 + $0x18] sm:$0xe] }
 0x657   :  { %4933 = vmatpush.bf16.msra.mxu3 %v8858_v13  ;;  %v10293_v13 = vld [vmem:[#allocation7 + $0x3d4] sm:$0xf]  ;;  %v9014_v49 = vor.u32 %v10294_v14, %v9013_v21  ;;  %v8902_v21 = vor.u32 %v10266_v5, %v8901_v4  ;;  %v8922_v14 = vor.u32 %v10269_v10, %v8919_v9  ;;  %v5223_v9 = vld [vmem:[%s13268_s8] sm:$0x3] }
 0x658   :  { %4892 = vmatpush.bf16.msra.mxu0 %v8782_v34  ;;  %v9018_v34 = vor.u32 %v10293_v13, %v9015_v45  ;;  %v8973_v13 = vld [vmem:[#allocation7 + $0x380] sm:$0xf] }
 0x659   :  { %4906 = vmatpush.bf16.msra.mxu1 %v8846_v37  ;;  %v10292_v37 = vld [vmem:[#allocation7 + $0x3c4] sm:$0xf0]  ;;  %v4995_v44 = vrot.slane %v8902_v21, 1 }
 0x65a   :  { %4920 = vmatpush.bf16.msra.mxu2 %v8786_v24  ;;  %v10291_v24 = vld [vmem:[#allocation7 + $0x3c4] sm:$0xf]  ;;  %v9006_v23 = vor.u32 %v10292_v37, %v9005_v47  ;;  %v8910_v37 = vor.u32 %v10268_v16, %v8909_v53 }
 0x65b   :  { %4934 = vmatpush.bf16.msra.mxu3 %v8850_v39  ;;  %v10274_v39 = vld [vmem:[#allocation7 + $0x334] sm:$0xf0]  ;;  %v9010_v60 = vor.u32 %v10291_v24, %v9007_v22  ;;  %v10283_v47 = vld [vmem:[#allocation7 + $0x384] sm:$0xf]  ;;  %v8914_v22 = vor.u32 %v10267_v62, %v8911_v25 }
 0x65c   :  { %4893 = vmatpush.bf16.msra.mxu0 %v8774_v51  ;;  %v8934_v7 = vor.u32 %v10274_v39, %v8933_v54  ;;  %v8925_v51 = vld [vmem:[#allocation7 + $0x320] sm:$0xf] }
 0x65d   :  { %4907 = vmatpush.bf16.msra.mxu1 %v8838_v3  ;;  %v8989_v3 = vld [vmem:[#allocation7 + $0x3a0] sm:$0xf]  ;;  %v8926_v18 = vor.u32 %v10272_v19, %v8925_v51 }
 0x65e   :  { %4921 = vmatpush.bf16.msra.mxu2 %v8778_v43  ;;  %v4948_v43 = vld [vmem:[#allocation3 + $0x28] sm:$0x11]  ;;  %v8990_v31 = vor.u32 %v10288_v56, %v8989_v3 }
 0x65f   :  { %4935 = vmatpush.bf16.msra.mxu3 %v8842_v35  ;;  %4894 = vmatmul.bf16.vlgmr.msra.gmra.mxu0 %v4720_v57  ;;  %v10287_v35 = vld [vmem:[#allocation7 + $0x3a4] sm:$0xf]  ;;  %v4989_v6 = vunpack.c.l.b16 %v4948_v43 }
 0x660   :  { %5163 = vmatpush.bf16.msrb.mxu0 %v8966_v30  ;;  %4908 = vmatmul.bf16.vlgmr.msra.gmra.mxu1 %v4723_v17  ;;  %v8991_v30 = vld [vmem:[#allocation7 + $0x3a8] sm:$0xf0] }
 0x661   :  { %5177 = vmatpush.bf16.msrb.mxu1 %v9030_v55  ;;  %4922 = vmatmul.bf16.vlgmr.msra.gmra.mxu2 %v4720_v57  ;;  %v10270_v55 = vld [vmem:[#allocation7 + $0x314] sm:$0xf0]  ;;  %v4990_v57 = vunpack.c.h.b16 %v4948_v43  ;;  %v8994_v59 = vor.u32 %v10287_v35, %v8991_v30 }
 0x662   :  { %5191 = vmatpush.bf16.msrb.mxu2 %v8970_v38  ;;  %4936 = vmatmul.bf16.vlgmr.msra.gmra.mxu3 %v4723_v17  ;;  %v8981_v38 = vld [vmem:[#allocation7 + $0x390] sm:$0xf]  ;;  %v10265_v17 = vld [vmem:[#allocation3 + $0x1c] sm:$0xe]  ;;  %v8918_v63 = vor.u32 %v10270_v55, %v8917_v33 }
 0x663   :  { %5205 = vmatpush.bf16.msrb.mxu3 %v9034_v61  ;;  %v8930_v61 = vor.u32 %v10271_v8, %v8927_v58  ;;  %v8982_v26 = vor.u32 %v10286_v46, %v8981_v38 }
 0x664   :  { %5164 = vmatpush.bf16.msrb.mxu0 %v8958_v15  ;;  %v8903_v15 = vld [vmem:[#allocation3 + $0x20] sm:$0xf0] }
 0x665   :  { %5178 = vmatpush.bf16.msrb.mxu1 %v9022_v11  ;;  %v10285_v11 = vld [vmem:[#allocation7 + $0x394] sm:$0xf]  ;;  %v8906_v45 = vor.u32 %v10265_v17, %v8903_v15 }
 0x666   :  { %5192 = vmatpush.bf16.msrb.mxu2 %v8962_v12  ;;  %v8983_v12 = vld [vmem:[#allocation7 + $0x398] sm:$0xf0] }
 0x667   :  { %5206 = vmatpush.bf16.msrb.mxu3 %v9026_v28  ;;  %v4993_v28 = vpack.c.b16 %v4989_v6, %v4989_v6 }
 0x668   :  { %5165 = vmatpush.bf16.msrb.mxu0 %v8950_v20  ;;  %v4994_v20 = vpack.c.b16 %v4990_v57, %v4990_v57 }
 0x669   :  { %5179 = vmatpush.bf16.msrb.mxu1 %v9014_v49  ;;  %v8986_v49 = vor.u32 %v10285_v11, %v8983_v12  ;;  %v4996_v27 = vrot.slane %v4993_v28, 1 }
 0x66a   :  { %5193 = vmatpush.bf16.msrb.mxu2 %v8954_v42  ;;  %v10284_v42 = vld [vmem:[#allocation7 + $0x384] sm:$0xf0] }
 0x66b   :  { %5207 = vmatpush.bf16.msrb.mxu3 %v9018_v34  ;;  %v8975_v34 = vld [vmem:[#allocation7 + $0x388] sm:$0xf0]  ;;  %v8974_v24 = vor.u32 %v10284_v42, %v8973_v13  ;;  %v4997_v54 = vsel %vm1796_vm0, %v4995_v44, %v4996_v27 }
 0x66c   :  { %5166 = vmatpush.bf16.msrb.mxu0 %v8942_v32  ;;  %v4998_v32 = vrot.slane %v8906_v45, 1 }
 0x66d   :  { %5180 = vmatpush.bf16.msrb.mxu1 %v9006_v23  ;;  %v4999_v23 = vrot.slane %v4994_v20, 1 }
 0x66e   :  { %5194 = vmatpush.bf16.msrb.mxu2 %v8946_v29  ;;  %v8978_v29 = vor.u32 %v10283_v47, %v8975_v34 }
 0x66f   :  { %5208 = vmatpush.bf16.msrb.mxu3 %v9010_v60  ;;  %v5000_v39 = vsel %vm1796_vm0, %v4998_v32, %v4999_v23 }
 0x670   :  { %5167 = vmatpush.bf16.msrb.mxu0 %v8934_v7 }
 0x671   :  { %5181 = vmatpush.bf16.msrb.mxu1 %v8998_v50 }
 0x672   :  { %5195 = vmatpush.bf16.msrb.mxu2 %v8938_v0 }
 0x673   :  { %5209 = vmatpush.bf16.msrb.mxu3 %v9002_v1 }
 0x674   :  { %5168 = vmatpush.bf16.msrb.mxu0 %v8926_v18 }
 0x675   :  { %5182 = vmatpush.bf16.msrb.mxu1 %v8990_v31 }
 0x676   :  { %5196 = vmatpush.bf16.msrb.mxu2 %v8930_v61 }
 0x677   :  { %5210 = vmatpush.bf16.msrb.mxu3 %v8994_v59 }
 0x678   :  { %5169 = vmatpush.bf16.msrb.mxu0 %v8918_v63 }
 0x679   :  { %5183 = vmatpush.bf16.msrb.mxu1 %v8982_v26  ;;  %v5225_v26 = vperm.slane %v5223_v9, 0 }
 0x67a   :  { %5197 = vmatpush.bf16.msrb.mxu2 %v8922_v14 }
 0x67b   :  { %5211 = vmatpush.bf16.msrb.mxu3 %v8986_v49 }
 0x67c   :  { %5170 = vmatpush.bf16.msrb.mxu0 %v8910_v37 }
 0x67d   :  { %5184 = vmatpush.bf16.msrb.mxu1 %v8974_v24  ;;  %v5226_v24 = vperm.slane %v5223_v9, 1 }
 0x67e   :  { %5198 = vmatpush.bf16.msrb.mxu2 %v8914_v22 }
 0x67f   :  { %5212 = vmatpush.bf16.msrb.mxu3 %v8978_v29  ;;  %5171 = vmatmul.bf16.vlgmr.msrb.gmra.mxu0 %v4997_v54 }
 0x680   :  { %5185 = vmatmul.bf16.vlgmr.msrb.gmra.mxu1 %v5000_v39 }
 0x681   :  { %5199 = vmatmul.bf16.vlgmr.msrb.gmra.mxu2 %v4997_v54 }
 0x682   :  { %5213 = vmatmul.bf16.vlgmr.msrb.gmra.mxu3 %v5000_v39 }
 0x69c   :  { %v4396_v36 = vpop.f32.mrf.mxu0 }
 0x69d   :  { %v4410_v60 = vpop.f32.mrf.mxu1 }
 0x69e   :  { %v4411_v55 = vadd.f32 %v4410_v60, %v4396_v36  ;;  %v9045_v36 = vld [vmem:[%s13269_s9 + $0x8] sm:$0xf] }
 0x6a4   :  { %v4424_v52 = vpop.f32.mrf.mxu2  ;;  %v4398_v48 = vpop.f32.mrf.mxu0 }
 0x6a5   :  { %v4438_v41 = vpop.f32.mrf.mxu3  ;;  %v4412_v2 = vpop.f32.mrf.mxu1 }
 0x6a6   :  { %v4439_v10 = vadd.f32 %v4438_v41, %v4424_v52  ;;  %v4413_v5 = vadd.f32 %v4412_v2, %v4398_v48  ;;  %v10300_v48 = vld [vmem:[%s13269_s9 + $0x8] sm:$0x10]  ;;  %v9037_v2 = vld [vmem:[%s13269_s9] sm:$0xf] }
 0x6ac   :  { %v4426_v40 = vpop.f32.mrf.mxu2 }
 0x6ad   :  { %v4440_v7 = vpop.f32.mrf.mxu3 }
 0x6ae   :  { %v4441_v13 = vadd.f32 %v4440_v7, %v4426_v40  ;;  %v10299_v40 = vld [vmem:[%s13269_s9] sm:$0x10] }
 0x6bc   :  { %v4622_v51 = vpop.f32.mrf.mxu0 }
 0x6bd   :  { %v4636_v50 = vpop.f32.mrf.mxu1  ;;  %v4623_v38 = vadd.f32 %v4622_v51, %v4411_v55 }
 0x6bf   :  { %v4637_v57 = vadd.f32 %v4636_v50, %v4623_v38 }
 0x6c4   :  { %v4650_v0 = vpop.f32.mrf.mxu2  ;;  %v4624_v3 = vpop.f32.mrf.mxu0 }
 0x6c5   :  { %v4664_v19 = vpop.f32.mrf.mxu3  ;;  %v4638_v43 = vpop.f32.mrf.mxu1  ;;  %v4625_v17 = vadd.f32 %v4624_v3, %v4413_v5  ;;  %v4651_v11 = vadd.f32 %v4650_v0, %v4439_v10  ;;  %v9038_v3 = vor.u32 %v10299_v40, %v9037_v2 }
 0x6c7   :  { %v4639_v14 = vadd.f32 %v4638_v43, %v4625_v17  ;;  %v4665_v45 = vadd.f32 %v4664_v19, %v4651_v11  ;;  %v9046_v19 = vor.u32 %v10300_v48, %v9045_v36 }
 0x6cc   :  { %v4652_v1 = vpop.f32.mrf.mxu2 }
 0x6cd   :  { %v4666_v56 = vpop.f32.mrf.mxu3  ;;  %v4653_v47 = vadd.f32 %v4652_v1, %v4441_v13 }
 0x6cf   :  { %v4667_v23 = vadd.f32 %v4666_v56, %v4653_v47 }
 0x6dc   :  { %v4895_v8 = vpop.f32.mrf.mxu0 }
 0x6dd   :  { %v4909_v58 = vpop.f32.mrf.mxu1 }
 0x6de   :  { %v4910_v6 = vadd.f32 %v4909_v58, %v4895_v8 }
 0x6e0   :  { %v4942_v15 = vadd.f32 %v4910_v6, %v4637_v57 }
 0x6e4   :  { %v4923_v35 = vpop.f32.mrf.mxu2  ;;  %v4897_v33 = vpop.f32.mrf.mxu0 }
 0x6e5   :  { %v4937_v30 = vpop.f32.mrf.mxu3  ;;  %v4911_v18 = vpop.f32.mrf.mxu1 }
 0x6e6   :  { %v4912_v12 = vadd.f32 %v4911_v18, %v4897_v33  ;;  %v4938_v21 = vadd.f32 %v4937_v30, %v4923_v35 }
 0x6e8   :  { %v4944_v42 = vadd.f32 %v4912_v12, %v4639_v14  ;;  %v4943_v34 = vadd.f32 %v4938_v21, %v4665_v45 }
 0x6ec   :  { %v4925_v46 = vpop.f32.mrf.mxu2 }
 0x6ed   :  { %v4939_v31 = vpop.f32.mrf.mxu3 }
 0x6ee   :  { %v4940_v44 = vadd.f32 %v4939_v31, %v4925_v46 }
 0x6f0   :  { %v4945_v60 = vadd.f32 %v4940_v44, %v4667_v23 }
 0x6fc   :  { %v5172_v61 = vpop.f32.mrf.mxu0 }
 0x6fd   :  { %v5186_v4 = vpop.f32.mrf.mxu1 }
 0x6fe   :  { %v5187_v59 = vadd.f32 %v5186_v4, %v5172_v61 }
 0x700   :  { %v5219_v63 = vadd.f32 %v5187_v59, %v4942_v15 }
 0x702   :  { %v5229_v62 = vadd.f32 %v5225_v26, %v5219_v63 }
 0x704   :  { %v5200_v28 = vpop.f32.mrf.mxu2  ;;  %v5174_v16 = vpop.f32.mrf.mxu0  ;;  %v5237_v22 = vmul.f32 0.2, %v5229_v62  ;;  %vm5233_vm0 = vcmp.ge.f32.partialorder %v5229_v62, 0.0 }
 0x705   :  { %v5214_v53 = vpop.f32.mrf.mxu3  ;;  %v5188_v49 = vpop.f32.mrf.mxu1 }
 0x706   :  { %v5215_v20 = vadd.f32 %v5214_v53, %v5200_v28  ;;  %v5189_v25 = vadd.f32 %v5188_v49, %v5174_v16  ;;  %v5241_v7 = vsel %vm5233_vm0, %v5229_v62, %v5237_v22 }
 0x708   :  { %v5221_v37 = vadd.f32 %v5189_v25, %v4944_v42  ;;  %v5220_v27 = vadd.f32 %v5215_v20, %v4943_v34 }
 0x70a   :  { %v5231_v32 = vadd.f32 %v5225_v26, %v5221_v37  ;;  %v5230_v52 = vadd.f32 %v5226_v24, %v5220_v27 }
 0x70c   :  { %v5202_v29 = vpop.f32.mrf.mxu2  ;;  %vm5235_vm12 = vcmp.ge.f32.partialorder %v5231_v32, 0.0  ;;  %v5239_v54 = vmul.f32 0.2, %v5231_v32  ;;  %v5238_v43 = vmul.f32 0.2, %v5230_v52  ;;  %vm5234_vm14 = vcmp.ge.f32.partialorder %v5230_v52, 0.0 }
 0x70d   :  { %v5216_v39 = vpop.f32.mrf.mxu3 }
 0x70e   :  { %v5217_v41 = vadd.f32 %v5216_v39, %v5202_v29  ;;  %v5243_v51 = vsel %vm5235_vm12, %v5231_v32, %v5239_v54  ;;  %v5242_v8 = vsel %vm5234_vm14, %v5230_v52, %v5238_v43 }
 0x70f   :  { %v5245_v0 = vpack.c.bf16 %v5243_v51, %v5241_v7 }
 0x710   :  { %v5222_v50 = vadd.f32 %v5217_v41, %v4945_v60 }
 0x711   :  { %5265 = vmatpush.bf16.msra.mxu0 %v5245_v0  ;;  %5308 = vmatpush.bf16.msra.mxu2 %v5245_v0 }
 0x712   :  { %v5232_v1 = vadd.f32 %v5226_v24, %v5222_v50 }
 0x714   :  { %vm5236_vm15 = vcmp.ge.f32.partialorder %v5232_v1, 0.0  ;;  %v5240_v56 = vmul.f32 0.2, %v5232_v1  ;;  %9047 = vmatmul.msk.bf16.vlgmr.msra.gmra.mxu2 %vm5254_vm13, %v9046_v19  ;;  %9039 = vmatmul.msk.bf16.vlgmr.msra.gmra.mxu0 %vm5254_vm13, %v9038_v3 }
 0x716   :  { %v5244_v58 = vsel %vm5236_vm15, %v5232_v1, %v5240_v56 }
 0x717   :  { %v5246_v35 = vpack.c.bf16 %v5244_v58, %v5242_v8 }
 0x719   :  { %5279 = vmatpush.bf16.msra.mxu1 %v5246_v35  ;;  %5322 = vmatpush.bf16.msra.mxu3 %v5246_v35 }
 0x71c   :  { %9048 = vmatmul.msk.bf16.vlgmr.msra.gmra.mxu3 %vm5254_vm13, %v9046_v19  ;;  %9040 = vmatmul.msk.bf16.vlgmr.msra.gmra.mxu1 %vm5254_vm13, %v9038_v3 }
 0x791   :  { %v5267_v30 = vpop.f32.mrf.mxu0 }
 0x797   :  { %v5310_v55 = vpop.f32.mrf.mxu2 }
 0x799   :  { %v5281_v33 = vpop.f32.mrf.mxu1  ;;  %v5269_v6 = vpop.f32.mrf.mxu0 }
 0x79a   :  { %v5286_v18 = vpack.c.bf16 %v5281_v33, %v5267_v30 }
 0x79c   :  { %5288 = vst [vmem:[#allocation4] sm:$0xff] %v5286_v18 }
 0x79f   :  { %v5324_v38 = vpop.f32.mrf.mxu3  ;;  %v5312_v10 = vpop.f32.mrf.mxu2 }
 0x7a0   :  { %v5329_v46 = vpack.c.bf16 %v5324_v38, %v5310_v55 }
 0x7a1   :  { %v5283_v31 = vpop.f32.mrf.mxu1 }
 0x7a2   :  { %5332 = vst [vmem:[#allocation4 + $0x10] sm:$0xff] %v5329_v46  ;;  %v5287_v61 = vpack.c.bf16 %v5283_v31, %v5269_v6 }
 0x7a4   :  { %5289 = vst [vmem:[#allocation4 + $0x8] sm:$0x11] %v5287_v61 }
 0x7a7   :  { %v5326_v4 = vpop.f32.mrf.mxu3 }
 0x7a8   :  { %v5330_v5 = vpack.c.bf16 %v5326_v4, %v5312_v10 }
 0x7aa   :  { %5333 = vst [vmem:[#allocation4 + $0x18] sm:$0x11] %v5330_v5 }
 0x7ab   :  { %10507 = dma.done.wait [#allocation10 + $0x2], 16384 }
 0x7ac   :  { %10508 = vsyncadd [#allocation10 + $0x2], 4294950912  ;;  %v10511_v57 = vmov 0   ;;  %v9107_v59 = vld [vmem:[#allocation8 + $0x170] sm:$0xf] }
 0x7ad   :  { %6385 = vst [vmem:[#allocation5] sm:$0x11] %v10511_v57  ;;  %v10348_v9 = vld [vmem:[#allocation8 + $0x174] sm:$0xf0]  ;;  %v9171_v17 = vld [vmem:[#allocation8 + $0x1f0] sm:$0xf] }
 0x7ae   :  { %6386 = vst [vmem:[#allocation5 + $0x8] sm:$0x22] %v10511_v57  ;;  %v9108_v15 = vor.u32 %v10348_v9, %v9107_v59  ;;  %v10364_v11 = vld [vmem:[#allocation8 + $0x1f4] sm:$0xf0]  ;;  %v10347_v12 = vld [vmem:[#allocation8 + $0x174] sm:$0xf] }
 0x7af   :  { %v9109_v63 = vld [vmem:[#allocation8 + $0x178] sm:$0xf0]  ;;  %v9172_v26 = vor.u32 %v10364_v11, %v9171_v17  ;;  %v10363_v28 = vld [vmem:[#allocation8 + $0x1f4] sm:$0xf]  ;;  %v9099_v53 = vld [vmem:[#allocation8 + $0x160] sm:$0xf] }
 0x7b0   :  { %v9112_v21 = vor.u32 %v10347_v12, %v9109_v63  ;;  %v9173_v14 = vld [vmem:[#allocation8 + $0x1f8] sm:$0xf0]  ;;  %5570 = vmatpush.bf16.msrb.mxu0 %v9108_v15  ;;  %v10346_v13 = vld [vmem:[#allocation8 + $0x164] sm:$0xf0]  ;;  %v9163_v45 = vld [vmem:[#allocation8 + $0x1e0] sm:$0xf] }
 0x7b1   :  { %v9176_v16 = vor.u32 %v10363_v28, %v9173_v14  ;;  %v10362_v20 = vld [vmem:[#allocation8 + $0x1e4] sm:$0xf0]  ;;  %5583 = vmatpush.bf16.msrb.mxu1 %v9172_v26  ;;  %v9100_v49 = vor.u32 %v10346_v13, %v9099_v53  ;;  %v10345_v62 = vld [vmem:[#allocation8 + $0x164] sm:$0xf]  ;;  %v9101_v25 = vld [vmem:[#allocation8 + $0x168] sm:$0xf0] }
 0x7b2   :  { %5596 = vmatpush.bf16.msrb.mxu2 %v9112_v21  ;;  %v9164_v42 = vor.u32 %v10362_v20, %v9163_v45  ;;  %v10361_v47 = vld [vmem:[#allocation8 + $0x1e4] sm:$0xf]  ;;  %v9104_v34 = vor.u32 %v10345_v62, %v9101_v25  ;;  %v9165_v37 = vld [vmem:[#allocation8 + $0x1e8] sm:$0xf0]  ;;  %v9091_v44 = vld [vmem:[#allocation8 + $0x150] sm:$0xf] }
 0x7b3   :  { %5609 = vmatpush.bf16.msrb.mxu3 %v9176_v16  ;;  %v10344_v27 = vld [vmem:[#allocation8 + $0x154] sm:$0xf0]  ;;  %v9168_v24 = vor.u32 %v10361_v47, %v9165_v37  ;;  %v9155_v22 = vld [vmem:[#allocation8 + $0x1d0] sm:$0xf]  ;;  %v10343_v23 = vld [vmem:[#allocation8 + $0x154] sm:$0xf] }
 0x7b4   :  { %v10360_v32 = vld [vmem:[#allocation8 + $0x1d4] sm:$0xf0]  ;;  %5571 = vmatpush.bf16.msrb.mxu0 %v9100_v49  ;;  %v9092_v29 = vor.u32 %v10344_v27, %v9091_v44  ;;  %v9093_v54 = vld [vmem:[#allocation8 + $0x158] sm:$0xf0]  ;;  %v10359_v39 = vld [vmem:[#allocation8 + $0x1d4] sm:$0xf] }
 0x7b5   :  { %v9157_v36 = vld [vmem:[#allocation8 + $0x1d8] sm:$0xf0]  ;;  %5584 = vmatpush.bf16.msrb.mxu1 %v9164_v42  ;;  %v9156_v60 = vor.u32 %v10360_v32, %v9155_v22  ;;  %v9096_v52 = vor.u32 %v10343_v23, %v9093_v54  ;;  %v9083_v41 = vld [vmem:[#allocation8 + $0x140] sm:$0xf]  ;;  %v10342_v48 = vld [vmem:[#allocation8 + $0x144] sm:$0xf0] }
 0x7b6   :  { %5597 = vmatpush.bf16.msrb.mxu2 %v9104_v34  ;;  %v9147_v2 = vld [vmem:[#allocation8 + $0x1c0] sm:$0xf]  ;;  %v9160_v40 = vor.u32 %v10359_v39, %v9157_v36  ;;  %v10358_v7 = vld [vmem:[#allocation8 + $0x1c4] sm:$0xf0]  ;;  %v10341_v51 = vld [vmem:[#allocation8 + $0x144] sm:$0xf]  ;;  %v9084_v3 = vor.u32 %v10342_v48, %v9083_v41 }
 0x7b7   :  { %5610 = vmatpush.bf16.msrb.mxu3 %v9168_v24  ;;  %v9085_v50 = vld [vmem:[#allocation8 + $0x148] sm:$0xf0]  ;;  %v10357_v0 = vld [vmem:[#allocation8 + $0x1c4] sm:$0xf]  ;;  %v9148_v43 = vor.u32 %v10358_v7, %v9147_v2  ;;  %v9075_v56 = vld [vmem:[#allocation8 + $0x130] sm:$0xf] }
 0x7b8   :  { %v9149_v19 = vld [vmem:[#allocation8 + $0x1c8] sm:$0xf0]  ;;  %5572 = vmatpush.bf16.msrb.mxu0 %v9092_v29  ;;  %v9088_v1 = vor.u32 %v10341_v51, %v9085_v50  ;;  %v10340_v8 = vld [vmem:[#allocation8 + $0x134] sm:$0xf0]  ;;  %v9139_v58 = vld [vmem:[#allocation8 + $0x1b0] sm:$0xf] }
 0x7b9   :  { %5585 = vmatpush.bf16.msrb.mxu1 %v9156_v60  ;;  %v9152_v35 = vor.u32 %v10357_v0, %v9149_v19  ;;  %v10356_v30 = vld [vmem:[#allocation8 + $0x1b4] sm:$0xf0]  ;;  %v10339_v33 = vld [vmem:[#allocation8 + $0x134] sm:$0xf]  ;;  %v9077_v18 = vld [vmem:[#allocation8 + $0x138] sm:$0xf0]  ;;  %v9076_v46 = vor.u32 %v10340_v8, %v9075_v56 }
 0x7ba   :  { %5598 = vmatpush.bf16.msrb.mxu2 %v9096_v52  ;;  %v10355_v55 = vld [vmem:[#allocation8 + $0x1b4] sm:$0xf]  ;;  %v9141_v38 = vld [vmem:[#allocation8 + $0x1b8] sm:$0xf0]  ;;  %v9140_v6 = vor.u32 %v10356_v30, %v9139_v58  ;;  %v9080_v31 = vor.u32 %v10339_v33, %v9077_v18  ;;  %v9067_v61 = vld [vmem:[#allocation8 + $0x120] sm:$0xf] }
 0x7bb   :  { %5611 = vmatpush.bf16.msrb.mxu3 %v9160_v40  ;;  %v10338_v10 = vld [vmem:[#allocation8 + $0x124] sm:$0xf0]  ;;  %v9131_v4 = vld [vmem:[#allocation8 + $0x1a0] sm:$0xf]  ;;  %v9144_v5 = vor.u32 %v10355_v55, %v9141_v38  ;;  %v10337_v59 = vld [vmem:[#allocation8 + $0x124] sm:$0xf] }
 0x7bc   :  { %5573 = vmatpush.bf16.msrb.mxu0 %v9084_v3  ;;  %v10354_v57 = vld [vmem:[#allocation8 + $0x1a4] sm:$0xf0]  ;;  %v9069_v9 = vld [vmem:[#allocation8 + $0x128] sm:$0xf0]  ;;  %v10353_v17 = vld [vmem:[#allocation8 + $0x1a4] sm:$0xf]  ;;  %v9068_v11 = vor.u32 %v10338_v10, %v9067_v61 }
 0x7bd   :  { %5586 = vmatpush.bf16.msrb.mxu1 %v9148_v43  ;;  %v9133_v15 = vld [vmem:[#allocation8 + $0x1a8] sm:$0xf0]  ;;  %v9132_v12 = vor.u32 %v10354_v57, %v9131_v4  ;;  %v9072_v63 = vor.u32 %v10337_v59, %v9069_v9  ;;  %v9059_v26 = vld [vmem:[#allocation8 + $0x110] sm:$0xf]  ;;  %v10336_v21 = vld [vmem:[#allocation8 + $0x114] sm:$0xf0] }
 0x7be   :  { %5599 = vmatpush.bf16.msrb.mxu2 %v9088_v1  ;;  %v9123_v28 = vld [vmem:[#allocation8 + $0x190] sm:$0xf]  ;;  %v9136_v14 = vor.u32 %v10353_v17, %v9133_v15  ;;  %v10352_v53 = vld [vmem:[#allocation8 + $0x194] sm:$0xf0]  ;;  %v10335_v16 = vld [vmem:[#allocation8 + $0x114] sm:$0xf]  ;;  %v9060_v49 = vor.u32 %v10336_v21, %v9059_v26 }
 0x7bf   :  { %5612 = vmatpush.bf16.msrb.mxu3 %v9152_v35  ;;  %v9061_v13 = vld [vmem:[#allocation8 + $0x118] sm:$0xf0]  ;;  %v10351_v45 = vld [vmem:[#allocation8 + $0x194] sm:$0xf]  ;;  %v9051_v42 = vld [vmem:[#allocation8 + $0x100] sm:$0xf]  ;;  %v9124_v25 = vor.u32 %v10352_v53, %v9123_v28 }
 0x7c0   :  { %5574 = vmatpush.bf16.msrb.mxu0 %v9076_v46  ;;  %v9125_v20 = vld [vmem:[#allocation8 + $0x198] sm:$0xf0]  ;;  %v10334_v62 = vld [vmem:[#allocation8 + $0x104] sm:$0xf0]  ;;  %v9064_v47 = vor.u32 %v10335_v16, %v9061_v13  ;;  %v9115_v34 = vld [vmem:[#allocation8 + $0x180] sm:$0xf] }
 0x7c1   :  { %5587 = vmatpush.bf16.msrb.mxu1 %v9140_v6  ;;  %v10350_v37 = vld [vmem:[#allocation8 + $0x184] sm:$0xf0]  ;;  %v10333_v44 = vld [vmem:[#allocation8 + $0x104] sm:$0xf]  ;;  %v9128_v27 = vor.u32 %v10351_v45, %v9125_v20  ;;  %v9053_v24 = vld [vmem:[#allocation8 + $0x108] sm:$0xf0]  ;;  %v9052_v39 = vor.u32 %v10334_v62, %v9051_v42 }
 0x7c2   :  { %5600 = vmatpush.bf16.msrb.mxu2 %v9080_v31  ;;  %v10349_v22 = vld [vmem:[#allocation8 + $0x184] sm:$0xf]  ;;  %v9117_v32 = vld [vmem:[#allocation8 + $0x188] sm:$0xf0]  ;;  %v9235_v23 = vld [vmem:[#allocation8 + $0x70] sm:$0xf]  ;;  %v9116_v41 = vor.u32 %v10350_v37, %v9115_v34  ;;  %v9056_v48 = vor.u32 %v10333_v44, %v9053_v24 }
 0x7c3   :  { %5613 = vmatpush.bf16.msrb.mxu3 %v9144_v5  ;;  %v10316_v29 = vld [vmem:[#allocation8 + $0x74] sm:$0xf0]  ;;  %v9299_v54 = vld [vmem:[#allocation8 + $0xf0] sm:$0xf]  ;;  %v10315_v60 = vld [vmem:[#allocation8 + $0x74] sm:$0xf]  ;;  %v9120_v7 = vor.u32 %v10349_v22, %v9117_v32 }
 0x7c4   :  { %5575 = vmatpush.bf16.msrb.mxu0 %v9068_v11  ;;  %v10332_v36 = vld [vmem:[#allocation8 + $0xf4] sm:$0xf0]  ;;  %v9237_v52 = vld [vmem:[#allocation8 + $0x78] sm:$0xf0]  ;;  %v10331_v2 = vld [vmem:[#allocation8 + $0xf4] sm:$0xf]  ;;  %v9236_v51 = vor.u32 %v10316_v29, %v9235_v23 }
 0x7c5   :  { %5588 = vmatpush.bf16.msrb.mxu1 %v9132_v12  ;;  %v9301_v40 = vld [vmem:[#allocation8 + $0xf8] sm:$0xf0]  ;;  %v9300_v50 = vor.u32 %v10332_v36, %v9299_v54  ;;  %v9240_v0 = vor.u32 %v10315_v60, %v9237_v52  ;;  %v9227_v19 = vld [vmem:[#allocation8 + $0x60] sm:$0xf]  ;;  %v10314_v3 = vld [vmem:[#allocation8 + $0x64] sm:$0xf0] }
 0x7c6   :  { %5601 = vmatpush.bf16.msrb.mxu2 %v9072_v63  ;;  %v9291_v43 = vld [vmem:[#allocation8 + $0xe0] sm:$0xf]  ;;  %v9304_v1 = vor.u32 %v10331_v2, %v9301_v40  ;;  %v10330_v56 = vld [vmem:[#allocation8 + $0xe4] sm:$0xf0]  ;;  %v10313_v8 = vld [vmem:[#allocation8 + $0x64] sm:$0xf]  ;;  %v9228_v18 = vor.u32 %v10314_v3, %v9227_v19 }
 0x7c7   :  { %5614 = vmatpush.bf16.msrb.mxu3 %v9136_v14  ;;  %v9229_v58 = vld [vmem:[#allocation8 + $0x68] sm:$0xf0]  ;;  %v10329_v35 = vld [vmem:[#allocation8 + $0xe4] sm:$0xf]  ;;  %v9292_v46 = vor.u32 %v10330_v56, %v9291_v43  ;;  %v9219_v31 = vld [vmem:[#allocation8 + $0x50] sm:$0xf] }
 0x7c8   :  { %5576 = vmatpush.bf16.msrb.mxu0 %v9060_v49  ;;  %v9293_v30 = vld [vmem:[#allocation8 + $0xe8] sm:$0xf0]  ;;  %v5369_v33 = vld [vmem:[#allocation4 + $0x10] sm:$0xff]  ;;  %v9232_v6 = vor.u32 %v10313_v8, %v9229_v58  ;;  %v10312_v61 = vld [vmem:[#allocation8 + $0x54] sm:$0xf0] }
 0x7c9   :  { %5589 = vmatpush.bf16.msrb.mxu1 %v9124_v25  ;;  %v5404_v55 = vunpack.c.l.b16 %v5369_v33  ;;  %v5405_v38 = vunpack.c.h.b16 %v5369_v33  ;;  %v9283_v10 = vld [vmem:[#allocation8 + $0xd0] sm:$0xf]  ;;  %v9296_v4 = vor.u32 %v10329_v35, %v9293_v30  ;;  %v10328_v5 = vld [vmem:[#allocation8 + $0xd4] sm:$0xf0]  ;;  %v10311_v57 = vld [vmem:[#allocation8 + $0x54] sm:$0xf]  ;;  %v9220_v12 = vor.u32 %v10312_v61, %v9219_v31 }
 0x7ca   :  { %5602 = vmatpush.bf16.msrb.mxu2 %v9064_v47  ;;  %v9221_v59 = vld [vmem:[#allocation8 + $0x58] sm:$0xf0]  ;;  %v10327_v17 = vld [vmem:[#allocation8 + $0xd4] sm:$0xf]  ;;  %v9284_v63 = vor.u32 %v10328_v5, %v9283_v10  ;;  %v9211_v21 = vld [vmem:[#allocation8 + $0x40] sm:$0xf] }
 0x7cb   :  { %5615 = vmatpush.bf16.msrb.mxu3 %v9128_v27  ;;  %v5406_v9 = vpack.c.b16 %v5404_v55, %v5404_v55  ;;  %v9285_v15 = vld [vmem:[#allocation8 + $0xd8] sm:$0xf0]  ;;  %v5407_v11 = vpack.c.b16 %v5405_v38, %v5405_v38  ;;  %v9224_v26 = vor.u32 %v10311_v57, %v9221_v59  ;;  %v10310_v28 = vld [vmem:[#allocation8 + $0x44] sm:$0xf0]  ;;  %v9275_v14 = vld [vmem:[#allocation8 + $0xc0] sm:$0xf] }
 0x7cc   :  { %5577 = vmatpush.bf16.msrb.mxu0 %v9052_v39  ;;  %v9288_v53 = vor.u32 %v10327_v17, %v9285_v15  ;;  %v10326_v16 = vld [vmem:[#allocation8 + $0xc4] sm:$0xf0]  ;;  %v10309_v13 = vld [vmem:[#allocation8 + $0x44] sm:$0xf]  ;;  %v9213_v45 = vld [vmem:[#allocation8 + $0x48] sm:$0xf0]  ;;  %v9212_v42 = vor.u32 %v10310_v28, %v9211_v21 }
 0x7cd   :  { %5590 = vmatpush.bf16.msrb.mxu1 %v9116_v41  ;;  %v10325_v20 = vld [vmem:[#allocation8 + $0xc4] sm:$0xf]  ;;  %v9277_v49 = vld [vmem:[#allocation8 + $0xc8] sm:$0xf0]  ;;  %v9276_v62 = vor.u32 %v10326_v16, %v9275_v14  ;;  %v9216_v25 = vor.u32 %v10309_v13, %v9213_v45  ;;  %v9203_v47 = vld [vmem:[#allocation8 + $0x30] sm:$0xf] }
 0x7ce   :  { %5603 = vmatpush.bf16.msrb.mxu2 %v9056_v48  ;;  %v10308_v34 = vld [vmem:[#allocation8 + $0x34] sm:$0xf0]  ;;  %v9267_v37 = vld [vmem:[#allocation8 + $0xb0] sm:$0xf]  ;;  %v9280_v44 = vor.u32 %v10325_v20, %v9277_v49  ;;  %v10307_v24 = vld [vmem:[#allocation8 + $0x34] sm:$0xf] }
 0x7cf   :  { %5616 = vmatpush.bf16.msrb.mxu3 %v9120_v7  ;;  %5578 = vmatmul.bf16.vlgmr.msrb.gmra.mxu0 %v5406_v9  ;;  %v10324_v27 = vld [vmem:[#allocation8 + $0xb4] sm:$0xf0]  ;;  %v9205_v22 = vld [vmem:[#allocation8 + $0x38] sm:$0xf0]  ;;  %v10323_v32 = vld [vmem:[#allocation8 + $0xb4] sm:$0xf]  ;;  %v9204_v29 = vor.u32 %v10308_v34, %v9203_v47 }
 0x7d0   :  { %5789 = vmatpush.bf16.msra.mxu0 %v9236_v51  ;;  %5591 = vmatmul.bf16.vlgmr.msrb.gmra.mxu1 %v5407_v11  ;;  %v9269_v23 = vld [vmem:[#allocation8 + $0xb8] sm:$0xf0]  ;;  %v9268_v54 = vor.u32 %v10324_v27, %v9267_v37  ;;  %v9208_v39 = vor.u32 %v10307_v24, %v9205_v22  ;;  %v9195_v36 = vld [vmem:[#allocation8 + $0x20] sm:$0xf]  ;;  %v10306_v60 = vld [vmem:[#allocation8 + $0x24] sm:$0xf0] }
 0x7d1   :  { %5802 = vmatpush.bf16.msra.mxu1 %v9300_v50  ;;  %5604 = vmatmul.bf16.vlgmr.msrb.gmra.mxu2 %v5406_v9  ;;  %v9259_v52 = vld [vmem:[#allocation8 + $0xa0] sm:$0xf]  ;;  %v9272_v41 = vor.u32 %v10323_v32, %v9269_v23  ;;  %v10322_v48 = vld [vmem:[#allocation8 + $0xa4] sm:$0xf0]  ;;  %v10305_v2 = vld [vmem:[#allocation8 + $0x24] sm:$0xf]  ;;  %v9196_v50 = vor.u32 %v10306_v60, %v9195_v36 }
 0x7d2   :  { %5815 = vmatpush.bf16.msra.mxu2 %v9240_v0  ;;  %5617 = vmatmul.bf16.vlgmr.msrb.gmra.mxu3 %v5407_v11  ;;  %v9197_v40 = vld [vmem:[#allocation8 + $0x28] sm:$0xf0]  ;;  %v10321_v7 = vld [vmem:[#allocation8 + $0xa4] sm:$0xf]  ;;  %v9260_v0 = vor.u32 %v10322_v48, %v9259_v52  ;;  %v9187_v3 = vld [vmem:[#allocation8 + $0x10] sm:$0xf] }
 0x7d3   :  { %5828 = vmatpush.bf16.msra.mxu3 %v9304_v1  ;;  %v9261_v51 = vld [vmem:[#allocation8 + $0xa8] sm:$0xf0]  ;;  %v9200_v19 = vor.u32 %v10305_v2, %v9197_v40  ;;  %v10304_v43 = vld [vmem:[#allocation8 + $0x14] sm:$0xf0]  ;;  %v9251_v1 = vld [vmem:[#allocation8 + $0x90] sm:$0xf] }
 0x7d4   :  { %5790 = vmatpush.bf16.msra.mxu0 %v9228_v18  ;;  %v9264_v56 = vor.u32 %v10321_v7, %v9261_v51  ;;  %v10320_v8 = vld [vmem:[#allocation8 + $0x94] sm:$0xf0]  ;;  %v10303_v58 = vld [vmem:[#allocation8 + $0x14] sm:$0xf]  ;;  %v9189_v35 = vld [vmem:[#allocation8 + $0x18] sm:$0xf0]  ;;  %v9188_v18 = vor.u32 %v10304_v43, %v9187_v3 }
 0x7d5   :  { %5803 = vmatpush.bf16.msra.mxu1 %v9292_v46  ;;  %v10319_v30 = vld [vmem:[#allocation8 + $0x94] sm:$0xf]  ;;  %v9253_v33 = vld [vmem:[#allocation8 + $0x98] sm:$0xf0]  ;;  %v9179_v55 = vld [vmem:[#allocation8] sm:$0xf]  ;;  %v9192_v31 = vor.u32 %v10303_v58, %v9189_v35 }
 0x7d6   :  { %5816 = vmatpush.bf16.msra.mxu2 %v9232_v6  ;;  %v10302_v38 = vld [vmem:[#allocation8 + $0x4] sm:$0xf0]  ;;  %v9243_v46 = vld [vmem:[#allocation8 + $0x80] sm:$0xf]  ;;  %v9252_v6 = vor.u32 %v10320_v8, %v9251_v1  ;;  %v10301_v10 = vld [vmem:[#allocation8 + $0x4] sm:$0xf]  ;;  %v9256_v5 = vor.u32 %v10319_v30, %v9253_v33 }
 0x7d7   :  { %5829 = vmatpush.bf16.msra.mxu3 %v9296_v4  ;;  %v10318_v61 = vld [vmem:[#allocation8 + $0x84] sm:$0xf0]  ;;  %v5336_v4 = vld [vmem:[#allocation4] sm:$0xff]  ;;  %v9181_v57 = vld [vmem:[#allocation8 + $0x8] sm:$0xf0] }
 0x7d8   :  { %5791 = vmatpush.bf16.msra.mxu0 %v9220_v12  ;;  %v10317_v59 = vld [vmem:[#allocation8 + $0x84] sm:$0xf]  ;;  %v9245_v9 = vld [vmem:[#allocation8 + $0x88] sm:$0xf0]  ;;  %v9371_v17 = vld [vmem:[#allocation8 + $0x270] sm:$0xf]  ;;  %v9180_v12 = vor.u32 %v10302_v38, %v9179_v55  ;;  %v5623_v28 = vunpack.c.l.b16 %v5336_v4  ;;  %v9244_v14 = vor.u32 %v10318_v61, %v9243_v46  ;;  %v5624_v45 = vunpack.c.h.b16 %v5336_v4 }
 0x7d9   :  { %5804 = vmatpush.bf16.msra.mxu1 %v9284_v63  ;;  %v10382_v15 = vld [vmem:[#allocation8 + $0x274] sm:$0xf0]  ;;  %v9435_v11 = vld [vmem:[#allocation8 + $0x2f0] sm:$0xf]  ;;  %v9373_v21 = vld [vmem:[#allocation8 + $0x278] sm:$0xf0]  ;;  %v9248_v20 = vor.u32 %v10317_v59, %v9245_v9 }
 0x7da   :  { %5817 = vmatpush.bf16.msra.mxu2 %v9224_v26  ;;  %v10398_v63 = vld [vmem:[#allocation8 + $0x2f4] sm:$0xf0]  ;;  %v10381_v26 = vld [vmem:[#allocation8 + $0x274] sm:$0xf]  ;;  %v9437_v13 = vld [vmem:[#allocation8 + $0x2f8] sm:$0xf0]  ;;  %v9372_v49 = vor.u32 %v10382_v15, %v9371_v17  ;;  %v5626_v32 = vpack.c.b16 %v5624_v45, %v5624_v45 }
 0x7db   :  { %5830 = vmatpush.bf16.msra.mxu3 %v9288_v53  ;;  %v9184_v53 = vor.u32 %v10301_v10, %v9181_v57  ;;  %v10397_v16 = vld [vmem:[#allocation8 + $0x2f4] sm:$0xf]  ;;  %v10380_v47 = vld [vmem:[#allocation8 + $0x264] sm:$0xf0]  ;;  %v9427_v34 = vld [vmem:[#allocation8 + $0x2e0] sm:$0xf] }
 0x7dc   :  { %5792 = vmatpush.bf16.msra.mxu0 %v9212_v42  ;;  %v9436_v42 = vor.u32 %v10398_v63, %v9435_v11  ;;  %v9440_v37 = vor.u32 %v10397_v16, %v9437_v13  ;;  %v10396_v27 = vld [vmem:[#allocation8 + $0x2e4] sm:$0xf0]  ;;  %v10379_v24 = vld [vmem:[#allocation8 + $0x264] sm:$0xf]  ;;  %v9365_v22 = vld [vmem:[#allocation8 + $0x268] sm:$0xf0] }
 0x7dd   :  { %5805 = vmatpush.bf16.msra.mxu1 %v9276_v62  ;;  %v9376_v62 = vor.u32 %v10381_v26, %v9373_v21  ;;  %v10395_v23 = vld [vmem:[#allocation8 + $0x2e4] sm:$0xf]  ;;  %v9368_v36 = vor.u32 %v10379_v24, %v9365_v22  ;;  %v9355_v60 = vld [vmem:[#allocation8 + $0x250] sm:$0xf]  ;;  %v10378_v52 = vld [vmem:[#allocation8 + $0x254] sm:$0xf0] }
 0x7de   :  { %5818 = vmatpush.bf16.msra.mxu2 %v9216_v25  ;;  %v9363_v25 = vld [vmem:[#allocation8 + $0x260] sm:$0xf]  ;;  %v10394_v2 = vld [vmem:[#allocation8 + $0x2d4] sm:$0xf0]  ;;  %v10377_v40 = vld [vmem:[#allocation8 + $0x254] sm:$0xf] }
 0x7df   :  { %5831 = vmatpush.bf16.msra.mxu3 %v9280_v44  ;;  %v5625_v44 = vpack.c.b16 %v5623_v28, %v5623_v28  ;;  %v9357_v7 = vld [vmem:[#allocation8 + $0x258] sm:$0xf0]  ;;  %v10393_v51 = vld [vmem:[#allocation8 + $0x2d4] sm:$0xf]  ;;  %v9347_v43 = vld [vmem:[#allocation8 + $0x240] sm:$0xf] }
 0x7e0   :  { %5793 = vmatpush.bf16.msra.mxu0 %v9204_v29  ;;  %v9429_v29 = vld [vmem:[#allocation8 + $0x2e8] sm:$0xf0]  ;;  %v9360_v3 = vor.u32 %v10377_v40, %v9357_v7  ;;  %v10376_v1 = vld [vmem:[#allocation8 + $0x244] sm:$0xf0]  ;;  %v10375_v35 = vld [vmem:[#allocation8 + $0x244] sm:$0xf] }
 0x7e1   :  { %5806 = vmatpush.bf16.msra.mxu1 %v9268_v54  ;;  %v9364_v54 = vor.u32 %v10380_v47, %v9363_v25  ;;  %v9432_v48 = vor.u32 %v10395_v23, %v9429_v29  ;;  %v10392_v58 = vld [vmem:[#allocation8 + $0x2c4] sm:$0xf0]  ;;  %v9349_v30 = vld [vmem:[#allocation8 + $0x248] sm:$0xf0]  ;;  %v10391_v33 = vld [vmem:[#allocation8 + $0x2c4] sm:$0xf]  ;;  %v9348_v55 = vor.u32 %v10376_v1, %v9347_v43 }
 0x7e2   :  { %5819 = vmatpush.bf16.msra.mxu2 %v9208_v39  ;;  %v9428_v39 = vor.u32 %v10396_v27, %v9427_v34  ;;  %v9352_v46 = vor.u32 %v10375_v35, %v9349_v30  ;;  %v9403_v61 = vld [vmem:[#allocation8 + $0x2b0] sm:$0xf]  ;;  %v10390_v4 = vld [vmem:[#allocation8 + $0x2b4] sm:$0xf0]  ;;  %v9341_v57 = vld [vmem:[#allocation8 + $0x238] sm:$0xf0] }
 0x7e3   :  { %5832 = vmatpush.bf16.msra.mxu3 %v9272_v41  ;;  %v9419_v41 = vld [vmem:[#allocation8 + $0x2d0] sm:$0xf]  ;;  %v10389_v59 = vld [vmem:[#allocation8 + $0x2b4] sm:$0xf]  ;;  %v9405_v9 = vld [vmem:[#allocation8 + $0x2b8] sm:$0xf0]  ;;  %v9404_v15 = vor.u32 %v10390_v4, %v9403_v61 }
 0x7e4   :  { %5794 = vmatpush.bf16.msra.mxu0 %v9196_v50  ;;  %v9421_v50 = vld [vmem:[#allocation8 + $0x2d8] sm:$0xf0]  ;;  %v10372_v63 = vld [vmem:[#allocation8 + $0x224] sm:$0xf0]  ;;  %v9395_v26 = vld [vmem:[#allocation8 + $0x2a0] sm:$0xf]  ;;  %v9408_v21 = vor.u32 %v10389_v59, %v9405_v9 }
 0x7e5   :  { %5807 = vmatpush.bf16.msra.mxu1 %v9260_v0  ;;  %v9356_v0 = vor.u32 %v10378_v52, %v9355_v60  ;;  %v9424_v8 = vor.u32 %v10393_v51, %v9421_v50  ;;  %v10388_v28 = vld [vmem:[#allocation8 + $0x2a4] sm:$0xf0]  ;;  %v10387_v16 = vld [vmem:[#allocation8 + $0x2a4] sm:$0xf]  ;;  %v9397_v13 = vld [vmem:[#allocation8 + $0x2a8] sm:$0xf0] }
 0x7e6   :  { %5820 = vmatpush.bf16.msra.mxu2 %v9200_v19  ;;  %v9420_v19 = vor.u32 %v10394_v2, %v9419_v41  ;;  %v9387_v25 = vld [vmem:[#allocation8 + $0x290] sm:$0xf]  ;;  %v10386_v47 = vld [vmem:[#allocation8 + $0x294] sm:$0xf0]  ;;  %v9400_v34 = vor.u32 %v10387_v16, %v9397_v13  ;;  %v10385_v27 = vld [vmem:[#allocation8 + $0x294] sm:$0xf] }
 0x7e7   :  { %5833 = vmatpush.bf16.msra.mxu3 %v9264_v56  ;;  %v9411_v56 = vld [vmem:[#allocation8 + $0x2c0] sm:$0xf]  ;;  %v9389_v24 = vld [vmem:[#allocation8 + $0x298] sm:$0xf0]  ;;  %v9388_v60 = vor.u32 %v10386_v47, %v9387_v25  ;;  %v10383_v41 = vld [vmem:[#allocation8 + $0x284] sm:$0xf] }
 0x7e8   :  { %5795 = vmatpush.bf16.msra.mxu0 %v9188_v18  ;;  %v9413_v18 = vld [vmem:[#allocation8 + $0x2c8] sm:$0xf0]  ;;  %v9412_v38 = vor.u32 %v10392_v58, %v9411_v56  ;;  %v9315_v22 = vld [vmem:[#allocation8 + $0x200] sm:$0xf]  ;;  %v10366_v2 = vld [vmem:[#allocation4 + $0x4] sm:$0x10]  ;;  %v9392_v40 = vor.u32 %v10385_v27, %v9389_v24 }
 0x7e9   :  { %5808 = vmatpush.bf16.msra.mxu1 %v9252_v6  ;;  %v9339_v6 = vld [vmem:[#allocation8 + $0x230] sm:$0xf]  ;;  %v9416_v10 = vor.u32 %v10391_v33, %v9413_v18  ;;  %v9379_v29 = vld [vmem:[#allocation8 + $0x280] sm:$0xf]  ;;  %v9381_v7 = vld [vmem:[#allocation8 + $0x288] sm:$0xf0] }
 0x7ea   :  { %5821 = vmatpush.bf16.msra.mxu2 %v9192_v31  ;;  %v10374_v31 = vld [vmem:[#allocation8 + $0x234] sm:$0xf0]  ;;  %v10365_v51 = vld [vmem:[#allocation4 + $0x4] sm:$0xe]  ;;  %v9309_v50 = vld [vmem:[#allocation4 + $0x8] sm:$0x10] }
 0x7eb   :  { %5834 = vmatpush.bf16.msra.mxu3 %v9256_v5  ;;  %v10373_v5 = vld [vmem:[#allocation8 + $0x234] sm:$0xf]  ;;  %v9340_v17 = vor.u32 %v10374_v31, %v9339_v6  ;;  %v10432_v1 = vld [vmem:[#allocation8 + $0x3f4] sm:$0xf0]  ;;  %v9573_v18 = vld [vmem:[#allocation8 + $0x3f8] sm:$0xf0] }
 0x7ec   :  { %5796 = vmatpush.bf16.msra.mxu0 %v9180_v12  ;;  %v9344_v11 = vor.u32 %v10373_v5, %v9341_v57  ;;  %v9331_v12 = vld [vmem:[#allocation8 + $0x220] sm:$0xf]  ;;  %v10415_v56 = vld [vmem:[#allocation8 + $0x374] sm:$0xf]  ;;  %v10430_v5 = vld [vmem:[#allocation8 + $0x3e4] sm:$0xf0] }
 0x7ed   :  { %5809 = vmatpush.bf16.msra.mxu1 %v9244_v14  ;;  %v10371_v14 = vld [vmem:[#allocation8 + $0x224] sm:$0xf]  ;;  %v9332_v45 = vor.u32 %v10372_v63, %v9331_v12  ;;  %v10431_v33 = vld [vmem:[#allocation8 + $0x3f4] sm:$0xf]  ;;  %v9499_v6 = vld [vmem:[#allocation8 + $0x360] sm:$0xf] }
 0x7ee   :  { %5822 = vmatpush.bf16.msra.mxu2 %v9184_v53  ;;  %v9333_v53 = vld [vmem:[#allocation8 + $0x228] sm:$0xf0]  ;;  %v9563_v4 = vld [vmem:[#allocation8 + $0x3e0] sm:$0xf]  ;;  %v9576_v57 = vor.u32 %v10431_v33, %v9573_v18  ;;  %v10413_v9 = vld [vmem:[#allocation8 + $0x364] sm:$0xf] }
 0x7ef   :  { %5835 = vmatpush.bf16.msra.mxu3 %v9248_v20  ;;  %5797 = vmatmul.bf16.vlgmr.msra.gmra.mxu0 %v5625_v44  ;;  %v9323_v20 = vld [vmem:[#allocation8 + $0x210] sm:$0xf]  ;;  %v9565_v12 = vld [vmem:[#allocation8 + $0x3e8] sm:$0xf0]  ;;  %v10428_v13 = vld [vmem:[#allocation8 + $0x3d4] sm:$0xf0] }
 0x7f0   :  { %6048 = vmatpush.bf16.msrb.mxu0 %v9372_v49  ;;  %5810 = vmatmul.bf16.vlgmr.msra.gmra.mxu1 %v5626_v32  ;;  %v9396_v49 = vor.u32 %v10388_v28, %v9395_v26  ;;  %v9564_v26 = vor.u32 %v10430_v5, %v9563_v4  ;;  %v9491_v28 = vld [vmem:[#allocation8 + $0x350] sm:$0xf]  ;;  %v10426_v24 = vld [vmem:[#allocation8 + $0x3c4] sm:$0xf0]  ;;  %v10421_v33 = vld [vmem:[#allocation8 + $0x3a4] sm:$0xf] }
 0x7f1   :  { %6061 = vmatpush.bf16.msrb.mxu1 %v9436_v42  ;;  %5823 = vmatmul.bf16.vlgmr.msra.gmra.mxu2 %v5625_v44  ;;  %v9336_v42 = vor.u32 %v10371_v14, %v9333_v53  ;;  %v9325_v44 = vld [vmem:[#allocation8 + $0x218] sm:$0xf0]  ;;  %v10412_v14 = vld [vmem:[#allocation8 + $0x354] sm:$0xf0]  ;;  %v9555_v53 = vld [vmem:[#allocation8 + $0x3d0] sm:$0xf] }
 0x7f2   :  { %6074 = vmatpush.bf16.msrb.mxu2 %v9376_v62  ;;  %5836 = vmatmul.bf16.vlgmr.msra.gmra.mxu3 %v5626_v32  ;;  %v10370_v62 = vld [vmem:[#allocation8 + $0x214] sm:$0xf0]  ;;  %v10368_v32 = vld [vmem:[#allocation8 + $0x204] sm:$0xf0]  ;;  %v9556_v25 = vor.u32 %v10428_v13, %v9555_v53  ;;  %v9533_v18 = vld [vmem:[#allocation8 + $0x3a8] sm:$0xf0] }
 0x7f3   :  { %6087 = vmatpush.bf16.msrb.mxu3 %v9440_v37  ;;  %v10369_v37 = vld [vmem:[#allocation8 + $0x214] sm:$0xf]  ;;  %v9324_v23 = vor.u32 %v10370_v62, %v9323_v20  ;;  %v9316_v43 = vor.u32 %v10368_v32, %v9315_v22  ;;  %v9493_v20 = vld [vmem:[#allocation8 + $0x358] sm:$0xf0]  ;;  %v9492_v62 = vor.u32 %v10412_v14, %v9491_v28  ;;  %v10409_v22 = vld [vmem:[#allocation8 + $0x344] sm:$0xf] }
 0x7f4   :  { %6049 = vmatpush.bf16.msrb.mxu0 %v9364_v54  ;;  %v10384_v54 = vld [vmem:[#allocation8 + $0x284] sm:$0xf0]  ;;  %v9328_v52 = vor.u32 %v10369_v37, %v9325_v44  ;;  %v9547_v44 = vld [vmem:[#allocation8 + $0x3c0] sm:$0xf]  ;;  %v9485_v32 = vld [vmem:[#allocation8 + $0x348] sm:$0xf0] }
 0x7f5   :  { %6062 = vmatpush.bf16.msrb.mxu1 %v9428_v39  ;;  %v10367_v39 = vld [vmem:[#allocation8 + $0x204] sm:$0xf]  ;;  %v9380_v35 = vor.u32 %v10384_v54, %v9379_v29  ;;  %v10410_v37 = vld [vmem:[#allocation8 + $0x344] sm:$0xf0]  ;;  %v9549_v29 = vld [vmem:[#allocation8 + $0x3c8] sm:$0xf0] }
 0x7f6   :  { %6075 = vmatpush.bf16.msrb.mxu2 %v9368_v36  ;;  %v9317_v36 = vld [vmem:[#allocation8 + $0x208] sm:$0xf0]  ;;  %v10420_v4 = vld [vmem:[#allocation8 + $0x394] sm:$0xf0]  ;;  %v10403_v5 = vld [vmem:[#allocation8 + $0x314] sm:$0xf] }
 0x7f7   :  { %6088 = vmatpush.bf16.msrb.mxu3 %v9432_v48  ;;  %v9307_v48 = vld [vmem:[#allocation4] sm:$0xe]  ;;  %v9320_v30 = vor.u32 %v10367_v39, %v9317_v36  ;;  %v9548_v39 = vor.u32 %v10426_v24, %v9547_v44  ;;  %v9488_v36 = vor.u32 %v10409_v22, %v9485_v32  ;;  %v9515_v28 = vld [vmem:[#allocation8 + $0x380] sm:$0xf]  ;;  %v10399_v14 = vld [vmem:[#allocation4 + $0x14] sm:$0xe] }
 0x7f8   :  { %6050 = vmatpush.bf16.msrb.mxu0 %v9356_v0  ;;  %v9507_v0 = vld [vmem:[#allocation8 + $0x370] sm:$0xf]  ;;  %v9308_v58 = vor.u32 %v10366_v2, %v9307_v48  ;;  %v10424_v2 = vld [vmem:[#allocation8 + $0x3b4] sm:$0xf0]  ;;  %v9445_v53 = vld [vmem:[#allocation4 + $0x18] sm:$0x10] }
 0x7f9   :  { %6063 = vmatpush.bf16.msrb.mxu1 %v9420_v19  ;;  %v10416_v19 = vld [vmem:[#allocation8 + $0x374] sm:$0xf0]  ;;  %v10418_v13 = vld [vmem:[#allocation8 + $0x384] sm:$0xf0] }
 0x7fa   :  { %6076 = vmatpush.bf16.msrb.mxu2 %v9360_v3  ;;  %v9571_v3 = vld [vmem:[#allocation8 + $0x3f0] sm:$0xf]  ;;  %v5884_v59 = vrot.slane %v9308_v58, 1  ;;  %v10422_v58 = vld [vmem:[#allocation8 + $0x3a4] sm:$0xf0] }
 0x7fb   :  { %6089 = vmatpush.bf16.msrb.mxu3 %v9424_v8  ;;  %v9509_v8 = vld [vmem:[#allocation8 + $0x378] sm:$0xf0]  ;;  %v9572_v31 = vor.u32 %v10432_v1, %v9571_v3  ;;  %v10406_v1 = vld [vmem:[#allocation8 + $0x324] sm:$0xf0] }
 0x7fc   :  { %6051 = vmatpush.bf16.msrb.mxu0 %v9348_v55  ;;  %v9312_v55 = vor.u32 %v10365_v51, %v9309_v50  ;;  %v9512_v61 = vor.u32 %v10415_v56, %v9509_v8  ;;  %v10423_v51 = vld [vmem:[#allocation8 + $0x3b4] sm:$0xf]  ;;  %v9541_v50 = vld [vmem:[#allocation8 + $0x3b8] sm:$0xf0]  ;;  %v9531_v56 = vld [vmem:[#allocation8 + $0x3a0] sm:$0xf] }
 0x7fd   :  { %6064 = vmatpush.bf16.msrb.mxu1 %v9412_v38  ;;  %v9384_v38 = vor.u32 %v10383_v41, %v9381_v7  ;;  %v9539_v41 = vld [vmem:[#allocation8 + $0x3b0] sm:$0xf]  ;;  %v9477_v7 = vld [vmem:[#allocation8 + $0x338] sm:$0xf0]  ;;  %v9544_v8 = vor.u32 %v10423_v51, %v9541_v50 }
 0x7fe   :  { %6077 = vmatpush.bf16.msrb.mxu2 %v9352_v46  ;;  %v9508_v46 = vor.u32 %v10416_v19, %v9507_v0  ;;  %v9540_v19 = vor.u32 %v10424_v2, %v9539_v41 }
 0x7ff   :  { %6090 = vmatpush.bf16.msrb.mxu3 %v9416_v10  ;;  %v10414_v10 = vld [vmem:[#allocation8 + $0x364] sm:$0xf0] }
 0x800   :  { %6052 = vmatpush.bf16.msrb.mxu0 %v9340_v17  ;;  %v9501_v17 = vld [vmem:[#allocation8 + $0x368] sm:$0xf0]  ;;  %v9500_v63 = vor.u32 %v10414_v10, %v9499_v6  ;;  %v9459_v6 = vld [vmem:[#allocation8 + $0x310] sm:$0xf]  ;;  %v9536_v10 = vor.u32 %v10421_v33, %v9533_v18 }
 0x801   :  { %6065 = vmatpush.bf16.msrb.mxu1 %v9404_v15  ;;  %v5885_v15 = vrot.slane %v9312_v55, 1 }
 0x802   :  { %6078 = vmatpush.bf16.msrb.mxu2 %v9344_v11  ;;  %v10429_v11 = vld [vmem:[#allocation8 + $0x3e4] sm:$0xf] }
 0x803   :  { %6091 = vmatpush.bf16.msrb.mxu3 %v9408_v21  ;;  %v9504_v21 = vor.u32 %v10413_v9, %v9501_v17  ;;  %v9568_v16 = vor.u32 %v10429_v11, %v9565_v12  ;;  %v9525_v9 = vld [vmem:[#allocation8 + $0x398] sm:$0xf0]  ;;  %v9451_v17 = vld [vmem:[#allocation8 + $0x300] sm:$0xf]  ;;  %v10402_v11 = vld [vmem:[#allocation8 + $0x304] sm:$0xf0] }
 0x804   :  { %6053 = vmatpush.bf16.msrb.mxu0 %v9332_v45  ;;  %v10411_v45 = vld [vmem:[#allocation8 + $0x354] sm:$0xf]  ;;  %v9443_v12 = vld [vmem:[#allocation4 + $0x10] sm:$0xe] }
 0x805   :  { %6066 = vmatpush.bf16.msrb.mxu1 %v9396_v49  ;;  %v10427_v49 = vld [vmem:[#allocation8 + $0x3d4] sm:$0xf]  ;;  %v9496_v47 = vor.u32 %v10411_v45, %v9493_v20  ;;  %v10401_v45 = vld [vmem:[#allocation8 + $0x304] sm:$0xf]  ;;  %v9453_v20 = vld [vmem:[#allocation8 + $0x308] sm:$0xf0] }
 0x806   :  { %6079 = vmatpush.bf16.msrb.mxu2 %v9336_v42  ;;  %v9557_v42 = vld [vmem:[#allocation8 + $0x3d8] sm:$0xf0] }
 0x807   :  { %6092 = vmatpush.bf16.msrb.mxu3 %v9400_v34  ;;  %v9483_v34 = vld [vmem:[#allocation8 + $0x340] sm:$0xf]  ;;  %v9560_v27 = vor.u32 %v10427_v49, %v9557_v42  ;;  %v10417_v49 = vld [vmem:[#allocation8 + $0x384] sm:$0xf]  ;;  %v9517_v42 = vld [vmem:[#allocation8 + $0x388] sm:$0xf0] }
 0x808   :  { %6054 = vmatpush.bf16.msrb.mxu0 %v9324_v23  ;;  %v10425_v23 = vld [vmem:[#allocation8 + $0x3c4] sm:$0xf]  ;;  %v9484_v54 = vor.u32 %v10410_v37, %v9483_v34  ;;  %v9516_v34 = vor.u32 %v10418_v13, %v9515_v28  ;;  %v9456_v37 = vor.u32 %v10401_v45, %v9453_v20  ;;  %v9520_v44 = vor.u32 %v10417_v49, %v9517_v42 }
 0x809   :  { %6067 = vmatpush.bf16.msrb.mxu1 %v9388_v60  ;;  %v9475_v60 = vld [vmem:[#allocation8 + $0x330] sm:$0xf]  ;;  %v9552_v48 = vor.u32 %v10425_v23, %v9549_v29 }
 0x80a   :  { %6080 = vmatpush.bf16.msrb.mxu2 %v9328_v52  ;;  %v10408_v52 = vld [vmem:[#allocation8 + $0x334] sm:$0xf0] }
 0x80b   :  { %6093 = vmatpush.bf16.msrb.mxu3 %v9392_v40  ;;  %v10407_v40 = vld [vmem:[#allocation8 + $0x334] sm:$0xf]  ;;  %v9476_v0 = vor.u32 %v10408_v52, %v9475_v60 }
 0x80c   :  { %6055 = vmatpush.bf16.msrb.mxu0 %v9316_v43  ;;  %v9480_v3 = vor.u32 %v10407_v40, %v9477_v7  ;;  %v9467_v43 = vld [vmem:[#allocation8 + $0x320] sm:$0xf] }
 0x80d   :  { %6068 = vmatpush.bf16.msrb.mxu1 %v9380_v35  ;;  %v10405_v35 = vld [vmem:[#allocation8 + $0x324] sm:$0xf]  ;;  %v9468_v55 = vor.u32 %v10406_v1, %v9467_v43 }
 0x80e   :  { %6081 = vmatpush.bf16.msrb.mxu2 %v9320_v30  ;;  %v9469_v30 = vld [vmem:[#allocation8 + $0x328] sm:$0xf0] }
 0x80f   :  { %6094 = vmatpush.bf16.msrb.mxu3 %v9384_v38  ;;  %6056 = vmatmul.bf16.vlgmr.msrb.gmra.mxu0 %v5884_v59  ;;  %v9532_v38 = vor.u32 %v10422_v58, %v9531_v56 }
 0x810   :  { %6309 = vmatpush.bf16.msra.mxu0 %v9508_v46  ;;  %6069 = vmatmul.bf16.vlgmr.msrb.gmra.mxu1 %v5885_v15  ;;  %v9472_v46 = vor.u32 %v10405_v35, %v9469_v30 }
 0x811   :  { %6322 = vmatpush.bf16.msra.mxu1 %v9572_v31  ;;  %6082 = vmatmul.bf16.vlgmr.msrb.gmra.mxu2 %v5884_v59  ;;  %v10404_v31 = vld [vmem:[#allocation8 + $0x314] sm:$0xf0]  ;;  %v10419_v59 = vld [vmem:[#allocation8 + $0x394] sm:$0xf] }
 0x812   :  { %6335 = vmatpush.bf16.msra.mxu2 %v9512_v61  ;;  %6095 = vmatmul.bf16.vlgmr.msrb.gmra.mxu3 %v5885_v15  ;;  %v9523_v61 = vld [vmem:[#allocation8 + $0x390] sm:$0xf]  ;;  %v9460_v15 = vor.u32 %v10404_v31, %v9459_v6 }
 0x813   :  { %6348 = vmatpush.bf16.msra.mxu3 %v9576_v57  ;;  %v9461_v57 = vld [vmem:[#allocation8 + $0x318] sm:$0xf0]  ;;  %v6363_v31 = vld [vmem:[%s13271_s11] sm:$0x3] }
 0x814   :  { %6310 = vmatpush.bf16.msra.mxu0 %v9500_v63  ;;  %v10400_v63 = vld [vmem:[#allocation4 + $0x14] sm:$0x10] }
 0x815   :  { %6323 = vmatpush.bf16.msra.mxu1 %v9564_v26  ;;  %v9524_v26 = vor.u32 %v10420_v4, %v9523_v61 }
 0x816   :  { %6336 = vmatpush.bf16.msra.mxu2 %v9504_v21  ;;  %v9464_v21 = vor.u32 %v10403_v5, %v9461_v57  ;;  %v6365_v57 = vperm.slane %v6363_v31, 0 }
 0x817   :  { %6349 = vmatpush.bf16.msra.mxu3 %v9568_v16  ;;  %v9528_v16 = vor.u32 %v10419_v59, %v9525_v9 }
 0x818   :  { %6311 = vmatpush.bf16.msra.mxu0 %v9492_v62  ;;  %v9444_v62 = vor.u32 %v10400_v63, %v9443_v12 }
 0x819   :  { %6324 = vmatpush.bf16.msra.mxu1 %v9556_v25  ;;  %v9452_v25 = vor.u32 %v10402_v11, %v9451_v17 }
 0x81a   :  { %6337 = vmatpush.bf16.msra.mxu2 %v9496_v47  ;;  %v9448_v47 = vor.u32 %v10399_v14, %v9445_v53 }
 0x81b   :  { %6350 = vmatpush.bf16.msra.mxu3 %v9560_v27  ;;  %v6145_v27 = vrot.slane %v9444_v62, 1 }
 0x81c   :  { %6312 = vmatpush.bf16.msra.mxu0 %v9484_v54  ;;  %v6146_v24 = vrot.slane %v9448_v47, 1 }
 0x81d   :  { %6325 = vmatpush.bf16.msra.mxu1 %v9548_v39 }
 0x81e   :  { %6338 = vmatpush.bf16.msra.mxu2 %v9488_v36 }
 0x81f   :  { %6351 = vmatpush.bf16.msra.mxu3 %v9552_v48 }
 0x820   :  { %6313 = vmatpush.bf16.msra.mxu0 %v9476_v0 }
 0x821   :  { %6326 = vmatpush.bf16.msra.mxu1 %v9540_v19 }
 0x822   :  { %6339 = vmatpush.bf16.msra.mxu2 %v9480_v3 }
 0x823   :  { %6352 = vmatpush.bf16.msra.mxu3 %v9544_v8 }
 0x824   :  { %6314 = vmatpush.bf16.msra.mxu0 %v9468_v55 }
 0x825   :  { %6327 = vmatpush.bf16.msra.mxu1 %v9532_v38 }
 0x826   :  { %6340 = vmatpush.bf16.msra.mxu2 %v9472_v46 }
 0x827   :  { %6353 = vmatpush.bf16.msra.mxu3 %v9536_v10 }
 0x828   :  { %6315 = vmatpush.bf16.msra.mxu0 %v9460_v15 }
 0x829   :  { %6328 = vmatpush.bf16.msra.mxu1 %v9524_v26  ;;  %v6366_v26 = vperm.slane %v6363_v31, 1 }
 0x82a   :  { %6341 = vmatpush.bf16.msra.mxu2 %v9464_v21 }
 0x82b   :  { %6354 = vmatpush.bf16.msra.mxu3 %v9528_v16 }
 0x82c   :  { %6316 = vmatpush.bf16.msra.mxu0 %v9452_v25 }
 0x82d   :  { %6329 = vmatpush.bf16.msra.mxu1 %v9516_v34 }
 0x82e   :  { %6342 = vmatpush.bf16.msra.mxu2 %v9456_v37 }
 0x82f   :  { %6355 = vmatpush.bf16.msra.mxu3 %v9520_v44  ;;  %6317 = vmatmul.bf16.vlgmr.msra.gmra.mxu0 %v6145_v27 }
 0x830   :  { %6330 = vmatmul.bf16.vlgmr.msra.gmra.mxu1 %v6146_v24 }
 0x831   :  { %6343 = vmatmul.bf16.vlgmr.msra.gmra.mxu2 %v6145_v27 }
 0x832   :  { %6356 = vmatmul.bf16.vlgmr.msra.gmra.mxu3 %v6146_v24 }
 0x84c   :  { %v5579_v22 = vpop.f32.mrf.mxu0 }
 0x84d   :  { %v5592_v32 = vpop.f32.mrf.mxu1 }
 0x84e   :  { %v5593_v23 = vadd.f32 %v5592_v32, %v5579_v22 }
 0x854   :  { %v5605_v29 = vpop.f32.mrf.mxu2  ;;  %v5581_v36 = vpop.f32.mrf.mxu0 }
 0x855   :  { %v5618_v54 = vpop.f32.mrf.mxu3  ;;  %v5594_v60 = vpop.f32.mrf.mxu1 }
 0x856   :  { %v5619_v39 = vadd.f32 %v5618_v54, %v5605_v29 }
 0x85c   :  { %v5607_v52 = vpop.f32.mrf.mxu2 }
 0x85d   :  { %v5620_v41 = vpop.f32.mrf.mxu3 }
 0x86c   :  { %v5798_v48 = vpop.f32.mrf.mxu0 }
 0x86d   :  { %v5811_v2 = vpop.f32.mrf.mxu1  ;;  %v5799_v33 = vadd.f32 %v5798_v48, %v5593_v23 }
 0x86f   :  { %v5812_v38 = vadd.f32 %v5811_v2, %v5799_v33 }
 0x874   :  { %v5824_v40 = vpop.f32.mrf.mxu2  ;;  %v5800_v51 = vpop.f32.mrf.mxu0 }
 0x875   :  { %v5837_v7 = vpop.f32.mrf.mxu3  ;;  %v5813_v50 = vpop.f32.mrf.mxu1  ;;  %v5825_v61 = vadd.f32 %v5824_v40, %v5619_v39 }
 0x877   :  { %v5838_v59 = vadd.f32 %v5837_v7, %v5825_v61 }
 0x87c   :  { %v5826_v0 = vpop.f32.mrf.mxu2 }
 0x87d   :  { %v5839_v19 = vpop.f32.mrf.mxu3 }
 0x88c   :  { %v6057_v3 = vpop.f32.mrf.mxu0 }
 0x88d   :  { %v6070_v43 = vpop.f32.mrf.mxu1 }
 0x88e   :  { %v6071_v18 = vadd.f32 %v6070_v43, %v6057_v3 }
 0x890   :  { %v6100_v10 = vadd.f32 %v6071_v18, %v5812_v38 }
 0x894   :  { %v6083_v1 = vpop.f32.mrf.mxu2  ;;  %v6059_v8 = vpop.f32.mrf.mxu0 }
 0x895   :  { %v6096_v56 = vpop.f32.mrf.mxu3  ;;  %v6072_v58 = vpop.f32.mrf.mxu1 }
 0x896   :  { %v6097_v4 = vadd.f32 %v6096_v56, %v6083_v1 }
 0x898   :  { %v6101_v11 = vadd.f32 %v6097_v4, %v5838_v59 }
 0x89c   :  { %v6085_v35 = vpop.f32.mrf.mxu2 }
 0x89d   :  { %v6098_v30 = vpop.f32.mrf.mxu3 }
 0x8ac   :  { %v6318_v55 = vpop.f32.mrf.mxu0 }
 0x8ad   :  { %v6331_v46 = vpop.f32.mrf.mxu1 }
 0x8ae   :  { %v6332_v6 = vadd.f32 %v6331_v46, %v6318_v55 }
 0x8b0   :  { %v6361_v5 = vadd.f32 %v6332_v6, %v6100_v10 }
 0x8b2   :  { %v6369_v12 = vadd.f32 %v6365_v57, %v6361_v5 }
 0x8b4   :  { %v6344_v9 = vpop.f32.mrf.mxu2  ;;  %v6320_v15 = vpop.f32.mrf.mxu0  ;;  %v6373_v14 = vmul.f32 0.2, %v6369_v12  ;;  %vm6371_vm1 = vcmp.ge.f32.partialorder %v6369_v12, 0.0 }
 0x8b5   :  { %v6357_v17 = vpop.f32.mrf.mxu3  ;;  %v6333_v21 = vpop.f32.mrf.mxu1 }
 0x8b6   :  { %v6358_v63 = vadd.f32 %v6357_v17, %v6344_v9  ;;  %v6375_v20 = vsel %vm6371_vm1, %v6369_v12, %v6373_v14 }
 0x8b8   :  { %v6362_v28 = vadd.f32 %v6358_v63, %v6101_v11 }
 0x8ba   :  { %v6370_v53 = vadd.f32 %v6366_v26, %v6362_v28 }
 0x8bc   :  { %vm6372_vm2 = vcmp.ge.f32.partialorder %v6370_v53, 0.0  ;;  %v6374_v16 = vmul.f32 0.2, %v6370_v53  ;;  %v6346_v13 = vpop.f32.mrf.mxu2 }
 0x8bd   :  { %v6359_v45 = vpop.f32.mrf.mxu3 }
 0x8be   :  { %v6376_v49 = vsel %vm6372_vm2, %v6370_v53, %v6374_v16 }
 0x8bf   :  { %v6377_v42 = vpack.c.bf16 %v6376_v49, %v6375_v20 }
 0x8c1   :  { %v6379_v62 = vrot.slane %v6377_v42, 7 }
 0x8c3   :  { %v6380_v25 = vrot.slane %v6379_v62, 4  ;;  %6383 = vst [vmem:[#allocation5] sm:$0xee] %v6379_v62 }
 0x8c5   :  { %6384 = vst [vmem:[#allocation5 + $0x8] sm:$0x11] %v6380_v25 }
 0x8c6   :  { %10509 = dma.done.wait [#allocation10 + $0x3], 8192 }
 0x8c7   :  { %10510 = vsyncadd [#allocation10 + $0x3], 4294959104  ;;  %v10456_v47 = vld [vmem:[#allocation9 + $0x28] sm:$0xff]  ;;  %v10448_v44 = vld [vmem:[#allocation9 + $0x60] sm:$0xff] }
 0x8c8   :  { %v10464_v34 = vld [vmem:[#allocation9 + $0x8] sm:$0xff]  ;;  %6562 = vmatpush.bf16.msrb.mxu0 %v10456_v47  ;;  %v10455_v27 = vld [vmem:[#allocation9 + $0x1b8] sm:$0xff]  ;;  %v10463_v24 = vld [vmem:[#allocation9 + $0xf0] sm:$0xff]  ;;  %6704 = vmatpush.bf16.msrb.mxu3 %v10448_v44 }
 0x8c9   :  { %v10440_v37 = vld [vmem:[#allocation9 + $0x48] sm:$0xff]  ;;  %6575 = vmatpush.bf16.msrb.mxu1 %v10464_v34  ;;  %v10439_v22 = vld [vmem:[#allocation9 + $0x130] sm:$0xff]  ;;  %v10462_v29 = vld [vmem:[#allocation9] sm:$0xff] }
 0x8ca   :  { %6691 = vmatpush.bf16.msrb.mxu2 %v10440_v37  ;;  %v10447_v32 = vld [vmem:[#allocation9 + $0x108] sm:$0xff]  ;;  %v10446_v39 = vld [vmem:[#allocation9 + $0x150] sm:$0xff]  ;;  %v10453_v36 = vld [vmem:[#allocation9 + $0x80] sm:$0xff] }
 0x8cb   :  { %v10454_v23 = vld [vmem:[#allocation9 + $0x1a8] sm:$0xff]  ;;  %v10461_v60 = vld [vmem:[#allocation9 + $0x1e0] sm:$0xff]  ;;  %v10437_v52 = vld [vmem:[#allocation9 + $0x50] sm:$0xff] }
 0x8cc   :  { %6563 = vmatpush.bf16.msrb.mxu0 %v10455_v27  ;;  %6705 = vmatpush.bf16.msrb.mxu3 %v10447_v32  ;;  %v10438_v54 = vld [vmem:[#allocation9 + $0x168] sm:$0xff]  ;;  %v10445_v41 = vld [vmem:[#allocation9 + $0x120] sm:$0xff]  ;;  %v10460_v2 = vld [vmem:[#allocation9 + $0x30] sm:$0xff] }
 0x8cd   :  { %6576 = vmatpush.bf16.msrb.mxu1 %v10463_v24  ;;  %v10452_v48 = vld [vmem:[#allocation9 + $0x140] sm:$0xff]  ;;  %v10436_v40 = vld [vmem:[#allocation9 + $0x18] sm:$0xff]  ;;  %v6423_v3 = vld [vmem:[#allocation5] sm:$0xee] }
 0x8ce   :  { %6692 = vmatpush.bf16.msrb.mxu2 %v10439_v22  ;;  %v10444_v7 = vld [vmem:[#allocation9 + $0x98] sm:$0xff]  ;;  %v10459_v50 = vld [vmem:[#allocation9 + $0x160] sm:$0xff]  ;;  %v10450_v43 = vld [vmem:[#allocation9 + $0x188] sm:$0xff]  ;;  %v6458_v35 = vunpack.c.l.b16 %v6423_v3  ;;  %v6459_v30 = vunpack.c.h.b16 %v6423_v3 }
 0x8cf   :  { %v10451_v51 = vld [vmem:[#allocation9 + $0x138] sm:$0xff]  ;;  %v10434_v56 = vld [vmem:[#allocation9 + $0x1b0] sm:$0xff]  ;;  %v10449_v33 = vld [vmem:[#allocation9 + $0xe0] sm:$0xff] }
 0x8d0   :  { %6564 = vmatpush.bf16.msrb.mxu0 %v10454_v23  ;;  %6706 = vmatpush.bf16.msrb.mxu3 %v10446_v39  ;;  %v10435_v0 = vld [vmem:[#allocation9 + $0xd8] sm:$0xff]  ;;  %v10442_v8 = vld [vmem:[#allocation9 + $0x110] sm:$0xff]  ;;  %v10457_v18 = vld [vmem:[#allocation9 + $0x1e8] sm:$0xff]  ;;  %v6460_v31 = vpack.c.b16 %v6458_v35, %v6458_v35  ;;  %v6461_v61 = vpack.c.b16 %v6459_v30, %v6459_v30 }
 0x8d1   :  { %6577 = vmatpush.bf16.msrb.mxu1 %v10462_v29  ;;  %v10443_v19 = vld [vmem:[#allocation9 + $0x118] sm:$0xff]  ;;  %v6390_v58 = vld [vmem:[#allocation5] sm:$0x77]  ;;  %v10441_v6 = vld [vmem:[#allocation9 + $0x180] sm:$0xff] }
 0x8d2   :  { %6693 = vmatpush.bf16.msrb.mxu2 %v10438_v54  ;;  %v10458_v1 = vld [vmem:[#allocation9 + $0xf8] sm:$0xff]  ;;  %v6589_v55 = vunpack.c.l.b16 %v6390_v58  ;;  %v6590_v38 = vunpack.c.h.b16 %v6390_v58  ;;  %v10433_v46 = vld [vmem:[#allocation9 + $0xb0] sm:$0xff]  ;;  %v10474_v10 = vld [vmem:[#allocation9 + $0x128] sm:$0xff]  ;;  %v6462_v17 = vrot.slane %v6460_v31, 1  ;;  %v6463_v15 = vrot.slane %v6461_v61, 1 }
 0x8d3   :  { %v10482_v4 = vld [vmem:[#allocation9 + $0xd0] sm:$0xff]  ;;  %v10500_v57 = vld [vmem:[#allocation9 + $0xa0] sm:$0xff]  ;;  %v10481_v12 = vld [vmem:[#allocation9 + $0x1d8] sm:$0xff] }
 0x8d4   :  { %6565 = vmatpush.bf16.msrb.mxu0 %v10453_v36  ;;  %6707 = vmatpush.bf16.msrb.mxu3 %v10445_v41  ;;  %v10492_v5 = vld [vmem:[#allocation9 + $0x190] sm:$0xff]  ;;  %v6591_v59 = vpack.c.b16 %v6589_v55, %v6589_v55  ;;  %v6592_v9 = vpack.c.b16 %v6590_v38, %v6590_v38  ;;  %v10473_v11 = vld [vmem:[#allocation9 + $0x20] sm:$0xff]  ;;  %v10491_v63 = vld [vmem:[#allocation9 + $0x68] sm:$0xff] }
 0x8d5   :  { %6578 = vmatpush.bf16.msrb.mxu1 %v10461_v60  ;;  %v10499_v26 = vld [vmem:[#allocation9 + $0x58] sm:$0xff]  ;;  %v10480_v28 = vld [vmem:[#allocation9 + $0x90] sm:$0xff]  ;;  %v10471_v16 = vld [vmem:[#allocation9 + $0x40] sm:$0xff] }
 0x8d6   :  { %6694 = vmatpush.bf16.msrb.mxu2 %v10437_v52  ;;  %v10472_v21 = vld [vmem:[#allocation9 + $0x1f8] sm:$0xff]  ;;  %v10498_v53 = vld [vmem:[#allocation9 + $0x10] sm:$0xff]  ;;  %v10470_v49 = vld [vmem:[#allocation9 + $0xc8] sm:$0xff] }
 0x8d7   :  { %v10490_v14 = vld [vmem:[#allocation9 + $0x178] sm:$0xff]  ;;  %v10479_v13 = vld [vmem:[#allocation9 + $0x70] sm:$0xff]  ;;  %v10488_v62 = vld [vmem:[#allocation9 + $0x1c8] sm:$0xff] }
 0x8d8   :  { %6566 = vmatpush.bf16.msrb.mxu0 %v10452_v48  ;;  %6708 = vmatpush.bf16.msrb.mxu3 %v10444_v7  ;;  %v10489_v45 = vld [vmem:[#allocation9 + $0x170] sm:$0xff]  ;;  %v10497_v20 = vld [vmem:[#allocation9 + $0x158] sm:$0xff]  ;;  %v10496_v25 = vld [vmem:[#allocation9 + $0x1c0] sm:$0xff] }
 0x8d9   :  { %6579 = vmatpush.bf16.msrb.mxu1 %v10460_v2  ;;  %v10478_v42 = vld [vmem:[#allocation9 + $0x78] sm:$0xff]  ;;  %v10469_v47 = vld [vmem:[#allocation9 + $0x100] sm:$0xff]  ;;  %v10477_v34 = vld [vmem:[#allocation9 + $0xe8] sm:$0xff] }
 0x8da   :  { %6695 = vmatpush.bf16.msrb.mxu2 %v10436_v40  ;;  %v10487_v37 = vld [vmem:[#allocation9 + $0xa8] sm:$0xff]  ;;  %v10495_v44 = vld [vmem:[#allocation9 + $0xc0] sm:$0xff]  ;;  %v10468_v27 = vld [vmem:[#allocation9 + $0x1d0] sm:$0xff] }
 0x8db   :  { %v10476_v24 = vld [vmem:[#allocation9 + $0x1f0] sm:$0xff]  ;;  %v10486_v22 = vld [vmem:[#allocation9 + $0x88] sm:$0xff]  ;;  %v10494_v32 = vld [vmem:[#allocation9 + $0x38] sm:$0xff] }
 0x8dc   :  { %6567 = vmatpush.bf16.msrb.mxu0 %v10451_v51  ;;  %6709 = vmatpush.bf16.msrb.mxu3 %v10443_v19  ;;  %v9707_v23 = vld [vmem:[#allocation5] sm:$0xc]  ;;  %v10466_v29 = vld [vmem:[#allocation5 + $0x4] sm:$0x10]  ;;  %v10465_v54 = vld [vmem:[#allocation5 + $0x4] sm:$0xc] }
 0x8dd   :  { %6580 = vmatpush.bf16.msrb.mxu1 %v10459_v50  ;;  %v9709_v39 = vld [vmem:[#allocation5 + $0x8] sm:$0x10]  ;;  %v9779_v36 = vld [vmem:[#allocation5] sm:$0x8]  ;;  %v10484_v60 = vld [vmem:[#allocation5 + $0x4] sm:$0x30]  ;;  %v9708_v48 = vor.u32 %v10466_v29, %v9707_v23 }
 0x8de   :  { %6696 = vmatpush.bf16.msrb.mxu2 %v10435_v0  ;;  %v10483_v52 = vld [vmem:[#allocation5 + $0x4] sm:$0x8]  ;;  %v9781_v41 = vld [vmem:[#allocation5 + $0x8] sm:$0x30]  ;;  %v9712_v2 = vor.u32 %v10465_v54, %v9709_v39  ;;  %v10467_v40 = vld [vmem:[#allocation9 + $0x148] sm:$0xff]  ;;  %v9780_v51 = vor.u32 %v10484_v60, %v9779_v36 }
 0x8df   :  { %v10475_v7 = vld [vmem:[#allocation9 + $0x1a0] sm:$0xff]  ;;  %v9784_v50 = vor.u32 %v10483_v52, %v9781_v41  ;;  %v10485_v0 = vld [vmem:[#allocation9 + $0xb8] sm:$0xff]  ;;  %v6760_v3 = vrot.slane %v9708_v48, 2 }
 0x8e0   :  { %6568 = vmatpush.bf16.msrb.mxu0 %v10450_v43  ;;  %6710 = vmatpush.bf16.msrb.mxu3 %v10442_v8  ;;  %v10493_v19 = vld [vmem:[#allocation9 + $0x198] sm:$0xff]  ;;  %v6761_v43 = vrot.slane %v9712_v2, 2 }
 0x8e1   :  { %6581 = vmatpush.bf16.msrb.mxu1 %v10458_v1  ;;  %v6930_v1 = vrot.slane %v9780_v51, 3 }
 0x8e2   :  { %6697 = vmatpush.bf16.msrb.mxu2 %v10434_v56  ;;  %v6931_v56 = vrot.slane %v9784_v50, 3 }
 0x8e4   :  { %6569 = vmatpush.bf16.msrb.mxu0 %v10449_v33  ;;  %6711 = vmatpush.bf16.msrb.mxu3 %v10441_v6 }
 0x8e5   :  { %6582 = vmatpush.bf16.msrb.mxu1 %v10457_v18 }
 0x8e6   :  { %6698 = vmatpush.bf16.msrb.mxu2 %v10433_v46 }
 0x8e7   :  { %6712 = vmatmul.bf16.vlgmr.msrb.gmra.mxu3 %v6592_v9  ;;  %6570 = vmatmul.bf16.vlgmr.msrb.gmra.mxu0 %v6462_v17  ;;  %v10502_v17 = vld [vmem:[%s13273_s13] ss:$0 sm:$0xff] }
 0x8e8   :  { %6860 = vmatpush.bf16.msra.mxu0 %v10474_v10  ;;  %7043 = vmatpush.bf16.msra.mxu3 %v10500_v57 }
 0x8e9   :  { %6873 = vmatpush.bf16.msra.mxu1 %v10482_v4  ;;  %6699 = vmatmul.bf16.vlgmr.msrb.gmra.mxu2 %v6591_v59 }
 0x8ea   :  { %7030 = vmatpush.bf16.msra.mxu2 %v10492_v5  ;;  %6583 = vmatmul.bf16.vlgmr.msrb.gmra.mxu1 %v6463_v15 }
 0x8ec   :  { %6861 = vmatpush.bf16.msra.mxu0 %v10473_v11  ;;  %7044 = vmatpush.bf16.msra.mxu3 %v10499_v26 }
 0x8ed   :  { %6874 = vmatpush.bf16.msra.mxu1 %v10481_v12 }
 0x8ee   :  { %7031 = vmatpush.bf16.msra.mxu2 %v10491_v63 }
 0x8f0   :  { %6862 = vmatpush.bf16.msra.mxu0 %v10472_v21  ;;  %7045 = vmatpush.bf16.msra.mxu3 %v10498_v53 }
 0x8f1   :  { %6875 = vmatpush.bf16.msra.mxu1 %v10480_v28 }
 0x8f2   :  { %7032 = vmatpush.bf16.msra.mxu2 %v10490_v14 }
 0x8f4   :  { %6863 = vmatpush.bf16.msra.mxu0 %v10471_v16  ;;  %7046 = vmatpush.bf16.msra.mxu3 %v10497_v20 }
 0x8f5   :  { %6876 = vmatpush.bf16.msra.mxu1 %v10479_v13 }
 0x8f6   :  { %7033 = vmatpush.bf16.msra.mxu2 %v10489_v45 }
 0x8f8   :  { %6864 = vmatpush.bf16.msra.mxu0 %v10470_v49  ;;  %7047 = vmatpush.bf16.msra.mxu3 %v10496_v25 }
 0x8f9   :  { %6877 = vmatpush.bf16.msra.mxu1 %v10478_v42 }
 0x8fa   :  { %7034 = vmatpush.bf16.msra.mxu2 %v10488_v62 }
 0x8fc   :  { %6865 = vmatpush.bf16.msra.mxu0 %v10469_v47  ;;  %7048 = vmatpush.bf16.msra.mxu3 %v10495_v44 }
 0x8fd   :  { %6878 = vmatpush.bf16.msra.mxu1 %v10477_v34 }
 0x8fe   :  { %7035 = vmatpush.bf16.msra.mxu2 %v10487_v37 }
 0x900   :  { %6866 = vmatpush.bf16.msra.mxu0 %v10468_v27  ;;  %7049 = vmatpush.bf16.msra.mxu3 %v10494_v32 }
 0x901   :  { %6879 = vmatpush.bf16.msra.mxu1 %v10476_v24 }
 0x902   :  { %7036 = vmatpush.bf16.msra.mxu2 %v10486_v22 }
 0x904   :  { %6867 = vmatpush.bf16.msra.mxu0 %v10467_v40  ;;  %7050 = vmatpush.bf16.msra.mxu3 %v10493_v19 }
 0x905   :  { %6880 = vmatpush.bf16.msra.mxu1 %v10475_v7 }
 0x906   :  { %7037 = vmatpush.bf16.msra.mxu2 %v10485_v0 }
 0x907   :  { %6868 = vmatmul.bf16.vlgmr.msra.gmra.mxu0 %v6760_v3  ;;  %7051 = vmatmul.bf16.vlgmr.msra.gmra.mxu3 %v6931_v56 }
 0x908   :  { %6881 = vmatmul.bf16.vlgmr.msra.gmra.mxu1 %v6761_v43 }
 0x909   :  { %7038 = vmatmul.bf16.vlgmr.msra.gmra.mxu2 %v6930_v1 }
 0x964   :  { %v6571_v8 = vpop.f32.mrf.mxu0 }
 0x967   :  { %v6584_v58 = vpop.f32.mrf.mxu1 }
 0x968   :  { %v6585_v46 = vadd.f32 %v6584_v58, %v6571_v8 }
 0x96a   :  { %v6713_v30 = vpop.f32.mrf.mxu3 }
 0x96c   :  { %v6700_v35 = vpop.f32.mrf.mxu2  ;;  %v6573_v33 = vpop.f32.mrf.mxu0 }
 0x96d   :  { %v6701_v61 = vadd.f32 %v6700_v35, %v6585_v46 }
 0x96f   :  { %v6586_v18 = vpop.f32.mrf.mxu1  ;;  %v6714_v4 = vadd.f32 %v6713_v30, %v6701_v61 }
 0x972   :  { %v6715_v38 = vpop.f32.mrf.mxu3 }
 0x974   :  { %v6702_v55 = vpop.f32.mrf.mxu2 }
 0x984   :  { %v6869_v6 = vpop.f32.mrf.mxu0 }
 0x985   :  { %v6882_v31 = vpop.f32.mrf.mxu1 }
 0x986   :  { %v6883_v10 = vadd.f32 %v6882_v31, %v6869_v6 }
 0x988   :  { %v6886_v59 = vadd.f32 %v6883_v10, %v6714_v4 }
 0x98a   :  { %v7052_v57 = vpop.f32.mrf.mxu3 }
 0x98c   :  { %v7039_v5 = vpop.f32.mrf.mxu2  ;;  %v6871_v15 = vpop.f32.mrf.mxu0 }
 0x98d   :  { %v7053_v9 = vadd.f32 %v7052_v57, %v7039_v5  ;;  %v6884_v11 = vpop.f32.mrf.mxu1 }
 0x98f   :  { %v7056_v12 = vadd.f32 %v7053_v9, %v6886_v59 }
 0x991   :  { %v7061_v63 = vadd.f32 %v10502_v17, %v7056_v12 }
 0x992   :  { %v7054_v21 = vpop.f32.mrf.mxu3 }
 0x993   :  { %7062 = vst [vmem:[%s13274_s14] sm:$0x3f] %v7061_v63 }
 0x994   :  { %v7041_v26 = vpop.f32.mrf.mxu2 }
 0x995   :  { %7067 = vsyncmov [#allocation10] }
 0x998   :  { %s7068_s7 = vpop.sfrf %7067 }
 0x999   :  { %p9849_p0 = scmp.ne.s32.totalorder %s7068_s7, 0 }
 0x99b   :  { %7072 = shalt.err (%p9849_p0)  }
 0x99c   :  { %7074 = vsyncmov [#allocation10 + $0x1] }
 0x99f   :  { %s7075_s21 = vpop.sfrf %7074 }
 0x9a0   :  { %p9850_p1 = scmp.ne.s32.totalorder %s7075_s21, 0 }
 0x9a2   :  { %7079 = shalt.err (%p9850_p1)  }
 0x9a3   :  { %7081 = vsyncmov [#allocation10 + $0x2] }
 0x9a6   :  { %s7082_s13 = vpop.sfrf %7081 }
 0x9a7   :  { %p9851_p2 = scmp.ne.s32.totalorder %s7082_s13, 0 }
 0x9a9   :  { %7086 = shalt.err (%p9851_p2)  }
 0x9aa   :  { %7088 = vsyncmov [#allocation10 + $0x3] }
 0x9ad   :  { %s7089_s22 = vpop.sfrf %7088 }
 0x9ae   :  { %p9852_p3 = scmp.ne.s32.totalorder %s7089_s22, 0 }
 0x9b0   :  { %7093 = shalt.err (%p9852_p3)  }

</bundles_post_ra>
